<compile_context>
chip_gen: v6e
topology: v6e:2x2x1
jax: 0.10.0
libtpu: 0.0.40
codegen_flags: <defaults>
</compile_context>

<pallas_src>
import jax
import jax.numpy as jnp
import numpy as np
from jax.experimental import pallas as pl
from jax.experimental.pallas import tpu as pltpu

_MARGIN = 128   # lane offset of the im2col read window inside the scratch
_LANE = 128


def _round_up(x, m):
    return (x + m - 1) // m * m


# ------------------------------ in-kernel helpers --------------------------- #

def _im2col_conv(patch_ref, parts, w_ref, b_ref, wp, qp, margin):
    """3x3 'same' conv + folded BN + ReLU as ONE fused im2col MXU matmul.

    `parts` are bf16 (c_i, qp) values whose channel concatenation is the zero-ring
    padded-flat conv input (zeros past the real extent).  Each part is stored nine
    times at tap-shifted lane offsets, so one (cout, 9*cin) @ (9*cin, qp) matmul
    realises all nine taps.  Only the two tap-overhang strips of the read window are
    re-zeroed (everything else is overwritten), so no full-scratch zeroing is needed.
    Returns (cout, qp) f32; ring / lane-pad positions hold junk (mask before reuse).
    """
    cin = sum(int(p.shape[0]) for p in parts)
    cout = w_ref.shape[0]
    kp = 9 * cin
    strip = wp + 1                     # max |tap shift|
    zeros = jnp.zeros((kp, strip), jnp.bfloat16)
    patch_ref[:kp, pl.ds(margin, strip)] = zeros
    patch_ref[:kp, pl.ds(margin + qp - strip, strip)] = zeros
    for t in range(9):
        kh, kw = divmod(t, 3)
        s = (kh - 1) * wp + (kw - 1)   # static per-tap shift in the flat layout
        base = t * cin
        for part in parts:
            c = int(part.shape[0])
            patch_ref[base:base + c, pl.ds(margin - s, qp)] = part
            base += c
    acc = jnp.dot(w_ref[...], patch_ref[:kp, pl.ds(margin, qp)],
                  preferred_element_type=jnp.float32)
    return jnp.maximum(acc + b_ref[...], 0.0)


def _make_decoder_kernel(dims, margin):
    """dims: per up-block (padded row pitch wp, lane-padded flat size qp) -- static."""
    def kernel(*refs):
        (dc4_ref, dc3_ref, dc2_ref, dc1_ref, inc_ref,
         u1, u2, u3, u4,
         m1, m2, m3, m4,
         w11, b11, w12, b12,
         w21, b21, w22, b22,
         w31, b31, w32, b32,
         w41, b41, w42, b42,
         wo_ref, bo_ref,
         out_ref, patch_ref) = refs

        x = dc4_ref[0]                                    # (C/2, qp0) bf16
        skips = (dc3_ref, dc2_ref, dc1_ref, inc_ref)
        umats = (u1, u2, u3, u4)
        masks = (m1, m2, m3, m4)
        convs = ((w11, b11, w12, b12), (w21, b21, w22, b22),
                 (w31, b31, w32, b32), (w41, b41, w42, b42))

        for (wp, qp), skip_ref, u_ref, m_ref, (wa, ba, wb, bb) in zip(
                dims, skips, umats, masks, convs):
            # 2x bilinear (align_corners=True) upsample == one bf16 matmul with a fixed
            # interpolation matrix (input ring/pad ignored, output ring/pad exact zero).
            up = jnp.dot(x.astype(jnp.bfloat16), u_ref[...],
                         preferred_element_type=jnp.float32)
            # concat([skip, up], channels) + conv1 + BN + ReLU, fused im2col matmul.
            h = _im2col_conv(patch_ref,
                             (skip_ref[0], up.astype(jnp.bfloat16)),
                             wa, ba, wp, qp, margin)
            h = h * m_ref[...]           # re-zero padding ring + lane tail before conv2
            x = _im2col_conv(patch_ref, (h.astype(jnp.bfloat16),),
                             wb, bb, wp, qp, margin)

        # OutConv (1x1, M=3 K=4): VPU broadcast-FMAs instead of a degenerate MXU dot.
        n_cls, c_last = wo_ref.shape
        qp4 = dims[-1][1]
        y = jnp.zeros((n_cls, qp4), jnp.float32) + bo_ref[...]
        for c in range(c_last):
            y = y + wo_ref[:, c:c + 1] * x[c:c + 1, :]
        out_ref[0] = y
    return kernel


# ------------------------------ wrapper helpers ------------------------------ #

def _axis_interp_matrix(n_in):
    """1-D 2x bilinear interpolation matrix (align_corners=True), (2*n_in, n_in)."""
    n_out = 2 * n_in
    if n_in == 1:
        return np.ones((n_out, 1), np.float32)
    src = np.arange(n_out, dtype=np.float32) * (n_in - 1) / (n_out - 1)
    lo = np.floor(src).astype(np.int32)
    hi = np.minimum(lo + 1, n_in - 1)
    frac = (src - lo).astype(np.float32)
    m = np.zeros((n_out, n_in), np.float32)
    m[np.arange(n_out), lo] += 1.0 - frac
    m[np.arange(n_out), hi] += frac
    return m


def _upsample_matrix_padded_T(h_in, w_in, qp_in, qp_out):
    """2x bilinear upsample as a matrix on lane-padded padded-flat images (transposed).

    Maps (h_in+2)(w_in+2) -> (2h_in+2)(2w_in+2); input ring and lane padding are ignored
    (zero rows), output ring and lane padding are written as exact zeros (zero columns).
    Built host-side so it is a compile-time constant; stored bf16.
    """
    uh, uw = _axis_interp_matrix(h_in), _axis_interp_matrix(w_in)
    vh = np.zeros((2 * h_in + 2, h_in + 2), np.float32)
    vh[1:-1, 1:-1] = uh
    vw = np.zeros((2 * w_in + 2, w_in + 2), np.float32)
    vw[1:-1, 1:-1] = uw
    mat = np.kron(vh, vw).T                                   # (q_in, q_out)
    full = np.zeros((qp_in, qp_out), np.float32)
    full[:mat.shape[0], :mat.shape[1]] = mat
    return full


def _interior_mask(h, w, qp):
    """(1, qp) f32: 1.0 at interior pixels, 0.0 on the padding ring and lane tail."""
    m = np.zeros((1, qp), np.float32)
    ring = np.pad(np.ones((h, w), np.float32), 1).reshape(-1)
    m[0, :ring.size] = ring
    return m


def _pad_flat_bf16(x, qp):
    """NCHW f32 -> (N, C, qp) bf16 with a one-pixel zero halo + zero lane padding."""
    n, c, h, w = x.shape
    q = (h + 2) * (w + 2)
    flat = jnp.pad(x, ((0, 0), (0, 0), (1, 1), (1, 1))).reshape(n, c, q)
    flat = jnp.pad(flat, ((0, 0), (0, 0), (0, qp - q)))
    return flat.astype(jnp.bfloat16)


def _const_spec(arr):
    zeros = (0,) * arr.ndim
    return pl.BlockSpec(arr.shape, lambda n: zeros)


def _batch_spec(arr):
    shape = (1,) + tuple(arr.shape[1:])
    zeros = (0,) * (arr.ndim - 1)
    return pl.BlockSpec(shape, lambda n: (n,) + zeros)


# -------------------------------- forward pass ------------------------------- #

def unet_decoder_forward(params, dc4, dc3, dc2, dc1, inc):
    """Inputs / output in PyTorch NCHW; the whole decoder is one fused Pallas kernel."""
    batch = dc4.shape[0]
    n_classes = params["out"]["w"].shape[0]

    h0, w0 = dc4.shape[2], dc4.shape[3]
    in_hw = [(h0 * 2 ** i, w0 * 2 ** i) for i in range(4)]       # upsample inputs
    out_hw = [(2 * h, 2 * w) for (h, w) in in_hw]                # block outputs

    def qpad(h, w):
        return _round_up((h + 2) * (w + 2), _LANE)

    qp_in0 = qpad(h0, w0)
    qp_out = [qpad(h, w) for (h, w) in out_hw]
    dims = tuple((w + 2, qp) for (h, w), qp in zip(out_hw, qp_out))
    assert _MARGIN >= max(wp for wp, _ in dims) + 1

    feats = [_pad_flat_bf16(dc4, qp_in0)] + [
        _pad_flat_bf16(f, qp) for f, qp in zip((dc3, dc2, dc1, inc), qp_out)]

    qp_ins = [qp_in0] + qp_out[:-1]
    u_mats = [jnp.asarray(_upsample_matrix_padded_T(h, w, qi, qo), jnp.bfloat16)
              for (h, w), qi, qo in zip(in_hw, qp_ins, qp_out)]
    masks = [jnp.asarray(_interior_mask(h, w, qp), jnp.float32)
             for (h, w), qp in zip(out_hw, qp_out)]

    operands = feats + u_mats + masks
    for name in ("up1", "up2", "up3", "up4"):
        p = params[name]
        operands += [p["w1"], p["b1"], p["w2"], p["b2"]]
    operands += [params["out"]["w"], params["out"]["b"]]

    in_specs = [_batch_spec(a) for a in feats]
    in_specs += [_const_spec(a) for a in operands[len(feats):]]

    kmax = 9 * (dc4.shape[1] + dc3.shape[1])     # widest im2col row count (block 1)
    qp4 = qp_out[-1]
    out_padded = pl.pallas_call(
        _make_decoder_kernel(dims, _MARGIN),
        out_shape=jax.ShapeDtypeStruct((batch, n_classes, qp4), jnp.float32),
        grid=(batch,),
        in_specs=in_specs,
        out_specs=pl.BlockSpec((1, n_classes, qp4), lambda n: (n, 0, 0)),
        scratch_shapes=[pltpu.VMEM((kmax, 2 * _MARGIN + qp4), jnp.bfloat16)],
        compiler_params=pltpu.CompilerParams(
            dimension_semantics=("parallel",)),
    )(*operands)

    ho, wo_ = out_hw[-1]
    q4 = (ho + 2) * (wo_ + 2)
    out = out_padded[:, :, :q4].reshape(batch, n_classes, ho + 2, wo_ + 2)
    return out[:, :, 1:-1, 1:-1]                 # strip the conv halo ring -> NCHW


# --------------------------- parameter construction -------------------------- #

def _fold_bn(key, cout, eps=1e-5):
    k1, k2, k3, k4 = jax.random.split(key, 4)
    gamma = 1.0 + 0.1 * jax.random.normal(k1, (cout,), jnp.float32)
    beta = 0.1 * jax.random.normal(k2, (cout,), jnp.float32)
    mean = 0.1 * jax.random.normal(k3, (cout,), jnp.float32)
    var = jnp.abs(1.0 + 0.1 * jax.random.normal(k4, (cout,), jnp.float32))
    scale = gamma / jnp.sqrt(var + eps)
    shift = beta - mean * scale
    return scale, shift


def _conv3x3_params(key_w, key_bn, cin, cout):
    """Conv3x3 (no bias) + BatchNorm(eval) folded.  Weights returned tap-major as
    (cout, 9*cin) bf16 so one im2col matmul realises the whole conv; K index is
    t*cin + c with t = kh*3 + kw (matches the kernel's patch row layout)."""
    w = jax.random.normal(key_w, (cout, cin, 3, 3), jnp.float32) / jnp.sqrt(9.0 * cin)
    scale, shift = _fold_bn(key_bn, cout)
    w = w * scale[:, None, None, None]
    w_fused = jnp.transpose(w, (0, 2, 3, 1)).reshape(cout, 9 * cin)
    return w_fused.astype(jnp.bfloat16), shift.reshape(cout, 1)


def init_params(key, in_chan, n_classes):
    C = in_chan
    blocks = [("up1", C, C // 4), ("up2", C // 2, C // 8),
              ("up3", C // 4, C // 16), ("up4", C // 8, C // 16)]
    params = {}
    keys = jax.random.split(key, len(blocks) + 1)
    for k, (name, cin, cout) in zip(keys[:-1], blocks):
        k1, k2, k3, k4 = jax.random.split(k, 4)
        w1, b1 = _conv3x3_params(k1, k3, cin, cout)
        w2, b2 = _conv3x3_params(k2, k4, cout, cout)
        params[name] = dict(w1=w1, b1=b1, w2=w2, b2=b2)
    ko1, ko2 = jax.random.split(keys[-1])
    c_in = C // 16
    wo = jax.random.normal(ko1, (n_classes, c_in), jnp.float32) / jnp.sqrt(float(c_in))
    bo = 0.1 * jax.random.normal(ko2, (n_classes,), jnp.float32)
    params["out"] = dict(w=wo, b=bo.reshape(n_classes, 1))
    return params


# ------------------------ pure-JAX reference (for checking) ------------------ #

def _ref_upsample2x(x):
    """nn.Upsample(scale_factor=2, mode='bilinear', align_corners=True) on NCHW."""
    n, c, h, w = x.shape

    def coords(n_in, n_out):
        src = jnp.arange(n_out, dtype=jnp.float32) * (n_in - 1) / (n_out - 1)
        lo = jnp.floor(src).astype(jnp.int32)
        hi = jnp.minimum(lo + 1, n_in - 1)
        return src - lo.astype(jnp.float32), lo, hi

    fh, h_lo, h_hi = coords(h, 2 * h)
    fw, w_lo, w_hi = coords(w, 2 * w)
    xh = (x[:, :, h_lo, :] * (1.0 - fh)[None, None, :, None]
          + x[:, :, h_hi, :] * fh[None, None, :, None])
    return (xh[:, :, :, w_lo] * (1.0 - fw)[None, None, None, :]
            + xh[:, :, :, w_hi] * fw[None, None, None, :])


def _ref_conv3x3_bn_relu(x, w_fused, shift):
    n, c, h, w = x.shape
    cout = w_fused.shape[0]
    w9 = w_fused.astype(jnp.float32).reshape(cout, 3, 3, c)
    xp = jnp.pad(x, ((0, 0), (0, 0), (1, 1), (1, 1)))
    acc = jnp.zeros((n, cout, h, w), jnp.float32)
    for kh in range(3):
        for kw in range(3):
            patch = xp[:, :, kh:kh + h, kw:kw + w]
            acc = acc + jnp.einsum('oi,nihw->nohw', w9[:, kh, kw, :], patch,
                                   precision=jax.lax.Precision.HIGHEST)
    return jnp.maximum(acc + shift.reshape(1, -1, 1, 1), 0.0)


def unet_decoder_reference(params, dc4, dc3, dc2, dc1, inc):
    x = dc4
    for name, skip in (("up1", dc3), ("up2", dc2), ("up3", dc1), ("up4", inc)):
        p = params[name]
        x = jnp.concatenate([skip, _ref_upsample2x(x)], axis=1)  # cat([x2, x1], dim=1)
        x = _ref_conv3x3_bn_relu(x, p["w1"], p["b1"])
        x = _ref_conv3x3_bn_relu(x, p["w2"], p["b2"])
    wo = params["out"]["w"]
    out = jnp.einsum('oi,nihw->nohw', wo, x, precision=jax.lax.Precision.HIGHEST)
    return out + params["out"]["b"].reshape(1, -1, 1, 1)


# ----------------------------------- main ------------------------------------ #

if __name__ == "__main__":
    in_chan, n_classes, batch = 64, 3, 2
    key = jax.random.PRNGKey(0)
    k_param, k_in = jax.random.split(key)
    params = init_params(k_param, in_chan, n_classes)

    ks = jax.random.split(k_in, 5)
    # Encoder feature maps (NCHW), consistent with UNetDecoder's channel arithmetic:
    dc4 = jax.random.normal(ks[0], (batch, in_chan // 2, 2, 2), jnp.float32)
    dc3 = jax.random.normal(ks[1], (batch, in_chan // 2, 4, 4), jnp.float32)
    dc2 = jax.random.normal(ks[2], (batch, in_chan // 4, 8, 8), jnp.float32)
    dc1 = jax.random.normal(ks[3], (batch, in_chan // 8, 16, 16), jnp.float32)
    inc = jax.random.normal(ks[4], (batch, in_chan // 16, 32, 32), jnp.float32)

    out = jax.block_until_ready(
        jax.jit(unet_decoder_forward)(params, dc4, dc3, dc2, dc1, inc))
    assert out.shape == (batch, n_classes, 32, 32), out.shape
    assert bool(jnp.all(jnp.isfinite(out)))

    ref = jax.block_until_ready(
        jax.jit(unet_decoder_reference)(params, dc4, dc3, dc2, dc1, inc))
    max_err = float(jnp.max(jnp.abs(out - ref)))
    rel_err = float(jnp.linalg.norm(out - ref) / (jnp.linalg.norm(ref) + 1e-12))
    assert max_err < 0.5, f"kernel vs reference mismatch: max |err| = {max_err}"
    assert rel_err < 0.05, f"kernel vs reference mismatch: rel L2 err = {rel_err}"
    print("KERNEL_OK")
</pallas_src>

<mosaic_0001>
module attributes {stable_mosaic.version = 11 : i64} {
  func.func @kernel(%arg0: i32, %arg1: memref<1x32x128xbf16, #tpu.memory_space<vmem>>, %arg2: memref<1x32x128xbf16, #tpu.memory_space<vmem>>, %arg3: memref<1x16x128xbf16, #tpu.memory_space<vmem>>, %arg4: memref<1x8x384xbf16, #tpu.memory_space<vmem>>, %arg5: memref<1x4x1280xbf16, #tpu.memory_space<vmem>>, %arg6: memref<128x128xbf16, #tpu.memory_space<vmem>>, %arg7: memref<128x128xbf16, #tpu.memory_space<vmem>>, %arg8: memref<128x384xbf16, #tpu.memory_space<vmem>>, %arg9: memref<384x1280xbf16, #tpu.memory_space<vmem>>, %arg10: memref<1x128xf32, #tpu.memory_space<vmem>>, %arg11: memref<1x128xf32, #tpu.memory_space<vmem>>, %arg12: memref<1x384xf32, #tpu.memory_space<vmem>>, %arg13: memref<1x1280xf32, #tpu.memory_space<vmem>>, %arg14: memref<16x576xbf16, #tpu.memory_space<vmem>>, %arg15: memref<16x1xf32, #tpu.memory_space<vmem>>, %arg16: memref<16x144xbf16, #tpu.memory_space<vmem>>, %arg17: memref<16x1xf32, #tpu.memory_space<vmem>>, %arg18: memref<8x288xbf16, #tpu.memory_space<vmem>>, %arg19: memref<8x1xf32, #tpu.memory_space<vmem>>, %arg20: memref<8x72xbf16, #tpu.memory_space<vmem>>, %arg21: memref<8x1xf32, #tpu.memory_space<vmem>>, %arg22: memref<4x144xbf16, #tpu.memory_space<vmem>>, %arg23: memref<4x1xf32, #tpu.memory_space<vmem>>, %arg24: memref<4x36xbf16, #tpu.memory_space<vmem>>, %arg25: memref<4x1xf32, #tpu.memory_space<vmem>>, %arg26: memref<4x72xbf16, #tpu.memory_space<vmem>>, %arg27: memref<4x1xf32, #tpu.memory_space<vmem>>, %arg28: memref<4x36xbf16, #tpu.memory_space<vmem>>, %arg29: memref<4x1xf32, #tpu.memory_space<vmem>>, %arg30: memref<3x4xf32, #tpu.memory_space<vmem>>, %arg31: memref<3x1xf32, #tpu.memory_space<vmem>>, %arg32: memref<1x3x1280xf32, #tpu.memory_space<vmem>>, %arg33: memref<576x1536xbf16, #tpu.memory_space<vmem>>) attributes {dimension_semantics = [#tpu.dimension_semantics<parallel>], iteration_bounds = array<i64: 2>, scalar_prefetch = 0 : i64, scratch_operands = 1 : i64, tpu.core_type = #tpu.core_type<tc>, window_params = [{transform_indices = @transform_0, window_bounds = array<i64: 1, 32, 128>}, {transform_indices = @transform_1, window_bounds = array<i64: 1, 32, 128>}, {transform_indices = @transform_2, window_bounds = array<i64: 1, 16, 128>}, {transform_indices = @transform_3, window_bounds = array<i64: 1, 8, 384>}, {transform_indices = @transform_4, window_bounds = array<i64: 1, 4, 1280>}, {pipeline_mode = #tpu.pipeline_mode<synchronous>, transform_indices = @transform_5, window_bounds = array<i64: 128, 128>}, {pipeline_mode = #tpu.pipeline_mode<synchronous>, transform_indices = @transform_6, window_bounds = array<i64: 128, 128>}, {pipeline_mode = #tpu.pipeline_mode<synchronous>, transform_indices = @transform_7, window_bounds = array<i64: 128, 384>}, {pipeline_mode = #tpu.pipeline_mode<synchronous>, transform_indices = @transform_8, window_bounds = array<i64: 384, 1280>}, {pipeline_mode = #tpu.pipeline_mode<synchronous>, transform_indices = @transform_9, window_bounds = array<i64: 1, 128>}, {pipeline_mode = #tpu.pipeline_mode<synchronous>, transform_indices = @transform_10, window_bounds = array<i64: 1, 128>}, {pipeline_mode = #tpu.pipeline_mode<synchronous>, transform_indices = @transform_11, window_bounds = array<i64: 1, 384>}, {pipeline_mode = #tpu.pipeline_mode<synchronous>, transform_indices = @transform_12, window_bounds = array<i64: 1, 1280>}, {pipeline_mode = #tpu.pipeline_mode<synchronous>, transform_indices = @transform_13, window_bounds = array<i64: 16, 576>}, {pipeline_mode = #tpu.pipeline_mode<synchronous>, transform_indices = @transform_14, window_bounds = array<i64: 16, 1>}, {pipeline_mode = #tpu.pipeline_mode<synchronous>, transform_indices = @transform_15, window_bounds = array<i64: 16, 144>}, {pipeline_mode = #tpu.pipeline_mode<synchronous>, transform_indices = @transform_16, window_bounds = array<i64: 16, 1>}, {pipeline_mode = #tpu.pipeline_mode<synchronous>, transform_indices = @transform_17, window_bounds = array<i64: 8, 288>}, {pipeline_mode = #tpu.pipeline_mode<synchronous>, transform_indices = @transform_18, window_bounds = array<i64: 8, 1>}, {pipeline_mode = #tpu.pipeline_mode<synchronous>, transform_indices = @transform_19, window_bounds = array<i64: 8, 72>}, {pipeline_mode = #tpu.pipeline_mode<synchronous>, transform_indices = @transform_20, window_bounds = array<i64: 8, 1>}, {pipeline_mode = #tpu.pipeline_mode<synchronous>, transform_indices = @transform_21, window_bounds = array<i64: 4, 144>}, {pipeline_mode = #tpu.pipeline_mode<synchronous>, transform_indices = @transform_22, window_bounds = array<i64: 4, 1>}, {pipeline_mode = #tpu.pipeline_mode<synchronous>, transform_indices = @transform_23, window_bounds = array<i64: 4, 36>}, {pipeline_mode = #tpu.pipeline_mode<synchronous>, transform_indices = @transform_24, window_bounds = array<i64: 4, 1>}, {pipeline_mode = #tpu.pipeline_mode<synchronous>, transform_indices = @transform_25, window_bounds = array<i64: 4, 72>}, {pipeline_mode = #tpu.pipeline_mode<synchronous>, transform_indices = @transform_26, window_bounds = array<i64: 4, 1>}, {pipeline_mode = #tpu.pipeline_mode<synchronous>, transform_indices = @transform_27, window_bounds = array<i64: 4, 36>}, {pipeline_mode = #tpu.pipeline_mode<synchronous>, transform_indices = @transform_28, window_bounds = array<i64: 4, 1>}, {pipeline_mode = #tpu.pipeline_mode<synchronous>, transform_indices = @transform_29, window_bounds = array<i64: 3, 4>}, {pipeline_mode = #tpu.pipeline_mode<synchronous>, transform_indices = @transform_30, window_bounds = array<i64: 3, 1>}, {transform_indices = @transform_31, window_bounds = array<i64: 1, 3, 1280>}]} {
    %c0 = arith.constant 0 : index
    %c0_0 = arith.constant 0 : index
    %c0_1 = arith.constant 0 : index
    %0 = vector.load %arg1[%c0, %c0_0, %c0_1] : memref<1x32x128xbf16, #tpu.memory_space<vmem>>, vector<1x32x128xbf16>
    %1 = vector.shape_cast %0 : vector<1x32x128xbf16> to vector<32x128xbf16>
    %c0_2 = arith.constant 0 : index
    %c0_3 = arith.constant 0 : index
    %2 = vector.load %arg6[%c0_2, %c0_3] : memref<128x128xbf16, #tpu.memory_space<vmem>>, vector<128x128xbf16>
    %cst = arith.constant dense<0.000000e+00> : vector<32x128xf32>
    %3 = tpu.matmul %1, %2, %cst {dimension_numbers = #tpu.dot_dimension_numbers<[1], [0], [0], [1], [0, 0, 1, 1], [], []>} : vector<32x128xbf16>, vector<128x128xbf16>, vector<32x128xf32> -> vector<32x128xf32>
    %c0_4 = arith.constant 0 : index
    %c0_5 = arith.constant 0 : index
    %c0_6 = arith.constant 0 : index
    %4 = vector.load %arg2[%c0_4, %c0_5, %c0_6] : memref<1x32x128xbf16, #tpu.memory_space<vmem>>, vector<1x32x128xbf16>
    %5 = vector.shape_cast %4 : vector<1x32x128xbf16> to vector<32x128xbf16>
    %6 = arith.truncf %3 : vector<32x128xf32> to vector<32x128xbf16>
    %cst_7 = arith.constant 0.000000e+00 : bf16
    %7 = vector.broadcast %cst_7 : bf16 to vector<576x7xbf16>
    %c0_8 = arith.constant 0 : index
    %c128 = arith.constant 128 : index
    %8 = vector.load %arg33[%c0_8, %c128] : memref<576x1536xbf16, #tpu.memory_space<vmem>>, vector<576x7xbf16>
    tpu.vector_store %arg33[%c0_8, %c128], %7 {strides = array<i32>} : memref<576x1536xbf16, #tpu.memory_space<vmem>>, vector<576x7xbf16>,
    %c0_9 = arith.constant 0 : index
    %c249 = arith.constant 249 : index
    %9 = vector.load %arg33[%c0_9, %c249] : memref<576x1536xbf16, #tpu.memory_space<vmem>>, vector<576x7xbf16>
    tpu.vector_store %arg33[%c0_9, %c249], %7 {strides = array<i32>} : memref<576x1536xbf16, #tpu.memory_space<vmem>>, vector<576x7xbf16>,
    %c0_10 = arith.constant 0 : index
    %c135 = arith.constant 135 : index
    %10 = vector.load %arg33[%c0_10, %c135] : memref<576x1536xbf16, #tpu.memory_space<vmem>>, vector<32x128xbf16>
    tpu.vector_store %arg33[%c0_10, %c135], %5 {strides = array<i32>} : memref<576x1536xbf16, #tpu.memory_space<vmem>>, vector<32x128xbf16>,
    %c32 = arith.constant 32 : index
    %c135_11 = arith.constant 135 : index
    %11 = vector.load %arg33[%c32, %c135_11] : memref<576x1536xbf16, #tpu.memory_space<vmem>>, vector<32x128xbf16>
    tpu.vector_store %arg33[%c32, %c135_11], %6 {strides = array<i32>} : memref<576x1536xbf16, #tpu.memory_space<vmem>>, vector<32x128xbf16>,
    %c64 = arith.constant 64 : index
    %c134 = arith.constant 134 : index
    %12 = vector.load %arg33[%c64, %c134] : memref<576x1536xbf16, #tpu.memory_space<vmem>>, vector<32x128xbf16>
    tpu.vector_store %arg33[%c64, %c134], %5 {strides = array<i32>} : memref<576x1536xbf16, #tpu.memory_space<vmem>>, vector<32x128xbf16>,
    %c96 = arith.constant 96 : index
    %c134_12 = arith.constant 134 : index
    %13 = vector.load %arg33[%c96, %c134_12] : memref<576x1536xbf16, #tpu.memory_space<vmem>>, vector<32x128xbf16>
    tpu.vector_store %arg33[%c96, %c134_12], %6 {strides = array<i32>} : memref<576x1536xbf16, #tpu.memory_space<vmem>>, vector<32x128xbf16>,
    %c128_13 = arith.constant 128 : index
    %c133 = arith.constant 133 : index
    %14 = vector.load %arg33[%c128_13, %c133] : memref<576x1536xbf16, #tpu.memory_space<vmem>>, vector<32x128xbf16>
    tpu.vector_store %arg33[%c128_13, %c133], %5 {strides = array<i32>} : memref<576x1536xbf16, #tpu.memory_space<vmem>>, vector<32x128xbf16>,
    %c160 = arith.constant 160 : index
    %c133_14 = arith.constant 133 : index
    %15 = vector.load %arg33[%c160, %c133_14] : memref<576x1536xbf16, #tpu.memory_space<vmem>>, vector<32x128xbf16>
    tpu.vector_store %arg33[%c160, %c133_14], %6 {strides = array<i32>} : memref<576x1536xbf16, #tpu.memory_space<vmem>>, vector<32x128xbf16>,
    %c192 = arith.constant 192 : index
    %c129 = arith.constant 129 : index
    %16 = vector.load %arg33[%c192, %c129] : memref<576x1536xbf16, #tpu.memory_space<vmem>>, vector<32x128xbf16>
    tpu.vector_store %arg33[%c192, %c129], %5 {strides = array<i32>} : memref<576x1536xbf16, #tpu.memory_space<vmem>>, vector<32x128xbf16>,
    %c224 = arith.constant 224 : index
    %c129_15 = arith.constant 129 : index
    %17 = vector.load %arg33[%c224, %c129_15] : memref<576x1536xbf16, #tpu.memory_space<vmem>>, vector<32x128xbf16>
    tpu.vector_store %arg33[%c224, %c129_15], %6 {strides = array<i32>} : memref<576x1536xbf16, #tpu.memory_space<vmem>>, vector<32x128xbf16>,
    %c256 = arith.constant 256 : index
    %c128_16 = arith.constant 128 : index
    %18 = vector.load %arg33[%c256, %c128_16] : memref<576x1536xbf16, #tpu.memory_space<vmem>>, vector<32x128xbf16>
    tpu.vector_store %arg33[%c256, %c128_16], %5 {strides = array<i32>} : memref<576x1536xbf16, #tpu.memory_space<vmem>>, vector<32x128xbf16>,
    %c288 = arith.constant 288 : index
    %c128_17 = arith.constant 128 : index
    %19 = vector.load %arg33[%c288, %c128_17] : memref<576x1536xbf16, #tpu.memory_space<vmem>>, vector<32x128xbf16>
    tpu.vector_store %arg33[%c288, %c128_17], %6 {strides = array<i32>} : memref<576x1536xbf16, #tpu.memory_space<vmem>>, vector<32x128xbf16>,
    %c320 = arith.constant 320 : index
    %c127 = arith.constant 127 : index
    %20 = vector.load %arg33[%c320, %c127] : memref<576x1536xbf16, #tpu.memory_space<vmem>>, vector<32x128xbf16>
    tpu.vector_store %arg33[%c320, %c127], %5 {strides = array<i32>} : memref<576x1536xbf16, #tpu.memory_space<vmem>>, vector<32x128xbf16>,
    %c352 = arith.constant 352 : index
    %c127_18 = arith.constant 127 : index
    %21 = vector.load %arg33[%c352, %c127_18] : memref<576x1536xbf16, #tpu.memory_space<vmem>>, vector<32x128xbf16>
    tpu.vector_store %arg33[%c352, %c127_18], %6 {strides = array<i32>} : memref<576x1536xbf16, #tpu.memory_space<vmem>>, vector<32x128xbf16>,
    %c384 = arith.constant 384 : index
    %c123 = arith.constant 123 : index
    %22 = vector.load %arg33[%c384, %c123] : memref<576x1536xbf16, #tpu.memory_space<vmem>>, vector<32x128xbf16>
    tpu.vector_store %arg33[%c384, %c123], %5 {strides = array<i32>} : memref<576x1536xbf16, #tpu.memory_space<vmem>>, vector<32x128xbf16>,
    %c416 = arith.constant 416 : index
    %c123_19 = arith.constant 123 : index
    %23 = vector.load %arg33[%c416, %c123_19] : memref<576x1536xbf16, #tpu.memory_space<vmem>>, vector<32x128xbf16>
    tpu.vector_store %arg33[%c416, %c123_19], %6 {strides = array<i32>} : memref<576x1536xbf16, #tpu.memory_space<vmem>>, vector<32x128xbf16>,
    %c448 = arith.constant 448 : index
    %c122 = arith.constant 122 : index
    %24 = vector.load %arg33[%c448, %c122] : memref<576x1536xbf16, #tpu.memory_space<vmem>>, vector<32x128xbf16>
    tpu.vector_store %arg33[%c448, %c122], %5 {strides = array<i32>} : memref<576x1536xbf16, #tpu.memory_space<vmem>>, vector<32x128xbf16>,
    %c480 = arith.constant 480 : index
    %c122_20 = arith.constant 122 : index
    %25 = vector.load %arg33[%c480, %c122_20] : memref<576x1536xbf16, #tpu.memory_space<vmem>>, vector<32x128xbf16>
    tpu.vector_store %arg33[%c480, %c122_20], %6 {strides = array<i32>} : memref<576x1536xbf16, #tpu.memory_space<vmem>>, vector<32x128xbf16>,
    %c512 = arith.constant 512 : index
    %c121 = arith.constant 121 : index
    %26 = vector.load %arg33[%c512, %c121] : memref<576x1536xbf16, #tpu.memory_space<vmem>>, vector<32x128xbf16>
    tpu.vector_store %arg33[%c512, %c121], %5 {strides = array<i32>} : memref<576x1536xbf16, #tpu.memory_space<vmem>>, vector<32x128xbf16>,
    %c544 = arith.constant 544 : index
    %c121_21 = arith.constant 121 : index
    %27 = vector.load %arg33[%c544, %c121_21] : memref<576x1536xbf16, #tpu.memory_space<vmem>>, vector<32x128xbf16>
    tpu.vector_store %arg33[%c544, %c121_21], %6 {strides = array<i32>} : memref<576x1536xbf16, #tpu.memory_space<vmem>>, vector<32x128xbf16>,
    %c0_22 = arith.constant 0 : index
    %c0_23 = arith.constant 0 : index
    %28 = vector.load %arg14[%c0_22, %c0_23] : memref<16x576xbf16, #tpu.memory_space<vmem>>, vector<16x576xbf16>
    %c0_24 = arith.constant 0 : index
    %c128_25 = arith.constant 128 : index
    %29 = vector.load %arg33[%c0_24, %c128_25] : memref<576x1536xbf16, #tpu.memory_space<vmem>>, vector<576x128xbf16>
    %cst_26 = arith.constant dense<0.000000e+00> : vector<16x128xf32>
    %30 = tpu.matmul %28, %29, %cst_26 {dimension_numbers = #tpu.dot_dimension_numbers<[1], [0], [0], [1], [0, 0, 1, 1], [], []>} : vector<16x576xbf16>, vector<576x128xbf16>, vector<16x128xf32> -> vector<16x128xf32>
    %c0_27 = arith.constant 0 : index
    %c0_28 = arith.constant 0 : index
    %31 = vector.load %arg15[%c0_27, %c0_28] : memref<16x1xf32, #tpu.memory_space<vmem>>, vector<16x1xf32>
    %32 = vector.broadcast %31 : vector<16x1xf32> to vector<16x128xf32>
    %33 = arith.addf %30, %32 : vector<16x128xf32>
    %cst_29 = arith.constant 0.000000e+00 : f32
    %34 = vector.broadcast %cst_29 : f32 to vector<16x128xf32>
    %35 = arith.maximumf %33, %34 : vector<16x128xf32>
    %c0_30 = arith.constant 0 : index
    %c0_31 = arith.constant 0 : index
    %36 = vector.load %arg10[%c0_30, %c0_31] : memref<1x128xf32, #tpu.memory_space<vmem>>, vector<1x128xf32>
    %37 = vector.broadcast %36 : vector<1x128xf32> to vector<16x128xf32>
    %38 = arith.mulf %35, %37 : vector<16x128xf32>
    %39 = arith.truncf %38 : vector<16x128xf32> to vector<16x128xbf16>
    %cst_32 = arith.constant 0.000000e+00 : bf16
    %40 = vector.broadcast %cst_32 : bf16 to vector<144x7xbf16>
    %c0_33 = arith.constant 0 : index
    %c128_34 = arith.constant 128 : index
    %41 = vector.load %arg33[%c0_33, %c128_34] : memref<576x1536xbf16, #tpu.memory_space<vmem>>, vector<144x7xbf16>
    tpu.vector_store %arg33[%c0_33, %c128_34], %40 {strides = array<i32>} : memref<576x1536xbf16, #tpu.memory_space<vmem>>, vector<144x7xbf16>,
    %c0_35 = arith.constant 0 : index
    %c249_36 = arith.constant 249 : index
    %42 = vector.load %arg33[%c0_35, %c249_36] : memref<576x1536xbf16, #tpu.memory_space<vmem>>, vector<144x7xbf16>
    tpu.vector_store %arg33[%c0_35, %c249_36], %40 {strides = array<i32>} : memref<576x1536xbf16, #tpu.memory_space<vmem>>, vector<144x7xbf16>,
    %c0_37 = arith.constant 0 : index
    %c135_38 = arith.constant 135 : index
    %43 = vector.load %arg33[%c0_37, %c135_38] : memref<576x1536xbf16, #tpu.memory_space<vmem>>, vector<16x128xbf16>
    tpu.vector_store %arg33[%c0_37, %c135_38], %39 {strides = array<i32>} : memref<576x1536xbf16, #tpu.memory_space<vmem>>, vector<16x128xbf16>,
    %c16 = arith.constant 16 : index
    %c134_39 = arith.constant 134 : index
    %44 = vector.load %arg33[%c16, %c134_39] : memref<576x1536xbf16, #tpu.memory_space<vmem>>, vector<16x128xbf16>
    tpu.vector_store %arg33[%c16, %c134_39], %39 {strides = array<i32>} : memref<576x1536xbf16, #tpu.memory_space<vmem>>, vector<16x128xbf16>,
    %c32_40 = arith.constant 32 : index
    %c133_41 = arith.constant 133 : index
    %45 = vector.load %arg33[%c32_40, %c133_41] : memref<576x1536xbf16, #tpu.memory_space<vmem>>, vector<16x128xbf16>
    tpu.vector_store %arg33[%c32_40, %c133_41], %39 {strides = array<i32>} : memref<576x1536xbf16, #tpu.memory_space<vmem>>, vector<16x128xbf16>,
    %c48 = arith.constant 48 : index
    %c129_42 = arith.constant 129 : index
    %46 = vector.load %arg33[%c48, %c129_42] : memref<576x1536xbf16, #tpu.memory_space<vmem>>, vector<16x128xbf16>
    tpu.vector_store %arg33[%c48, %c129_42], %39 {strides = array<i32>} : memref<576x1536xbf16, #tpu.memory_space<vmem>>, vector<16x128xbf16>,
    %c64_43 = arith.constant 64 : index
    %c128_44 = arith.constant 128 : index
    %47 = vector.load %arg33[%c64_43, %c128_44] : memref<576x1536xbf16, #tpu.memory_space<vmem>>, vector<16x128xbf16>
    tpu.vector_store %arg33[%c64_43, %c128_44], %39 {strides = array<i32>} : memref<576x1536xbf16, #tpu.memory_space<vmem>>, vector<16x128xbf16>,
    %c80 = arith.constant 80 : index
    %c127_45 = arith.constant 127 : index
    %48 = vector.load %arg33[%c80, %c127_45] : memref<576x1536xbf16, #tpu.memory_space<vmem>>, vector<16x128xbf16>
    tpu.vector_store %arg33[%c80, %c127_45], %39 {strides = array<i32>} : memref<576x1536xbf16, #tpu.memory_space<vmem>>, vector<16x128xbf16>,
    %c96_46 = arith.constant 96 : index
    %c123_47 = arith.constant 123 : index
    %49 = vector.load %arg33[%c96_46, %c123_47] : memref<576x1536xbf16, #tpu.memory_space<vmem>>, vector<16x128xbf16>
    tpu.vector_store %arg33[%c96_46, %c123_47], %39 {strides = array<i32>} : memref<576x1536xbf16, #tpu.memory_space<vmem>>, vector<16x128xbf16>,
    %c112 = arith.constant 112 : index
    %c122_48 = arith.constant 122 : index
    %50 = vector.load %arg33[%c112, %c122_48] : memref<576x1536xbf16, #tpu.memory_space<vmem>>, vector<16x128xbf16>
    tpu.vector_store %arg33[%c112, %c122_48], %39 {strides = array<i32>} : memref<576x1536xbf16, #tpu.memory_space<vmem>>, vector<16x128xbf16>,
    %c128_49 = arith.constant 128 : index
    %c121_50 = arith.constant 121 : index
    %51 = vector.load %arg33[%c128_49, %c121_50] : memref<576x1536xbf16, #tpu.memory_space<vmem>>, vector<16x128xbf16>
    tpu.vector_store %arg33[%c128_49, %c121_50], %39 {strides = array<i32>} : memref<576x1536xbf16, #tpu.memory_space<vmem>>, vector<16x128xbf16>,
    %c0_51 = arith.constant 0 : index
    %c0_52 = arith.constant 0 : index
    %52 = vector.load %arg16[%c0_51, %c0_52] : memref<16x144xbf16, #tpu.memory_space<vmem>>, vector<16x144xbf16>
    %c0_53 = arith.constant 0 : index
    %c128_54 = arith.constant 128 : index
    %53 = vector.load %arg33[%c0_53, %c128_54] : memref<576x1536xbf16, #tpu.memory_space<vmem>>, vector<144x128xbf16>
    %cst_55 = arith.constant dense<0.000000e+00> : vector<16x128xf32>
    %54 = tpu.matmul %52, %53, %cst_55 {dimension_numbers = #tpu.dot_dimension_numbers<[1], [0], [0], [1], [0, 0, 1, 1], [], []>} : vector<16x144xbf16>, vector<144x128xbf16>, vector<16x128xf32> -> vector<16x128xf32>
    %c0_56 = arith.constant 0 : index
    %c0_57 = arith.constant 0 : index
    %55 = vector.load %arg17[%c0_56, %c0_57] : memref<16x1xf32, #tpu.memory_space<vmem>>, vector<16x1xf32>
    %56 = vector.broadcast %55 : vector<16x1xf32> to vector<16x128xf32>
    %57 = arith.addf %54, %56 : vector<16x128xf32>
    %cst_58 = arith.constant 0.000000e+00 : f32
    %58 = vector.broadcast %cst_58 : f32 to vector<16x128xf32>
    %59 = arith.maximumf %57, %58 : vector<16x128xf32>
    %60 = arith.truncf %59 : vector<16x128xf32> to vector<16x128xbf16>
    %c0_59 = arith.constant 0 : index
    %c0_60 = arith.constant 0 : index
    %61 = vector.load %arg7[%c0_59, %c0_60] : memref<128x128xbf16, #tpu.memory_space<vmem>>, vector<128x128xbf16>
    %cst_61 = arith.constant dense<0.000000e+00> : vector<16x128xf32>
    %62 = tpu.matmul %60, %61, %cst_61 {dimension_numbers = #tpu.dot_dimension_numbers<[1], [0], [0], [1], [0, 0, 1, 1], [], []>} : vector<16x128xbf16>, vector<128x128xbf16>, vector<16x128xf32> -> vector<16x128xf32>
    %c0_62 = arith.constant 0 : index
    %c0_63 = arith.constant 0 : index
    %c0_64 = arith.constant 0 : index
    %63 = vector.load %arg3[%c0_62, %c0_63, %c0_64] : memref<1x16x128xbf16, #tpu.memory_space<vmem>>, vector<1x16x128xbf16>
    %64 = vector.shape_cast %63 : vector<1x16x128xbf16> to vector<16x128xbf16>
    %65 = arith.truncf %62 : vector<16x128xf32> to vector<16x128xbf16>
    %cst_65 = arith.constant 0.000000e+00 : bf16
    %66 = vector.broadcast %cst_65 : bf16 to vector<288x11xbf16>
    %c0_66 = arith.constant 0 : index
    %c128_67 = arith.constant 128 : index
    %67 = vector.load %arg33[%c0_66, %c128_67] : memref<576x1536xbf16, #tpu.memory_space<vmem>>, vector<288x11xbf16>
    tpu.vector_store %arg33[%c0_66, %c128_67], %66 {strides = array<i32>} : memref<576x1536xbf16, #tpu.memory_space<vmem>>, vector<288x11xbf16>,
    %c0_68 = arith.constant 0 : index
    %c245 = arith.constant 245 : index
    %68 = vector.load %arg33[%c0_68, %c245] : memref<576x1536xbf16, #tpu.memory_space<vmem>>, vector<288x11xbf16>
    tpu.vector_store %arg33[%c0_68, %c245], %66 {strides = array<i32>} : memref<576x1536xbf16, #tpu.memory_space<vmem>>, vector<288x11xbf16>,
    %c0_69 = arith.constant 0 : index
    %c139 = arith.constant 139 : index
    %69 = vector.load %arg33[%c0_69, %c139] : memref<576x1536xbf16, #tpu.memory_space<vmem>>, vector<16x128xbf16>
    tpu.vector_store %arg33[%c0_69, %c139], %64 {strides = array<i32>} : memref<576x1536xbf16, #tpu.memory_space<vmem>>, vector<16x128xbf16>,
    %c16_70 = arith.constant 16 : index
    %c139_71 = arith.constant 139 : index
    %70 = vector.load %arg33[%c16_70, %c139_71] : memref<576x1536xbf16, #tpu.memory_space<vmem>>, vector<16x128xbf16>
    tpu.vector_store %arg33[%c16_70, %c139_71], %65 {strides = array<i32>} : memref<576x1536xbf16, #tpu.memory_space<vmem>>, vector<16x128xbf16>,
    %c32_72 = arith.constant 32 : index
    %c138 = arith.constant 138 : index
    %71 = vector.load %arg33[%c32_72, %c138] : memref<576x1536xbf16, #tpu.memory_space<vmem>>, vector<16x128xbf16>
    tpu.vector_store %arg33[%c32_72, %c138], %64 {strides = array<i32>} : memref<576x1536xbf16, #tpu.memory_space<vmem>>, vector<16x128xbf16>,
    %c48_73 = arith.constant 48 : index
    %c138_74 = arith.constant 138 : index
    %72 = vector.load %arg33[%c48_73, %c138_74] : memref<576x1536xbf16, #tpu.memory_space<vmem>>, vector<16x128xbf16>
    tpu.vector_store %arg33[%c48_73, %c138_74], %65 {strides = array<i32>} : memref<576x1536xbf16, #tpu.memory_space<vmem>>, vector<16x128xbf16>,
    %c64_75 = arith.constant 64 : index
    %c137 = arith.constant 137 : index
    %73 = vector.load %arg33[%c64_75, %c137] : memref<576x1536xbf16, #tpu.memory_space<vmem>>, vector<16x128xbf16>
    tpu.vector_store %arg33[%c64_75, %c137], %64 {strides = array<i32>} : memref<576x1536xbf16, #tpu.memory_space<vmem>>, vector<16x128xbf16>,
    %c80_76 = arith.constant 80 : index
    %c137_77 = arith.constant 137 : index
    %74 = vector.load %arg33[%c80_76, %c137_77] : memref<576x1536xbf16, #tpu.memory_space<vmem>>, vector<16x128xbf16>
    tpu.vector_store %arg33[%c80_76, %c137_77], %65 {strides = array<i32>} : memref<576x1536xbf16, #tpu.memory_space<vmem>>, vector<16x128xbf16>,
    %c96_78 = arith.constant 96 : index
    %c129_79 = arith.constant 129 : index
    %75 = vector.load %arg33[%c96_78, %c129_79] : memref<576x1536xbf16, #tpu.memory_space<vmem>>, vector<16x128xbf16>
    tpu.vector_store %arg33[%c96_78, %c129_79], %64 {strides = array<i32>} : memref<576x1536xbf16, #tpu.memory_space<vmem>>, vector<16x128xbf16>,
    %c112_80 = arith.constant 112 : index
    %c129_81 = arith.constant 129 : index
    %76 = vector.load %arg33[%c112_80, %c129_81] : memref<576x1536xbf16, #tpu.memory_space<vmem>>, vector<16x128xbf16>
    tpu.vector_store %arg33[%c112_80, %c129_81], %65 {strides = array<i32>} : memref<576x1536xbf16, #tpu.memory_space<vmem>>, vector<16x128xbf16>,
    %c128_82 = arith.constant 128 : index
    %c128_83 = arith.constant 128 : index
    %77 = vector.load %arg33[%c128_82, %c128_83] : memref<576x1536xbf16, #tpu.memory_space<vmem>>, vector<16x128xbf16>
    tpu.vector_store %arg33[%c128_82, %c128_83], %64 {strides = array<i32>} : memref<576x1536xbf16, #tpu.memory_space<vmem>>, vector<16x128xbf16>,
    %c144 = arith.constant 144 : index
    %c128_84 = arith.constant 128 : index
    %78 = vector.load %arg33[%c144, %c128_84] : memref<576x1536xbf16, #tpu.memory_space<vmem>>, vector<16x128xbf16>
    tpu.vector_store %arg33[%c144, %c128_84], %65 {strides = array<i32>} : memref<576x1536xbf16, #tpu.memory_space<vmem>>, vector<16x128xbf16>,
    %c160_85 = arith.constant 160 : index
    %c127_86 = arith.constant 127 : index
    %79 = vector.load %arg33[%c160_85, %c127_86] : memref<576x1536xbf16, #tpu.memory_space<vmem>>, vector<16x128xbf16>
    tpu.vector_store %arg33[%c160_85, %c127_86], %64 {strides = array<i32>} : memref<576x1536xbf16, #tpu.memory_space<vmem>>, vector<16x128xbf16>,
    %c176 = arith.constant 176 : index
    %c127_87 = arith.constant 127 : index
    %80 = vector.load %arg33[%c176, %c127_87] : memref<576x1536xbf16, #tpu.memory_space<vmem>>, vector<16x128xbf16>
    tpu.vector_store %arg33[%c176, %c127_87], %65 {strides = array<i32>} : memref<576x1536xbf16, #tpu.memory_space<vmem>>, vector<16x128xbf16>,
    %c192_88 = arith.constant 192 : index
    %c119 = arith.constant 119 : index
    %81 = vector.load %arg33[%c192_88, %c119] : memref<576x1536xbf16, #tpu.memory_space<vmem>>, vector<16x128xbf16>
    tpu.vector_store %arg33[%c192_88, %c119], %64 {strides = array<i32>} : memref<576x1536xbf16, #tpu.memory_space<vmem>>, vector<16x128xbf16>,
    %c208 = arith.constant 208 : index
    %c119_89 = arith.constant 119 : index
    %82 = vector.load %arg33[%c208, %c119_89] : memref<576x1536xbf16, #tpu.memory_space<vmem>>, vector<16x128xbf16>
    tpu.vector_store %arg33[%c208, %c119_89], %65 {strides = array<i32>} : memref<576x1536xbf16, #tpu.memory_space<vmem>>, vector<16x128xbf16>,
    %c224_90 = arith.constant 224 : index
    %c118 = arith.constant 118 : index
    %83 = vector.load %arg33[%c224_90, %c118] : memref<576x1536xbf16, #tpu.memory_space<vmem>>, vector<16x128xbf16>
    tpu.vector_store %arg33[%c224_90, %c118], %64 {strides = array<i32>} : memref<576x1536xbf16, #tpu.memory_space<vmem>>, vector<16x128xbf16>,
    %c240 = arith.constant 240 : index
    %c118_91 = arith.constant 118 : index
    %84 = vector.load %arg33[%c240, %c118_91] : memref<576x1536xbf16, #tpu.memory_space<vmem>>, vector<16x128xbf16>
    tpu.vector_store %arg33[%c240, %c118_91], %65 {strides = array<i32>} : memref<576x1536xbf16, #tpu.memory_space<vmem>>, vector<16x128xbf16>,
    %c256_92 = arith.constant 256 : index
    %c117 = arith.constant 117 : index
    %85 = vector.load %arg33[%c256_92, %c117] : memref<576x1536xbf16, #tpu.memory_space<vmem>>, vector<16x128xbf16>
    tpu.vector_store %arg33[%c256_92, %c117], %64 {strides = array<i32>} : memref<576x1536xbf16, #tpu.memory_space<vmem>>, vector<16x128xbf16>,
    %c272 = arith.constant 272 : index
    %c117_93 = arith.constant 117 : index
    %86 = vector.load %arg33[%c272, %c117_93] : memref<576x1536xbf16, #tpu.memory_space<vmem>>, vector<16x128xbf16>
    tpu.vector_store %arg33[%c272, %c117_93], %65 {strides = array<i32>} : memref<576x1536xbf16, #tpu.memory_space<vmem>>, vector<16x128xbf16>,
    %c0_94 = arith.constant 0 : index
    %c0_95 = arith.constant 0 : index
    %87 = vector.load %arg18[%c0_94, %c0_95] : memref<8x288xbf16, #tpu.memory_space<vmem>>, vector<8x288xbf16>
    %c0_96 = arith.constant 0 : index
    %c128_97 = arith.constant 128 : index
    %88 = vector.load %arg33[%c0_96, %c128_97] : memref<576x1536xbf16, #tpu.memory_space<vmem>>, vector<288x128xbf16>
    %cst_98 = arith.constant dense<0.000000e+00> : vector<8x128xf32>
    %89 = tpu.matmul %87, %88, %cst_98 {dimension_numbers = #tpu.dot_dimension_numbers<[1], [0], [0], [1], [0, 0, 1, 1], [], []>} : vector<8x288xbf16>, vector<288x128xbf16>, vector<8x128xf32> -> vector<8x128xf32>
    %c0_99 = arith.constant 0 : index
    %c0_100 = arith.constant 0 : index
    %90 = vector.load %arg19[%c0_99, %c0_100] : memref<8x1xf32, #tpu.memory_space<vmem>>, vector<8x1xf32>
    %91 = vector.broadcast %90 : vector<8x1xf32> to vector<8x128xf32>
    %92 = arith.addf %89, %91 : vector<8x128xf32>
    %cst_101 = arith.constant 0.000000e+00 : f32
    %93 = vector.broadcast %cst_101 : f32 to vector<8x128xf32>
    %94 = arith.maximumf %92, %93 : vector<8x128xf32>
    %c0_102 = arith.constant 0 : index
    %c0_103 = arith.constant 0 : index
    %95 = vector.load %arg11[%c0_102, %c0_103] : memref<1x128xf32, #tpu.memory_space<vmem>>, vector<1x128xf32>
    %96 = vector.broadcast %95 : vector<1x128xf32> to vector<8x128xf32>
    %97 = arith.mulf %94, %96 : vector<8x128xf32>
    %98 = arith.truncf %97 : vector<8x128xf32> to vector<8x128xbf16>
    %cst_104 = arith.constant 0.000000e+00 : bf16
    %99 = vector.broadcast %cst_104 : bf16 to vector<72x11xbf16>
    %c0_105 = arith.constant 0 : index
    %c128_106 = arith.constant 128 : index
    %100 = vector.load %arg33[%c0_105, %c128_106] : memref<576x1536xbf16, #tpu.memory_space<vmem>>, vector<72x11xbf16>
    tpu.vector_store %arg33[%c0_105, %c128_106], %99 {strides = array<i32>} : memref<576x1536xbf16, #tpu.memory_space<vmem>>, vector<72x11xbf16>,
    %c0_107 = arith.constant 0 : index
    %c245_108 = arith.constant 245 : index
    %101 = vector.load %arg33[%c0_107, %c245_108] : memref<576x1536xbf16, #tpu.memory_space<vmem>>, vector<72x11xbf16>
    tpu.vector_store %arg33[%c0_107, %c245_108], %99 {strides = array<i32>} : memref<576x1536xbf16, #tpu.memory_space<vmem>>, vector<72x11xbf16>,
    %c0_109 = arith.constant 0 : index
    %c139_110 = arith.constant 139 : index
    %102 = vector.load %arg33[%c0_109, %c139_110] : memref<576x1536xbf16, #tpu.memory_space<vmem>>, vector<8x128xbf16>
    tpu.vector_store %arg33[%c0_109, %c139_110], %98 {strides = array<i32>} : memref<576x1536xbf16, #tpu.memory_space<vmem>>, vector<8x128xbf16>,
    %c8 = arith.constant 8 : index
    %c138_111 = arith.constant 138 : index
    %103 = vector.load %arg33[%c8, %c138_111] : memref<576x1536xbf16, #tpu.memory_space<vmem>>, vector<8x128xbf16>
    tpu.vector_store %arg33[%c8, %c138_111], %98 {strides = array<i32>} : memref<576x1536xbf16, #tpu.memory_space<vmem>>, vector<8x128xbf16>,
    %c16_112 = arith.constant 16 : index
    %c137_113 = arith.constant 137 : index
    %104 = vector.load %arg33[%c16_112, %c137_113] : memref<576x1536xbf16, #tpu.memory_space<vmem>>, vector<8x128xbf16>
    tpu.vector_store %arg33[%c16_112, %c137_113], %98 {strides = array<i32>} : memref<576x1536xbf16, #tpu.memory_space<vmem>>, vector<8x128xbf16>,
    %c24 = arith.constant 24 : index
    %c129_114 = arith.constant 129 : index
    %105 = vector.load %arg33[%c24, %c129_114] : memref<576x1536xbf16, #tpu.memory_space<vmem>>, vector<8x128xbf16>
    tpu.vector_store %arg33[%c24, %c129_114], %98 {strides = array<i32>} : memref<576x1536xbf16, #tpu.memory_space<vmem>>, vector<8x128xbf16>,
    %c32_115 = arith.constant 32 : index
    %c128_116 = arith.constant 128 : index
    %106 = vector.load %arg33[%c32_115, %c128_116] : memref<576x1536xbf16, #tpu.memory_space<vmem>>, vector<8x128xbf16>
    tpu.vector_store %arg33[%c32_115, %c128_116], %98 {strides = array<i32>} : memref<576x1536xbf16, #tpu.memory_space<vmem>>, vector<8x128xbf16>,
    %c40 = arith.constant 40 : index
    %c127_117 = arith.constant 127 : index
    %107 = vector.load %arg33[%c40, %c127_117] : memref<576x1536xbf16, #tpu.memory_space<vmem>>, vector<8x128xbf16>
    tpu.vector_store %arg33[%c40, %c127_117], %98 {strides = array<i32>} : memref<576x1536xbf16, #tpu.memory_space<vmem>>, vector<8x128xbf16>,
    %c48_118 = arith.constant 48 : index
    %c119_119 = arith.constant 119 : index
    %108 = vector.load %arg33[%c48_118, %c119_119] : memref<576x1536xbf16, #tpu.memory_space<vmem>>, vector<8x128xbf16>
    tpu.vector_store %arg33[%c48_118, %c119_119], %98 {strides = array<i32>} : memref<576x1536xbf16, #tpu.memory_space<vmem>>, vector<8x128xbf16>,
    %c56 = arith.constant 56 : index
    %c118_120 = arith.constant 118 : index
    %109 = vector.load %arg33[%c56, %c118_120] : memref<576x1536xbf16, #tpu.memory_space<vmem>>, vector<8x128xbf16>
    tpu.vector_store %arg33[%c56, %c118_120], %98 {strides = array<i32>} : memref<576x1536xbf16, #tpu.memory_space<vmem>>, vector<8x128xbf16>,
    %c64_121 = arith.constant 64 : index
    %c117_122 = arith.constant 117 : index
    %110 = vector.load %arg33[%c64_121, %c117_122] : memref<576x1536xbf16, #tpu.memory_space<vmem>>, vector<8x128xbf16>
    tpu.vector_store %arg33[%c64_121, %c117_122], %98 {strides = array<i32>} : memref<576x1536xbf16, #tpu.memory_space<vmem>>, vector<8x128xbf16>,
    %c0_123 = arith.constant 0 : index
    %c0_124 = arith.constant 0 : index
    %111 = vector.load %arg20[%c0_123, %c0_124] : memref<8x72xbf16, #tpu.memory_space<vmem>>, vector<8x72xbf16>
    %c0_125 = arith.constant 0 : index
    %c128_126 = arith.constant 128 : index
    %112 = vector.load %arg33[%c0_125, %c128_126] : memref<576x1536xbf16, #tpu.memory_space<vmem>>, vector<72x128xbf16>
    %cst_127 = arith.constant dense<0.000000e+00> : vector<8x128xf32>
    %113 = tpu.matmul %111, %112, %cst_127 {dimension_numbers = #tpu.dot_dimension_numbers<[1], [0], [0], [1], [0, 0, 1, 1], [], []>} : vector<8x72xbf16>, vector<72x128xbf16>, vector<8x128xf32> -> vector<8x128xf32>
    %c0_128 = arith.constant 0 : index
    %c0_129 = arith.constant 0 : index
    %114 = vector.load %arg21[%c0_128, %c0_129] : memref<8x1xf32, #tpu.memory_space<vmem>>, vector<8x1xf32>
    %115 = vector.broadcast %114 : vector<8x1xf32> to vector<8x128xf32>
    %116 = arith.addf %113, %115 : vector<8x128xf32>
    %cst_130 = arith.constant 0.000000e+00 : f32
    %117 = vector.broadcast %cst_130 : f32 to vector<8x128xf32>
    %118 = arith.maximumf %116, %117 : vector<8x128xf32>
    %119 = arith.truncf %118 : vector<8x128xf32> to vector<8x128xbf16>
    %c0_131 = arith.constant 0 : index
    %c0_132 = arith.constant 0 : index
    %120 = vector.load %arg8[%c0_131, %c0_132] : memref<128x384xbf16, #tpu.memory_space<vmem>>, vector<128x384xbf16>
    %cst_133 = arith.constant dense<0.000000e+00> : vector<8x384xf32>
    %121 = tpu.matmul %119, %120, %cst_133 {dimension_numbers = #tpu.dot_dimension_numbers<[1], [0], [0], [1], [0, 0, 1, 1], [], []>} : vector<8x128xbf16>, vector<128x384xbf16>, vector<8x384xf32> -> vector<8x384xf32>
    %c0_134 = arith.constant 0 : index
    %c0_135 = arith.constant 0 : index
    %c0_136 = arith.constant 0 : index
    %122 = vector.load %arg4[%c0_134, %c0_135, %c0_136] : memref<1x8x384xbf16, #tpu.memory_space<vmem>>, vector<1x8x384xbf16>
    %123 = vector.shape_cast %122 : vector<1x8x384xbf16> to vector<8x384xbf16>
    %124 = arith.truncf %121 : vector<8x384xf32> to vector<8x384xbf16>
    %cst_137 = arith.constant 0.000000e+00 : bf16
    %125 = vector.broadcast %cst_137 : bf16 to vector<144x19xbf16>
    %c0_138 = arith.constant 0 : index
    %c128_139 = arith.constant 128 : index
    %126 = vector.load %arg33[%c0_138, %c128_139] : memref<576x1536xbf16, #tpu.memory_space<vmem>>, vector<144x19xbf16>
    tpu.vector_store %arg33[%c0_138, %c128_139], %125 {strides = array<i32>} : memref<576x1536xbf16, #tpu.memory_space<vmem>>, vector<144x19xbf16>,
    %c0_140 = arith.constant 0 : index
    %c493 = arith.constant 493 : index
    %127 = vector.load %arg33[%c0_140, %c493] : memref<576x1536xbf16, #tpu.memory_space<vmem>>, vector<144x19xbf16>
    tpu.vector_store %arg33[%c0_140, %c493], %125 {strides = array<i32>} : memref<576x1536xbf16, #tpu.memory_space<vmem>>, vector<144x19xbf16>,
    %c0_141 = arith.constant 0 : index
    %c147 = arith.constant 147 : index
    %128 = vector.load %arg33[%c0_141, %c147] : memref<576x1536xbf16, #tpu.memory_space<vmem>>, vector<8x384xbf16>
    tpu.vector_store %arg33[%c0_141, %c147], %123 {strides = array<i32>} : memref<576x1536xbf16, #tpu.memory_space<vmem>>, vector<8x384xbf16>,
    %c8_142 = arith.constant 8 : index
    %c147_143 = arith.constant 147 : index
    %129 = vector.load %arg33[%c8_142, %c147_143] : memref<576x1536xbf16, #tpu.memory_space<vmem>>, vector<8x384xbf16>
    tpu.vector_store %arg33[%c8_142, %c147_143], %124 {strides = array<i32>} : memref<576x1536xbf16, #tpu.memory_space<vmem>>, vector<8x384xbf16>,
    %c16_144 = arith.constant 16 : index
    %c146 = arith.constant 146 : index
    %130 = vector.load %arg33[%c16_144, %c146] : memref<576x1536xbf16, #tpu.memory_space<vmem>>, vector<8x384xbf16>
    tpu.vector_store %arg33[%c16_144, %c146], %123 {strides = array<i32>} : memref<576x1536xbf16, #tpu.memory_space<vmem>>, vector<8x384xbf16>,
    %c24_145 = arith.constant 24 : index
    %c146_146 = arith.constant 146 : index
    %131 = vector.load %arg33[%c24_145, %c146_146] : memref<576x1536xbf16, #tpu.memory_space<vmem>>, vector<8x384xbf16>
    tpu.vector_store %arg33[%c24_145, %c146_146], %124 {strides = array<i32>} : memref<576x1536xbf16, #tpu.memory_space<vmem>>, vector<8x384xbf16>,
    %c32_147 = arith.constant 32 : index
    %c145 = arith.constant 145 : index
    %132 = vector.load %arg33[%c32_147, %c145] : memref<576x1536xbf16, #tpu.memory_space<vmem>>, vector<8x384xbf16>
    tpu.vector_store %arg33[%c32_147, %c145], %123 {strides = array<i32>} : memref<576x1536xbf16, #tpu.memory_space<vmem>>, vector<8x384xbf16>,
    %c40_148 = arith.constant 40 : index
    %c145_149 = arith.constant 145 : index
    %133 = vector.load %arg33[%c40_148, %c145_149] : memref<576x1536xbf16, #tpu.memory_space<vmem>>, vector<8x384xbf16>
    tpu.vector_store %arg33[%c40_148, %c145_149], %124 {strides = array<i32>} : memref<576x1536xbf16, #tpu.memory_space<vmem>>, vector<8x384xbf16>,
    %c48_150 = arith.constant 48 : index
    %c129_151 = arith.constant 129 : index
    %134 = vector.load %arg33[%c48_150, %c129_151] : memref<576x1536xbf16, #tpu.memory_space<vmem>>, vector<8x384xbf16>
    tpu.vector_store %arg33[%c48_150, %c129_151], %123 {strides = array<i32>} : memref<576x1536xbf16, #tpu.memory_space<vmem>>, vector<8x384xbf16>,
    %c56_152 = arith.constant 56 : index
    %c129_153 = arith.constant 129 : index
    %135 = vector.load %arg33[%c56_152, %c129_153] : memref<576x1536xbf16, #tpu.memory_space<vmem>>, vector<8x384xbf16>
    tpu.vector_store %arg33[%c56_152, %c129_153], %124 {strides = array<i32>} : memref<576x1536xbf16, #tpu.memory_space<vmem>>, vector<8x384xbf16>,
    %c64_154 = arith.constant 64 : index
    %c128_155 = arith.constant 128 : index
    %136 = vector.load %arg33[%c64_154, %c128_155] : memref<576x1536xbf16, #tpu.memory_space<vmem>>, vector<8x384xbf16>
    tpu.vector_store %arg33[%c64_154, %c128_155], %123 {strides = array<i32>} : memref<576x1536xbf16, #tpu.memory_space<vmem>>, vector<8x384xbf16>,
    %c72 = arith.constant 72 : index
    %c128_156 = arith.constant 128 : index
    %137 = vector.load %arg33[%c72, %c128_156] : memref<576x1536xbf16, #tpu.memory_space<vmem>>, vector<8x384xbf16>
    tpu.vector_store %arg33[%c72, %c128_156], %124 {strides = array<i32>} : memref<576x1536xbf16, #tpu.memory_space<vmem>>, vector<8x384xbf16>,
    %c80_157 = arith.constant 80 : index
    %c127_158 = arith.constant 127 : index
    %138 = vector.load %arg33[%c80_157, %c127_158] : memref<576x1536xbf16, #tpu.memory_space<vmem>>, vector<8x384xbf16>
    tpu.vector_store %arg33[%c80_157, %c127_158], %123 {strides = array<i32>} : memref<576x1536xbf16, #tpu.memory_space<vmem>>, vector<8x384xbf16>,
    %c88 = arith.constant 88 : index
    %c127_159 = arith.constant 127 : index
    %139 = vector.load %arg33[%c88, %c127_159] : memref<576x1536xbf16, #tpu.memory_space<vmem>>, vector<8x384xbf16>
    tpu.vector_store %arg33[%c88, %c127_159], %124 {strides = array<i32>} : memref<576x1536xbf16, #tpu.memory_space<vmem>>, vector<8x384xbf16>,
    %c96_160 = arith.constant 96 : index
    %c111 = arith.constant 111 : index
    %140 = vector.load %arg33[%c96_160, %c111] : memref<576x1536xbf16, #tpu.memory_space<vmem>>, vector<8x384xbf16>
    tpu.vector_store %arg33[%c96_160, %c111], %123 {strides = array<i32>} : memref<576x1536xbf16, #tpu.memory_space<vmem>>, vector<8x384xbf16>,
    %c104 = arith.constant 104 : index
    %c111_161 = arith.constant 111 : index
    %141 = vector.load %arg33[%c104, %c111_161] : memref<576x1536xbf16, #tpu.memory_space<vmem>>, vector<8x384xbf16>
    tpu.vector_store %arg33[%c104, %c111_161], %124 {strides = array<i32>} : memref<576x1536xbf16, #tpu.memory_space<vmem>>, vector<8x384xbf16>,
    %c112_162 = arith.constant 112 : index
    %c110 = arith.constant 110 : index
    %142 = vector.load %arg33[%c112_162, %c110] : memref<576x1536xbf16, #tpu.memory_space<vmem>>, vector<8x384xbf16>
    tpu.vector_store %arg33[%c112_162, %c110], %123 {strides = array<i32>} : memref<576x1536xbf16, #tpu.memory_space<vmem>>, vector<8x384xbf16>,
    %c120 = arith.constant 120 : index
    %c110_163 = arith.constant 110 : index
    %143 = vector.load %arg33[%c120, %c110_163] : memref<576x1536xbf16, #tpu.memory_space<vmem>>, vector<8x384xbf16>
    tpu.vector_store %arg33[%c120, %c110_163], %124 {strides = array<i32>} : memref<576x1536xbf16, #tpu.memory_space<vmem>>, vector<8x384xbf16>,
    %c128_164 = arith.constant 128 : index
    %c109 = arith.constant 109 : index
    %144 = vector.load %arg33[%c128_164, %c109] : memref<576x1536xbf16, #tpu.memory_space<vmem>>, vector<8x384xbf16>
    tpu.vector_store %arg33[%c128_164, %c109], %123 {strides = array<i32>} : memref<576x1536xbf16, #tpu.memory_space<vmem>>, vector<8x384xbf16>,
    %c136 = arith.constant 136 : index
    %c109_165 = arith.constant 109 : index
    %145 = vector.load %arg33[%c136, %c109_165] : memref<576x1536xbf16, #tpu.memory_space<vmem>>, vector<8x384xbf16>
    tpu.vector_store %arg33[%c136, %c109_165], %124 {strides = array<i32>} : memref<576x1536xbf16, #tpu.memory_space<vmem>>, vector<8x384xbf16>,
    %c0_166 = arith.constant 0 : index
    %c0_167 = arith.constant 0 : index
    %146 = vector.load %arg22[%c0_166, %c0_167] : memref<4x144xbf16, #tpu.memory_space<vmem>>, vector<4x144xbf16>
    %c0_168 = arith.constant 0 : index
    %c128_169 = arith.constant 128 : index
    %147 = vector.load %arg33[%c0_168, %c128_169] : memref<576x1536xbf16, #tpu.memory_space<vmem>>, vector<144x384xbf16>
    %cst_170 = arith.constant dense<0.000000e+00> : vector<4x384xf32>
    %148 = tpu.matmul %146, %147, %cst_170 {dimension_numbers = #tpu.dot_dimension_numbers<[1], [0], [0], [1], [0, 0, 1, 1], [], []>} : vector<4x144xbf16>, vector<144x384xbf16>, vector<4x384xf32> -> vector<4x384xf32>
    %c0_171 = arith.constant 0 : index
    %c0_172 = arith.constant 0 : index
    %149 = vector.load %arg23[%c0_171, %c0_172] : memref<4x1xf32, #tpu.memory_space<vmem>>, vector<4x1xf32>
    %150 = vector.broadcast %149 : vector<4x1xf32> to vector<4x384xf32>
    %151 = arith.addf %148, %150 : vector<4x384xf32>
    %cst_173 = arith.constant 0.000000e+00 : f32
    %152 = vector.broadcast %cst_173 : f32 to vector<4x384xf32>
    %153 = arith.maximumf %151, %152 : vector<4x384xf32>
    %c0_174 = arith.constant 0 : index
    %c0_175 = arith.constant 0 : index
    %154 = vector.load %arg12[%c0_174, %c0_175] : memref<1x384xf32, #tpu.memory_space<vmem>>, vector<1x384xf32>
    %155 = vector.broadcast %154 : vector<1x384xf32> to vector<4x384xf32>
    %156 = arith.mulf %153, %155 : vector<4x384xf32>
    %157 = arith.truncf %156 : vector<4x384xf32> to vector<4x384xbf16>
    %cst_176 = arith.constant 0.000000e+00 : bf16
    %158 = vector.broadcast %cst_176 : bf16 to vector<36x19xbf16>
    %c0_177 = arith.constant 0 : index
    %c128_178 = arith.constant 128 : index
    %159 = vector.load %arg33[%c0_177, %c128_178] : memref<576x1536xbf16, #tpu.memory_space<vmem>>, vector<36x19xbf16>
    tpu.vector_store %arg33[%c0_177, %c128_178], %158 {strides = array<i32>} : memref<576x1536xbf16, #tpu.memory_space<vmem>>, vector<36x19xbf16>,
    %c0_179 = arith.constant 0 : index
    %c493_180 = arith.constant 493 : index
    %160 = vector.load %arg33[%c0_179, %c493_180] : memref<576x1536xbf16, #tpu.memory_space<vmem>>, vector<36x19xbf16>
    tpu.vector_store %arg33[%c0_179, %c493_180], %158 {strides = array<i32>} : memref<576x1536xbf16, #tpu.memory_space<vmem>>, vector<36x19xbf16>,
    %c0_181 = arith.constant 0 : index
    %c147_182 = arith.constant 147 : index
    %161 = vector.load %arg33[%c0_181, %c147_182] : memref<576x1536xbf16, #tpu.memory_space<vmem>>, vector<4x384xbf16>
    tpu.vector_store %arg33[%c0_181, %c147_182], %157 {strides = array<i32>} : memref<576x1536xbf16, #tpu.memory_space<vmem>>, vector<4x384xbf16>,
    %c4 = arith.constant 4 : index
    %c146_183 = arith.constant 146 : index
    %162 = vector.load %arg33[%c4, %c146_183] : memref<576x1536xbf16, #tpu.memory_space<vmem>>, vector<4x384xbf16>
    tpu.vector_store %arg33[%c4, %c146_183], %157 {strides = array<i32>} : memref<576x1536xbf16, #tpu.memory_space<vmem>>, vector<4x384xbf16>,
    %c8_184 = arith.constant 8 : index
    %c145_185 = arith.constant 145 : index
    %163 = vector.load %arg33[%c8_184, %c145_185] : memref<576x1536xbf16, #tpu.memory_space<vmem>>, vector<4x384xbf16>
    tpu.vector_store %arg33[%c8_184, %c145_185], %157 {strides = array<i32>} : memref<576x1536xbf16, #tpu.memory_space<vmem>>, vector<4x384xbf16>,
    %c12 = arith.constant 12 : index
    %c129_186 = arith.constant 129 : index
    %164 = vector.load %arg33[%c12, %c129_186] : memref<576x1536xbf16, #tpu.memory_space<vmem>>, vector<4x384xbf16>
    tpu.vector_store %arg33[%c12, %c129_186], %157 {strides = array<i32>} : memref<576x1536xbf16, #tpu.memory_space<vmem>>, vector<4x384xbf16>,
    %c16_187 = arith.constant 16 : index
    %c128_188 = arith.constant 128 : index
    %165 = vector.load %arg33[%c16_187, %c128_188] : memref<576x1536xbf16, #tpu.memory_space<vmem>>, vector<4x384xbf16>
    tpu.vector_store %arg33[%c16_187, %c128_188], %157 {strides = array<i32>} : memref<576x1536xbf16, #tpu.memory_space<vmem>>, vector<4x384xbf16>,
    %c20 = arith.constant 20 : index
    %c127_189 = arith.constant 127 : index
    %166 = vector.load %arg33[%c20, %c127_189] : memref<576x1536xbf16, #tpu.memory_space<vmem>>, vector<4x384xbf16>
    tpu.vector_store %arg33[%c20, %c127_189], %157 {strides = array<i32>} : memref<576x1536xbf16, #tpu.memory_space<vmem>>, vector<4x384xbf16>,
    %c24_190 = arith.constant 24 : index
    %c111_191 = arith.constant 111 : index
    %167 = vector.load %arg33[%c24_190, %c111_191] : memref<576x1536xbf16, #tpu.memory_space<vmem>>, vector<4x384xbf16>
    tpu.vector_store %arg33[%c24_190, %c111_191], %157 {strides = array<i32>} : memref<576x1536xbf16, #tpu.memory_space<vmem>>, vector<4x384xbf16>,
    %c28 = arith.constant 28 : index
    %c110_192 = arith.constant 110 : index
    %168 = vector.load %arg33[%c28, %c110_192] : memref<576x1536xbf16, #tpu.memory_space<vmem>>, vector<4x384xbf16>
    tpu.vector_store %arg33[%c28, %c110_192], %157 {strides = array<i32>} : memref<576x1536xbf16, #tpu.memory_space<vmem>>, vector<4x384xbf16>,
    %c32_193 = arith.constant 32 : index
    %c109_194 = arith.constant 109 : index
    %169 = vector.load %arg33[%c32_193, %c109_194] : memref<576x1536xbf16, #tpu.memory_space<vmem>>, vector<4x384xbf16>
    tpu.vector_store %arg33[%c32_193, %c109_194], %157 {strides = array<i32>} : memref<576x1536xbf16, #tpu.memory_space<vmem>>, vector<4x384xbf16>,
    %c0_195 = arith.constant 0 : index
    %c0_196 = arith.constant 0 : index
    %170 = vector.load %arg24[%c0_195, %c0_196] : memref<4x36xbf16, #tpu.memory_space<vmem>>, vector<4x36xbf16>
    %c0_197 = arith.constant 0 : index
    %c128_198 = arith.constant 128 : index
    %171 = vector.load %arg33[%c0_197, %c128_198] : memref<576x1536xbf16, #tpu.memory_space<vmem>>, vector<36x384xbf16>
    %cst_199 = arith.constant dense<0.000000e+00> : vector<4x384xf32>
    %172 = tpu.matmul %170, %171, %cst_199 {dimension_numbers = #tpu.dot_dimension_numbers<[1], [0], [0], [1], [0, 0, 1, 1], [], []>} : vector<4x36xbf16>, vector<36x384xbf16>, vector<4x384xf32> -> vector<4x384xf32>
    %c0_200 = arith.constant 0 : index
    %c0_201 = arith.constant 0 : index
    %173 = vector.load %arg25[%c0_200, %c0_201] : memref<4x1xf32, #tpu.memory_space<vmem>>, vector<4x1xf32>
    %174 = vector.broadcast %173 : vector<4x1xf32> to vector<4x384xf32>
    %175 = arith.addf %172, %174 : vector<4x384xf32>
    %cst_202 = arith.constant 0.000000e+00 : f32
    %176 = vector.broadcast %cst_202 : f32 to vector<4x384xf32>
    %177 = arith.maximumf %175, %176 : vector<4x384xf32>
    %178 = arith.truncf %177 : vector<4x384xf32> to vector<4x384xbf16>
    %c0_203 = arith.constant 0 : index
    %c0_204 = arith.constant 0 : index
    %179 = vector.load %arg9[%c0_203, %c0_204] : memref<384x1280xbf16, #tpu.memory_space<vmem>>, vector<384x1280xbf16>
    %cst_205 = arith.constant dense<0.000000e+00> : vector<4x1280xf32>
    %180 = tpu.matmul %178, %179, %cst_205 {dimension_numbers = #tpu.dot_dimension_numbers<[1], [0], [0], [1], [0, 0, 1, 1], [], []>} : vector<4x384xbf16>, vector<384x1280xbf16>, vector<4x1280xf32> -> vector<4x1280xf32>
    %c0_206 = arith.constant 0 : index
    %c0_207 = arith.constant 0 : index
    %c0_208 = arith.constant 0 : index
    %181 = vector.load %arg5[%c0_206, %c0_207, %c0_208] : memref<1x4x1280xbf16, #tpu.memory_space<vmem>>, vector<1x4x1280xbf16>
    %182 = vector.shape_cast %181 : vector<1x4x1280xbf16> to vector<4x1280xbf16>
    %183 = arith.truncf %180 : vector<4x1280xf32> to vector<4x1280xbf16>
    %cst_209 = arith.constant 0.000000e+00 : bf16
    %184 = vector.broadcast %cst_209 : bf16 to vector<72x35xbf16>
    %c0_210 = arith.constant 0 : index
    %c128_211 = arith.constant 128 : index
    %185 = vector.load %arg33[%c0_210, %c128_211] : memref<576x1536xbf16, #tpu.memory_space<vmem>>, vector<72x35xbf16>
    tpu.vector_store %arg33[%c0_210, %c128_211], %184 {strides = array<i32>} : memref<576x1536xbf16, #tpu.memory_space<vmem>>, vector<72x35xbf16>,
    %c0_212 = arith.constant 0 : index
    %c1373 = arith.constant 1373 : index
    %186 = vector.load %arg33[%c0_212, %c1373] : memref<576x1536xbf16, #tpu.memory_space<vmem>>, vector<72x35xbf16>
    tpu.vector_store %arg33[%c0_212, %c1373], %184 {strides = array<i32>} : memref<576x1536xbf16, #tpu.memory_space<vmem>>, vector<72x35xbf16>,
    %c0_213 = arith.constant 0 : index
    %c163 = arith.constant 163 : index
    %187 = vector.load %arg33[%c0_213, %c163] : memref<576x1536xbf16, #tpu.memory_space<vmem>>, vector<4x1280xbf16>
    tpu.vector_store %arg33[%c0_213, %c163], %182 {strides = array<i32>} : memref<576x1536xbf16, #tpu.memory_space<vmem>>, vector<4x1280xbf16>,
    %c4_214 = arith.constant 4 : index
    %c163_215 = arith.constant 163 : index
    %188 = vector.load %arg33[%c4_214, %c163_215] : memref<576x1536xbf16, #tpu.memory_space<vmem>>, vector<4x1280xbf16>
    tpu.vector_store %arg33[%c4_214, %c163_215], %183 {strides = array<i32>} : memref<576x1536xbf16, #tpu.memory_space<vmem>>, vector<4x1280xbf16>,
    %c8_216 = arith.constant 8 : index
    %c162 = arith.constant 162 : index
    %189 = vector.load %arg33[%c8_216, %c162] : memref<576x1536xbf16, #tpu.memory_space<vmem>>, vector<4x1280xbf16>
    tpu.vector_store %arg33[%c8_216, %c162], %182 {strides = array<i32>} : memref<576x1536xbf16, #tpu.memory_space<vmem>>, vector<4x1280xbf16>,
    %c12_217 = arith.constant 12 : index
    %c162_218 = arith.constant 162 : index
    %190 = vector.load %arg33[%c12_217, %c162_218] : memref<576x1536xbf16, #tpu.memory_space<vmem>>, vector<4x1280xbf16>
    tpu.vector_store %arg33[%c12_217, %c162_218], %183 {strides = array<i32>} : memref<576x1536xbf16, #tpu.memory_space<vmem>>, vector<4x1280xbf16>,
    %c16_219 = arith.constant 16 : index
    %c161 = arith.constant 161 : index
    %191 = vector.load %arg33[%c16_219, %c161] : memref<576x1536xbf16, #tpu.memory_space<vmem>>, vector<4x1280xbf16>
    tpu.vector_store %arg33[%c16_219, %c161], %182 {strides = array<i32>} : memref<576x1536xbf16, #tpu.memory_space<vmem>>, vector<4x1280xbf16>,
    %c20_220 = arith.constant 20 : index
    %c161_221 = arith.constant 161 : index
    %192 = vector.load %arg33[%c20_220, %c161_221] : memref<576x1536xbf16, #tpu.memory_space<vmem>>, vector<4x1280xbf16>
    tpu.vector_store %arg33[%c20_220, %c161_221], %183 {strides = array<i32>} : memref<576x1536xbf16, #tpu.memory_space<vmem>>, vector<4x1280xbf16>,
    %c24_222 = arith.constant 24 : index
    %c129_223 = arith.constant 129 : index
    %193 = vector.load %arg33[%c24_222, %c129_223] : memref<576x1536xbf16, #tpu.memory_space<vmem>>, vector<4x1280xbf16>
    tpu.vector_store %arg33[%c24_222, %c129_223], %182 {strides = array<i32>} : memref<576x1536xbf16, #tpu.memory_space<vmem>>, vector<4x1280xbf16>,
    %c28_224 = arith.constant 28 : index
    %c129_225 = arith.constant 129 : index
    %194 = vector.load %arg33[%c28_224, %c129_225] : memref<576x1536xbf16, #tpu.memory_space<vmem>>, vector<4x1280xbf16>
    tpu.vector_store %arg33[%c28_224, %c129_225], %183 {strides = array<i32>} : memref<576x1536xbf16, #tpu.memory_space<vmem>>, vector<4x1280xbf16>,
    %c32_226 = arith.constant 32 : index
    %c128_227 = arith.constant 128 : index
    %195 = vector.load %arg33[%c32_226, %c128_227] : memref<576x1536xbf16, #tpu.memory_space<vmem>>, vector<4x1280xbf16>
    tpu.vector_store %arg33[%c32_226, %c128_227], %182 {strides = array<i32>} : memref<576x1536xbf16, #tpu.memory_space<vmem>>, vector<4x1280xbf16>,
    %c36 = arith.constant 36 : index
    %c128_228 = arith.constant 128 : index
    %196 = vector.load %arg33[%c36, %c128_228] : memref<576x1536xbf16, #tpu.memory_space<vmem>>, vector<4x1280xbf16>
    tpu.vector_store %arg33[%c36, %c128_228], %183 {strides = array<i32>} : memref<576x1536xbf16, #tpu.memory_space<vmem>>, vector<4x1280xbf16>,
    %c40_229 = arith.constant 40 : index
    %c127_230 = arith.constant 127 : index
    %197 = vector.load %arg33[%c40_229, %c127_230] : memref<576x1536xbf16, #tpu.memory_space<vmem>>, vector<4x1280xbf16>
    tpu.vector_store %arg33[%c40_229, %c127_230], %182 {strides = array<i32>} : memref<576x1536xbf16, #tpu.memory_space<vmem>>, vector<4x1280xbf16>,
    %c44 = arith.constant 44 : index
    %c127_231 = arith.constant 127 : index
    %198 = vector.load %arg33[%c44, %c127_231] : memref<576x1536xbf16, #tpu.memory_space<vmem>>, vector<4x1280xbf16>
    tpu.vector_store %arg33[%c44, %c127_231], %183 {strides = array<i32>} : memref<576x1536xbf16, #tpu.memory_space<vmem>>, vector<4x1280xbf16>,
    %c48_232 = arith.constant 48 : index
    %c95 = arith.constant 95 : index
    %199 = vector.load %arg33[%c48_232, %c95] : memref<576x1536xbf16, #tpu.memory_space<vmem>>, vector<4x1280xbf16>
    tpu.vector_store %arg33[%c48_232, %c95], %182 {strides = array<i32>} : memref<576x1536xbf16, #tpu.memory_space<vmem>>, vector<4x1280xbf16>,
    %c52 = arith.constant 52 : index
    %c95_233 = arith.constant 95 : index
    %200 = vector.load %arg33[%c52, %c95_233] : memref<576x1536xbf16, #tpu.memory_space<vmem>>, vector<4x1280xbf16>
    tpu.vector_store %arg33[%c52, %c95_233], %183 {strides = array<i32>} : memref<576x1536xbf16, #tpu.memory_space<vmem>>, vector<4x1280xbf16>,
    %c56_234 = arith.constant 56 : index
    %c94 = arith.constant 94 : index
    %201 = vector.load %arg33[%c56_234, %c94] : memref<576x1536xbf16, #tpu.memory_space<vmem>>, vector<4x1280xbf16>
    tpu.vector_store %arg33[%c56_234, %c94], %182 {strides = array<i32>} : memref<576x1536xbf16, #tpu.memory_space<vmem>>, vector<4x1280xbf16>,
    %c60 = arith.constant 60 : index
    %c94_235 = arith.constant 94 : index
    %202 = vector.load %arg33[%c60, %c94_235] : memref<576x1536xbf16, #tpu.memory_space<vmem>>, vector<4x1280xbf16>
    tpu.vector_store %arg33[%c60, %c94_235], %183 {strides = array<i32>} : memref<576x1536xbf16, #tpu.memory_space<vmem>>, vector<4x1280xbf16>,
    %c64_236 = arith.constant 64 : index
    %c93 = arith.constant 93 : index
    %203 = vector.load %arg33[%c64_236, %c93] : memref<576x1536xbf16, #tpu.memory_space<vmem>>, vector<4x1280xbf16>
    tpu.vector_store %arg33[%c64_236, %c93], %182 {strides = array<i32>} : memref<576x1536xbf16, #tpu.memory_space<vmem>>, vector<4x1280xbf16>,
    %c68 = arith.constant 68 : index
    %c93_237 = arith.constant 93 : index
    %204 = vector.load %arg33[%c68, %c93_237] : memref<576x1536xbf16, #tpu.memory_space<vmem>>, vector<4x1280xbf16>
    tpu.vector_store %arg33[%c68, %c93_237], %183 {strides = array<i32>} : memref<576x1536xbf16, #tpu.memory_space<vmem>>, vector<4x1280xbf16>,
    %c0_238 = arith.constant 0 : index
    %c0_239 = arith.constant 0 : index
    %205 = vector.load %arg26[%c0_238, %c0_239] : memref<4x72xbf16, #tpu.memory_space<vmem>>, vector<4x72xbf16>
    %c0_240 = arith.constant 0 : index
    %c128_241 = arith.constant 128 : index
    %206 = vector.load %arg33[%c0_240, %c128_241] : memref<576x1536xbf16, #tpu.memory_space<vmem>>, vector<72x1280xbf16>
    %cst_242 = arith.constant dense<0.000000e+00> : vector<4x1280xf32>
    %207 = tpu.matmul %205, %206, %cst_242 {dimension_numbers = #tpu.dot_dimension_numbers<[1], [0], [0], [1], [0, 0, 1, 1], [], []>} : vector<4x72xbf16>, vector<72x1280xbf16>, vector<4x1280xf32> -> vector<4x1280xf32>
    %c0_243 = arith.constant 0 : index
    %c0_244 = arith.constant 0 : index
    %208 = vector.load %arg27[%c0_243, %c0_244] : memref<4x1xf32, #tpu.memory_space<vmem>>, vector<4x1xf32>
    %209 = vector.broadcast %208 : vector<4x1xf32> to vector<4x1280xf32>
    %210 = arith.addf %207, %209 : vector<4x1280xf32>
    %cst_245 = arith.constant 0.000000e+00 : f32
    %211 = vector.broadcast %cst_245 : f32 to vector<4x1280xf32>
    %212 = arith.maximumf %210, %211 : vector<4x1280xf32>
    %c0_246 = arith.constant 0 : index
    %c0_247 = arith.constant 0 : index
    %213 = vector.load %arg13[%c0_246, %c0_247] : memref<1x1280xf32, #tpu.memory_space<vmem>>, vector<1x1280xf32>
    %214 = vector.broadcast %213 : vector<1x1280xf32> to vector<4x1280xf32>
    %215 = arith.mulf %212, %214 : vector<4x1280xf32>
    %216 = arith.truncf %215 : vector<4x1280xf32> to vector<4x1280xbf16>
    %cst_248 = arith.constant 0.000000e+00 : bf16
    %217 = vector.broadcast %cst_248 : bf16 to vector<36x35xbf16>
    %c0_249 = arith.constant 0 : index
    %c128_250 = arith.constant 128 : index
    %218 = vector.load %arg33[%c0_249, %c128_250] : memref<576x1536xbf16, #tpu.memory_space<vmem>>, vector<36x35xbf16>
    tpu.vector_store %arg33[%c0_249, %c128_250], %217 {strides = array<i32>} : memref<576x1536xbf16, #tpu.memory_space<vmem>>, vector<36x35xbf16>,
    %c0_251 = arith.constant 0 : index
    %c1373_252 = arith.constant 1373 : index
    %219 = vector.load %arg33[%c0_251, %c1373_252] : memref<576x1536xbf16, #tpu.memory_space<vmem>>, vector<36x35xbf16>
    tpu.vector_store %arg33[%c0_251, %c1373_252], %217 {strides = array<i32>} : memref<576x1536xbf16, #tpu.memory_space<vmem>>, vector<36x35xbf16>,
    %c0_253 = arith.constant 0 : index
    %c163_254 = arith.constant 163 : index
    %220 = vector.load %arg33[%c0_253, %c163_254] : memref<576x1536xbf16, #tpu.memory_space<vmem>>, vector<4x1280xbf16>
    tpu.vector_store %arg33[%c0_253, %c163_254], %216 {strides = array<i32>} : memref<576x1536xbf16, #tpu.memory_space<vmem>>, vector<4x1280xbf16>,
    %c4_255 = arith.constant 4 : index
    %c162_256 = arith.constant 162 : index
    %221 = vector.load %arg33[%c4_255, %c162_256] : memref<576x1536xbf16, #tpu.memory_space<vmem>>, vector<4x1280xbf16>
    tpu.vector_store %arg33[%c4_255, %c162_256], %216 {strides = array<i32>} : memref<576x1536xbf16, #tpu.memory_space<vmem>>, vector<4x1280xbf16>,
    %c8_257 = arith.constant 8 : index
    %c161_258 = arith.constant 161 : index
    %222 = vector.load %arg33[%c8_257, %c161_258] : memref<576x1536xbf16, #tpu.memory_space<vmem>>, vector<4x1280xbf16>
    tpu.vector_store %arg33[%c8_257, %c161_258], %216 {strides = array<i32>} : memref<576x1536xbf16, #tpu.memory_space<vmem>>, vector<4x1280xbf16>,
    %c12_259 = arith.constant 12 : index
    %c129_260 = arith.constant 129 : index
    %223 = vector.load %arg33[%c12_259, %c129_260] : memref<576x1536xbf16, #tpu.memory_space<vmem>>, vector<4x1280xbf16>
    tpu.vector_store %arg33[%c12_259, %c129_260], %216 {strides = array<i32>} : memref<576x1536xbf16, #tpu.memory_space<vmem>>, vector<4x1280xbf16>,
    %c16_261 = arith.constant 16 : index
    %c128_262 = arith.constant 128 : index
    %224 = vector.load %arg33[%c16_261, %c128_262] : memref<576x1536xbf16, #tpu.memory_space<vmem>>, vector<4x1280xbf16>
    tpu.vector_store %arg33[%c16_261, %c128_262], %216 {strides = array<i32>} : memref<576x1536xbf16, #tpu.memory_space<vmem>>, vector<4x1280xbf16>,
    %c20_263 = arith.constant 20 : index
    %c127_264 = arith.constant 127 : index
    %225 = vector.load %arg33[%c20_263, %c127_264] : memref<576x1536xbf16, #tpu.memory_space<vmem>>, vector<4x1280xbf16>
    tpu.vector_store %arg33[%c20_263, %c127_264], %216 {strides = array<i32>} : memref<576x1536xbf16, #tpu.memory_space<vmem>>, vector<4x1280xbf16>,
    %c24_265 = arith.constant 24 : index
    %c95_266 = arith.constant 95 : index
    %226 = vector.load %arg33[%c24_265, %c95_266] : memref<576x1536xbf16, #tpu.memory_space<vmem>>, vector<4x1280xbf16>
    tpu.vector_store %arg33[%c24_265, %c95_266], %216 {strides = array<i32>} : memref<576x1536xbf16, #tpu.memory_space<vmem>>, vector<4x1280xbf16>,
    %c28_267 = arith.constant 28 : index
    %c94_268 = arith.constant 94 : index
    %227 = vector.load %arg33[%c28_267, %c94_268] : memref<576x1536xbf16, #tpu.memory_space<vmem>>, vector<4x1280xbf16>
    tpu.vector_store %arg33[%c28_267, %c94_268], %216 {strides = array<i32>} : memref<576x1536xbf16, #tpu.memory_space<vmem>>, vector<4x1280xbf16>,
    %c32_269 = arith.constant 32 : index
    %c93_270 = arith.constant 93 : index
    %228 = vector.load %arg33[%c32_269, %c93_270] : memref<576x1536xbf16, #tpu.memory_space<vmem>>, vector<4x1280xbf16>
    tpu.vector_store %arg33[%c32_269, %c93_270], %216 {strides = array<i32>} : memref<576x1536xbf16, #tpu.memory_space<vmem>>, vector<4x1280xbf16>,
    %c0_271 = arith.constant 0 : index
    %c0_272 = arith.constant 0 : index
    %229 = vector.load %arg28[%c0_271, %c0_272] : memref<4x36xbf16, #tpu.memory_space<vmem>>, vector<4x36xbf16>
    %c0_273 = arith.constant 0 : index
    %c128_274 = arith.constant 128 : index
    %230 = vector.load %arg33[%c0_273, %c128_274] : memref<576x1536xbf16, #tpu.memory_space<vmem>>, vector<36x1280xbf16>
    %cst_275 = arith.constant dense<0.000000e+00> : vector<4x1280xf32>
    %231 = tpu.matmul %229, %230, %cst_275 {dimension_numbers = #tpu.dot_dimension_numbers<[1], [0], [0], [1], [0, 0, 1, 1], [], []>} : vector<4x36xbf16>, vector<36x1280xbf16>, vector<4x1280xf32> -> vector<4x1280xf32>
    %c0_276 = arith.constant 0 : index
    %c0_277 = arith.constant 0 : index
    %232 = vector.load %arg29[%c0_276, %c0_277] : memref<4x1xf32, #tpu.memory_space<vmem>>, vector<4x1xf32>
    %233 = vector.broadcast %232 : vector<4x1xf32> to vector<4x1280xf32>
    %234 = arith.addf %231, %233 : vector<4x1280xf32>
    %cst_278 = arith.constant 0.000000e+00 : f32
    %235 = vector.broadcast %cst_278 : f32 to vector<4x1280xf32>
    %236 = arith.maximumf %234, %235 : vector<4x1280xf32>
    %cst_279 = arith.constant 0.000000e+00 : f32
    %237 = vector.broadcast %cst_279 : f32 to vector<3x1280xf32>
    %c0_280 = arith.constant 0 : index
    %c0_281 = arith.constant 0 : index
    %238 = vector.load %arg31[%c0_280, %c0_281] : memref<3x1xf32, #tpu.memory_space<vmem>>, vector<3x1xf32>
    %239 = vector.broadcast %238 : vector<3x1xf32> to vector<3x1280xf32>
    %240 = arith.addf %237, %239 : vector<3x1280xf32>
    %c0_282 = arith.constant 0 : index
    %c0_283 = arith.constant 0 : index
    %241 = vector.load %arg30[%c0_282, %c0_283] : memref<3x4xf32, #tpu.memory_space<vmem>>, vector<3x1xf32>
    %242 = vector.extract_strided_slice %236 {offsets = [0, 0], sizes = [1, 1280], strides = [1, 1]} : vector<4x1280xf32> to vector<1x1280xf32>
    %243 = vector.broadcast %241 : vector<3x1xf32> to vector<3x1280xf32>
    %244 = vector.broadcast %242 : vector<1x1280xf32> to vector<3x1280xf32>
    %245 = arith.mulf %243, %244 : vector<3x1280xf32>
    %246 = arith.addf %240, %245 : vector<3x1280xf32>
    %c0_284 = arith.constant 0 : index
    %c1 = arith.constant 1 : index
    %247 = vector.load %arg30[%c0_284, %c1] : memref<3x4xf32, #tpu.memory_space<vmem>>, vector<3x1xf32>
    %248 = vector.extract_strided_slice %236 {offsets = [1, 0], sizes = [1, 1280], strides = [1, 1]} : vector<4x1280xf32> to vector<1x1280xf32>
    %249 = vector.broadcast %247 : vector<3x1xf32> to vector<3x1280xf32>
    %250 = vector.broadcast %248 : vector<1x1280xf32> to vector<3x1280xf32>
    %251 = arith.mulf %249, %250 : vector<3x1280xf32>
    %252 = arith.addf %246, %251 : vector<3x1280xf32>
    %c0_285 = arith.constant 0 : index
    %c2 = arith.constant 2 : index
    %253 = vector.load %arg30[%c0_285, %c2] : memref<3x4xf32, #tpu.memory_space<vmem>>, vector<3x1xf32>
    %254 = vector.extract_strided_slice %236 {offsets = [2, 0], sizes = [1, 1280], strides = [1, 1]} : vector<4x1280xf32> to vector<1x1280xf32>
    %255 = vector.broadcast %253 : vector<3x1xf32> to vector<3x1280xf32>
    %256 = vector.broadcast %254 : vector<1x1280xf32> to vector<3x1280xf32>
    %257 = arith.mulf %255, %256 : vector<3x1280xf32>
    %258 = arith.addf %252, %257 : vector<3x1280xf32>
    %c0_286 = arith.constant 0 : index
    %c3 = arith.constant 3 : index
    %259 = vector.load %arg30[%c0_286, %c3] : memref<3x4xf32, #tpu.memory_space<vmem>>, vector<3x1xf32>
    %260 = vector.extract_strided_slice %236 {offsets = [3, 0], sizes = [1, 1280], strides = [1, 1]} : vector<4x1280xf32> to vector<1x1280xf32>
    %261 = vector.broadcast %259 : vector<3x1xf32> to vector<3x1280xf32>
    %262 = vector.broadcast %260 : vector<1x1280xf32> to vector<3x1280xf32>
    %263 = arith.mulf %261, %262 : vector<3x1280xf32>
    %264 = arith.addf %258, %263 : vector<3x1280xf32>
    %c0_287 = arith.constant 0 : index
    %c0_288 = arith.constant 0 : index
    %c0_289 = arith.constant 0 : index
    %265 = vector.load %arg32[%c0_287, %c0_288, %c0_289] : memref<1x3x1280xf32, #tpu.memory_space<vmem>>, vector<1x3x1280xf32>
    %266 = vector.shape_cast %265 : vector<1x3x1280xf32> to vector<3x1280xf32>
    %267 = vector.shape_cast %264 : vector<3x1280xf32> to vector<1x3x1280xf32>
    tpu.vector_store %arg32[%c0_287, %c0_288, %c0_289], %267 {strides = array<i32>} : memref<1x3x1280xf32, #tpu.memory_space<vmem>>, vector<1x3x1280xf32>,
    return
  }
  func.func @transform_0(%arg0: i32) -> (i32, i32, i32) {
    %c0_i32 = arith.constant 0 : i32
    %c0_i32_0 = arith.constant 0 : i32
    %c0_i32_1 = arith.constant 0 : i32
    return %arg0, %c0_i32, %c0_i32_0 : i32, i32, i32
  }
  func.func @transform_1(%arg0: i32) -> (i32, i32, i32) {
    %c0_i32 = arith.constant 0 : i32
    %c0_i32_0 = arith.constant 0 : i32
    %c0_i32_1 = arith.constant 0 : i32
    return %arg0, %c0_i32, %c0_i32_0 : i32, i32, i32
  }
  func.func @transform_2(%arg0: i32) -> (i32, i32, i32) {
    %c0_i32 = arith.constant 0 : i32
    %c0_i32_0 = arith.constant 0 : i32
    %c0_i32_1 = arith.constant 0 : i32
    return %arg0, %c0_i32, %c0_i32_0 : i32, i32, i32
  }
  func.func @transform_3(%arg0: i32) -> (i32, i32, i32) {
    %c0_i32 = arith.constant 0 : i32
    %c0_i32_0 = arith.constant 0 : i32
    %c0_i32_1 = arith.constant 0 : i32
    return %arg0, %c0_i32, %c0_i32_0 : i32, i32, i32
  }
  func.func @transform_4(%arg0: i32) -> (i32, i32, i32) {
    %c0_i32 = arith.constant 0 : i32
    %c0_i32_0 = arith.constant 0 : i32
    %c0_i32_1 = arith.constant 0 : i32
    return %arg0, %c0_i32, %c0_i32_0 : i32, i32, i32
  }
  func.func @transform_5(%arg0: i32) -> (i32, i32) {
    %c0_i32 = arith.constant 0 : i32
    %c0_i32_0 = arith.constant 0 : i32
    %c0_i32_1 = arith.constant 0 : i32
    return %c0_i32, %c0_i32_0 : i32, i32
  }
  func.func @transform_6(%arg0: i32) -> (i32, i32) {
    %c0_i32 = arith.constant 0 : i32
    %c0_i32_0 = arith.constant 0 : i32
    %c0_i32_1 = arith.constant 0 : i32
    return %c0_i32, %c0_i32_0 : i32, i32
  }
  func.func @transform_7(%arg0: i32) -> (i32, i32) {
    %c0_i32 = arith.constant 0 : i32
    %c0_i32_0 = arith.constant 0 : i32
    %c0_i32_1 = arith.constant 0 : i32
    return %c0_i32, %c0_i32_0 : i32, i32
  }
  func.func @transform_8(%arg0: i32) -> (i32, i32) {
    %c0_i32 = arith.constant 0 : i32
    %c0_i32_0 = arith.constant 0 : i32
    %c0_i32_1 = arith.constant 0 : i32
    return %c0_i32, %c0_i32_0 : i32, i32
  }
  func.func @transform_9(%arg0: i32) -> (i32, i32) {
    %c0_i32 = arith.constant 0 : i32
    %c0_i32_0 = arith.constant 0 : i32
    %c0_i32_1 = arith.constant 0 : i32
    return %c0_i32, %c0_i32_0 : i32, i32
  }
  func.func @transform_10(%arg0: i32) -> (i32, i32) {
    %c0_i32 = arith.constant 0 : i32
    %c0_i32_0 = arith.constant 0 : i32
    %c0_i32_1 = arith.constant 0 : i32
    return %c0_i32, %c0_i32_0 : i32, i32
  }
  func.func @transform_11(%arg0: i32) -> (i32, i32) {
    %c0_i32 = arith.constant 0 : i32
    %c0_i32_0 = arith.constant 0 : i32
    %c0_i32_1 = arith.constant 0 : i32
    return %c0_i32, %c0_i32_0 : i32, i32
  }
  func.func @transform_12(%arg0: i32) -> (i32, i32) {
    %c0_i32 = arith.constant 0 : i32
    %c0_i32_0 = arith.constant 0 : i32
    %c0_i32_1 = arith.constant 0 : i32
    return %c0_i32, %c0_i32_0 : i32, i32
  }
  func.func @transform_13(%arg0: i32) -> (i32, i32) {
    %c0_i32 = arith.constant 0 : i32
    %c0_i32_0 = arith.constant 0 : i32
    %c0_i32_1 = arith.constant 0 : i32
    return %c0_i32, %c0_i32_0 : i32, i32
  }
  func.func @transform_14(%arg0: i32) -> (i32, i32) {
    %c0_i32 = arith.constant 0 : i32
    %c0_i32_0 = arith.constant 0 : i32
    %c0_i32_1 = arith.constant 0 : i32
    return %c0_i32, %c0_i32_0 : i32, i32
  }
  func.func @transform_15(%arg0: i32) -> (i32, i32) {
    %c0_i32 = arith.constant 0 : i32
    %c0_i32_0 = arith.constant 0 : i32
    %c0_i32_1 = arith.constant 0 : i32
    return %c0_i32, %c0_i32_0 : i32, i32
  }
  func.func @transform_16(%arg0: i32) -> (i32, i32) {
    %c0_i32 = arith.constant 0 : i32
    %c0_i32_0 = arith.constant 0 : i32
    %c0_i32_1 = arith.constant 0 : i32
    return %c0_i32, %c0_i32_0 : i32, i32
  }
  func.func @transform_17(%arg0: i32) -> (i32, i32) {
    %c0_i32 = arith.constant 0 : i32
    %c0_i32_0 = arith.constant 0 : i32
    %c0_i32_1 = arith.constant 0 : i32
    return %c0_i32, %c0_i32_0 : i32, i32
  }
  func.func @transform_18(%arg0: i32) -> (i32, i32) {
    %c0_i32 = arith.constant 0 : i32
    %c0_i32_0 = arith.constant 0 : i32
    %c0_i32_1 = arith.constant 0 : i32
    return %c0_i32, %c0_i32_0 : i32, i32
  }
  func.func @transform_19(%arg0: i32) -> (i32, i32) {
    %c0_i32 = arith.constant 0 : i32
    %c0_i32_0 = arith.constant 0 : i32
    %c0_i32_1 = arith.constant 0 : i32
    return %c0_i32, %c0_i32_0 : i32, i32
  }
  func.func @transform_20(%arg0: i32) -> (i32, i32) {
    %c0_i32 = arith.constant 0 : i32
    %c0_i32_0 = arith.constant 0 : i32
    %c0_i32_1 = arith.constant 0 : i32
    return %c0_i32, %c0_i32_0 : i32, i32
  }
  func.func @transform_21(%arg0: i32) -> (i32, i32) {
    %c0_i32 = arith.constant 0 : i32
    %c0_i32_0 = arith.constant 0 : i32
    %c0_i32_1 = arith.constant 0 : i32
    return %c0_i32, %c0_i32_0 : i32, i32
  }
  func.func @transform_22(%arg0: i32) -> (i32, i32) {
    %c0_i32 = arith.constant 0 : i32
    %c0_i32_0 = arith.constant 0 : i32
    %c0_i32_1 = arith.constant 0 : i32
    return %c0_i32, %c0_i32_0 : i32, i32
  }
  func.func @transform_23(%arg0: i32) -> (i32, i32) {
    %c0_i32 = arith.constant 0 : i32
    %c0_i32_0 = arith.constant 0 : i32
    %c0_i32_1 = arith.constant 0 : i32
    return %c0_i32, %c0_i32_0 : i32, i32
  }
  func.func @transform_24(%arg0: i32) -> (i32, i32) {
    %c0_i32 = arith.constant 0 : i32
    %c0_i32_0 = arith.constant 0 : i32
    %c0_i32_1 = arith.constant 0 : i32
    return %c0_i32, %c0_i32_0 : i32, i32
  }
  func.func @transform_25(%arg0: i32) -> (i32, i32) {
    %c0_i32 = arith.constant 0 : i32
    %c0_i32_0 = arith.constant 0 : i32
    %c0_i32_1 = arith.constant 0 : i32
    return %c0_i32, %c0_i32_0 : i32, i32
  }
  func.func @transform_26(%arg0: i32) -> (i32, i32) {
    %c0_i32 = arith.constant 0 : i32
    %c0_i32_0 = arith.constant 0 : i32
    %c0_i32_1 = arith.constant 0 : i32
    return %c0_i32, %c0_i32_0 : i32, i32
  }
  func.func @transform_27(%arg0: i32) -> (i32, i32) {
    %c0_i32 = arith.constant 0 : i32
    %c0_i32_0 = arith.constant 0 : i32
    %c0_i32_1 = arith.constant 0 : i32
    return %c0_i32, %c0_i32_0 : i32, i32
  }
  func.func @transform_28(%arg0: i32) -> (i32, i32) {
    %c0_i32 = arith.constant 0 : i32
    %c0_i32_0 = arith.constant 0 : i32
    %c0_i32_1 = arith.constant 0 : i32
    return %c0_i32, %c0_i32_0 : i32, i32
  }
  func.func @transform_29(%arg0: i32) -> (i32, i32) {
    %c0_i32 = arith.constant 0 : i32
    %c0_i32_0 = arith.constant 0 : i32
    %c0_i32_1 = arith.constant 0 : i32
    return %c0_i32, %c0_i32_0 : i32, i32
  }
  func.func @transform_30(%arg0: i32) -> (i32, i32) {
    %c0_i32 = arith.constant 0 : i32
    %c0_i32_0 = arith.constant 0 : i32
    %c0_i32_1 = arith.constant 0 : i32
    return %c0_i32, %c0_i32_0 : i32, i32
  }
  func.func @transform_31(%arg0: i32) -> (i32, i32, i32) {
    %c0_i32 = arith.constant 0 : i32
    %c0_i32_0 = arith.constant 0 : i32
    %c0_i32_1 = arith.constant 0 : i32
    return %arg0, %c0_i32, %c0_i32_0 : i32, i32, i32
  }
}

</mosaic_0001>

<bundles_post_ra>
// kernel: unet_decoder_forward.1
= control target key start
LH: loop header
LB: loop body
LE: loop exit
PB: predicated region body
PF: predicated region fallthrough
CT: control target
= control target key end

     0   :  { %s10372_s6 = smov 1   ;;  %s10373_s10 = smov 2   ;;  %s14137_s0 = inlined_call_operand.smem [shape: u32[32], index: -1, kind: input, shape index: {}] }
   0x1   :  { %s10444_s5 = sld [smem:[%s14137_s0]]   ;;  %s10374_s14 = smov 3  }
   0x2   :  { %s10449_s9 = sld [smem:[%s14137_s0 + %s10372_s6]]   ;;  %s10375_s18 = smov 4  }
   0x3   :  { %s10454_s13 = sld [smem:[%s14137_s0 + %s10373_s10]]   ;;  %s10376_s22 = smov 5  }
   0x4   :  { %s10459_s17 = sld [smem:[%s14137_s0 + %s10374_s14]]   ;;  %s10377_s26 = smov 6  }
   0x5   :  { %s10464_s21 = sld [smem:[%s14137_s0 + %s10375_s18]]   ;;  %s10378_s30 = smov 7  }
   0x6   :  { %s10469_s25 = sld [smem:[%s14137_s0 + %s10376_s22]]   ;;  %s10379_s4 = smov 8  }
   0x7   :  { %s10474_s29 = sld [smem:[%s14137_s0 + %s10377_s26]]   ;;  %s10380_s10 = smov 9  }
   0x8   :  { %s10479_s3 = sld [smem:[%s14137_s0 + %s10378_s30]]   ;;  %s10381_s15 = smov 10  }
   0x9   :  { %s10484_s8 = sld [smem:[%s14137_s0 + %s10379_s4]]   ;;  %s10382_s20 = smov 11  }
   0xa   :  { %14193 = sst [smem:[#allocation3_spill]] %s10459_s17  ;;  %s10383_s26 = smov 12  }
   0xb   :  { %14194 = sst [smem:[#allocation4_spill]] %s10464_s21  ;;  %s10384_s1 = smov 13  }
   0xc   :  { %s10489_s14 = sld [smem:[%s14137_s0 + %s10380_s10]]   ;;  %s10385_s7 = smov 14  }
   0xd   :  { %s10494_s19 = sld [smem:[%s14137_s0 + %s10381_s15]]   ;;  %s10386_s15 = smov 15  }
   0xe   :  { %14195 = sst [smem:[#allocation5_spill]] %s10479_s3  ;;  %s10387_s22 = smov 16  }
   0xf   :  { %14196 = sst [smem:[#allocation6_spill]] %s10484_s8  ;;  %s10388_s28 = smov 17  }
  0x10   :  { %s10499_s24 = sld [smem:[%s14137_s0 + %s10382_s20]]  }
  0x11   :  { %s10504_s30 = sld [smem:[%s14137_s0 + %s10383_s26]]  }
  0x12   :  { %s10509_s6 = sld [smem:[%s14137_s0 + %s10384_s1]]  }
  0x13   :  { %s10514_s12 = sld [smem:[%s14137_s0 + %s10385_s7]]   ;;  %s10389_s7 = smov 18  }
  0x14   :  { %s10519_s20 = sld [smem:[%s14137_s0 + %s10386_s15]]   ;;  %s10390_s15 = smov 19  }
  0x15   :  { %s10524_s27 = sld [smem:[%s14137_s0 + %s10387_s22]]   ;;  %s10391_s22 = smov 20  }
  0x16   :  { %14197 = sst [smem:[#allocation7_spill]] %s10499_s24 }
  0x17   :  { %14198 = sst [smem:[#allocation8_spill]] %s10504_s30 }
  0x18   :  { %s10529_s4 = sld [smem:[%s14137_s0 + %s10388_s28]]   ;;  %s10392_s28 = smov 21  }
  0x19   :  { %s10534_s30 = sld [smem:[%s14137_s0 + %s10389_s7]]   ;;  %s10393_s7 = smov 22  }
  0x1a   :  { %s10539_s8 = sld [smem:[%s14137_s0 + %s10390_s15]]   ;;  %s10394_s15 = smov 23  }
  0x1b   :  { %s10544_s24 = sld [smem:[%s14137_s0 + %s10391_s22]]   ;;  %s10395_s22 = smov 24  }
  0x1c   :  { %s10549_s21 = sld [smem:[%s14137_s0 + %s10392_s28]]   ;;  %s10396_s28 = smov 25  }
  0x1d   :  { %s10554_s17 = sld [smem:[%s14137_s0 + %s10393_s7]]   ;;  %s10397_s7 = smov 26  }
  0x1e   :  { %s10564_s3 = sld [smem:[%s14137_s0 + %s10395_s22]]   ;;  %s10399_s22 = smov 28  }
  0x20   :  { %14199 = sst [smem:[#allocation9_spill]] %s10539_s8 }
  0x21   :  { %s10559_s8 = sld [smem:[%s14137_s0 + %s10394_s15]]   ;;  %s10398_s15 = smov 27  }
  0x22   :  { %14200 = sst [smem:[#allocation10_spill]] %s10549_s21 }
  0x23   :  { %14201 = sst [smem:[#allocation11_spill]] %s10554_s17 }
  0x24   :  { %14203 = sst [smem:[#allocation13_spill]] %s10564_s3 }
  0x25   :  { %s10569_s21 = sld [smem:[%s14137_s0 + %s10396_s28]]   ;;  %s10400_s28 = smov 29  }
  0x26   :  { %s10574_s17 = sld [smem:[%s14137_s0 + %s10397_s7]]   ;;  %s10401_s7 = smov 30  }
  0x27   :  { %14202 = sst [smem:[#allocation12_spill]] %s10559_s8 }
  0x28   :  { %s10579_s8 = sld [smem:[%s14137_s0 + %s10398_s15]]   ;;  %s10402_s15 = smov 31  }
  0x29   :  { %s10584_s3 = sld [smem:[%s14137_s0 + %s10399_s22]]   ;;  %s10601_s22 = smov 0  }
  0x2b   :  { %14204 = sst [smem:[#allocation14_spill]] %s10569_s21 }
  0x2c   :  { %14205 = sst [smem:[#allocation15_spill]] %s10574_s17 }
  0x2d   :  { %s10589_s21 = sld [smem:[%s14137_s0 + %s10400_s28]]  }
  0x2e   :  { %14206 = sst [smem:[#allocation16_spill]] %s10579_s8 }
  0x2f   :  { %s10594_s17 = sld [smem:[%s14137_s0 + %s10401_s7]]  }
  0x30   :  { %s10599_s8 = sld [smem:[%s14137_s0 + %s10402_s15]]  }
  0x31 LB: > { %s8882_s23 = sadd.s32 4294967295, %s10370_s22   ;;  %p8886_p0 = scmp.ge.s32.totalorder %s10370_s22, 1  ;;  %s10370_s22 = sphi %s10601_s22, %s73_s22  }
  0x32   : > { %p909_p1 = scmp.lt.s32.totalorder %s10370_s22, 3 }
  0x34   : > { %p910_p2 = pnand %p8886_p0, %p909_p1 }
  0x35   : > { %p1009_p3 = scmp.lt.s32.totalorder (!%p910_p2), %s8882_s23, 1  ;;  %s14172_s1 = smov (!%p910_p2), 1  }
  0x36   : > { %913 = sbr.rel (%p910_p2) target bundleno = 4088 (0xff8), region = 144  ;;  %s10405_s2 = smov (!%p910_p2), 6  }
  0x37   : > { %s10406_s7 = smov (!%p910_p2), 122   ;;  %s10407_s10 = smov (!%p910_p2), 127  }
  0x38   : > { %s10408_s11 = smov (!%p910_p2), 5   ;;  %s10409_s15 = smov (!%p910_p2), 7  }
  0x39   : > { %s10410_s16 = smov (!%p910_p2), 123   ;;  %s10411_s18 = smov (!%p910_p2), 121  }
  0x3b   : > { %v9757_v0 = vld [vmem:[%s10469_s25 + $0x38] sm:$0xff]   ;;  %v10611_v1 = vld [vmem:[%s10469_s25 + $0x30] sm:$0xff]   ;;  %vm14153_vm0 = vcmask 52224   ;;  %s14699_s23 = smov (!%p1009_p3, %s8882_s23), 1  ;;  %v10617_v2 = vld [vmem:[%s10469_s25 + $0x28] sm:$0xff]   ;;  %v10403_v3 = vmov 0  }
  0x3c   : > { %9572 = vmatprep.subr.bf16.mxu0 %v9757_v0  ;;  %s9434_s0 = sshll.u32 %s14699_s23, 4  ;;  %1208 = vst.msk [vmem:[#allocation2 + $0x604] sm:$0xf] %vm14153_vm0, %v10403_v3  ;;  %1209 = vst.msk [vmem:[#allocation2 + $0x634] sm:$0xf] %vm14153_vm0, %v10403_v3  ;;  %9751 = vset.pattern.permute.xlu0 %v10403_v3  ;;  %vm14156_vm1 = vcmask 1044424  }
  0x3d   : > { %9573 = vmatpush3.bf16.msra.mxu0 %v9757_v0  ;;  %1210 = vst.msk [vmem:[#allocation2 + $0x664] sm:$0xf] %vm14153_vm0, %v10403_v3  ;;  %1211 = vst.msk [vmem:[#allocation2 + $0x694] sm:$0xf] %vm14153_vm0, %v10403_v3  ;;  %s10768_s26 = scalar_lea.vmem %s10444_s5, %s9434_s0  ;;  %9752 = vset.pattern.permute.xlu1 %v10403_v3  ;;  %s10774_s28 = scalar_lea.vmem %s10449_s9, %s9434_s0  ;;  %v9760_v4 = vld [vmem:[%s10469_s25 + $0x20] sm:$0xff]   ;;  %v9761_v10 = vld [vmem:[%s10469_s25 + $0x18] sm:$0xff]  }
  0x3e   : > { %9574 = vmatprep.subr.bf16.mxu0 %v10611_v1  ;;  %1176 = vst.msk [vmem:[#allocation2 + $0x4] sm:$0xf] %vm14153_vm0, %v10403_v3  ;;  %1177 = vst.msk [vmem:[#allocation2 + $0x34] sm:$0xf] %vm14153_vm0, %v10403_v3  ;;  %v9765_v5 = vld [vmem:[%s10768_s26] sm:$0xff]   ;;  %v9762_v11 = vld [vmem:[%s10469_s25 + $0x10] sm:$0xff]  }
  0x3f   : > { %1178 = vst.msk [vmem:[#allocation2 + $0x64] sm:$0xf] %vm14153_vm0, %v10403_v3  ;;  %1179 = vst.msk [vmem:[#allocation2 + $0x94] sm:$0xf] %vm14153_vm0, %v10403_v3  ;;  %v10925_v6 = vld [vmem:[%s10774_s28] sm:$0xf]  ;;  %9588 = vmatprep.mubr.bf16.mxu0 %v9765_v5 }
  0x40   : > { %1180 = vst.msk [vmem:[#allocation2 + $0xc4] sm:$0xf] %vm14153_vm0, %v10403_v3  ;;  %1181 = vst.msk [vmem:[#allocation2 + $0xf4] sm:$0xf] %vm14153_vm0, %v10403_v3  ;;  %v10928_v7 = vld [vmem:[%s10774_s28 + $0x4] sm:$0xf] }
  0x41   : > { %1182 = vst.msk [vmem:[#allocation2 + $0x124] sm:$0xf] %vm14153_vm0, %v10403_v3  ;;  %1183 = vst.msk [vmem:[#allocation2 + $0x154] sm:$0xf] %vm14153_vm0, %v10403_v3  ;;  %9575 = vmatpush3.bf16.msra.mxu0 %v10611_v1  ;;  %v10931_v8 = vld [vmem:[%s10774_s28 + $0x8] sm:$0xf] }
  0x42   : > { %1184 = vst.msk [vmem:[#allocation2 + $0x184] sm:$0xf] %vm14153_vm0, %v10403_v3  ;;  %1185 = vst.msk [vmem:[#allocation2 + $0x1b4] sm:$0xf] %vm14153_vm0, %v10403_v3  ;;  %9576 = vmatprep.subr.bf16.mxu0 %v10617_v2  ;;  %v10934_v9 = vld [vmem:[%s10774_s28 + $0xc] sm:$0xf]  ;;  %1495 = vrot.lane.b32.xlu0 %v10931_v8, %s14172_s1 }
  0x43   : > { %1186 = vst.msk [vmem:[#allocation2 + $0x1e4] sm:$0xf] %vm14153_vm0, %v10403_v3  ;;  %1187 = vst.msk [vmem:[#allocation2 + $0x214] sm:$0xf] %vm14153_vm0, %v10403_v3  ;;  %1497 = vrot.lane.b32.xlu1 %v10934_v9, %s14172_s1  ;;  %v9763_v12 = vld [vmem:[%s10469_s25 + $0x8] sm:$0xff]   ;;  %v9764_v13 = vld [vmem:[%s10469_s25] sm:$0xff]  }
  0x44   : > { %1188 = vst.msk [vmem:[#allocation2 + $0x244] sm:$0xf] %vm14153_vm0, %v10403_v3  ;;  %1189 = vst.msk [vmem:[#allocation2 + $0x274] sm:$0xf] %vm14153_vm0, %v10403_v3  ;;  %v9766_v14 = vld [vmem:[%s10768_s26 + $0x8] sm:$0xff]   ;;  %vm14154_vm2 = vcmask 7168  }
  0x45   : > { %1190 = vst.msk [vmem:[#allocation2 + $0x2a4] sm:$0xf] %vm14153_vm0, %v10403_v3  ;;  %1191 = vst.msk [vmem:[#allocation2 + $0x2d4] sm:$0xf] %vm14153_vm0, %v10403_v3  ;;  %9577 = vmatpush3.bf16.msra.mxu0 %v10617_v2  ;;  %vm14142_vm3 = vcmask 1043464   ;;  %vm14141_vm4 = vcmask 7172  }
  0x46   : > { %1192 = vst.msk [vmem:[#allocation2 + $0x304] sm:$0xf] %vm14153_vm0, %v10403_v3  ;;  %1193 = vst.msk [vmem:[#allocation2 + $0x334] sm:$0xf] %vm14153_vm0, %v10403_v3  ;;  %9578 = vmatprep.subr.bf16.mxu0 %v9760_v4  ;;  %1391 = vrot.lane.b32.xlu0 %v10931_v8, %s10405_s2  ;;  %vm14147_vm6 = vcmask 48128   ;;  %vm1408_vm7 = vcmask 1043504  }
  0x47   : > { %1194 = vst.msk [vmem:[#allocation2 + $0x364] sm:$0xf] %vm14153_vm0, %v10403_v3  ;;  %1195 = vst.msk [vmem:[#allocation2 + $0x394] sm:$0xf] %vm14153_vm0, %v10403_v3  ;;  %1393 = vrot.lane.b32.xlu1 %v10934_v9, %s10405_s2  ;;  %vm1409_vm8 = vcmask 48132   ;;  %vm14149_vm10 = vcmask 998400  }
  0x48   : > { %1196 = vst.msk [vmem:[#allocation2 + $0x3c4] sm:$0xf] %vm14153_vm0, %v10403_v3  ;;  %1197 = vst.msk [vmem:[#allocation2 + $0x3f4] sm:$0xf] %vm14153_vm0, %v10403_v3  ;;  %vm1680_vm11 = vcmask 1044432   ;;  %vm1681_vm12 = vcmask 998404  }
  0x49   : > { %1198 = vst.msk [vmem:[#allocation2 + $0x424] sm:$0xf] %vm14153_vm0, %v10403_v3  ;;  %1199 = vst.msk [vmem:[#allocation2 + $0x454] sm:$0xf] %vm14153_vm0, %v10403_v3  ;;  %9579 = vmatpush3.bf16.msra.mxu0 %v9760_v4  ;;  %vm14144_vm14 = vcmask 1044472   ;;  %vm14143_vm15 = vcmask 1039364  }
  0x4a   : > { %1200 = vst.msk [vmem:[#allocation2 + $0x484] sm:$0xf] %vm14153_vm0, %v10403_v3  ;;  %1201 = vst.msk [vmem:[#allocation2 + $0x4b4] sm:$0xf] %vm14153_vm0, %v10403_v3  ;;  %9580 = vmatprep.subr.bf16.mxu0 %v9761_v10  ;;  %1491 = vrot.lane.b32.xlu0 %v10925_v6, %s14172_s1  ;;  %s9436_s0 = sshll.u32 %s14699_s23, 3  ;;  %s10414_s28 = smov 118  }
  0x4b   : > { %1202 = vst.msk [vmem:[#allocation2 + $0x4e4] sm:$0xf] %vm14153_vm0, %v10403_v3  ;;  %1203 = vst.msk [vmem:[#allocation2 + $0x514] sm:$0xf] %vm14153_vm0, %v10403_v3  ;;  %1493 = vrot.lane.b32.xlu1 %v10928_v7, %s14172_s1  ;;  %s1023_s26 = scalar_lea.vmem %s10454_s13, %s9436_s0  ;;  %s14371_s0 = sld [smem:[#allocation3_spill]] }
  0x4c   : > { %1204 = vst.msk [vmem:[#allocation2 + $0x544] sm:$0xf] %vm14153_vm0, %v10403_v3  ;;  %1205 = vst.msk [vmem:[#allocation2 + $0x574] sm:$0xf] %vm14153_vm0, %v10403_v3 }
  0x4d   : > { %1206 = vst.msk [vmem:[#allocation2 + $0x5a4] sm:$0xf] %vm14153_vm0, %v10403_v3  ;;  %1207 = vst.msk [vmem:[#allocation2 + $0x5d4] sm:$0xf] %vm14153_vm0, %v10403_v3  ;;  %9581 = vmatpush3.bf16.msra.mxu0 %v9761_v10 }
  0x4e   : > { %1212 = vst.msk [vmem:[#allocation2 + $0x6c4] sm:$0xf] %vm14153_vm0, %v10403_v3  ;;  %1213 = vst.msk [vmem:[#allocation2 + $0x6f4] sm:$0xf] %vm14153_vm0, %v10403_v3  ;;  %9582 = vmatprep.subr.bf16.mxu0 %v9762_v11  ;;  %1387 = vrot.lane.b32.xlu0 %v10925_v6, %s10405_s2 }
  0x4f   : > { %1214 = vst.msk [vmem:[#allocation2 + $0x724] sm:$0xf] %vm14153_vm0, %v10403_v3  ;;  %1215 = vst.msk [vmem:[#allocation2 + $0x754] sm:$0xf] %vm14153_vm0, %v10403_v3  ;;  %1389 = vrot.lane.b32.xlu1 %v10928_v7, %s10405_s2 }
  0x50   : > { %1216 = vst.msk [vmem:[#allocation2 + $0x784] sm:$0xf] %vm14153_vm0, %v10403_v3  ;;  %1217 = vst.msk [vmem:[#allocation2 + $0x7b4] sm:$0xf] %vm14153_vm0, %v10403_v3 }
  0x51   : > { %1218 = vst.msk [vmem:[#allocation2 + $0x7e4] sm:$0xf] %vm14153_vm0, %v10403_v3  ;;  %1219 = vst.msk [vmem:[#allocation2 + $0x814] sm:$0xf] %vm14153_vm0, %v10403_v3  ;;  %9583 = vmatpush3.bf16.msra.mxu0 %v9762_v11 }
  0x52   : > { %1220 = vst.msk [vmem:[#allocation2 + $0x844] sm:$0xf] %vm14153_vm0, %v10403_v3  ;;  %1221 = vst.msk [vmem:[#allocation2 + $0x874] sm:$0xf] %vm14153_vm0, %v10403_v3  ;;  %9584 = vmatprep.subr.bf16.mxu0 %v9763_v12  ;;  %1663 = vrot.lane.b32.xlu0 %v10931_v8, %s10406_s7 }
  0x53   : > { %1222 = vst.msk [vmem:[#allocation2 + $0x8a4] sm:$0xf] %vm14153_vm0, %v10403_v3  ;;  %1223 = vst.msk [vmem:[#allocation2 + $0x8d4] sm:$0xf] %vm14153_vm0, %v10403_v3  ;;  %1665 = vrot.lane.b32.xlu1 %v10934_v9, %s10406_s7 }
  0x54   : > { %1224 = vst.msk [vmem:[#allocation2 + $0x904] sm:$0xf] %vm14153_vm0, %v10403_v3  ;;  %1225 = vst.msk [vmem:[#allocation2 + $0x934] sm:$0xf] %vm14153_vm0, %v10403_v3 }
  0x55   : > { %1226 = vst.msk [vmem:[#allocation2 + $0x964] sm:$0xf] %vm14153_vm0, %v10403_v3  ;;  %1227 = vst.msk [vmem:[#allocation2 + $0x994] sm:$0xf] %vm14153_vm0, %v10403_v3  ;;  %9585 = vmatpush3.bf16.msra.mxu0 %v9763_v12 }
  0x56   : > { %1228 = vst.msk [vmem:[#allocation2 + $0x9c4] sm:$0xf] %vm14153_vm0, %v10403_v3  ;;  %1229 = vst.msk [vmem:[#allocation2 + $0x9f4] sm:$0xf] %vm14153_vm0, %v10403_v3  ;;  %9586 = vmatprep.subr.bf16.mxu0 %v9764_v13  ;;  %1559 = vrot.lane.b32.xlu0 %v10931_v8, %s10407_s10 }
  0x57   : > { %1230 = vst.msk [vmem:[#allocation2 + $0xa24] sm:$0xf] %vm14153_vm0, %v10403_v3  ;;  %1231 = vst.msk [vmem:[#allocation2 + $0xa54] sm:$0xf] %vm14153_vm0, %v10403_v3  ;;  %1561 = vrot.lane.b32.xlu1 %v10934_v9, %s10407_s10 }
  0x58   : > { %1232 = vst.msk [vmem:[#allocation2 + $0xa84] sm:$0xf] %vm14153_vm0, %v10403_v3  ;;  %1233 = vst.msk [vmem:[#allocation2 + $0xab4] sm:$0xf] %vm14153_vm0, %v10403_v3 }
  0x59   : > { %1234 = vst.msk [vmem:[#allocation2 + $0xae4] sm:$0xf] %vm14153_vm0, %v10403_v3  ;;  %1235 = vst.msk [vmem:[#allocation2 + $0xb14] sm:$0xf] %vm14153_vm0, %v10403_v3  ;;  %9587 = vmatpush3.bf16.msra.mxu0 %v9764_v13 }
  0x5a   : > { %1236 = vst.msk [vmem:[#allocation2 + $0xb44] sm:$0xf] %vm14153_vm0, %v10403_v3  ;;  %1237 = vst.msk [vmem:[#allocation2 + $0xb74] sm:$0xf] %vm14153_vm0, %v10403_v3  ;;  %1659 = vrot.lane.b32.xlu0 %v10925_v6, %s10406_s7 }
  0x5b   : > { %1238 = vst.msk [vmem:[#allocation2 + $0xba4] sm:$0xf] %vm14153_vm0, %v10403_v3  ;;  %1239 = vst.msk [vmem:[#allocation2 + $0xbd4] sm:$0xf] %vm14153_vm0, %v10403_v3  ;;  %1661 = vrot.lane.b32.xlu1 %v10928_v7, %s10406_s7 }
  0x5c   : > { %1240 = vst.msk [vmem:[#allocation2 + $0xc04] sm:$0xf] %vm14153_vm0, %v10403_v3  ;;  %1241 = vst.msk [vmem:[#allocation2 + $0xc34] sm:$0xf] %vm14153_vm0, %v10403_v3  ;;  %9589 = vmatmul.mubr.bf16.vlgmr.msra.gmra.mxu0 %v9766_v14 }
  0x5d   : > { %1242 = vst.msk [vmem:[#allocation2 + $0xc64] sm:$0xf] %vm14153_vm0, %v10403_v3  ;;  %1243 = vst.msk [vmem:[#allocation2 + $0xc94] sm:$0xf] %vm14153_vm0, %v10403_v3 }
  0x5e   : > { %1244 = vst.msk [vmem:[#allocation2 + $0xcc4] sm:$0xf] %vm14153_vm0, %v10403_v3  ;;  %1245 = vst.msk [vmem:[#allocation2 + $0xcf4] sm:$0xf] %vm14153_vm0, %v10403_v3  ;;  %1555 = vrot.lane.b32.xlu0 %v10925_v6, %s10407_s10 }
  0x5f   : > { %1246 = vst.msk [vmem:[#allocation2 + $0xd24] sm:$0xf] %vm14153_vm0, %v10403_v3  ;;  %1247 = vst.msk [vmem:[#allocation2 + $0xd54] sm:$0xf] %vm14153_vm0, %v10403_v3  ;;  %1557 = vrot.lane.b32.xlu1 %v10928_v7, %s10407_s10 }
  0x60   : > { %1281 = vst.msk [vmem:[#allocation2 + $0x604] sm:$0xf] %vm14156_vm1, %v10403_v3  ;;  %1282 = vst.msk [vmem:[#allocation2 + $0x634] sm:$0xf] %vm14156_vm1, %v10403_v3 }
  0x61   : > { %1283 = vst.msk [vmem:[#allocation2 + $0x664] sm:$0xf] %vm14156_vm1, %v10403_v3  ;;  %1284 = vst.msk [vmem:[#allocation2 + $0x694] sm:$0xf] %vm14156_vm1, %v10403_v3 }
  0x62   : > { %1249 = vst.msk [vmem:[#allocation2 + $0x4] sm:$0xf] %vm14156_vm1, %v10403_v3  ;;  %1250 = vst.msk [vmem:[#allocation2 + $0x34] sm:$0xf] %vm14156_vm1, %v10403_v3 }
  0x63   : > { %1251 = vst.msk [vmem:[#allocation2 + $0x64] sm:$0xf] %vm14156_vm1, %v10403_v3  ;;  %1252 = vst.msk [vmem:[#allocation2 + $0x94] sm:$0xf] %vm14156_vm1, %v10403_v3 }
  0x64   : > { %1253 = vst.msk [vmem:[#allocation2 + $0xc4] sm:$0xf] %vm14156_vm1, %v10403_v3  ;;  %1254 = vst.msk [vmem:[#allocation2 + $0xf4] sm:$0xf] %vm14156_vm1, %v10403_v3 }
  0x65   : > { %1255 = vst.msk [vmem:[#allocation2 + $0x124] sm:$0xf] %vm14156_vm1, %v10403_v3  ;;  %1256 = vst.msk [vmem:[#allocation2 + $0x154] sm:$0xf] %vm14156_vm1, %v10403_v3 }
  0x66   : > { %1257 = vst.msk [vmem:[#allocation2 + $0x184] sm:$0xf] %vm14156_vm1, %v10403_v3  ;;  %1258 = vst.msk [vmem:[#allocation2 + $0x1b4] sm:$0xf] %vm14156_vm1, %v10403_v3 }
  0x67   : > { %1259 = vst.msk [vmem:[#allocation2 + $0x1e4] sm:$0xf] %vm14156_vm1, %v10403_v3  ;;  %1260 = vst.msk [vmem:[#allocation2 + $0x214] sm:$0xf] %vm14156_vm1, %v10403_v3 }
  0x68   : > { %1261 = vst.msk [vmem:[#allocation2 + $0x244] sm:$0xf] %vm14156_vm1, %v10403_v3  ;;  %1262 = vst.msk [vmem:[#allocation2 + $0x274] sm:$0xf] %vm14156_vm1, %v10403_v3 }
  0x69   : > { %1263 = vst.msk [vmem:[#allocation2 + $0x2a4] sm:$0xf] %vm14156_vm1, %v10403_v3  ;;  %1264 = vst.msk [vmem:[#allocation2 + $0x2d4] sm:$0xf] %vm14156_vm1, %v10403_v3 }
  0x6a   : > { %1265 = vst.msk [vmem:[#allocation2 + $0x304] sm:$0xf] %vm14156_vm1, %v10403_v3  ;;  %1266 = vst.msk [vmem:[#allocation2 + $0x334] sm:$0xf] %vm14156_vm1, %v10403_v3 }
  0x6b   : > { %1267 = vst.msk [vmem:[#allocation2 + $0x364] sm:$0xf] %vm14156_vm1, %v10403_v3  ;;  %1268 = vst.msk [vmem:[#allocation2 + $0x394] sm:$0xf] %vm14156_vm1, %v10403_v3 }
  0x6c   : > { %1269 = vst.msk [vmem:[#allocation2 + $0x3c4] sm:$0xf] %vm14156_vm1, %v10403_v3  ;;  %1270 = vst.msk [vmem:[#allocation2 + $0x3f4] sm:$0xf] %vm14156_vm1, %v10403_v3 }
  0x6d   : > { %1271 = vst.msk [vmem:[#allocation2 + $0x424] sm:$0xf] %vm14156_vm1, %v10403_v3  ;;  %1272 = vst.msk [vmem:[#allocation2 + $0x454] sm:$0xf] %vm14156_vm1, %v10403_v3 }
  0x6e   : > { %1273 = vst.msk [vmem:[#allocation2 + $0x484] sm:$0xf] %vm14156_vm1, %v10403_v3  ;;  %1274 = vst.msk [vmem:[#allocation2 + $0x4b4] sm:$0xf] %vm14156_vm1, %v10403_v3 }
  0x6f   : > { %1275 = vst.msk [vmem:[#allocation2 + $0x4e4] sm:$0xf] %vm14156_vm1, %v10403_v3  ;;  %1276 = vst.msk [vmem:[#allocation2 + $0x514] sm:$0xf] %vm14156_vm1, %v10403_v3 }
  0x70   : > { %1277 = vst.msk [vmem:[#allocation2 + $0x544] sm:$0xf] %vm14156_vm1, %v10403_v3  ;;  %1278 = vst.msk [vmem:[#allocation2 + $0x574] sm:$0xf] %vm14156_vm1, %v10403_v3 }
  0x71   : > { %1279 = vst.msk [vmem:[#allocation2 + $0x5a4] sm:$0xf] %vm14156_vm1, %v10403_v3  ;;  %1280 = vst.msk [vmem:[#allocation2 + $0x5d4] sm:$0xf] %vm14156_vm1, %v10403_v3 }
  0x72   : > { %1285 = vst.msk [vmem:[#allocation2 + $0x6c4] sm:$0xf] %vm14156_vm1, %v10403_v3  ;;  %1286 = vst.msk [vmem:[#allocation2 + $0x6f4] sm:$0xf] %vm14156_vm1, %v10403_v3 }
  0x73   : > { %1287 = vst.msk [vmem:[#allocation2 + $0x724] sm:$0xf] %vm14156_vm1, %v10403_v3  ;;  %1288 = vst.msk [vmem:[#allocation2 + $0x754] sm:$0xf] %vm14156_vm1, %v10403_v3 }
  0x74   : > { %1289 = vst.msk [vmem:[#allocation2 + $0x784] sm:$0xf] %vm14156_vm1, %v10403_v3  ;;  %1290 = vst.msk [vmem:[#allocation2 + $0x7b4] sm:$0xf] %vm14156_vm1, %v10403_v3 }
  0x75   : > { %1291 = vst.msk [vmem:[#allocation2 + $0x7e4] sm:$0xf] %vm14156_vm1, %v10403_v3  ;;  %1292 = vst.msk [vmem:[#allocation2 + $0x814] sm:$0xf] %vm14156_vm1, %v10403_v3 }
  0x76   : > { %1293 = vst.msk [vmem:[#allocation2 + $0x844] sm:$0xf] %vm14156_vm1, %v10403_v3  ;;  %1294 = vst.msk [vmem:[#allocation2 + $0x874] sm:$0xf] %vm14156_vm1, %v10403_v3 }
  0x77   : > { %1295 = vst.msk [vmem:[#allocation2 + $0x8a4] sm:$0xf] %vm14156_vm1, %v10403_v3  ;;  %1296 = vst.msk [vmem:[#allocation2 + $0x8d4] sm:$0xf] %vm14156_vm1, %v10403_v3 }
  0x78   : > { %1297 = vst.msk [vmem:[#allocation2 + $0x904] sm:$0xf] %vm14156_vm1, %v10403_v3  ;;  %1298 = vst.msk [vmem:[#allocation2 + $0x934] sm:$0xf] %vm14156_vm1, %v10403_v3 }
  0x79   : > { %1299 = vst.msk [vmem:[#allocation2 + $0x964] sm:$0xf] %vm14156_vm1, %v10403_v3  ;;  %1300 = vst.msk [vmem:[#allocation2 + $0x994] sm:$0xf] %vm14156_vm1, %v10403_v3 }
  0x7a   : > { %1301 = vst.msk [vmem:[#allocation2 + $0x9c4] sm:$0xf] %vm14156_vm1, %v10403_v3  ;;  %1302 = vst.msk [vmem:[#allocation2 + $0x9f4] sm:$0xf] %vm14156_vm1, %v10403_v3 }
  0x7b   : > { %1303 = vst.msk [vmem:[#allocation2 + $0xa24] sm:$0xf] %vm14156_vm1, %v10403_v3  ;;  %1304 = vst.msk [vmem:[#allocation2 + $0xa54] sm:$0xf] %vm14156_vm1, %v10403_v3 }
  0x7c   : > { %1305 = vst.msk [vmem:[#allocation2 + $0xa84] sm:$0xf] %vm14156_vm1, %v10403_v3  ;;  %1306 = vst.msk [vmem:[#allocation2 + $0xab4] sm:$0xf] %vm14156_vm1, %v10403_v3 }
  0x7d   : > { %1307 = vst.msk [vmem:[#allocation2 + $0xae4] sm:$0xf] %vm14156_vm1, %v10403_v3  ;;  %1308 = vst.msk [vmem:[#allocation2 + $0xb14] sm:$0xf] %vm14156_vm1, %v10403_v3 }
  0x7e   : > { %1309 = vst.msk [vmem:[#allocation2 + $0xb44] sm:$0xf] %vm14156_vm1, %v10403_v3  ;;  %1310 = vst.msk [vmem:[#allocation2 + $0xb74] sm:$0xf] %vm14156_vm1, %v10403_v3 }
  0x7f   : > { %1311 = vst.msk [vmem:[#allocation2 + $0xba4] sm:$0xf] %vm14156_vm1, %v10403_v3  ;;  %1312 = vst.msk [vmem:[#allocation2 + $0xbd4] sm:$0xf] %vm14156_vm1, %v10403_v3 }
  0x80   : > { %1313 = vst.msk [vmem:[#allocation2 + $0xc04] sm:$0xf] %vm14156_vm1, %v10403_v3  ;;  %1314 = vst.msk [vmem:[#allocation2 + $0xc34] sm:$0xf] %vm14156_vm1, %v10403_v3 }
  0x81   : > { %1315 = vst.msk [vmem:[#allocation2 + $0xc64] sm:$0xf] %vm14156_vm1, %v10403_v3  ;;  %1316 = vst.msk [vmem:[#allocation2 + $0xc94] sm:$0xf] %vm14156_vm1, %v10403_v3 }
  0x82   : > { %1317 = vst.msk [vmem:[#allocation2 + $0xcc4] sm:$0xf] %vm14156_vm1, %v10403_v3  ;;  %1318 = vst.msk [vmem:[#allocation2 + $0xcf4] sm:$0xf] %vm14156_vm1, %v10403_v3 }
  0x83   : > { %1319 = vst.msk [vmem:[#allocation2 + $0xd24] sm:$0xf] %vm14156_vm1, %v10403_v3  ;;  %1320 = vst.msk [vmem:[#allocation2 + $0xd54] sm:$0xf] %vm14156_vm1, %v10403_v3 }
  0x84   : > { %1543 = vst [vmem:[#allocation2 + $0x604] sm:$0xf] %v10925_v6  ;;  %1544 = vst [vmem:[#allocation2 + $0x634] sm:$0xf] %v10928_v7 }
  0x85   : > { %1545 = vst [vmem:[#allocation2 + $0x664] sm:$0xf] %v10931_v8  ;;  %1546 = vst [vmem:[#allocation2 + $0x694] sm:$0xf] %v10934_v9 }
  0x86   : > { %vm10980_vm5 = vmor %vm14141_vm4, %vm14142_vm3  ;;  %vm1460_vm4 = vcmask 1043496   ;;  %vm1461_vm3 = vcmask 39940  }
  0x87   : > { %vm10990_vm9 = vmor %vm1409_vm8, %vm1408_vm7  ;;  %vm14148_vm7 = vcmask 1039360  }
  0x88   : > { %vm11024_vm13 = vmor %vm1681_vm12, %vm1680_vm11  ;;  %vm14146_vm11 = vcmask 84992   ;;  %vm14145_vm12 = vcmask 1044392  }
  0x89   : > { %vm11036_vm8 = vmor %vm14143_vm15, %vm14144_vm14  ;;  %vm14150_vm15 = vcmask 39936  }
  0x8a   : > { %vm11206_vm14 = vmor %vm1461_vm3, %vm1460_vm4  ;;  %vm14219_vm4 = vcmask 48128  }
  0xb4   : > { %v1496_v16 = vpop.permute.xlu0 %1495 }
  0xb5   : > { %v1498_v15 = vpop.permute.xlu1 %1497  ;;  %v1501_v19 = vrot.slane %v1496_v16, 4 }
  0xb6   : > { %v1502_v18 = vrot.slane %v1498_v15, 4 }
  0xb7   : > { %v1506_v21 = vsel %vm14154_vm2, %v1501_v19, %v1496_v16 }
  0xb8   : > { %v1507_v20 = vsel %vm14154_vm2, %v1502_v18, %v1498_v15  ;;  %1517 = vst.msk [vmem:[#allocation2 + $0x4e4] sm:$0xff] %vm10980_vm5, %v1506_v21  ;;  %v1392_v23 = vpop.permute.xlu0 %1391 }
  0xb9   : > { %1518 = vst.msk [vmem:[#allocation2 + $0x514] sm:$0xff] %vm10980_vm5, %v1507_v20  ;;  %v1394_v22 = vpop.permute.xlu1 %1393  ;;  %v1397_v26 = vrot.slane %v1392_v23, 4 }
  0xba   : > { %v1398_v25 = vrot.slane %v1394_v22, 4 }
  0xbb   : > { %v1402_v28 = vsel %vm14147_vm6, %v1397_v26, %v1392_v23  ;;  %v9792_v23 = vld [vmem:[%s10509_s6 + $0x4] ss:$20 sps:$4 sm:$0xff]  }
  0xbc   : > { %v1403_v27 = vsel %vm14147_vm6, %v1398_v25, %v1394_v22  ;;  %1413 = vst.msk [vmem:[#allocation2 + $0x1e4] sm:$0xff] %vm10990_vm9, %v1402_v28  ;;  %v1492_v30 = vpop.permute.xlu0 %1491  ;;  %2129 = vmatprep.mubr.bf16.mxu1 %v9792_v23  ;;  %v11161_v25 = vld [vmem:[#allocation2 + $0x664] ss:$48 sps:$4 sm:$0xff]  }
  0xbd   : > { %1414 = vst.msk [vmem:[#allocation2 + $0x214] sm:$0xff] %vm10990_vm9, %v1403_v27  ;;  %v1494_v29 = vpop.permute.xlu1 %1493  ;;  %v1499_v32 = vrot.slane %v1492_v30, 4  ;;  %v11175_v26 = vld [vmem:[#allocation2 + $0x604] ss:$48 sps:$4 sm:$0xff]   ;;  %v9801_v27 = vld [vmem:[%s10509_s6 + $0xc] ss:$20 sps:$4 sm:$0xff]  }
  0xbe   : > { %v1500_v31 = vrot.slane %v1494_v29, 4  ;;  %2659 = vst.msk [vmem:[#allocation2 + $0x664] sm:$0xf] %vm14146_vm11, %v10403_v3  ;;  %2660 = vst.msk [vmem:[#allocation2 + $0x694] sm:$0xf] %vm14146_vm11, %v10403_v3  ;;  %2170 = vmatprep.mubr.bf16.mxu0 %v9801_v27  ;;  %v1840_v28 = vld [vmem:[%s10514_s12] sm:$0xff] }
  0xbf   : > { %v1504_v34 = vsel %vm14154_vm2, %v1499_v32, %v1492_v30  ;;  %2696 = vst.msk [vmem:[#allocation2 + $0x664] sm:$0xf] %vm14145_vm12, %v10403_v3  ;;  %2697 = vst.msk [vmem:[#allocation2 + $0x694] sm:$0xf] %vm14145_vm12, %v10403_v3 }
  0xc0   : > { %v1505_v33 = vsel %vm14154_vm2, %v1500_v31, %v1494_v29  ;;  %1515 = vst.msk [vmem:[#allocation2 + $0x484] sm:$0xff] %vm10980_vm5, %v1504_v34  ;;  %v1388_v36 = vpop.permute.xlu0 %1387  ;;  %v11114_v21 = vld [vmem:[#allocation2 + $0x4e4] ss:$48 sps:$4 sm:$0xff]   ;;  %v1841_v29 = vld [vmem:[%s10514_s12 + $0x8] sm:$0xff] }
  0xc1   : > { %1516 = vst.msk [vmem:[#allocation2 + $0x4b4] sm:$0xff] %vm10980_vm5, %v1505_v33  ;;  %v1390_v35 = vpop.permute.xlu1 %1389  ;;  %v1395_v38 = vrot.slane %v1388_v36, 4 }
  0xc2   : > { %v1396_v37 = vrot.slane %v1390_v35, 4  ;;  %2651 = vst.msk [vmem:[#allocation2 + $0x4e4] sm:$0xf] %vm14146_vm11, %v10403_v3  ;;  %2652 = vst.msk [vmem:[#allocation2 + $0x514] sm:$0xf] %vm14146_vm11, %v10403_v3 }
  0xc3   : > { %v11008_v40 = vld [vmem:[#allocation2 + $0x1e4] sm:$0xf]  ;;  %v1400_v42 = vsel %vm14147_vm6, %v1395_v38, %v1388_v36  ;;  %2688 = vst.msk [vmem:[#allocation2 + $0x4e4] sm:$0xf] %vm14145_vm12, %v10403_v3  ;;  %2689 = vst.msk [vmem:[#allocation2 + $0x514] sm:$0xf] %vm14145_vm12, %v10403_v3 }
  0xc4   : > { %v11006_v39 = vld [vmem:[#allocation2 + $0x214] sm:$0xf]  ;;  %v1401_v41 = vsel %vm14147_vm6, %v1396_v37, %v1390_v35  ;;  %2242 = vst.msk [vmem:[#allocation2 + $0x1e4] sm:$0xf] %vm14153_vm0, %v10403_v3  ;;  %v1664_v44 = vpop.permute.xlu0 %1663 }
  0xc5   : > { %2243 = vst.msk [vmem:[#allocation2 + $0x214] sm:$0xf] %vm14153_vm0, %v10403_v3  ;;  %v1666_v43 = vpop.permute.xlu1 %1665  ;;  %v1669_v47 = vrot.slane %v1664_v44, 4 }
  0xc6   : > { %1412 = vst.msk [vmem:[#allocation2 + $0x1b4] sm:$0xff] %vm10990_vm9, %v1401_v41  ;;  %1411 = vst.msk [vmem:[#allocation2 + $0x184] sm:$0xff] %vm10990_vm9, %v1400_v42  ;;  %v1670_v46 = vrot.slane %v1666_v43, 4 }
  0xc7   : > { %2261 = vst.msk [vmem:[#allocation2 + $0x214] sm:$0xf] %vm14156_vm1, %v10403_v3  ;;  %2260 = vst.msk [vmem:[#allocation2 + $0x1e4] sm:$0xf] %vm14156_vm1, %v10403_v3  ;;  %v1674_v49 = vsel %vm14149_vm10, %v1669_v47, %v1664_v44 }
  0xc8   : > { %v1675_v48 = vsel %vm14149_vm10, %v1670_v46, %v1666_v43  ;;  %1685 = vst.msk [vmem:[#allocation2 + $0xae0] sm:$0xff] %vm11024_vm13, %v1674_v49  ;;  %v1560_v51 = vpop.permute.xlu0 %1559  ;;  %v11116_v22 = vld [vmem:[#allocation2 + $0x484] ss:$48 sps:$4 sm:$0xff]  }
  0xc9   : > { %1686 = vst.msk [vmem:[#allocation2 + $0xb10] sm:$0xff] %vm11024_vm13, %v1675_v48  ;;  %v1562_v50 = vpop.permute.xlu1 %1561  ;;  %v1565_v54 = vrot.slane %v1560_v51, 4 }
  0xca   : > { %v1566_v53 = vrot.slane %v1562_v50, 4  ;;  %2649 = vst.msk [vmem:[#allocation2 + $0x484] sm:$0xf] %vm14146_vm11, %v10403_v3  ;;  %2650 = vst.msk [vmem:[#allocation2 + $0x4b4] sm:$0xf] %vm14146_vm11, %v10403_v3 }
  0xcb   : > { %v1570_v58 = vsel %vm14148_vm7, %v1565_v54, %v1560_v51  ;;  %2686 = vst.msk [vmem:[#allocation2 + $0x484] sm:$0xf] %vm14145_vm12, %v10403_v3  ;;  %2687 = vst.msk [vmem:[#allocation2 + $0x4b4] sm:$0xf] %vm14145_vm12, %v10403_v3 }
  0xcc   : > { %v1571_v57 = vsel %vm14148_vm7, %v1566_v53, %v1562_v50  ;;  %1581 = vst.msk [vmem:[#allocation2 + $0x7e0] sm:$0xff] %vm11036_vm8, %v1570_v58  ;;  %v1660_v60 = vpop.permute.xlu0 %1659 }
  0xcd   : > { %v11040_v55 = vld [vmem:[#allocation2 + $0x1b4] sm:$0xf]  ;;  %v11042_v56 = vld [vmem:[#allocation2 + $0x184] sm:$0xf]  ;;  %1582 = vst.msk [vmem:[#allocation2 + $0x810] sm:$0xff] %vm11036_vm8, %v1571_v57  ;;  %v1662_v59 = vpop.permute.xlu1 %1661  ;;  %v1667_v62 = vrot.slane %v1660_v60, 4 }
  0xce   : > { %2241 = vst.msk [vmem:[#allocation2 + $0x1b4] sm:$0xf] %vm14153_vm0, %v10403_v3  ;;  %2240 = vst.msk [vmem:[#allocation2 + $0x184] sm:$0xf] %vm14153_vm0, %v10403_v3  ;;  %v1668_v61 = vrot.slane %v1662_v59, 4 }
  0xcf   : > { %2259 = vst.msk [vmem:[#allocation2 + $0x1b4] sm:$0xf] %vm14156_vm1, %v10403_v3  ;;  %2258 = vst.msk [vmem:[#allocation2 + $0x184] sm:$0xf] %vm14156_vm1, %v10403_v3  ;;  %v1672_v0 = vsel %vm14149_vm10, %v1667_v62, %v1660_v60 }
  0xd0   : > { %v1673_v63 = vsel %vm14149_vm10, %v1668_v61, %v1662_v59  ;;  %1683 = vst.msk [vmem:[#allocation2 + $0xa80] sm:$0xff] %vm11024_vm13, %v1672_v0  ;;  %v1556_v2 = vpop.permute.xlu0 %1555 }
  0xd1   : > { %1684 = vst.msk [vmem:[#allocation2 + $0xab0] sm:$0xff] %vm11024_vm13, %v1673_v63  ;;  %v1558_v1 = vpop.permute.xlu1 %1557  ;;  %v1563_v5 = vrot.slane %v1556_v2, 4 }
  0xd2   : > { %v1564_v4 = vrot.slane %v1558_v1, 4  ;;  %2657 = vst.msk [vmem:[#allocation2 + $0x604] sm:$0xf] %vm14146_vm11, %v10403_v3  ;;  %2658 = vst.msk [vmem:[#allocation2 + $0x634] sm:$0xf] %vm14146_vm11, %v10403_v3  ;;  %vm1347_vm11 = vcmask 56324  }
  0xd3   : > { %v1568_v11 = vsel %vm14148_vm7, %v1563_v5, %v1556_v2  ;;  %2694 = vst.msk [vmem:[#allocation2 + $0x604] sm:$0xf] %vm14145_vm12, %v10403_v3  ;;  %2695 = vst.msk [vmem:[#allocation2 + $0x634] sm:$0xf] %vm14145_vm12, %v10403_v3  ;;  %vm1346_vm12 = vcmask 1043512  }
  0xd4   : > { %v1569_v10 = vsel %vm14148_vm7, %v1564_v4, %v1558_v1  ;;  %1579 = vst.msk [vmem:[#allocation2 + $0x780] sm:$0xff] %vm11036_vm8, %v1568_v11  ;;  %vm11216_vm3 = vmor %vm1347_vm11, %vm1346_vm12  ;;  %vm1628_vm12 = vcmask 1044440  }
  0xd5   : > { %1580 = vst.msk [vmem:[#allocation2 + $0x7b0] sm:$0xff] %vm11036_vm8, %v1569_v10  ;;  %vm14220_vm11 = vmmov %vm14219_vm4 }
 0x11c   : > { %v9590_v12 = vpop.f32.mrf.mxu0 }
 0x11d   : > { %v9439_v13 = vpack.c.bf16 %v9590_v12, %v9590_v12 }
 0x11e   : > { %v1154_v14 = vpop.f32.mrf.mxu0 }
 0x11f   : > { %1553 = vst [vmem:[#allocation2 + $0x724] sm:$0xf] %v9439_v13  ;;  %v11070_v15 = vpack.c.bf16 %v1154_v14, %v1154_v14  ;;  %1419 = vrot.lane.b32.xlu1 %v9439_v13, %s10405_s2  ;;  %1523 = vrot.lane.b32.xlu0 %v9439_v13, %s14172_s1 }
 0x120   : > { %v9591_v16 = vpop.f32.mrf.mxu0 }
 0x121   : > { %1551 = vst [vmem:[#allocation2 + $0x6c4] sm:$0xf] %v11070_v15  ;;  %v9440_v18 = vpack.c.bf16 %v9591_v16, %v9591_v16 }
 0x122   : > { %v1157_v19 = vpop.f32.mrf.mxu0 }
 0x123   : > { %1554 = vst [vmem:[#allocation2 + $0x754] sm:$0xf] %v9440_v18  ;;  %v11075_v20 = vpack.c.bf16 %v1157_v19, %v1157_v19  ;;  %1445 = vrot.lane.b32.xlu1 %v10934_v9, %s10408_s11  ;;  %1691 = vrot.lane.b32.xlu0 %v9439_v13, %s10406_s7 }
 0x125   : > { %1552 = vst [vmem:[#allocation2 + $0x6f4] sm:$0xf] %v11075_v20 }
 0x127   : > { %1331 = vrot.lane.b32.xlu1 %v10934_v9, %s10409_s15  ;;  %1587 = vrot.lane.b32.xlu0 %v9439_v13, %s10407_s10 }
 0x12b   : > { %1441 = vrot.lane.b32.xlu1 %v10928_v7, %s10408_s11  ;;  %1471 = vrot.lane.b32.xlu0 %v9439_v13, %s10408_s11 }
 0x12f   : > { %1327 = vrot.lane.b32.xlu1 %v10928_v7, %s10409_s15  ;;  %1367 = vrot.lane.b32.xlu0 %v9439_v13, %s10409_s15 }
 0x133   : > { %1519 = vrot.lane.b32.xlu0 %v11070_v15, %s14172_s1  ;;  %1421 = vrot.lane.b32.xlu1 %v9440_v18, %s10405_s2 }
 0x137   : > { %1415 = vrot.lane.b32.xlu0 %v11070_v15, %s10405_s2  ;;  %1693 = vrot.lane.b32.xlu1 %v9440_v18, %s10406_s7 }
 0x13b   : > { %1687 = vrot.lane.b32.xlu0 %v11070_v15, %s10406_s7  ;;  %1589 = vrot.lane.b32.xlu1 %v9440_v18, %s10407_s10 }
 0x13f   : > { %1583 = vrot.lane.b32.xlu0 %v11070_v15, %s10407_s10  ;;  %1473 = vrot.lane.b32.xlu1 %v9440_v18, %s10408_s11 }
 0x143   : > { %1467 = vrot.lane.b32.xlu0 %v11070_v15, %s10408_s11  ;;  %1369 = vrot.lane.b32.xlu1 %v9440_v18, %s10409_s15 }
 0x147   : > { %1363 = vrot.lane.b32.xlu0 %v11070_v15, %s10409_s15  ;;  %1641 = vrot.lane.b32.xlu1 %v9440_v18, %s10410_s16 }
 0x14b   : > { %1744 = vrot.lane.b32.xlu1 %v9440_v18, %s10411_s18  ;;  %1525 = vrot.lane.b32.xlu0 %v9440_v18, %s14172_s1 }
 0x14f   : > { %1443 = vrot.lane.b32.xlu0 %v10931_v8, %s10408_s11  ;;  %1521 = vrot.lane.b32.xlu1 %v11075_v20, %s14172_s1 }
 0x153   : > { %1329 = vrot.lane.b32.xlu0 %v10931_v8, %s10409_s15  ;;  %1417 = vrot.lane.b32.xlu1 %v11075_v20, %s10405_s2 }
 0x157   : > { %1639 = vrot.lane.b32.xlu0 %v9439_v13, %s10410_s16  ;;  %1689 = vrot.lane.b32.xlu1 %v11075_v20, %s10406_s7 }
 0x15b   : > { %1439 = vrot.lane.b32.xlu0 %v10925_v6, %s10408_s11  ;;  %1585 = vrot.lane.b32.xlu1 %v11075_v20, %s10407_s10 }
 0x15f   : > { %1325 = vrot.lane.b32.xlu0 %v10925_v6, %s10409_s15  ;;  %1469 = vrot.lane.b32.xlu1 %v11075_v20, %s10408_s11 }
 0x163   : > { %1635 = vrot.lane.b32.xlu0 %v11070_v15, %s10410_s16  ;;  %1365 = vrot.lane.b32.xlu1 %v11075_v20, %s10409_s15 }
 0x167   : > { %1742 = vrot.lane.b32.xlu0 %v9439_v13, %s10411_s18  ;;  %1613 = vrot.lane.b32.xlu1 %v10934_v9, %s10410_s16 }
 0x16b   : > { %1611 = vrot.lane.b32.xlu0 %v10931_v8, %s10410_s16  ;;  %1637 = vrot.lane.b32.xlu1 %v11075_v20, %s10410_s16 }
 0x16f   : > { %1738 = vrot.lane.b32.xlu0 %v11070_v15, %s10411_s18  ;;  %1609 = vrot.lane.b32.xlu1 %v10928_v7, %s10410_s16 }
 0x173   : > { %1607 = vrot.lane.b32.xlu0 %v10925_v6, %s10410_s16  ;;  %1740 = vrot.lane.b32.xlu1 %v11075_v20, %s10411_s18 }
 0x177   : > { %1715 = vrot.lane.b32.xlu0 %v10931_v8, %s10411_s18  ;;  %1717 = vrot.lane.b32.xlu1 %v10934_v9, %s10411_s18 }
 0x17b   : > { %1711 = vrot.lane.b32.xlu0 %v10925_v6, %s10411_s18  ;;  %1713 = vrot.lane.b32.xlu1 %v10928_v7, %s10411_s18 }
 0x17f   : > { %1844 = vperm.xlu0 %9751, %v1840_v28   ;;  %1849 = vperm.xlu1 %9752, %v1841_v29  }
 0x191   : > { %v1420_v30 = vpop.permute.xlu1 %1419  ;;  %v1524_v31 = vpop.permute.xlu0 %1523 }
 0x192   : > { %v1425_v32 = vrot.slane %v1420_v30, 4  ;;  %v1529_v33 = vrot.slane %v1524_v31, 4 }
 0x194   : > { %v1429_v8 = vsel %vm14147_vm6, %v1425_v32, %v1420_v30  ;;  %v1533_v9 = vsel %vm14154_vm2, %v1529_v33, %v1524_v31  ;;  %vm14151_vm6 = vcmask 56320  }
 0x195   : > { %1437 = vst.msk [vmem:[#allocation2 + $0x2a4] sm:$0xff] %vm10990_vm9, %v1429_v8  ;;  %v1446_v6 = vpop.permute.xlu1 %1445  ;;  %v1692_v7 = vpop.permute.xlu0 %1691 }
 0x196   : > { %1541 = vst.msk [vmem:[#allocation2 + $0x5a4] sm:$0xff] %vm10980_vm5, %v1533_v9  ;;  %v1450_v35 = vrot.slane %v1446_v6, 4  ;;  %v1697_v36 = vrot.slane %v1692_v7, 4 }
 0x198   : > { %v1455_v37 = vsel %vm14150_vm15, %v1450_v35, %v1446_v6  ;;  %v1701_v38 = vsel %vm14149_vm10, %v1697_v36, %v1692_v7 }
 0x199   : > { %1466 = vst.msk [vmem:[#allocation2 + $0x394] sm:$0xff] %vm11206_vm14, %v1455_v37  ;;  %v1332_v41 = vpop.permute.xlu1 %1331  ;;  %v1588_v42 = vpop.permute.xlu0 %1587 }
 0x19a   : > { %1709 = vst.msk [vmem:[#allocation2 + $0xba0] sm:$0xff] %vm11024_vm13, %v1701_v38  ;;  %v1336_v44 = vrot.slane %v1332_v41, 4  ;;  %v1593_v46 = vrot.slane %v1588_v42, 4 }
 0x19c   : > { %v11220_v47 = vld [vmem:[#allocation2 + $0x2a4] sm:$0xf]  ;;  %v1341_v48 = vsel %vm14151_vm6, %v1336_v44, %v1332_v41  ;;  %v1597_v49 = vsel %vm14148_vm7, %v1593_v46, %v1588_v42 }
 0x19d   : > { %2246 = vst.msk [vmem:[#allocation2 + $0x2a4] sm:$0xf] %vm14153_vm0, %v10403_v3  ;;  %v1442_v50 = vpop.permute.xlu1 %1441  ;;  %v1472_v51 = vpop.permute.xlu0 %1471 }
 0x19e   : > { %1352 = vst.msk [vmem:[#allocation2 + $0x94] sm:$0xff] %vm11216_vm3, %v1341_v48  ;;  %v1448_v53 = vrot.slane %v1442_v50, 4  ;;  %v1477_v54 = vrot.slane %v1472_v51, 4 }
 0x19f   : > { %1605 = vst.msk [vmem:[#allocation2 + $0x8a0] sm:$0xff] %vm11036_vm8, %v1597_v49 }
 0x1a0   : > { %2264 = vst.msk [vmem:[#allocation2 + $0x2a4] sm:$0xf] %vm14156_vm1, %v10403_v3  ;;  %v1453_v57 = vsel %vm14150_vm15, %v1448_v53, %v1442_v50  ;;  %v1481_v58 = vsel %vm14150_vm15, %v1477_v54, %v1472_v51 }
 0x1a1   : > { %1464 = vst.msk [vmem:[#allocation2 + $0x334] sm:$0xff] %vm11206_vm14, %v1453_v57  ;;  %1489 = vst.msk [vmem:[#allocation2 + $0x424] sm:$0xff] %vm11206_vm14, %v1481_v58  ;;  %v1328_v59 = vpop.permute.xlu1 %1327  ;;  %v1368_v60 = vpop.permute.xlu0 %1367 }
 0x1a2   : > { %v1334_v61 = vrot.slane %v1328_v59, 4  ;;  %v1373_v62 = vrot.slane %v1368_v60, 4 }
 0x1a4   : > { %v1339_v63 = vsel %vm14151_vm6, %v1334_v61, %v1328_v59  ;;  %v1377_v0 = vsel %vm14151_vm6, %v1373_v62, %v1368_v60 }
 0x1a5   : > { %1350 = vst.msk [vmem:[#allocation2 + $0x34] sm:$0xff] %vm11216_vm3, %v1339_v63  ;;  %1385 = vst.msk [vmem:[#allocation2 + $0x124] sm:$0xff] %vm11216_vm3, %v1377_v0  ;;  %v1520_v1 = vpop.permute.xlu0 %1519  ;;  %v1422_v2 = vpop.permute.xlu1 %1421 }
 0x1a6   : > { %v1527_v4 = vrot.slane %v1520_v1, 4  ;;  %v1426_v5 = vrot.slane %v1422_v2, 4 }
 0x1a8   : > { %v11244_v10 = vld [vmem:[#allocation2 + $0x334] sm:$0xf]  ;;  %v1531_v11 = vsel %vm14154_vm2, %v1527_v4, %v1520_v1  ;;  %v1430_v12 = vsel %vm14219_vm4, %v1426_v5, %v1422_v2  ;;  %vm1629_vm4 = vcmask 1006596  }
 0x1a9   : > { %2249 = vst.msk [vmem:[#allocation2 + $0x334] sm:$0xf] %vm14153_vm0, %v10403_v3  ;;  %v1416_v13 = vpop.permute.xlu0 %1415  ;;  %v1694_v14 = vpop.permute.xlu1 %1693 }
 0x1aa   : > { %1539 = vst.msk [vmem:[#allocation2 + $0x544] sm:$0xff] %vm10980_vm5, %v1531_v11  ;;  %v1423_v15 = vrot.slane %v1416_v13, 4  ;;  %v1698_v16 = vrot.slane %v1694_v14, 4 }
 0x1ab   : > { %1438 = vst.msk [vmem:[#allocation2 + $0x2d4] sm:$0xff] %vm10990_vm9, %v1430_v12 }
 0x1ac   : > { %2267 = vst.msk [vmem:[#allocation2 + $0x334] sm:$0xf] %vm14156_vm1, %v10403_v3  ;;  %v1427_v18 = vsel %vm14220_vm11, %v1423_v15, %v1416_v13  ;;  %v1702_v19 = vsel %vm14149_vm10, %v1698_v16, %v1694_v14  ;;  %vm14152_vm11 = vcmask 1006592  }
 0x1ad   : > { %1435 = vst.msk [vmem:[#allocation2 + $0x244] sm:$0xff] %vm10990_vm9, %v1427_v18  ;;  %v1688_v20 = vpop.permute.xlu0 %1687  ;;  %v1590_v23 = vpop.permute.xlu1 %1589 }
 0x1ae   : > { %1710 = vst.msk [vmem:[#allocation2 + $0xbd0] sm:$0xff] %vm11024_vm13, %v1702_v19  ;;  %v1695_v27 = vrot.slane %v1688_v20, 4  ;;  %v1594_v28 = vrot.slane %v1590_v23, 4 }
 0x1b0   : > { %v1699_v30 = vsel %vm14149_vm10, %v1695_v27, %v1688_v20  ;;  %v1598_v31 = vsel %vm14148_vm7, %v1594_v28, %v1590_v23  ;;  %vm1732_vm10 = vcmask 990212  }
 0x1b1   : > { %1707 = vst.msk [vmem:[#allocation2 + $0xb40] sm:$0xff] %vm11024_vm13, %v1699_v30  ;;  %v1584_v32 = vpop.permute.xlu0 %1583  ;;  %v1474_v33 = vpop.permute.xlu1 %1473 }
 0x1b2   : > { %v11262_v29 = vld [vmem:[#allocation2 + $0x2d4] sm:$0xf]  ;;  %1606 = vst.msk [vmem:[#allocation2 + $0x8d0] sm:$0xff] %vm11036_vm8, %v1598_v31  ;;  %v1591_v8 = vrot.slane %v1584_v32, 4  ;;  %v1478_v9 = vrot.slane %v1474_v33, 4 }
 0x1b3   : > { %2247 = vst.msk [vmem:[#allocation2 + $0x2d4] sm:$0xf] %vm14153_vm0, %v10403_v3 }
 0x1b4   : > { %2265 = vst.msk [vmem:[#allocation2 + $0x2d4] sm:$0xf] %vm14156_vm1, %v10403_v3  ;;  %v11274_v6 = vld [vmem:[#allocation2 + $0x244] sm:$0xf]  ;;  %v1595_v7 = vsel %vm14148_vm7, %v1591_v8, %v1584_v32  ;;  %v1482_v35 = vsel %vm14150_vm15, %v1478_v9, %v1474_v33  ;;  %vm11292_vm7 = vmor %vm1629_vm4, %vm1628_vm12  ;;  %vm14223_vm12 = vcmask 84992   ;;  %v8922_v32 = vcombine.low %v11220_v47, %v11262_v29 }
 0x1b5   : > { %v9767_v36 = vld [vmem:[#allocation2 + $0xba4] ss:$48 sps:$4 sm:$0xff]   ;;  %2244 = vst.msk [vmem:[#allocation2 + $0x244] sm:$0xf] %vm14153_vm0, %v10403_v3  ;;  %v1468_v37 = vpop.permute.xlu0 %1467  ;;  %v1370_v38 = vpop.permute.xlu1 %1369  ;;  %vm14224_vm4 = vmmov %vm14223_vm12 }
 0x1b6   : > { %1603 = vst.msk [vmem:[#allocation2 + $0x840] sm:$0xff] %vm11036_vm8, %v1595_v7  ;;  %v1475_v41 = vrot.slane %v1468_v37, 4  ;;  %v1374_v42 = vrot.slane %v1370_v38, 4  ;;  %9492 = vmatprep.subr.bf16.mxu0 %v9767_v36 }
 0x1b7   : > { %1490 = vst.msk [vmem:[#allocation2 + $0x454] sm:$0xff] %vm11206_vm14, %v1482_v35 }
 0x1b8   : > { %2262 = vst.msk [vmem:[#allocation2 + $0x244] sm:$0xf] %vm14156_vm1, %v10403_v3  ;;  %v1479_v44 = vsel %vm14150_vm15, %v1475_v41, %v1468_v37  ;;  %v1378_v46 = vsel %vm14151_vm6, %v1374_v42, %v1370_v38  ;;  %vm14155_vm15 = vcmask 990208  }
 0x1b9   : > { %v9768_v48 = vld [vmem:[#allocation2 + $0x8a4] ss:$48 sps:$4 sm:$0xff]   ;;  %1487 = vst.msk [vmem:[#allocation2 + $0x3c4] sm:$0xff] %vm11206_vm14, %v1479_v44  ;;  %v1364_v49 = vpop.permute.xlu0 %1363  ;;  %v1642_v50 = vpop.permute.xlu1 %1641 }
 0x1ba   : > { %1386 = vst.msk [vmem:[#allocation2 + $0x154] sm:$0xff] %vm11216_vm3, %v1378_v46  ;;  %v1371_v51 = vrot.slane %v1364_v49, 4  ;;  %v1646_v54 = vrot.slane %v1642_v50, 4  ;;  %9493 = vmatpush3.bf16.msra.mxu0 %v9768_v48 }
 0x1bc   : > { %v1375_v57 = vsel %vm14151_vm6, %v1371_v51, %v1364_v49  ;;  %v1650_v58 = vsel %vm14152_vm11, %v1646_v54, %v1642_v50  ;;  %vm11309_vm6 = vmor %vm1732_vm10, %vm14156_vm1  ;;  %vm14227_vm11 = vcmask 1044392   ;;  %vm14229_vm10 = vcmask 52224  }
 0x1bd   : > { %1383 = vst.msk [vmem:[#allocation2 + $0xc4] sm:$0xff] %vm11216_vm3, %v1375_v57  ;;  %v1745_v60 = vpop.permute.xlu1 %1744  ;;  %v1526_v61 = vpop.permute.xlu0 %1525  ;;  %vm14228_vm0 = vmmov %vm14227_vm11 }
 0x1be   : > { %v11298_v59 = vld [vmem:[#allocation2 + $0x424] ss:$48 sps:$4 sm:$0xff]   ;;  %1658 = vst.msk [vmem:[#allocation2 + $0xa50] sm:$0xff] %vm11292_vm7, %v1650_v58  ;;  %v1749_v63 = vrot.slane %v1745_v60, 4  ;;  %v1530_v0 = vrot.slane %v1526_v61, 4 }
 0x1bf   : > { %2647 = vst.msk [vmem:[#allocation2 + $0x424] sm:$0xf] %vm14223_vm12, %v10403_v3  ;;  %vm14232_vm12 = vcmask 56320  }
 0x1c0   : > { %2648 = vst.msk [vmem:[#allocation2 + $0x454] sm:$0xf] %vm14224_vm4, %v10403_v3  ;;  %v1753_v1 = vsel %vm14155_vm15, %v1749_v63, %v1745_v60  ;;  %v1534_v2 = vsel %vm14154_vm2, %v1530_v0, %v1526_v61  ;;  %vm14233_vm4 = vcmask 48128   ;;  %vm14246_vm15 = vcmask 39936  }
 0x1c1   : > { %2684 = vst.msk [vmem:[#allocation2 + $0x424] sm:$0xf] %vm14227_vm11, %v10403_v3  ;;  %v11319_v4 = vld [vmem:[#allocation2 + $0x124] ss:$48 sps:$4 sm:$0xff]   ;;  %v1444_v5 = vpop.permute.xlu0 %1443  ;;  %v1522_v11 = vpop.permute.xlu1 %1521  ;;  %vm14230_vm11 = vmmov %vm14229_vm10  ;;  %v8920_v63 = vcombine.low %v11008_v40, %v11006_v39 }
 0x1c2   : > { %2685 = vst.msk [vmem:[#allocation2 + $0x454] sm:$0xf] %vm14228_vm0, %v10403_v3  ;;  %v1449_v12 = vrot.slane %v1444_v5, 4  ;;  %v1528_v13 = vrot.slane %v1522_v11, 4  ;;  %vm14231_vm0 = vcmask 39936  }
 0x1c3   : > { %1761 = vst.msk [vmem:[#allocation2 + $0xd50] sm:$0xff] %vm11309_vm6, %v1753_v1 }
 0x1c4   : > { %1542 = vst.msk [vmem:[#allocation2 + $0x5d4] sm:$0xff] %vm10980_vm5, %v1534_v2  ;;  %v1454_v14 = vsel %vm14231_vm0, %v1449_v12, %v1444_v5  ;;  %v1532_v15 = vsel %vm14154_vm2, %v1528_v13, %v1522_v11  ;;  %vm14236_vm0 = vcmask 1044392   ;;  %vm14239_vm2 = vcmask 998400   ;;  %v9776_v13 = vld [vmem:[#allocation2 + $0xae4] ss:$48 sps:$4 sm:$0xff]  }
 0x1c5   : > { %2238 = vst.msk [vmem:[#allocation2 + $0x124] sm:$0xf] %vm14229_vm10, %v10403_v3  ;;  %v1330_v16 = vpop.permute.xlu0 %1329  ;;  %v1418_v18 = vpop.permute.xlu1 %1417  ;;  %vm14234_vm10 = vcmask 84992   ;;  %v8919_v12 = vcombine.low %v11042_v56, %v11040_v55 }
 0x1c6   : > { %2239 = vst.msk [vmem:[#allocation2 + $0x154] sm:$0xf] %vm14230_vm11, %v10403_v3  ;;  %v1335_v19 = vrot.slane %v1330_v16, 4  ;;  %v1424_v20 = vrot.slane %v1418_v18, 4  ;;  %vm14235_vm11 = vmmov %vm14234_vm10 }
 0x1c7   : > { %2256 = vst.msk [vmem:[#allocation2 + $0x124] sm:$0xf] %vm14156_vm1, %v10403_v3  ;;  %2257 = vst.msk [vmem:[#allocation2 + $0x154] sm:$0xf] %vm14156_vm1, %v10403_v3  ;;  %vm14247_vm1 = vcmask 1039360  }
 0x1c8   : > { %1465 = vst.msk [vmem:[#allocation2 + $0x364] sm:$0xff] %vm11206_vm14, %v1454_v14  ;;  %v1340_v23 = vsel %vm14232_vm12, %v1335_v19, %v1330_v16  ;;  %v1428_v27 = vsel %vm14233_vm4, %v1424_v20, %v1418_v18  ;;  %vm14237_vm12 = vmmov %vm14236_vm0  ;;  %vm14238_vm4 = vcmask 1006592   ;;  %v9780_v20 = vld [vmem:[#allocation2 + $0xa84] ss:$48 sps:$4 sm:$0xff]  }
 0x1c9   : > { %1540 = vst.msk [vmem:[#allocation2 + $0x574] sm:$0xff] %vm10980_vm5, %v1532_v15  ;;  %v1640_v30 = vpop.permute.xlu0 %1639  ;;  %v1690_v31 = vpop.permute.xlu1 %1689  ;;  %v9778_v15 = vld [vmem:[#allocation2 + $0x7e4] ss:$48 sps:$4 sm:$0xff]  }
 0x1ca   : > { %1351 = vst.msk [vmem:[#allocation2 + $0x64] sm:$0xff] %vm11216_vm3, %v1340_v23  ;;  %v1645_v33 = vrot.slane %v1640_v30, 4  ;;  %v1696_v8 = vrot.slane %v1690_v31, 4 }
 0x1cb   : > { %v9769_v28 = vld [vmem:[#allocation2 + $0x5a4] ss:$48 sps:$4 sm:$0xff]   ;;  %1436 = vst.msk [vmem:[#allocation2 + $0x274] sm:$0xff] %vm10990_vm9, %v1428_v27 }
 0x1cc   : > { %2655 = vst.msk [vmem:[#allocation2 + $0x5a4] sm:$0xf] %vm14234_vm10, %v10403_v3  ;;  %9470 = vmatprep.subr.bf16.mxu1 %v9769_v28  ;;  %v1649_v9 = vsel %vm14238_vm4, %v1645_v33, %v1640_v30  ;;  %v1700_v7 = vsel %vm14239_vm2, %v1696_v8, %v1690_v31  ;;  %vm14241_vm2 = vmmov %vm14236_vm0 }
 0x1cd   : > { %2656 = vst.msk [vmem:[#allocation2 + $0x5d4] sm:$0xf] %vm14235_vm11, %v10403_v3  ;;  %9471 = vmatpush3.bf16.msra.mxu1 %v8922_v32  ;;  %v1440_v47 = vpop.permute.xlu0 %1439  ;;  %v1586_v29 = vpop.permute.xlu1 %1585  ;;  %vm14240_vm11 = vmmov %vm14234_vm10 }
 0x1ce   : > { %2692 = vst.msk [vmem:[#allocation2 + $0x5a4] sm:$0xf] %vm14236_vm0, %v10403_v3  ;;  %v1447_v37 = vrot.slane %v1440_v47, 4  ;;  %v1592_v38 = vrot.slane %v1586_v29, 4  ;;  %vm14243_vm4 = vmmov %vm14234_vm10 }
 0x1cf   : > { %2693 = vst.msk [vmem:[#allocation2 + $0x5d4] sm:$0xf] %vm14237_vm12, %v10403_v3  ;;  %v11365_v36 = vld [vmem:[#allocation2 + $0x364] ss:$48 sps:$4 sm:$0xff]   ;;  %vm14242_vm12 = vmmov %vm14234_vm10 }
 0x1d0   : > { %v9770_v35 = vld [vmem:[#allocation2 + $0x544] ss:$48 sps:$4 sm:$0xff]   ;;  %1657 = vst.msk [vmem:[#allocation2 + $0xa20] sm:$0xff] %vm11292_vm7, %v1649_v9  ;;  %v1452_v42 = vsel %vm14246_vm15, %v1447_v37, %v1440_v47  ;;  %v1596_v44 = vsel %vm14247_vm1, %v1592_v38, %v1586_v29  ;;  %vm14251_vm15 = vcmask 1044424  }
 0x1d1   : > { %1708 = vst.msk [vmem:[#allocation2 + $0xb70] sm:$0xff] %vm11024_vm13, %v1700_v7  ;;  %9472 = vmatprep.subr.bf16.mxu1 %v9770_v35  ;;  %v11381_v46 = vld [vmem:[#allocation2 + $0x64] ss:$48 sps:$4 sm:$0xff]   ;;  %v1326_v48 = vpop.permute.xlu0 %1325  ;;  %v1470_v49 = vpop.permute.xlu1 %1469 }
 0x1d2   : > { %2653 = vst.msk [vmem:[#allocation2 + $0x544] sm:$0xf] %vm14234_vm10, %v10403_v3  ;;  %vm14244_vm10 = vmmov %vm14236_vm0  ;;  %v1781_v41 = vld [vmem:[#allocation2 + $0x274] sm:$0xf]  ;;  %v1333_v51 = vrot.slane %v1326_v48, 4  ;;  %v1476_v54 = vrot.slane %v1470_v49, 4 }
 0x1d3   : > { %2654 = vst.msk [vmem:[#allocation2 + $0x574] sm:$0xf] %vm14240_vm11, %v10403_v3  ;;  %vm14245_vm11 = vmmov %vm14236_vm0  ;;  %v8921_v50 = vcombine.low %v11274_v6, %v1781_v41  ;;  %v9786_v29 = vld [vmem:[#allocation2 + $0x724] ss:$48 sps:$4 sm:$0xff]  }
 0x1d4   : > { %2690 = vst.msk [vmem:[#allocation2 + $0x544] sm:$0xf] %vm14241_vm2, %v10403_v3  ;;  %vm14248_vm2 = vcmask 52224  }
 0x1d5   : > { %2691 = vst.msk [vmem:[#allocation2 + $0x574] sm:$0xf] %vm14236_vm0, %v10403_v3  ;;  %vm14249_vm0 = vmmov %vm14248_vm2  ;;  %9473 = vmatpush3.bf16.msra.mxu1 %v8921_v50  ;;  %v1636_v60 = vpop.permute.xlu0 %1635  ;;  %v1366_v61 = vpop.permute.xlu1 %1365 }
 0x1d6   : > { %2643 = vst.msk [vmem:[#allocation2 + $0x364] sm:$0xf] %vm14242_vm12, %v10403_v3  ;;  %vm14250_vm1 = vmmov %vm14249_vm0  ;;  %9474 = vmatprep.subr.bf16.mxu1 %v11114_v21  ;;  %v1643_v0 = vrot.slane %v1636_v60, 4  ;;  %v1372_v1 = vrot.slane %v1366_v61, 4 }
 0x1d7   : > { %2644 = vst.msk [vmem:[#allocation2 + $0x394] sm:$0xf] %vm14243_vm4, %v10403_v3  ;;  %vm14252_vm12 = vmmov %vm14251_vm15  ;;  %v9784_v8 = vld [vmem:[#allocation2 + $0xa24] ss:$48 sps:$4 sm:$0xff]  }
 0x1d8   : > { %2680 = vst.msk [vmem:[#allocation2 + $0x364] sm:$0xf] %vm14244_vm10, %v10403_v3  ;;  %vm14253_vm4 = vmmov %vm14252_vm12  ;;  %vm14254_vm10 = vcmask 56320   ;;  %v9772_v58 = vld [vmem:[#allocation2 + $0xb44] ss:$48 sps:$4 sm:$0xff]  }
 0x1d9   : > { %2681 = vst.msk [vmem:[#allocation2 + $0x394] sm:$0xf] %vm14245_vm11, %v10403_v3  ;;  %v1338_v6 = vsel %vm14254_vm10, %v1333_v51, %v1326_v48  ;;  %vm14255_vm11 = vcmask 39936   ;;  %9494 = vmatprep.subr.bf16.mxu0 %v9772_v58  ;;  %9475 = vmatpush3.bf16.msra.mxu1 %v8920_v63  ;;  %v1743_v39 = vpop.permute.xlu0 %1742  ;;  %v1614_v40 = vpop.permute.xlu1 %1613 }
 0x1da   : > { %2245 = vst.msk [vmem:[#allocation2 + $0x274] sm:$0xf] %vm14248_vm2, %v10403_v3  ;;  %v1480_v57 = vsel %vm14255_vm11, %v1476_v54, %v1470_v49  ;;  %vm14256_vm2 = vcmask 1006592   ;;  %9476 = vmatprep.subr.bf16.mxu1 %v11116_v22  ;;  %v1748_v22 = vrot.slane %v1743_v39, 4  ;;  %v1618_v14 = vrot.slane %v1614_v40, 4 }
 0x1db   : > { %1463 = vst.msk [vmem:[#allocation2 + $0x304] sm:$0xff] %vm11206_vm14, %v1452_v42  ;;  %1488 = vst.msk [vmem:[#allocation2 + $0x3f4] sm:$0xff] %vm11206_vm14, %v1480_v57  ;;  %v1647_v21 = vsel %vm14256_vm2, %v1643_v0, %v1636_v60  ;;  %v9789_v54 = vld [vmem:[#allocation2 + $0x6c4] ss:$48 sps:$4 sm:$0xff]  }
 0x1dc   : > { %1604 = vst.msk [vmem:[#allocation2 + $0x870] sm:$0xff] %vm11036_vm8, %v1596_v44 }
 0x1dd   : > { %2234 = vst.msk [vmem:[#allocation2 + $0x64] sm:$0xf] %vm14249_vm0, %v10403_v3  ;;  %vm14257_vm0 = vmmov %vm14254_vm10  ;;  %9477 = vmatpush3.bf16.msra.mxu1 %v8919_v12  ;;  %v1612_v55 = vpop.permute.xlu0 %1611  ;;  %v1638_v56 = vpop.permute.xlu1 %1637  ;;  %vm14261_vm10 = vcmask 84992  }
 0x1de   : > { %2235 = vst.msk [vmem:[#allocation2 + $0x94] sm:$0xf] %vm14250_vm1, %v10403_v3  ;;  %v1376_v5 = vsel %vm14257_vm0, %v1372_v1, %v1366_v61  ;;  %9478 = vmatprep.subr.bf16.mxu1 %v11298_v59  ;;  %vm14262_vm11 = vmmov %vm14261_vm10  ;;  %v1617_v27 = vrot.slane %v1612_v55, 4  ;;  %v1644_v28 = vrot.slane %v1638_v56, 4  ;;  %v9782_v59 = vld [vmem:[#allocation2 + $0x784] ss:$48 sps:$4 sm:$0xff]  }
 0x1df   : > { %2263 = vst.msk [vmem:[#allocation2 + $0x274] sm:$0xf] %vm14251_vm15, %v10403_v3  ;;  %vm14258_vm15 = vmmov %vm14253_vm4  ;;  %v10412_v61 = vmov 0.0  }
 0x1e0   : > { %2252 = vst.msk [vmem:[#allocation2 + $0x64] sm:$0xf] %vm14252_vm12, %v10403_v3  ;;  %vm14259_vm12 = vcmask 990208  }
 0x1e1   : > { %2253 = vst.msk [vmem:[#allocation2 + $0x94] sm:$0xf] %vm14253_vm4, %v10403_v3  ;;  %v1752_v16 = vsel %vm14259_vm12, %v1748_v22, %v1743_v39  ;;  %vm14260_vm4 = vmmov %vm14256_vm2  ;;  %vm14263_vm2 = vcmask 1044392   ;;  %9479 = vmatpush3.bf16.msra.mxu1 %v11319_v4  ;;  %vm14266_vm12 = vcmask 1044424   ;;  %v1739_v4 = vpop.permute.xlu0 %1738  ;;  %v1610_v33 = vpop.permute.xlu1 %1609  ;;  %v9804_v22 = vld [vmem:[%s10509_s6 + $0x10] ss:$20 sps:$4 sm:$0xff]  }
 0x1e2   : > { %1349 = vst.msk [vmem:[#allocation2 + $0x4] sm:$0xff] %vm11216_vm3, %v1338_v6  ;;  %v11409_v2 = vld [vmem:[#allocation2 + $0x304] sm:$0xf]  ;;  %1384 = vst.msk [vmem:[#allocation2 + $0xf4] sm:$0xff] %vm11216_vm3, %v1376_v5  ;;  %v1623_v18 = vsel %vm14260_vm4, %v1618_v14, %v1614_v40  ;;  %v1746_v9 = vrot.slane %v1739_v4, 4  ;;  %v1616_v7 = vrot.slane %v1610_v33, 4 }
 0x1e3   : > { %v9774_v11 = vld [vmem:[#allocation2 + $0x844] ss:$48 sps:$4 sm:$0xff]   ;;  %2248 = vst.msk [vmem:[#allocation2 + $0x304] sm:$0xf] %vm14250_vm1, %v10403_v3  ;;  %vm14264_vm0 = vmmov %vm14263_vm2  ;;  %v8923_v44 = vcombine.low %v11409_v2, %v11244_v10 }
 0x1e4   : > { %1655 = vst.msk [vmem:[#allocation2 + $0x9c0] sm:$0xff] %vm11292_vm7, %v1647_v21  ;;  %9495 = vmatpush3.bf16.msra.mxu0 %v9774_v11  ;;  %v9779_v19 = vld [vmem:[#allocation2 + $0x3c4] ss:$48 sps:$4 sm:$0xff]   ;;  %1634 = vst.msk [vmem:[#allocation2 + $0x990] sm:$0xff] %vm11292_vm7, %v1623_v18 }
 0x1e5   : > { %2266 = vst.msk [vmem:[#allocation2 + $0x304] sm:$0xf] %vm14258_vm15, %v10403_v3  ;;  %9496 = vmatprep.subr.bf16.mxu0 %v9776_v13  ;;  %vm14265_vm15 = vmmov %vm14250_vm1  ;;  %9480 = vmatprep.subr.bf16.mxu1 %v9779_v19  ;;  %v1608_v37 = vpop.permute.xlu0 %1607  ;;  %v1741_v38 = vpop.permute.xlu1 %1740  ;;  %v9790_v10 = vld [vmem:[%s10509_s6] ss:$20 sps:$4 sm:$0xff]  }
 0x1e6   : > { %1760 = vst.msk [vmem:[#allocation2 + $0xd20] sm:$0xff] %vm11309_vm6, %v1752_v16  ;;  %vm14267_vm4 = vmmov %vm14266_vm12  ;;  %v1615_v41 = vrot.slane %v1608_v37, 4  ;;  %v1747_v42 = vrot.slane %v1741_v38, 4 }
 0x1e7   : > { %2645 = vst.msk [vmem:[#allocation2 + $0x3c4] sm:$0xf] %vm14261_vm10, %v10403_v3  ;;  %vm14268_vm10 = vcmask 1006592  }
 0x1e8   : > { %2646 = vst.msk [vmem:[#allocation2 + $0x3f4] sm:$0xf] %vm14262_vm11, %v10403_v3  ;;  %9497 = vmatpush3.bf16.msra.mxu0 %v9778_v15  ;;  %v1622_v30 = vsel %vm14268_vm10, %v1617_v27, %v1612_v55  ;;  %vm14269_vm11 = vmmov %vm14268_vm10 }
 0x1e9   : > { %v9787_v23 = vld [vmem:[#allocation2 + $0x4] ss:$48 sps:$4 sm:$0xff]   ;;  %2682 = vst.msk [vmem:[#allocation2 + $0x3c4] sm:$0xf] %vm14263_vm2, %v10403_v3  ;;  %9498 = vmatprep.subr.bf16.mxu0 %v9780_v20  ;;  %v1648_v31 = vsel %vm14269_vm11, %v1644_v28, %v1638_v56  ;;  %vm14270_vm2 = vmmov %vm14250_vm1  ;;  %v1716_v50 = vpop.permute.xlu0 %1715  ;;  %v1718_v51 = vpop.permute.xlu1 %1717 }
 0x1ea   : > { %2683 = vst.msk [vmem:[#allocation2 + $0x3f4] sm:$0xf] %vm14264_vm0, %v10403_v3  ;;  %v9781_v32 = vld [vmem:[#allocation2 + $0xc4] ss:$48 sps:$4 sm:$0xff]   ;;  %vm14271_vm0 = vmmov %vm14250_vm1  ;;  %v1721_v6 = vrot.slane %v1716_v50, 4  ;;  %v1722_v57 = vrot.slane %v1718_v51, 4 }
 0x1eb   : > { %2232 = vst.msk [vmem:[#allocation2 + $0x4] sm:$0xf] %vm14250_vm1, %v10403_v3  ;;  %vm14272_vm1 = vmmov %vm14267_vm4  ;;  %9481 = vmatpush3.bf16.msra.mxu1 %v9781_v32 }
 0x1ec   : > { %2233 = vst.msk [vmem:[#allocation2 + $0x34] sm:$0xf] %vm14265_vm15, %v10403_v3  ;;  %vm14273_vm15 = vmmov %vm14272_vm1  ;;  %9499 = vmatpush3.bf16.msra.mxu0 %v9782_v59  ;;  %9482 = vmatprep.subr.bf16.mxu1 %v11365_v36 }
 0x1ed   : > { %2250 = vst.msk [vmem:[#allocation2 + $0x4] sm:$0xf] %vm14266_vm12, %v10403_v3  ;;  %9500 = vmatprep.subr.bf16.mxu0 %v9784_v8  ;;  %vm14274_vm12 = vcmask 990208   ;;  %v1712_v63 = vpop.permute.xlu0 %1711  ;;  %v1714_v0 = vpop.permute.xlu1 %1713  ;;  %v9794_v1 = vld [vmem:[#allocation2 + $0xd24] ss:$48 sps:$4 sm:$0xff]  }
 0x1ee   : > { %2251 = vst.msk [vmem:[#allocation2 + $0x34] sm:$0xf] %vm14267_vm4, %v10403_v3  ;;  %v1750_v35 = vsel %vm14274_vm12, %v1746_v9, %v1739_v4  ;;  %vm14275_vm4 = vmmov %vm14268_vm10  ;;  %v1719_v2 = vrot.slane %v1712_v63, 4  ;;  %v1720_v21 = vrot.slane %v1714_v0, 4  ;;  %v8952_v9 = vld [vmem:[%s10489_s14] ss:$0 sm:$0xff] }
 0x1ef   : > { %1633 = vst.msk [vmem:[#allocation2 + $0x960] sm:$0xff] %vm11292_vm7, %v1622_v30  ;;  %1656 = vst.msk [vmem:[#allocation2 + $0x9f0] sm:$0xff] %vm11292_vm7, %v1648_v31  ;;  %v1621_v47 = vsel %vm14275_vm4, %v1616_v7, %v1610_v33  ;;  %9483 = vmatpush3.bf16.msra.mxu1 %v11381_v46 }
 0x1f0   : > { %2236 = vst.msk [vmem:[#allocation2 + $0xc4] sm:$0xf] %vm14270_vm2, %v10403_v3  ;;  %9501 = vmatpush3.bf16.msra.mxu0 %v9786_v29  ;;  %vm14276_vm10 = vmmov %vm14275_vm4  ;;  %9484 = vmatprep.subr.bf16.mxu1 %v8923_v44  ;;  %vm2093_vm4 = vcmask 523264  }
 0x1f1   : > { %2237 = vst.msk [vmem:[#allocation2 + $0xf4] sm:$0xf] %vm14271_vm0, %v10403_v3  ;;  %v1620_v36 = vsel %vm14276_vm10, %v1615_v41, %v1608_v37  ;;  %vm14277_vm11 = vmmov %vm14274_vm12  ;;  %vm14164_vm12 = vmmov 0   ;;  %vm14282_vm10 = vcmask 84992  }
 0x1f2   : > { %2254 = vst.msk [vmem:[#allocation2 + $0xc4] sm:$0xf] %vm14272_vm1, %v10403_v3  ;;  %v1751_v48 = vsel %vm14277_vm11, %v1747_v42, %v1741_v38  ;;  %vm14278_vm2 = vmmov %vm14277_vm11 }
 0x1f3   : > { %2255 = vst.msk [vmem:[#allocation2 + $0xf4] sm:$0xf] %vm14273_vm15, %v10403_v3  ;;  %9485 = vmatpush3.bf16.msra.mxu1 %v9787_v23  ;;  %v1726_v58 = vsel %vm14278_vm2, %v1721_v6, %v1716_v50  ;;  %vm14279_vm0 = vmmov %vm14278_vm2  ;;  %vm14284_vm2 = vcmask 1044392   ;;  %v2393_v50 = vld [vmem:[%s10524_s27] sm:$0xff]  ;;  %v9816_v6 = vld [vmem:[%s10474_s29 + $0x38] sm:$0xff]  }
 0x1f4   : > { %1758 = vst.msk [vmem:[#allocation2 + $0xcc0] sm:$0xff] %vm11309_vm6, %v1750_v35  ;;  %1759 = vst.msk [vmem:[#allocation2 + $0xcf0] sm:$0xff] %vm11309_vm6, %v1751_v48  ;;  %v1727_v60 = vsel %vm14279_vm0, %v1722_v57, %v1718_v51  ;;  %9592 = vmatprep.subr.bf16.mxu1 %v10412_v61  ;;  %v2394_v51 = vld [vmem:[%s10524_s27 + $0x8] sm:$0xff]  ;;  %v9817_v57 = vld [vmem:[%s10474_s29 + $0x30] sm:$0xff]  }
 0x1f5   : > { %1632 = vst.msk [vmem:[#allocation2 + $0x930] sm:$0xff] %vm11292_vm7, %v1621_v47  ;;  %1631 = vst.msk [vmem:[#allocation2 + $0x900] sm:$0xff] %vm11292_vm7, %v1620_v36 }
 0x1f6   : > { %v9788_v49 = vld [vmem:[#allocation2 + $0x9c4] ss:$48 sps:$4 sm:$0xff]   ;;  %1736 = vst.msk [vmem:[#allocation2 + $0xc60] sm:$0xff] %vm11309_vm6, %v1726_v58  ;;  %1737 = vst.msk [vmem:[#allocation2 + $0xc90] sm:$0xff] %vm11309_vm6, %v1727_v60  ;;  %2130 = vmatmul.mubr.bf16.vlgmr.msra.gmra.mxu1 %v9790_v10  ;;  %v9818_v10 = vld [vmem:[%s10474_s29 + $0x28] sm:$0xff]  }
 0x1f7   : > { %9502 = vmatprep.subr.bf16.mxu0 %v9788_v49  ;;  %v9793_v46 = vld [vmem:[#allocation2 + $0x964] ss:$48 sps:$4 sm:$0xff]   ;;  %9593 = vmatpush3.bf16.msra.mxu1 %v9794_v1  ;;  %vm14280_vm1 = vmmov %vm14279_vm0  ;;  %v9820_v58 = vld [vmem:[%s10474_s29 + $0x18] sm:$0xff]  }
 0x1f8   : > { %9503 = vmatpush3.bf16.msra.mxu0 %v9789_v54  ;;  %v1724_v5 = vsel %vm14280_vm1, %v1719_v2, %v1712_v63  ;;  %vm14281_vm15 = vmmov %vm14279_vm0  ;;  %9594 = vmatprep.subr.bf16.mxu1 %v10412_v61  ;;  %v9813_v54 = vld [vmem:[%s10519_s20 + $0x4] ss:$8 sps:$4 sm:$0xff]   ;;  %vm14157_vm1 = vcmask 130048  }
 0x1f9   : > { %9504 = vmatprep.subr.bf16.mxu0 %v9793_v46  ;;  %v1725_v11 = vsel %vm14281_vm15, %v1720_v21, %v1714_v0  ;;  %9600 = vmatprep.mubr.msk.bf16.mxu1 %vm14164_vm12, %v10412_v61  ;;  %1734 = vst.msk [vmem:[#allocation2 + $0xc00] sm:$0xff] %vm11309_vm6, %v1724_v5  ;;  %vm14283_vm11 = vmmov %vm14282_vm10  ;;  %v9819_v46 = vld [vmem:[%s10474_s29 + $0x20] sm:$0xff]   ;;  %vm14286_vm15 = vcmask 998400  }
 0x1fa   : > { %1735 = vst.msk [vmem:[#allocation2 + $0xc30] sm:$0xff] %vm11309_vm6, %v1725_v11  ;;  %v1845_v19 = vpop.permute.xlu0 %1844  ;;  %v1850_v59 = vpop.permute.xlu1 %1849  ;;  %vm14285_vm0 = vmmov %vm14284_vm2 }
 0x1fb   : > { %v9797_v40 = vld [vmem:[#allocation2 + $0xcc4] ss:$48 sps:$4 sm:$0xff]  }
 0x1fc   : > { %9505 = vmatpush3.bf16.msra.mxu0 %v11161_v25  ;;  %v9796_v39 = vld [vmem:[#allocation2 + $0x904] ss:$48 sps:$4 sm:$0xff]   ;;  %v9799_v25 = vld [vmem:[%s10509_s6 + $0x8] ss:$20 sps:$4 sm:$0xff]   ;;  %9595 = vmatpush3.bf16.msra.mxu1 %v9797_v40 }
 0x1fd   : > { %9506 = vmatprep.subr.bf16.mxu0 %v9796_v39  ;;  %9596 = vmatprep.subr.bf16.mxu1 %v10412_v61  ;;  %v9802_v12 = vld [vmem:[#allocation2 + $0xc64] ss:$48 sps:$4 sm:$0xff]  }
 0x200   : > { %9507 = vmatpush3.bf16.msra.mxu0 %v11175_v26  ;;  %9597 = vmatpush3.bf16.msra.mxu1 %v9802_v12 }
 0x201   : > { %9604 = vmatprep.subr.bf16.mxu0 %v10412_v61  ;;  %9598 = vmatprep.subr.bf16.mxu1 %v10412_v61  ;;  %v9803_v13 = vld [vmem:[#allocation2 + $0xc04] ss:$48 sps:$4 sm:$0xff]  }
 0x203   : > { %2171 = vmatmul.mubr.bf16.vlgmr.msra.gmra.mxu0 %v9799_v25 }
 0x204   : > { %9620 = vmatprep.mubr.msk.bf16.mxu0 %vm14164_vm12, %v10412_v61  ;;  %9599 = vmatpush3.bf16.msra.mxu1 %v9803_v13 }
 0x205   : > { %2472 = vmatprep.subr.bf16.mxu1 %v10403_v3  ;;  %9605 = vmatpush3.bf16.msra.mxu0 %v9816_v6 }
 0x206   : > { %9606 = vmatprep.subr.bf16.mxu0 %v10412_v61 }
 0x207   : > { %9601 = vmatmul.mubr.msk.bf16.vlgmr.msra.gmra.mxu1 %vm2093_vm4, %v9804_v22  ;;  %vm14287_vm4 = vmmov %vm14286_vm15 }
 0x208   : > { %8966 = vmatprep.mubr.msk.bf16.mxu1 %vm14157_vm1, %v9813_v54 }
 0x209   : > { %9607 = vmatpush3.bf16.msra.mxu0 %v9817_v57 }
 0x20a   : > { %9608 = vmatprep.subr.bf16.mxu0 %v10412_v61 }
 0x20d   : > { %9609 = vmatpush3.bf16.msra.mxu0 %v9818_v10 }
 0x20e   : > { %9610 = vmatprep.subr.bf16.mxu0 %v10412_v61 }
 0x211   : > { %9611 = vmatpush3.bf16.msra.mxu0 %v9819_v46  ;;  %v9815_v46 = vld [vmem:[%s10519_s20] ss:$8 sps:$4 sm:$0xff]  }
 0x212   : > { %9612 = vmatprep.subr.bf16.mxu0 %v10412_v61 }
 0x215   : > { %9613 = vmatpush3.bf16.msra.mxu0 %v9820_v58  ;;  %v9821_v58 = vld [vmem:[%s10474_s29 + $0x10] sm:$0xff]  }
 0x216   : > { %9614 = vmatprep.subr.bf16.mxu0 %v10412_v61 }
 0x219   : > { %9615 = vmatpush3.bf16.msra.mxu0 %v9821_v58  ;;  %v2964_v58 = vld [vmem:[%s10534_s30] sm:$0xff] }
 0x21a   : > { %9616 = vmatprep.subr.bf16.mxu0 %v10412_v61 }
 0x2b6   : > { %v9486_v26 = vpop.f32.mrf.mxu1 }
 0x2b8   : > { %v9487_v14 = vpop.f32.mrf.mxu1 }
 0x2b9   : > { %v9488_v18 = vadd.f32 %v9487_v14, %v9486_v26 }
 0x2ba   : > { %v9489_v15 = vpop.f32.mrf.mxu1 }
 0x2bb   : > { %v2132_v27 = vadd.f32 %v9488_v18, %v1845_v19 }
 0x2bc   : > { %v9490_v55 = vpop.f32.mrf.mxu1 }
 0x2bd   : > { %v9491_v28 = vadd.f32 %v9490_v55, %v9489_v15 }
 0x2bf   : > { %v2135_v33 = vadd.f32 %v9491_v28, %v1850_v59 }
 0x2c3   : > { %v9508_v16 = vpop.f32.mrf.mxu0 }
 0x2c5   : > { %v9509_v56 = vpop.f32.mrf.mxu0 }
 0x2c6   : > { %v9510_v20 = vadd.f32 %v9509_v56, %v9508_v16 }
 0x2c7   : > { %v9511_v23 = vpop.f32.mrf.mxu0  ;;  %v2213_v4 = vpop.f32.mrf.mxu1 }
 0x2c8   : > { %v2173_v32 = vadd.f32 %v9510_v20, %v2132_v27 }
 0x2c9   : > { %v9512_v30 = vpop.f32.mrf.mxu0  ;;  %v9602_v7 = vpop.f32.mrf.mxu1 }
 0x2ca   : > { %v9513_v31 = vadd.f32 %v9512_v30, %v9511_v23  ;;  %v2214_v8 = vadd.f32 %v2213_v4, %v2173_v32 }
 0x2cb   : > { %v2216_v29 = vpop.f32.mrf.mxu1 }
 0x2cc   : > { %v2220_v35 = vmax.f32 %v2214_v8, 0.0  ;;  %v2176_v47 = vadd.f32 %v9513_v31, %v2135_v33 }
 0x2cd   : > { %v9603_v41 = vpop.f32.mrf.mxu1 }
 0x2ce   : > { %v2229_v37 = vmul.f32 %v8952_v9, %v2220_v35  ;;  %v2217_v38 = vadd.f32 %v2216_v29, %v2176_v47 }
 0x2d0   : > { %v9441_v42 = vpack.c.bf16 %v2229_v37, %v2229_v37  ;;  %v2221_v44 = vmax.f32 %v2217_v38, 0.0 }
 0x2d2   : > { %2323 = vst [vmem:[#allocation2 + $0x184] sm:$0xf] %v9441_v42  ;;  %v2230_v36 = vmul.f32 %v8952_v9, %v2221_v44  ;;  %2349 = vrot.lane.b32.xlu1 %v9441_v42, %s10406_s7 }
 0x2d4   : > { %v9442_v48 = vpack.c.bf16 %v2230_v36, %v2230_v36 }
 0x2d6   : > { %2324 = vst [vmem:[#allocation2 + $0x1b4] sm:$0xf] %v9442_v48  ;;  %2351 = vrot.lane.b32.xlu0 %v9442_v48, %s10406_s7  ;;  %2337 = vrot.lane.b32.xlu1 %v9441_v42, %s10410_s16  ;;  %s10416_s7 = smov 9  }
 0x2da   : > { %2339 = vrot.lane.b32.xlu0 %v9442_v48, %s10410_s16  ;;  %2325 = vrot.lane.b32.xlu1 %v9441_v42, %s10407_s10  ;;  %s10419_s16 = smov 117  }
 0x2dd   : > { %v11511_v49 = vld [vmem:[#allocation2 + $0x184] ss:$48 sps:$4 sm:$0xff]  }
 0x2de   : > { %2327 = vrot.lane.b32.xlu0 %v9442_v48, %s10407_s10  ;;  %2309 = vrot.lane.b32.xlu1 %v9441_v42, %s14172_s1  ;;  %2633 = vst.msk [vmem:[#allocation2 + $0x184] sm:$0xf] %vm14282_vm10, %v10403_v3  ;;  %vm14288_vm10 = vcmask 1006592  }
 0x2df   : > { %2634 = vst.msk [vmem:[#allocation2 + $0x1b4] sm:$0xf] %vm14283_vm11, %v10403_v3  ;;  %vm14289_vm11 = vmmov %vm14288_vm10 }
 0x2e0   : > { %2670 = vst.msk [vmem:[#allocation2 + $0x184] sm:$0xf] %vm14284_vm2, %v10403_v3  ;;  %vm14290_vm2 = vcmask 1039360  }
 0x2e1   : > { %2671 = vst.msk [vmem:[#allocation2 + $0x1b4] sm:$0xf] %vm14285_vm0, %v10403_v3  ;;  %vm14292_vm0 = vcmask 7168  }
 0x2e2   : > { %2311 = vrot.lane.b32.xlu0 %v9442_v48, %s14172_s1  ;;  %2297 = vrot.lane.b32.xlu1 %v9441_v42, %s10408_s11 }
 0x2e6   : > { %2299 = vrot.lane.b32.xlu0 %v9442_v48, %s10408_s11  ;;  %2285 = vrot.lane.b32.xlu1 %v9441_v42, %s10405_s2  ;;  %s10417_s11 = smov 10  }
 0x2ea   : > { %2287 = vrot.lane.b32.xlu0 %v9442_v48, %s10405_s2  ;;  %2273 = vrot.lane.b32.xlu1 %v9441_v42, %s10409_s15  ;;  %s10415_s2 = smov 119  }
 0x2ee   : > { %2275 = vrot.lane.b32.xlu0 %v9442_v48, %s10409_s15  ;;  %2361 = vrot.lane.b32.xlu1 %v9441_v42, %s10411_s18  ;;  %s10418_s15 = smov 11  }
 0x2f2   : > { %2363 = vrot.lane.b32.xlu0 %v9442_v48, %s10411_s18  ;;  %2397 = vperm.xlu1 %9752, %v2393_v50   ;;  %s14369_s18 = sld [smem:[#allocation5_spill]] }
 0x2f6   : > { %2402 = vperm.xlu0 %9751, %v2394_v51  }
 0x344   : > { %v2350_v60 = vpop.permute.xlu1 %2349 }
 0x345   : > { %v2353_v63 = vrot.slane %v2350_v60, 4 }
 0x347   : > { %v2355_v0 = vsel %vm14286_vm15, %v2353_v63, %v2350_v60  ;;  %v9822_v60 = vld [vmem:[%s10474_s29 + $0x8] sm:$0xff]   ;;  %v9823_v63 = vld [vmem:[%s10474_s29] sm:$0xff]  }
 0x348   : > { %2359 = vst.msk [vmem:[#allocation2 + $0x2a0] sm:$0xff] %vm11024_vm13, %v2355_v0  ;;  %v2352_v1 = vpop.permute.xlu0 %2351  ;;  %v2338_v2 = vpop.permute.xlu1 %2337  ;;  %9617 = vmatpush3.bf16.msra.mxu0 %v9822_v60  ;;  %v11676_v0 = vld [vmem:[%s1023_s26] sm:$0xf] }
 0x349   : > { %v2354_v21 = vrot.slane %v2352_v1, 4  ;;  %v2341_v5 = vrot.slane %v2338_v2, 4  ;;  %9618 = vmatprep.subr.bf16.mxu0 %v10412_v61  ;;  %2871 = vrot.lane.b32.xlu1 %v11676_v0, %s10414_s28 }
 0x34b   : > { %v2356_v11 = vsel %vm14287_vm4, %v2354_v21, %v2352_v1  ;;  %v2343_v39 = vsel %vm14288_vm10, %v2341_v5, %v2338_v2  ;;  %vm14295_vm4 = vcmask 1044392   ;;  %v11678_v1 = vld [vmem:[%s1023_s26 + $0x4] sm:$0xf]  ;;  %s9676_s26 = smul.u32 12, %s14699_s23 }
 0x34c   : > { %2360 = vst.msk [vmem:[#allocation2 + $0x2d0] sm:$0xff] %vm11024_vm13, %v2356_v11  ;;  %v2340_v40 = vpop.permute.xlu0 %2339  ;;  %v2326_v25 = vpop.permute.xlu1 %2325  ;;  %vm14291_vm13 = vmmov %vm14290_vm2  ;;  %9619 = vmatpush3.bf16.msra.mxu0 %v9823_v63  ;;  %2873 = vrot.lane.b32.xlu0 %v11678_v1, %s10414_s28 }
 0x34d   : > { %2347 = vst.msk [vmem:[#allocation2 + $0x240] sm:$0xff] %vm11292_vm7, %v2343_v39  ;;  %v2342_v12 = vrot.slane %v2340_v40, 4  ;;  %v2329_v13 = vrot.slane %v2326_v25, 4  ;;  %vm14296_vm10 = vmmov %vm14295_vm4  ;;  %9624 = vmatprep.subr.bf16.mxu0 %v10412_v61  ;;  %2789 = vrot.lane.b32.xlu1 %v11676_v0, %s14172_s1 }
 0x34f   : > { %v2344_v22 = vsel %vm14289_vm11, %v2342_v12, %v2340_v40  ;;  %v2331_v26 = vsel %vm14290_vm2, %v2329_v13, %v2326_v25  ;;  %vm14297_vm11 = vmmov %vm14292_vm0  ;;  %vm14298_vm2 = vcmask 39936  }
 0x350   : > { %2348 = vst.msk [vmem:[#allocation2 + $0x270] sm:$0xff] %vm11292_vm7, %v2344_v22  ;;  %v2328_v14 = vpop.permute.xlu0 %2327  ;;  %v2310_v45 = vpop.permute.xlu1 %2309  ;;  %vm14293_vm7 = vcmask 84992   ;;  %2791 = vrot.lane.b32.xlu0 %v11678_v1, %s14172_s1 }
 0x351   : > { %2335 = vst.msk [vmem:[#allocation2 + $0x1e0] sm:$0xff] %vm11036_vm8, %v2331_v26  ;;  %v2330_v15 = vrot.slane %v2328_v14, 4  ;;  %v2313_v16 = vrot.slane %v2310_v45, 4  ;;  %vm14294_vm15 = vmmov %vm14293_vm7  ;;  %2843 = vrot.lane.b32.xlu1 %v11676_v0, %s10415_s2 }
 0x353   : > { %v2332_v18 = vsel %vm14291_vm13, %v2330_v15, %v2328_v14  ;;  %v2315_v19 = vsel %vm14292_vm0, %v2313_v16, %v2310_v45  ;;  %v9805_v55 = vld [vmem:[#allocation2 + $0x2a4] ss:$48 sps:$4 sm:$0xff]   ;;  %vm14299_vm13 = vmmov %vm14293_vm7 }
 0x354   : > { %2336 = vst.msk [vmem:[#allocation2 + $0x210] sm:$0xff] %vm11036_vm8, %v2332_v18  ;;  %v2312_v53 = vpop.permute.xlu0 %2311  ;;  %v2298_v56 = vpop.permute.xlu1 %2297  ;;  %2473 = vmatpush1.bf16.msra.mxu1 %v9805_v55  ;;  %vm14300_vm0 = vmmov %vm14293_vm7  ;;  %2845 = vrot.lane.b32.xlu0 %v11678_v1, %s10415_s2 }
 0x355   : > { %2319 = vst.msk [vmem:[#allocation2 + $0x124] sm:$0xff] %vm10980_vm5, %v2315_v19  ;;  %v2314_v20 = vrot.slane %v2312_v53, 4  ;;  %v2301_v23 = vrot.slane %v2298_v56, 4  ;;  %2474 = vmatprep.subr.bf16.mxu1 %v10403_v3  ;;  %2761 = vrot.lane.b32.xlu1 %v11676_v0, %s10416_s7 }
 0x356   : > { %2639 = vst.msk [vmem:[#allocation2 + $0x2a4] sm:$0xf] %vm14293_vm7, %v10403_v3  ;;  %vm14301_vm7 = vmmov %vm14295_vm4 }
 0x357   : > { %2640 = vst.msk [vmem:[#allocation2 + $0x2d4] sm:$0xf] %vm14294_vm15, %v10403_v3  ;;  %v2316_v27 = vsel %vm14297_vm11, %v2314_v20, %v2312_v53  ;;  %v2303_v28 = vsel %vm14298_vm2, %v2301_v23, %v2298_v56  ;;  %v9806_v59 = vld [vmem:[#allocation2 + $0x244] ss:$48 sps:$4 sm:$0xff]   ;;  %vm14302_vm15 = vmmov %vm14295_vm4 }
 0x358   : > { %2676 = vst.msk [vmem:[#allocation2 + $0x2a4] sm:$0xf] %vm14295_vm4, %v10403_v3  ;;  %v2300_v30 = vpop.permute.xlu0 %2299  ;;  %v2286_v31 = vpop.permute.xlu1 %2285  ;;  %2475 = vmatpush1.bf16.msra.mxu1 %v9806_v59  ;;  %vm14303_vm4 = vmmov %vm14298_vm2  ;;  %2763 = vrot.lane.b32.xlu0 %v11678_v1, %s10416_s7 }
 0x359   : > { %2677 = vst.msk [vmem:[#allocation2 + $0x2d4] sm:$0xf] %vm14296_vm10, %v10403_v3  ;;  %v2302_v32 = vrot.slane %v2300_v30, 4  ;;  %v2289_v4 = vrot.slane %v2286_v31, 4  ;;  %2476 = vmatprep.subr.bf16.mxu1 %v10403_v3  ;;  %vm14304_vm10 = vcmask 48128   ;;  %vm14305_vm11 = vmmov %vm14300_vm0  ;;  %2819 = vrot.lane.b32.xlu1 %v11676_v0, %s10407_s10 }
 0x35a   : > { %2320 = vst.msk [vmem:[#allocation2 + $0x154] sm:$0xff] %vm10980_vm5, %v2316_v27  ;;  %vm14306_vm2 = vmmov %vm14300_vm0 }
 0x35b   : > { %2307 = vst.msk [vmem:[#allocation2 + $0xc4] sm:$0xff] %vm11206_vm14, %v2303_v28  ;;  %v2304_v33 = vsel %vm14303_vm4, %v2302_v32, %v2300_v30  ;;  %v2291_v8 = vsel %vm14304_vm10, %v2289_v4, %v2286_v31  ;;  %v9807_v9 = vld [vmem:[#allocation2 + $0x1e4] ss:$48 sps:$4 sm:$0xff]   ;;  %vm14312_vm4 = vmmov %vm14306_vm2 }
 0x35c   : > { %2637 = vst.msk [vmem:[#allocation2 + $0x244] sm:$0xf] %vm14299_vm13, %v10403_v3  ;;  %v2288_v7 = vpop.permute.xlu0 %2287  ;;  %v2274_v35 = vpop.permute.xlu1 %2273  ;;  %2477 = vmatpush1.bf16.msra.mxu1 %v9807_v9  ;;  %vm14307_vm13 = vmmov %vm14301_vm7  ;;  %2821 = vrot.lane.b32.xlu0 %v11678_v1, %s10407_s10 }
 0x35d   : > { %2638 = vst.msk [vmem:[#allocation2 + $0x274] sm:$0xf] %vm14300_vm0, %v10403_v3  ;;  %v2290_v47 = vrot.slane %v2288_v7, 4  ;;  %v2277_v29 = vrot.slane %v2274_v35, 4  ;;  %vm14308_vm0 = vmmov %vm14301_vm7  ;;  %2478 = vmatprep.subr.bf16.mxu1 %v10403_v3 }
 0x35e   : > { %2674 = vst.msk [vmem:[#allocation2 + $0x244] sm:$0xf] %vm14301_vm7, %v10403_v3  ;;  %vm14310_vm7 = vcmask 56320  }
 0x35f   : > { %2675 = vst.msk [vmem:[#allocation2 + $0x274] sm:$0xf] %vm14302_vm15, %v10403_v3  ;;  %v2279_v37 = vsel %vm14310_vm7, %v2277_v29, %v2274_v35  ;;  %vm14311_vm15 = vmmov %vm14306_vm2 }
 0x360   : > { %2308 = vst.msk [vmem:[#allocation2 + $0xf4] sm:$0xff] %vm11206_vm14, %v2304_v33  ;;  %vm14309_vm14 = vmmov %vm14304_vm10  ;;  %v2276_v41 = vpop.permute.xlu0 %2275  ;;  %v2362_v42 = vpop.permute.xlu1 %2361  ;;  %2479 = vmatpush1.bf16.msra.mxu1 %v11511_v49 }
 0x361   : > { %2295 = vst.msk [vmem:[#allocation2 + $0x64] sm:$0xff] %vm10990_vm9, %v2291_v8  ;;  %v2292_v34 = vsel %vm14309_vm14, %v2290_v47, %v2288_v7  ;;  %v9809_v38 = vld [vmem:[#allocation2 + $0x124] ss:$48 sps:$4 sm:$0xff]   ;;  %v2278_v44 = vrot.slane %v2276_v41, 4  ;;  %v2365_v36 = vrot.slane %v2362_v42, 4  ;;  %vm14313_vm10 = vmmov %vm14308_vm0  ;;  %2480 = vmatprep.subr.bf16.mxu1 %v10403_v3 }
 0x362   : > { %2635 = vst.msk [vmem:[#allocation2 + $0x1e4] sm:$0xf] %vm14305_vm11, %v10403_v3  ;;  %vm14315_vm11 = vmmov %vm14310_vm7 }
 0x363   : > { %2636 = vst.msk [vmem:[#allocation2 + $0x214] sm:$0xf] %vm14306_vm2, %v10403_v3  ;;  %v2280_v24 = vsel %vm14315_vm11, %v2278_v44, %v2276_v41  ;;  %vm14316_vm2 = vcmask 990208  }
 0x364   : > { %2672 = vst.msk [vmem:[#allocation2 + $0x1e4] sm:$0xf] %vm14307_vm13, %v10403_v3  ;;  %v2367_v48 = vsel %vm14316_vm2, %v2365_v36, %v2362_v42  ;;  %v2364_v49 = vpop.permute.xlu0 %2363  ;;  %vm14317_vm13 = vmmov %vm14312_vm4  ;;  %2481 = vmatpush1.bf16.msra.mxu1 %v9809_v38 }
 0x365   : > { %2673 = vst.msk [vmem:[#allocation2 + $0x214] sm:$0xf] %vm14308_vm0, %v10403_v3  ;;  %v2366_v51 = vrot.slane %v2364_v49, 4  ;;  %2482 = vmatprep.subr.bf16.mxu1 %v10403_v3 }
 0x366   : > { %2296 = vst.msk [vmem:[#allocation2 + $0x94] sm:$0xff] %vm10990_vm9, %v2292_v34  ;;  %vm14314_vm9 = vmmov %vm14308_vm0 }
 0x367   : > { %2283 = vst.msk [vmem:[#allocation2 + $0x4] sm:$0xff] %vm11216_vm3, %v2279_v37  ;;  %v9810_v50 = vld [vmem:[#allocation2 + $0xc4] ss:$48 sps:$4 sm:$0xff]   ;;  %2284 = vst.msk [vmem:[#allocation2 + $0x34] sm:$0xff] %vm11216_vm3, %v2280_v24 }
 0x368   : > { %2631 = vst.msk [vmem:[#allocation2 + $0x124] sm:$0xf] %vm14311_vm15, %v10403_v3  ;;  %vm14318_vm0 = vmmov %vm14312_vm4  ;;  %2483 = vmatpush1.bf16.msra.mxu1 %v9810_v50 }
 0x369   : > { %2632 = vst.msk [vmem:[#allocation2 + $0x154] sm:$0xf] %vm14312_vm4, %v10403_v3  ;;  %vm14319_vm14 = vmmov %vm14314_vm9  ;;  %2484 = vmatprep.subr.bf16.mxu1 %v10403_v3 }
 0x36a   : > { %2668 = vst.msk [vmem:[#allocation2 + $0x124] sm:$0xf] %vm14313_vm10, %v10403_v3  ;;  %vm14320_vm7 = vmmov %vm14314_vm9 }
 0x36b   : > { %2669 = vst.msk [vmem:[#allocation2 + $0x154] sm:$0xf] %vm14314_vm9, %v10403_v3  ;;  %vm14321_vm3 = vmmov %vm14316_vm2 }
 0x36c   : > { %2371 = vst.msk [vmem:[#allocation2 + $0x300] sm:$0xff] %vm11309_vm6, %v2367_v48  ;;  %v2368_v43 = vsel %vm14321_vm3, %v2366_v51, %v2364_v49  ;;  %vm14322_vm15 = vmmov %vm14318_vm0 }
 0x36d   : > { %2629 = vst.msk [vmem:[#allocation2 + $0xc4] sm:$0xf] %vm14317_vm13, %v10403_v3  ;;  %v9811_v54 = vld [vmem:[#allocation2 + $0x64] ss:$48 sps:$4 sm:$0xff]   ;;  %vm14323_vm4 = vmmov %vm14318_vm0  ;;  %v2398_v21 = vpop.permute.xlu1 %2397 }
 0x36e   : > { %2630 = vst.msk [vmem:[#allocation2 + $0xf4] sm:$0xf] %vm14318_vm0, %v10403_v3  ;;  %vm14324_vm10 = vmmov %vm14320_vm7  ;;  %v9812_v57 = vld [vmem:[#allocation2 + $0x4] ss:$48 sps:$4 sm:$0xff]   ;;  %2485 = vmatpush1.bf16.msra.mxu1 %v9811_v54 }
 0x36f   : > { %2666 = vst.msk [vmem:[#allocation2 + $0xc4] sm:$0xf] %vm14319_vm14, %v10403_v3  ;;  %vm14325_vm9 = vmmov %vm14320_vm7  ;;  %2486 = vmatprep.subr.bf16.mxu1 %v10403_v3 }
 0x370   : > { %2667 = vst.msk [vmem:[#allocation2 + $0xf4] sm:$0xf] %vm14320_vm7, %v10403_v3  ;;  %vm14327_vm11 = vmmov %vm14318_vm0 }
 0x371   : > { %2372 = vst.msk [vmem:[#allocation2 + $0x330] sm:$0xff] %vm11309_vm6, %v2368_v43  ;;  %vm14326_vm6 = vmmov %vm14318_vm0  ;;  %v2403_v39 = vpop.permute.xlu0 %2402 }
 0x372   : > { %2627 = vst.msk [vmem:[#allocation2 + $0x64] sm:$0xf] %vm14322_vm15, %v10403_v3  ;;  %vm14328_vm2 = vmmov %vm14318_vm0  ;;  %2487 = vmatpush1.bf16.msra.mxu1 %v9812_v57  ;;  %vm14161_vm15 = vcmask 965632  }
 0x373   : > { %2628 = vst.msk [vmem:[#allocation2 + $0x94] sm:$0xf] %vm14323_vm4, %v10403_v3  ;;  %v2391_v6 = vld [vmem:[#allocation2 + $0x304] sm:$0xf]  ;;  %vm14329_vm13 = vmmov %vm14320_vm7  ;;  %2502 = vmatprep.subr.bf16.mxu1 %v10403_v3  ;;  %vm2882_vm4 = vcmask 1044400  }
 0x374   : > { %2664 = vst.msk [vmem:[#allocation2 + $0x64] sm:$0xf] %vm14324_vm10, %v10403_v3  ;;  %vm14330_vm0 = vmmov %vm14320_vm7  ;;  %vm2883_vm10 = vcmask 965636  }
 0x375   : > { %2665 = vst.msk [vmem:[#allocation2 + $0x94] sm:$0xf] %vm14325_vm9, %v10403_v3  ;;  %vm14331_vm14 = vmmov %vm14330_vm0 }
 0x376   : > { %2641 = vst.msk [vmem:[#allocation2 + $0x304] sm:$0xf] %vm14326_vm6, %v10403_v3  ;;  %vm14332_vm7 = vmmov %vm14328_vm2  ;;  %vm2854_vm6 = vcmask 1044408  }
 0x377   : > { %2625 = vst.msk [vmem:[#allocation2 + $0x4] sm:$0xf] %vm14327_vm11, %v10403_v3  ;;  %vm14333_vm3 = vmmov %vm14330_vm0  ;;  %vm2855_vm11 = vcmask 973828  }
 0x378   : > { %2626 = vst.msk [vmem:[#allocation2 + $0x34] sm:$0xf] %vm14328_vm2, %v10403_v3  ;;  %v2392_v62 = vld [vmem:[#allocation2 + $0x334] sm:$0xf]  ;;  %vm11704_vm9 = vmor %vm2883_vm10, %vm2882_vm4  ;;  %vm14336_vm2 = vcmask 7168   ;;  %vm14158_vm4 = vcmask 72704  }
 0x379   : > { %2678 = vst.msk [vmem:[#allocation2 + $0x304] sm:$0xf] %vm14329_vm13, %v10403_v3  ;;  %v8965_v10 = vcombine.low %v2391_v6, %v2392_v62  ;;  %vm14337_vm13 = vmmov %vm14336_vm2 }
 0x37a   : > { %2662 = vst.msk [vmem:[#allocation2 + $0x4] sm:$0xf] %vm14330_vm0, %v10403_v3  ;;  %2813 = vst [vmem:[#allocation2 + $0x304] sm:$0xf] %v11676_v0  ;;  %vm14162_vm0 = vcmask 973824  }
 0x37b   : > { %2663 = vst.msk [vmem:[#allocation2 + $0x34] sm:$0xf] %vm14331_vm14, %v10403_v3  ;;  %2503 = vmatpush2.bf16.msra.mxu1 %v8965_v10  ;;  %vm11720_vm14 = vmor %vm2855_vm11, %vm2854_vm6  ;;  %vm14342_vm6 = vcmask 1039360   ;;  %v11790_v10 = vld [vmem:[%s10529_s4] sm:$0xff] }
 0x37c   : > { %2642 = vst.msk [vmem:[#allocation2 + $0x334] sm:$0xf] %vm14332_vm7, %v10403_v3  ;;  %vm2772_vm7 = vcmask 1043528   ;;  %vm14343_vm11 = vmmov %vm14342_vm6 }
 0x37d   : > { %2679 = vst.msk [vmem:[#allocation2 + $0x334] sm:$0xf] %vm14333_vm3, %v10403_v3  ;;  %vm2773_vm3 = vcmask 72708  }
 0x37e   : > { %2505 = vmatmul.mubr.bf16.vlgmr.msra.gmra.mxu1 %v9815_v46  ;;  %2814 = vst [vmem:[#allocation2 + $0x334] sm:$0xf] %v11678_v1  ;;  %vm11730_vm10 = vmor %vm2773_vm3, %vm2772_vm7  ;;  %vm14160_vm7 = vcmask 150528   ;;  %v8978_v46 = vcombine.high %v11790_v10, %v11790_v10  ;;  %vm14346_vm3 = vcmask 7168  }
 0x380   : > { %3124 = vmatprep.mubr.bf16.mxu1 %v8978_v46 }
 0x385   : > { %v11780_v62 = vld [vmem:[#allocation2 + $0x304] ss:$48 sps:$4 sm:$0xff]  }
 0x386   : > { %3608 = vst.msk [vmem:[#allocation2 + $0x304] sm:$0xf] %vm14160_vm7, %v10403_v3  ;;  %3609 = vst.msk [vmem:[#allocation2 + $0x334] sm:$0xf] %vm14160_vm7, %v10403_v3 }
 0x3bb   : > { %v2872_v14 = vpop.permute.xlu1 %2871 }
 0x3bc   : > { %v2875_v16 = vrot.slane %v2872_v14, 4 }
 0x3be   : > { %v2874_v45 = vpop.permute.xlu0 %2873  ;;  %v2878_v19 = vsel %vm14161_vm15, %v2875_v16, %v2872_v14 }
 0x3bf   : > { %v2876_v18 = vrot.slane %v2874_v45, 4  ;;  %2885 = vst.msk [vmem:[#allocation2 + $0x540] sm:$0xff] %vm11704_vm9, %v2878_v19  ;;  %v2790_v53 = vpop.permute.xlu1 %2789 }
 0x3c0   : > { %v2793_v20 = vrot.slane %v2790_v53, 4 }
 0x3c1   : > { %v2879_v55 = vsel %vm14161_vm15, %v2876_v18, %v2874_v45 }
 0x3c2   : > { %2886 = vst.msk [vmem:[#allocation2 + $0x570] sm:$0xff] %vm11704_vm9, %v2879_v55  ;;  %v2792_v56 = vpop.permute.xlu0 %2791  ;;  %v2795_v27 = vsel %vm14336_vm2, %v2793_v20, %v2790_v53  ;;  %vm14344_vm2 = vcmask 84992  }
 0x3c3   : > { %v2794_v23 = vrot.slane %v2792_v56, 4  ;;  %2799 = vst.msk [vmem:[#allocation2 + $0x244] sm:$0xff] %vm10980_vm5, %v2795_v27  ;;  %v2844_v59 = vpop.permute.xlu1 %2843 }
 0x3c4   : > { %v2847_v32 = vrot.slane %v2844_v59, 4 }
 0x3c5   : > { %v2796_v28 = vsel %vm14337_vm13, %v2794_v23, %v2792_v56  ;;  %vm14345_vm13 = vcmask 1044392  }
 0x3c6   : > { %2800 = vst.msk [vmem:[#allocation2 + $0x274] sm:$0xff] %vm10980_vm5, %v2796_v28  ;;  %v2846_v30 = vpop.permute.xlu0 %2845  ;;  %v2850_v33 = vsel %vm14162_vm0, %v2847_v32, %v2844_v59 }
 0x3c7   : > { %v2848_v4 = vrot.slane %v2846_v30, 4  ;;  %2857 = vst.msk [vmem:[#allocation2 + $0x480] sm:$0xff] %vm11720_vm14, %v2850_v33  ;;  %v2762_v9 = vpop.permute.xlu1 %2761 }
 0x3c8   : > { %v2765_v47 = vrot.slane %v2762_v9, 4 }
 0x3c9   : > { %v2851_v8 = vsel %vm14162_vm0, %v2848_v4, %v2846_v30  ;;  %v9826_v33 = vld [vmem:[#allocation2 + $0x544] ss:$48 sps:$4 sm:$0xff]  }
 0x3ca   : > { %2858 = vst.msk [vmem:[#allocation2 + $0x4b0] sm:$0xff] %vm11720_vm14, %v2851_v8  ;;  %v2764_v7 = vpop.permute.xlu0 %2763  ;;  %v2768_v34 = vsel %vm14158_vm4, %v2765_v47, %v2762_v9 }
 0x3cb   : > { %v2766_v29 = vrot.slane %v2764_v7, 4  ;;  %2775 = vst.msk [vmem:[#allocation2 + $0x184] sm:$0xff] %vm11730_vm10, %v2768_v34  ;;  %v2820_v38 = vpop.permute.xlu1 %2819 }
 0x3cc   : > { %v2823_v42 = vrot.slane %v2820_v38, 4 }
 0x3cd   : > { %v2769_v37 = vsel %vm14158_vm4, %v2766_v29, %v2764_v7  ;;  %v11761_v57 = vld [vmem:[#allocation2 + $0x244] ss:$48 sps:$4 sm:$0xff]  }
 0x3ce   : > { %2776 = vst.msk [vmem:[#allocation2 + $0x1b4] sm:$0xff] %vm11730_vm10, %v2769_v37  ;;  %v2822_v41 = vpop.permute.xlu0 %2821  ;;  %v2825_v36 = vsel %vm14342_vm6, %v2823_v42, %v2820_v38  ;;  %vm14347_vm6 = vmmov %vm14346_vm3 }
 0x3cf   : > { %v2824_v44 = vrot.slane %v2822_v41, 4  ;;  %2829 = vst.msk [vmem:[#allocation2 + $0x3c0] sm:$0xff] %vm11036_vm8, %v2825_v36 }
 0x3d0   : > { %3604 = vst.msk [vmem:[#allocation2 + $0x244] sm:$0xf] %vm14160_vm7, %v10403_v3  ;;  %3605 = vst.msk [vmem:[#allocation2 + $0x274] sm:$0xf] %vm14160_vm7, %v10403_v3 }
 0x3d1   : > { %v2826_v24 = vsel %vm14343_vm11, %v2824_v44, %v2822_v41  ;;  %vm2744_vm11 = vcmask 1043536  }
 0x3d2   : > { %2830 = vst.msk [vmem:[#allocation2 + $0x3f0] sm:$0xff] %vm11036_vm8, %v2826_v24 }
 0x3d5   : > { %v11746_v48 = vld [vmem:[#allocation2 + $0x184] ss:$48 sps:$4 sm:$0xff]  }
 0x3d6   : > { %3190 = vst.msk [vmem:[#allocation2 + $0x184] sm:$0xf] %vm14344_vm2, %v10403_v3  ;;  %vm2745_vm2 = vcmask 80900  }
 0x3d7   : > { %3199 = vst.msk [vmem:[#allocation2 + $0x184] sm:$0xf] %vm14345_vm13, %v10403_v3  ;;  %vm14348_vm13 = vcmask 1039360  }
 0x3d8   : > { %3601 = vst.msk [vmem:[#allocation2 + $0x1b4] sm:$0xf] %vm14160_vm7, %v10403_v3 }
 0x43e   : > { %v2506_v2 = vpop.f32.mrf.mxu1 }
 0x43f   : > { %v2507_v11 = vadd.f32 %v2506_v2, %v2398_v21 }
 0x440   : > { %v2508_v5 = vpop.f32.mrf.mxu1 }
 0x441   : > { %v2513_v13 = vmax.f32 %v2507_v11, 0.0 }
 0x442   : > { %v2509_v40 = vpop.f32.mrf.mxu1 }
 0x443   : > { %v2510_v25 = vadd.f32 %v2509_v40, %v2403_v39 }
 0x444   : > { %v2511_v12 = vpop.f32.mrf.mxu1 }
 0x445   : > { %v2514_v22 = vmax.f32 %v2510_v25, 0.0 }
 0x447   : > { %v2515_v26 = vpack.c.bf16 %v2514_v22, %v2513_v13 }
 0x449   : > { %9621 = vmatmul.mubr.bf16.vlgmr.msra.gmra.mxu0 %v2515_v26 }
 0x44a   : > { %9628 = vmatprep.mubr.msk.bf16.mxu0 %vm14164_vm12, %v10412_v61 }
 0x509   : > { %v2614_v50 = vpop.f32.mrf.mxu0 }
 0x50a   : > { %v9443_v49 = vpack.c.bf16 %v2614_v50, %v2614_v50 }
 0x50b   : > { %v9622_v51 = vpop.f32.mrf.mxu0 }
 0x50c   : > { %2817 = vst [vmem:[#allocation2 + $0x364] sm:$0xf] %v9443_v49  ;;  %2887 = vrot.lane.b32.xlu1 %v9443_v49, %s10414_s28  ;;  %v9830_v51 = vld [vmem:[#allocation2 + $0x484] ss:$48 sps:$4 sm:$0xff]  }
 0x50d   : > { %v2617_v43 = vpop.f32.mrf.mxu0 }
 0x50e   : > { %v9444_v54 = vpack.c.bf16 %v2617_v43, %v2617_v43 }
 0x50f   : > { %v9623_v6 = vpop.f32.mrf.mxu0 }
 0x510   : > { %2818 = vst [vmem:[#allocation2 + $0x394] sm:$0xf] %v9444_v54  ;;  %2801 = vrot.lane.b32.xlu1 %v9443_v49, %s14172_s1  ;;  %2889 = vrot.lane.b32.xlu0 %v9444_v54, %s10414_s28 }
 0x514   : > { %2859 = vrot.lane.b32.xlu1 %v9443_v49, %s10415_s2  ;;  %2803 = vrot.lane.b32.xlu0 %v9444_v54, %s14172_s1 }
 0x518   : > { %2777 = vrot.lane.b32.xlu1 %v9443_v49, %s10416_s7  ;;  %2861 = vrot.lane.b32.xlu0 %v9444_v54, %s10415_s2 }
 0x51c   : > { %2831 = vrot.lane.b32.xlu1 %v9443_v49, %s10407_s10  ;;  %2779 = vrot.lane.b32.xlu0 %v9444_v54, %s10416_s7 }
 0x520   : > { %2749 = vrot.lane.b32.xlu1 %v9443_v49, %s10417_s11  ;;  %2833 = vrot.lane.b32.xlu0 %v9444_v54, %s10407_s10 }
 0x524   : > { %2733 = vrot.lane.b32.xlu1 %v11676_v0, %s10417_s11  ;;  %2751 = vrot.lane.b32.xlu0 %v9444_v54, %s10417_s11 }
 0x528   : > { %2721 = vrot.lane.b32.xlu1 %v9443_v49, %s10418_s15  ;;  %2735 = vrot.lane.b32.xlu0 %v11678_v1, %s10417_s11 }
 0x52c   : > { %2700 = vrot.lane.b32.xlu1 %v11676_v0, %s10418_s15  ;;  %2723 = vrot.lane.b32.xlu0 %v9444_v54, %s10418_s15 }
 0x530   : > { %2914 = vrot.lane.b32.xlu1 %v9443_v49, %s10419_s16  ;;  %2702 = vrot.lane.b32.xlu0 %v11678_v1, %s10418_s15 }
 0x534   : > { %2899 = vrot.lane.b32.xlu1 %v11676_v0, %s10419_s16  ;;  %2916 = vrot.lane.b32.xlu0 %v9444_v54, %s10419_s16 }
 0x538   : > { %2967 = vperm.xlu1 %9752, %v2964_v58   ;;  %2901 = vrot.lane.b32.xlu0 %v11678_v1, %s10419_s16 }
 0x57e   : > { %v2888_v60 = vpop.permute.xlu1 %2887 }
 0x57f   : > { %v2891_v63 = vrot.slane %v2888_v60, 4 }
 0x581   : > { %v2893_v2 = vsel %vm14161_vm15, %v2891_v63, %v2888_v60 }
 0x582   : > { %2897 = vst.msk [vmem:[#allocation2 + $0x5a0] sm:$0xff] %vm11704_vm9, %v2893_v2  ;;  %v2802_v21 = vpop.permute.xlu1 %2801  ;;  %v2890_v5 = vpop.permute.xlu0 %2889 }
 0x583   : > { %v2805_v11 = vrot.slane %v2802_v21, 4  ;;  %v2892_v39 = vrot.slane %v2890_v5, 4 }
 0x585   : > { %v2807_v0 = vsel %vm14346_vm3, %v2805_v11, %v2802_v21  ;;  %v2894_v40 = vsel %vm14161_vm15, %v2892_v39, %v2890_v5  ;;  %vm14159_vm3 = vcmask 80896  }
 0x586   : > { %2811 = vst.msk [vmem:[#allocation2 + $0x2a4] sm:$0xff] %vm10980_vm5, %v2807_v0  ;;  %v2860_v1 = vpop.permute.xlu1 %2859  ;;  %v2804_v25 = vpop.permute.xlu0 %2803 }
 0x587   : > { %2898 = vst.msk [vmem:[#allocation2 + $0x5d0] sm:$0xff] %vm11704_vm9, %v2894_v40  ;;  %v2863_v12 = vrot.slane %v2860_v1, 4  ;;  %v2806_v13 = vrot.slane %v2804_v25, 4 }
 0x589   : > { %v2865_v22 = vsel %vm14162_vm0, %v2863_v12, %v2860_v1  ;;  %v2808_v26 = vsel %vm14347_vm6, %v2806_v13, %v2804_v25  ;;  %vm11831_vm6 = vmor %vm2745_vm2, %vm2744_vm11  ;;  %vm2711_vm11 = vcmask 1043544   ;;  %vm2712_vm2 = vcmask 89092  }
 0x58a   : > { %2869 = vst.msk [vmem:[#allocation2 + $0x4e0] sm:$0xff] %vm11720_vm14, %v2865_v22  ;;  %v2778_v14 = vpop.permute.xlu1 %2777  ;;  %v2862_v45 = vpop.permute.xlu0 %2861  ;;  %vm11852_vm1 = vmor %vm2712_vm2, %vm2711_vm11  ;;  %vm14354_vm11 = vcmask 1044392   ;;  %vm2910_vm2 = vcmask 957444  }
 0x58b   : > { %2812 = vst.msk [vmem:[#allocation2 + $0x2d4] sm:$0xff] %vm10980_vm5, %v2808_v26  ;;  %v2781_v16 = vrot.slane %v2778_v14, 4  ;;  %v2864_v18 = vrot.slane %v2862_v45, 4  ;;  %v9833_v26 = vld [vmem:[#allocation2 + $0x3c4] ss:$48 sps:$4 sm:$0xff]  }
 0x58d   : > { %v2783_v19 = vsel %vm14158_vm4, %v2781_v16, %v2778_v14  ;;  %v2866_v55 = vsel %vm14162_vm0, %v2864_v18, %v2862_v45 }
 0x58e   : > { %v9824_v53 = vld [vmem:[#allocation2 + $0x5a4] ss:$48 sps:$4 sm:$0xff]   ;;  %2787 = vst.msk [vmem:[#allocation2 + $0x1e4] sm:$0xff] %vm11730_vm10, %v2783_v19  ;;  %v2832_v56 = vpop.permute.xlu1 %2831  ;;  %v2780_v20 = vpop.permute.xlu0 %2779 }
 0x58f   : > { %2870 = vst.msk [vmem:[#allocation2 + $0x510] sm:$0xff] %vm11720_vm14, %v2866_v55  ;;  %v2835_v23 = vrot.slane %v2832_v56, 4  ;;  %v2782_v27 = vrot.slane %v2780_v20, 4  ;;  %9528 = vmatprep.subr.bf16.mxu1 %v9824_v53 }
 0x591   : > { %v2837_v28 = vsel %vm14348_vm13, %v2835_v23, %v2832_v56  ;;  %v2784_v59 = vsel %vm14158_vm4, %v2782_v27, %v2780_v20  ;;  %vm14353_vm4 = vcmask 84992   ;;  %v9834_v20 = vld [vmem:[#allocation2 + $0x364] ss:$48 sps:$4 sm:$0xff]  }
 0x592   : > { %v9825_v30 = vld [vmem:[#allocation2 + $0x2a4] ss:$48 sps:$4 sm:$0xff]   ;;  %2841 = vst.msk [vmem:[#allocation2 + $0x420] sm:$0xff] %vm11036_vm8, %v2837_v28  ;;  %v2750_v32 = vpop.permute.xlu1 %2749  ;;  %v2834_v4 = vpop.permute.xlu0 %2833 }
 0x593   : > { %2788 = vst.msk [vmem:[#allocation2 + $0x214] sm:$0xff] %vm11730_vm10, %v2784_v59  ;;  %v2753_v9 = vrot.slane %v2750_v32, 4  ;;  %v2836_v7 = vrot.slane %v2834_v4, 4  ;;  %9529 = vmatpush3.bf16.msra.mxu1 %v9825_v30 }
 0x594   : > { %3606 = vst.msk [vmem:[#allocation2 + $0x2a4] sm:$0xf] %vm14160_vm7, %v10403_v3  ;;  %3607 = vst.msk [vmem:[#allocation2 + $0x2d4] sm:$0xf] %vm14160_vm7, %v10403_v3  ;;  %9530 = vmatprep.subr.bf16.mxu1 %v9826_v33  ;;  %v8977_v33 = vcombine.low %v11790_v10, %v11790_v10 }
 0x595   : > { %v2755_v47 = vsel %vm14159_vm3, %v2753_v9, %v2750_v32  ;;  %v2838_v29 = vsel %vm14348_vm13, %v2836_v7, %v2834_v4  ;;  %vm2706_vm13 = vcmask 89088   ;;  %v9842_v7 = vld [vmem:[%s10529_s4 + $0x8] ss:$0 sps:$4 sm:$0xff]  }
 0x596   : > { %v9828_v34 = vld [vmem:[#allocation2 + $0x4e4] ss:$48 sps:$4 sm:$0xff]   ;;  %2759 = vst.msk [vmem:[#allocation2 + $0x124] sm:$0xff] %vm11831_vm6, %v2755_v47  ;;  %v2734_v37 = vpop.permute.xlu1 %2733  ;;  %v2752_v38 = vpop.permute.xlu0 %2751 }
 0x597   : > { %2842 = vst.msk [vmem:[#allocation2 + $0x450] sm:$0xff] %vm11036_vm8, %v2838_v29  ;;  %v2737_v41 = vrot.slane %v2734_v37, 4  ;;  %v2754_v42 = vrot.slane %v2752_v38, 4  ;;  %9531 = vmatpush3.bf16.msra.mxu1 %v11761_v57 }
 0x598   : > { %9532 = vmatprep.subr.bf16.mxu1 %v9828_v34 }
 0x599   : > { %v2740_v44 = vsel %vm14159_vm3, %v2737_v41, %v2734_v37  ;;  %v2756_v36 = vsel %vm14159_vm3, %v2754_v42, %v2752_v38 }
 0x59a   : > { %v9829_v24 = vld [vmem:[#allocation2 + $0x1e4] ss:$48 sps:$4 sm:$0xff]   ;;  %2747 = vst.msk [vmem:[#allocation2 + $0xc4] sm:$0xff] %vm11831_vm6, %v2740_v44  ;;  %2760 = vst.msk [vmem:[#allocation2 + $0x154] sm:$0xff] %vm11831_vm6, %v2756_v36  ;;  %v2722_v50 = vpop.permute.xlu1 %2721  ;;  %v2736_v49 = vpop.permute.xlu0 %2735  ;;  %v8999_v36 = vld [vmem:[%s10494_s19] ss:$0 sm:$0xff] }
 0x59b   : > { %3602 = vst.msk [vmem:[#allocation2 + $0x1e4] sm:$0xf] %vm14160_vm7, %v10403_v3  ;;  %3603 = vst.msk [vmem:[#allocation2 + $0x214] sm:$0xf] %vm14160_vm7, %v10403_v3  ;;  %v2725_v54 = vrot.slane %v2722_v50, 4  ;;  %v2738_v6 = vrot.slane %v2736_v49, 4  ;;  %9533 = vmatpush3.bf16.msra.mxu1 %v9829_v24 }
 0x59c   : > { %9534 = vmatprep.subr.bf16.mxu1 %v9830_v51  ;;  %vm14356_vm7 = vcmask 1044392  }
 0x59d   : > { %v2934_v57 = vld [vmem:[#allocation2 + $0x124] sm:$0xf]  ;;  %v2727_v46 = vsel %vm2706_vm13, %v2725_v54, %v2722_v50  ;;  %v2741_v58 = vsel %vm14159_vm3, %v2738_v6, %v2736_v49  ;;  %vm14355_vm3 = vmmov %vm14353_vm4 }
 0x59e   : > { %v9832_v60 = vld [vmem:[#allocation2 + $0x424] ss:$48 sps:$4 sm:$0xff]   ;;  %3188 = vst.msk [vmem:[#allocation2 + $0x124] sm:$0xf] %vm14353_vm4, %v10403_v3  ;;  %v2701_v63 = vpop.permute.xlu1 %2700  ;;  %v2724_v2 = vpop.permute.xlu0 %2723  ;;  %vm14357_vm15 = vmmov %vm14356_vm7 }
 0x59f   : > { %2731 = vst.msk [vmem:[#allocation2 + $0x64] sm:$0xff] %vm11852_vm1, %v2727_v46  ;;  %v2704_v21 = vrot.slane %v2701_v63, 4  ;;  %v2726_v5 = vrot.slane %v2724_v2, 4  ;;  %9535 = vmatpush3.bf16.msra.mxu1 %v11746_v48  ;;  %v9848_v46 = vld [vmem:[%s14369_s18 + $0xa8] ss:$12 sps:$4 sm:$0xff]  }
 0x5a0   : > { %2748 = vst.msk [vmem:[#allocation2 + $0xf4] sm:$0xff] %vm11831_vm6, %v2741_v58  ;;  %9536 = vmatprep.subr.bf16.mxu1 %v9832_v60  ;;  %v9850_v58 = vld [vmem:[%s14369_s18 + $0xac] ss:$12 sps:$4 sm:$0xff]   ;;  %v9854_v60 = vld [vmem:[%s14369_s18 + $0x94] ss:$12 sps:$4 sm:$0xff]  }
 0x5a1   : > { %3197 = vst.msk [vmem:[#allocation2 + $0x124] sm:$0xf] %vm14354_vm11, %v10403_v3  ;;  %v2932_v11 = vld [vmem:[#allocation2 + $0xc4] sm:$0xf]  ;;  %v2935_v39 = vld [vmem:[#allocation2 + $0x154] sm:$0xf]  ;;  %v2707_v0 = vsel %vm2706_vm13, %v2704_v21, %v2701_v63  ;;  %v2728_v40 = vsel %vm2706_vm13, %v2726_v5, %v2724_v2 }
 0x5a2   : > { %3186 = vst.msk [vmem:[#allocation2 + $0xc4] sm:$0xf] %vm14353_vm4, %v10403_v3  ;;  %vm2905_vm11 = vcmask 957440   ;;  %v2915_v48 = vpop.permute.xlu1 %2914  ;;  %v2703_v1 = vpop.permute.xlu0 %2702  ;;  %v8983_v25 = vcombine.low %v2934_v57, %v2935_v39  ;;  %vm14358_vm4 = vmmov %vm14356_vm7  ;;  %v3262_v57 = vld [vmem:[%s10544_s24] sm:$0xff]  ;;  %v9852_v63 = vld [vmem:[%s14369_s18 + $0x90] ss:$12 sps:$4 sm:$0xff]  }
 0x5a3   : > { %3189 = vst.msk [vmem:[#allocation2 + $0x154] sm:$0xf] %vm14355_vm3, %v10403_v3  ;;  %vm11883_vm0 = vmor %vm2910_vm2, %vm14358_vm4  ;;  %v2918_v13 = vrot.slane %v2915_v48, 4  ;;  %v2705_v22 = vrot.slane %v2703_v1, 4  ;;  %v9858_v2 = vld [vmem:[%s14369_s18 + $0x7c] ss:$12 sps:$4 sm:$0xff]  }
 0x5a4   : > { %2714 = vst.msk [vmem:[#allocation2 + $0x4] sm:$0xff] %vm11852_vm1, %v2707_v0  ;;  %2732 = vst.msk [vmem:[#allocation2 + $0x94] sm:$0xff] %vm11852_vm1, %v2728_v40  ;;  %9537 = vmatpush3.bf16.msra.mxu1 %v8983_v25  ;;  %v9856_v21 = vld [vmem:[%s14369_s18 + $0x78] ss:$12 sps:$4 sm:$0xff]   ;;  %v9864_v0 = vld [vmem:[%s14369_s18 + $0x48] ss:$12 sps:$4 sm:$0xff]  }
 0x5a5   : > { %3195 = vst.msk [vmem:[#allocation2 + $0xc4] sm:$0xf] %vm14356_vm7, %v10403_v3  ;;  %v2920_v45 = vsel %vm2905_vm11, %v2918_v13, %v2915_v48  ;;  %v2708_v16 = vsel %vm2706_vm13, %v2705_v22, %v2703_v1  ;;  %9538 = vmatprep.subr.bf16.mxu1 %v9833_v26  ;;  %vm14361_vm7 = vmmov %vm14355_vm3  ;;  %v9862_v5 = vld [vmem:[%s14369_s18 + $0x64] ss:$12 sps:$4 sm:$0xff]   ;;  %v9866_v39 = vld [vmem:[%s14369_s18 + $0x4c] ss:$12 sps:$4 sm:$0xff]  }
 0x5a6   : > { %3198 = vst.msk [vmem:[#allocation2 + $0x154] sm:$0xf] %vm14357_vm15, %v10403_v3  ;;  %v2917_v18 = vpop.permute.xlu0 %2916  ;;  %v2900_v19 = vpop.permute.xlu1 %2899  ;;  %vm14362_vm15 = vmmov %vm14358_vm4  ;;  %v9870_v40 = vld [vmem:[%s14369_s18 + $0x34] ss:$12 sps:$4 sm:$0xff]   ;;  %v9868_v48 = vld [vmem:[%s14369_s18 + $0x30] ss:$12 sps:$4 sm:$0xff]  }
 0x5a7   : > { %v2933_v14 = vld [vmem:[#allocation2 + $0xf4] sm:$0xf]  ;;  %2924 = vst.msk [vmem:[#allocation2 + $0x660] sm:$0xff] %vm11883_vm0, %v2920_v45  ;;  %v2919_v53 = vrot.slane %v2917_v18, 4  ;;  %v2903_v56 = vrot.slane %v2900_v19, 4  ;;  %vm14363_vm2 = vmmov %vm14355_vm3 }
 0x5a8   : > { %3187 = vst.msk [vmem:[#allocation2 + $0xf4] sm:$0xf] %vm14361_vm7, %v10403_v3  ;;  %v8982_v55 = vcombine.low %v2932_v11, %v2933_v14  ;;  %vm14364_vm7 = vmmov %vm14358_vm4  ;;  %v9860_v11 = vld [vmem:[%s14369_s18 + $0x60] ss:$12 sps:$4 sm:$0xff]   ;;  %v9874_v1 = vld [vmem:[%s14369_s18 + $0x1c] ss:$12 sps:$4 sm:$0xff]  }
 0x5a9   : > { %2715 = vst.msk [vmem:[#allocation2 + $0x34] sm:$0xff] %vm11852_vm1, %v2708_v16  ;;  %v2921_v23 = vsel %vm2905_vm11, %v2919_v53, %v2917_v18  ;;  %v2906_v27 = vsel %vm2905_vm11, %v2903_v56, %v2900_v19  ;;  %v9872_v25 = vld [vmem:[%s14369_s18 + $0x18] ss:$12 sps:$4 sm:$0xff]  }
 0x5aa   : > { %3196 = vst.msk [vmem:[#allocation2 + $0xf4] sm:$0xf] %vm14362_vm15, %v10403_v3  ;;  %9539 = vmatpush3.bf16.msra.mxu1 %v8982_v55  ;;  %v2902_v59 = vpop.permute.xlu0 %2901  ;;  %vm14365_vm15 = vmmov %vm14363_vm2 }
 0x5ab   : > { %9540 = vmatprep.subr.bf16.mxu1 %v9834_v20  ;;  %v9835_v28 = vld [vmem:[#allocation2 + $0x64] ss:$48 sps:$4 sm:$0xff]   ;;  %2925 = vst.msk [vmem:[#allocation2 + $0x690] sm:$0xff] %vm11883_vm0, %v2921_v23  ;;  %2912 = vst.msk [vmem:[#allocation2 + $0x600] sm:$0xff] %vm11883_vm0, %v2906_v27  ;;  %v2904_v30 = vrot.slane %v2902_v59, 4 }
 0x5ac   : > { %3184 = vst.msk [vmem:[#allocation2 + $0x64] sm:$0xf] %vm14355_vm3, %v10403_v3  ;;  %vm14366_vm3 = vmmov %vm14363_vm2 }
 0x5ad   : > { %3185 = vst.msk [vmem:[#allocation2 + $0x94] sm:$0xf] %vm14363_vm2, %v10403_v3  ;;  %v2907_v32 = vsel %vm2905_vm11, %v2904_v30, %v2902_v59  ;;  %vm14367_vm2 = vmmov %vm14358_vm4 }
 0x5ae   : > { %3193 = vst.msk [vmem:[#allocation2 + $0x64] sm:$0xf] %vm14358_vm4, %v10403_v3  ;;  %9541 = vmatpush3.bf16.msra.mxu1 %v9835_v28  ;;  %vm14368_vm4 = vmmov %vm14367_vm2 }
 0x5af   : > { %3194 = vst.msk [vmem:[#allocation2 + $0x94] sm:$0xf] %vm14364_vm7, %v10403_v3  ;;  %9542 = vmatprep.subr.bf16.mxu1 %v11780_v62  ;;  %vm3088_vm7 = vcmask 261120  }
 0x5b0   : > { %v9837_v4 = vld [vmem:[#allocation2 + $0x4] ss:$48 sps:$4 sm:$0xff]   ;;  %2913 = vst.msk [vmem:[#allocation2 + $0x630] sm:$0xff] %vm11883_vm0, %v2907_v32 }
 0x5b1   : > { %3182 = vst.msk [vmem:[#allocation2 + $0x4] sm:$0xf] %vm14365_vm15, %v10403_v3  ;;  %vm14370_vm15 = vcmask 973824  }
 0x5b2   : > { %3183 = vst.msk [vmem:[#allocation2 + $0x34] sm:$0xf] %vm14366_vm3, %v10403_v3  ;;  %9543 = vmatpush3.bf16.msra.mxu1 %v9837_v4  ;;  %v9840_v62 = vld [vmem:[#allocation2 + $0x664] ss:$48 sps:$4 sm:$0xff]   ;;  %vm14372_vm3 = vcmask 1039360  }
 0x5b3   : > { %3191 = vst.msk [vmem:[#allocation2 + $0x4] sm:$0xf] %vm14367_vm2, %v10403_v3  ;;  %9625 = vmatpush3.bf16.msra.mxu0 %v9840_v62  ;;  %v2968_v34 = vpop.permute.xlu1 %2967  ;;  %3505 = vmatprep.subr.bf16.mxu1 %v9850_v58  ;;  %vm14373_vm2 = vcmask 965632  }
 0x5b4   : > { %3192 = vst.msk [vmem:[#allocation2 + $0x34] sm:$0xf] %vm14368_vm4, %v10403_v3  ;;  %9626 = vmatprep.subr.bf16.mxu0 %v10412_v61 }
 0x5b5   : > { %3125 = vmatmul.mubr.bf16.vlgmr.msra.gmra.mxu1 %v8977_v33 }
 0x5b6   : > { %3537 = vmatprep.mubr.bf16.mxu1 %v10403_v3  ;;  %3506 = vmatpush1.bf16.msra.mxu1 %v9848_v46 }
 0x5b7   : > { %v9841_v9 = vld [vmem:[#allocation2 + $0x604] ss:$48 sps:$4 sm:$0xff]   ;;  %3507 = vmatprep.subr.bf16.mxu1 %v9854_v60 }
 0x5b8   : > { %9627 = vmatpush3.bf16.msra.mxu0 %v9841_v9 }
 0x5b9   : > { %9632 = vmatprep.subr.bf16.mxu0 %v10412_v61 }
 0x5ba   : > { %3508 = vmatpush1.bf16.msra.mxu1 %v9852_v63 }
 0x5bb   : > { %9629 = vmatmul.mubr.msk.bf16.vlgmr.msra.gmra.mxu0 %vm3088_vm7, %v9842_v7  ;;  %3509 = vmatprep.subr.bf16.mxu1 %v9858_v2 }
 0x5bc   : > { %9642 = vmatprep.mubr.msk.bf16.mxu0 %vm14164_vm12, %v10412_v61 }
 0x5be   : > { %3510 = vmatpush1.bf16.msra.mxu1 %v9856_v21 }
 0x5bf   : > { %3511 = vmatprep.subr.bf16.mxu1 %v9862_v5 }
 0x5c2   : > { %3512 = vmatpush1.bf16.msra.mxu1 %v9860_v11 }
 0x5c3   : > { %3513 = vmatprep.subr.bf16.mxu1 %v9866_v39 }
 0x5c6   : > { %3514 = vmatpush1.bf16.msra.mxu1 %v9864_v0 }
 0x5c7   : > { %3515 = vmatprep.subr.bf16.mxu1 %v9870_v40 }
 0x5ca   : > { %3516 = vmatpush1.bf16.msra.mxu1 %v9868_v48 }
 0x5cb   : > { %3517 = vmatprep.subr.bf16.mxu1 %v9874_v1 }
 0x5ce   : > { %3518 = vmatpush1.bf16.msra.mxu1 %v9872_v25 }
 0x675   : > { %v9544_v10 = vpop.f32.mrf.mxu1 }
 0x677   : > { %v9545_v47 = vpop.f32.mrf.mxu1 }
 0x678   : > { %v9546_v29 = vadd.f32 %v9545_v47, %v9544_v10  ;;  %v9851_v47 = vld [vmem:[%s14369_s18 + $0xb0] ss:$12 sps:$4 sm:$0xff]  }
 0x679   : > { %v9547_v37 = vpop.f32.mrf.mxu1 }
 0x67a   : > { %v3127_v38 = vadd.f32 %v9546_v29, %v2968_v34  ;;  %v9855_v29 = vld [vmem:[%s14369_s18 + $0x98] ss:$12 sps:$4 sm:$0xff]   ;;  %v9859_v34 = vld [vmem:[%s14369_s18 + $0x80] ss:$12 sps:$4 sm:$0xff]   ;;  %v9863_v37 = vld [vmem:[%s14369_s18 + $0x68] ss:$12 sps:$4 sm:$0xff]  }
 0x67b   : > { %v9548_v41 = vpop.f32.mrf.mxu1  ;;  %v3166_v42 = vpop.f32.mrf.mxu0 }
 0x67c   : > { %v3167_v44 = vadd.f32 %v3166_v42, %v3127_v38  ;;  %v9867_v38 = vld [vmem:[%s14369_s18 + $0x50] ss:$12 sps:$4 sm:$0xff]   ;;  %v9871_v41 = vld [vmem:[%s14369_s18 + $0x38] ss:$12 sps:$4 sm:$0xff]   ;;  %v9875_v42 = vld [vmem:[%s14369_s18 + $0x20] ss:$12 sps:$4 sm:$0xff]  }
 0x67d   : > { %v9630_v24 = vpop.f32.mrf.mxu0 }
 0x67e   : > { %v3172_v50 = vmax.f32 %v3167_v44, 0.0  ;;  %v9878_v44 = vld [vmem:[%s14369_s18 + $0x4] ss:$12 sps:$4 sm:$0xff]   ;;  %v9879_v24 = vld [vmem:[%s14369_s18 + $0x8] ss:$12 sps:$4 sm:$0xff]  }
 0x67f   : > { %v3169_v49 = vpop.f32.mrf.mxu0  ;;  %3519 = vmatprep.subr.bf16.mxu1 %v9878_v44 }
 0x680   : > { %v3180_v51 = vmul.f32 %v8999_v36, %v3172_v50  ;;  %v9876_v36 = vld [vmem:[%s14369_s18] ss:$12 sps:$4 sm:$0xff]  }
 0x681   : > { %v9631_v54 = vpop.f32.mrf.mxu0  ;;  %3520 = vmatpush1.bf16.msra.mxu1 %v9876_v36 }
 0x682   : > { %v3181_v6 = vpack.c.bf16 %v3180_v51, %v3180_v51 }
 0x684   : > { %3227 = vst [vmem:[#allocation2 + $0xc4] sm:$0xf] %v3181_v6  ;;  %3234 = vrot.lane.b32.xlu1 %v3181_v6, %s10415_s2  ;;  %3246 = vrot.lane.b32.xlu0 %v3181_v6, %s10419_s16  ;;  %s14381_s2 = sld [smem:[#allocation9_spill]] }
 0x685   : > { %s14415_s16 = sld [smem:[#allocation11_spill]] }
 0x688   : > { %3228 = vrot.lane.b32.xlu1 %v3181_v6, %s10407_s10  ;;  %3240 = vrot.lane.b32.xlu0 %v3181_v6, %s10414_s28  ;;  %s11969_s28 = scalar_lea.vmem %s14371_s0, %s9676_s26  ;;  %s14174_s0 = smov 18  }
 0x689   : > { %v11974_v32 = vld [vmem:[%s11969_s28] sm:$0xff]  ;;  %v12034_v50 = vld [vmem:[%s11969_s28 + $0x8] sm:$0xf]  ;;  %s14416_s26 = sld [smem:[#allocation10_spill]]  ;;  %s10424_s28 = smov 19  }
 0x68a   : > { %v3252_v10 = vld [vmem:[%s14381_s2] sm:$0xf]  ;;  %s10425_s2 = smov 109  }
 0x68c   : > { %3221 = vrot.lane.b32.xlu1 %v3181_v6, %s14172_s1  ;;  %3215 = vrot.lane.b32.xlu0 %v3181_v6, %s10416_s7  ;;  %s10420_s7 = smov 110  }
 0x690   : > { %3209 = vrot.lane.b32.xlu1 %v3181_v6, %s10417_s11  ;;  %3203 = vrot.lane.b32.xlu0 %v3181_v6, %s10418_s15  ;;  %s10421_s11 = smov 111   ;;  %s10422_s15 = smov 17  }
 0x694   : > { %3265 = vperm.xlu0 %9751, %v3262_v57   ;;  %3827 = vrot.lane.b32.xlu1 %v11974_v32, %s10420_s7 }
 0x698   : > { %3829 = vrot.lane.b32.xlu0 %v12034_v50, %s10420_s7  ;;  %3796 = vrot.lane.b32.xlu1 %v11974_v32, %s10421_s11 }
 0x69c   : > { %3798 = vrot.lane.b32.xlu0 %v12034_v50, %s10421_s11  ;;  %3768 = vrot.lane.b32.xlu1 %v11974_v32, %s10407_s10 }
 0x6a0   : > { %3770 = vrot.lane.b32.xlu0 %v12034_v50, %s10407_s10  ;;  %3734 = vrot.lane.b32.xlu1 %v11974_v32, %s14172_s1 }
 0x6a4   : > { %3736 = vrot.lane.b32.xlu1 %v12034_v50, %s14172_s1 }
 0x6a8   : > { %3703 = vrot.lane.b32.xlu1 %v11974_v32, %s10422_s15 }
 0x6ac   : > { %3705 = vrot.lane.b32.xlu1 %v12034_v50, %s10422_s15 }
 0x6f6   : > { %v3235_v13 = vpop.permute.xlu1 %3234  ;;  %v3247_v22 = vpop.permute.xlu0 %3246 }
 0x6f7   : > { %v3236_v26 = vrot.slane %v3235_v13, 4  ;;  %v3248_v14 = vrot.slane %v3247_v22, 4 }
 0x6f9   : > { %v3237_v45 = vsel %vm14370_vm15, %v3236_v26, %v3235_v13  ;;  %v3249_v16 = vsel %vm2905_vm11, %v3248_v14, %v3247_v22  ;;  %vm14375_vm11 = vcmask 72704  }
 0x6fa   : > { %3239 = vst.msk [vmem:[#allocation2 + $0x120] sm:$0xff] %vm11720_vm14, %v3237_v45  ;;  %v3229_v18 = vpop.permute.xlu1 %3228  ;;  %v3241_v19 = vpop.permute.xlu0 %3240  ;;  %vm14374_vm14 = vcmask 7168  }
 0x6fb   : > { %3251 = vst.msk [vmem:[#allocation2 + $0x180] sm:$0xff] %vm11883_vm0, %v3249_v16  ;;  %v3230_v55 = vrot.slane %v3229_v18, 4  ;;  %v3242_v53 = vrot.slane %v3241_v19, 4  ;;  %vm14185_vm0 = vcmask 1043456  }
 0x6fd   : > { %v3231_v56 = vsel %vm14372_vm3, %v3230_v55, %v3229_v18  ;;  %v3243_v20 = vsel %vm14373_vm2, %v3242_v53, %v3241_v19  ;;  %vm14163_vm3 = vcmask 588800   ;;  %vm14165_vm2 = vcmask 1044328  }
 0x6fe   : > { %3233 = vst.msk [vmem:[#allocation2 + $0xf0] sm:$0xff] %vm11036_vm8, %v3231_v56  ;;  %v3222_v31 = vpop.permute.xlu1 %3221  ;;  %v3216_v23 = vpop.permute.xlu0 %3215  ;;  %vm14376_vm8 = vcmask 150528  }
 0x6ff   : > { %3245 = vst.msk [vmem:[#allocation2 + $0x150] sm:$0xff] %vm11704_vm9, %v3243_v20  ;;  %v3223_v12 = vrot.slane %v3222_v31, 4  ;;  %v3217_v27 = vrot.slane %v3216_v23, 4  ;;  %vm14377_vm9 = vcmask 80896  }
 0x700   : > { %3619 = vst.msk [vmem:[#allocation2 + $0x18c] sm:$0xf] %vm14165_vm2, %v10403_v3  ;;  %3611 = vst.msk [vmem:[#allocation2 + $0xc] sm:$0xf] %vm14165_vm2, %v10403_v3 }
 0x701   : > { %v3224_v28 = vsel %vm14374_vm14, %v3223_v12, %v3222_v31  ;;  %v3218_v59 = vsel %vm14375_vm11, %v3217_v27, %v3216_v23  ;;  %3612 = vst.msk [vmem:[#allocation2 + $0x3c] sm:$0xf] %vm14165_vm2, %v10403_v3  ;;  %3613 = vst.msk [vmem:[#allocation2 + $0x6c] sm:$0xf] %vm14165_vm2, %v10403_v3  ;;  %vm3645_vm14 = vcmask 1047556   ;;  %vm14168_vm11 = vcmask 900096  }
 0x702   : > { %v9843_v30 = vld [vmem:[#allocation2 + $0x184] ss:$0 sps:$4 sm:$0xff]   ;;  %3226 = vst.msk [vmem:[#allocation2 + $0x94] sm:$0xff] %vm10980_vm5, %v3224_v28  ;;  %v3210_v52 = vpop.permute.xlu1 %3209  ;;  %v3204_v15 = vpop.permute.xlu0 %3203  ;;  %vm14378_vm5 = vmmov %vm14376_vm8 }
 0x703   : > { %3220 = vst.msk [vmem:[#allocation2 + $0x64] sm:$0xff] %vm11730_vm10, %v3218_v59  ;;  %v3211_v4 = vrot.slane %v3210_v52, 4  ;;  %v3205_v33 = vrot.slane %v3204_v15, 4  ;;  %v3301_v62 = vsel %vm14185_vm0, %v9843_v30, 0  ;;  %vm14379_vm10 = vmmov %vm14378_vm5 }
 0x704   : > { %3600 = vst.msk [vmem:[#allocation2 + $0x184] sm:$0xf] %vm14376_vm8, %v10403_v3  ;;  %9633 = vmatpush3.bf16.msra.mxu0 %v3301_v62  ;;  %vm14380_vm4 = vmmov %vm14378_vm5  ;;  %vm3839_vm8 = vcmask 1044336  }
 0x705   : > { %3762 = vst [vmem:[#allocation2 + $0x184] sm:$0xff] %v11974_v32  ;;  %v3212_v9 = vsel %vm14377_vm9, %v3211_v4, %v3210_v52  ;;  %v3206_v17 = vsel %vm2706_vm13, %v3205_v33, %v3204_v15  ;;  %9634 = vmatprep.subr.bf16.mxu0 %v10412_v61  ;;  %v9845_v7 = vld [vmem:[#allocation2 + $0xc4] ss:$48 sps:$4 sm:$0xff]   ;;  %vm14382_vm13 = vmmov %vm14380_vm4 }
 0x706   : > { %v9844_v35 = vld [vmem:[#allocation2 + $0x124] ss:$48 sps:$4 sm:$0xff]   ;;  %3214 = vst.msk [vmem:[#allocation2 + $0x34] sm:$0xff] %vm11831_vm6, %v3212_v9  ;;  %3763 = vst [vmem:[#allocation2 + $0x18c] sm:$0xf] %v12034_v50  ;;  %v3828_v63 = vpop.permute.xlu1 %3827 }
 0x707   : > { %3208 = vst.msk [vmem:[#allocation2 + $0x4] sm:$0xff] %vm11852_vm1, %v3206_v17  ;;  %vm14383_vm1 = vmmov %vm14380_vm4  ;;  %v3831_v5 = vrot.slane %v3828_v63, 4 }
 0x708   : > { %3598 = vst.msk [vmem:[#allocation2 + $0x124] sm:$0xf] %vm14378_vm5, %v10403_v3  ;;  %9635 = vmatpush3.bf16.msra.mxu0 %v9844_v35  ;;  %vm14384_vm6 = vmmov %vm14383_vm1  ;;  %vm3808_vm5 = vcmask 1044344  }
 0x709   : > { %3599 = vst.msk [vmem:[#allocation2 + $0x154] sm:$0xf] %vm14379_vm10, %v10403_v3  ;;  %9636 = vmatprep.subr.bf16.mxu0 %v10412_v61  ;;  %vm14385_vm7 = vmmov %vm14383_vm1  ;;  %vm3842_vm10 = vcmask 900100   ;;  %v3834_v39 = vsel %vm14168_vm11, %v3831_v5, %v3828_v63 }
 0x70a   : > { %3596 = vst.msk [vmem:[#allocation2 + $0xc4] sm:$0xf] %vm14380_vm4, %v10403_v3  ;;  %v9846_v8 = vld [vmem:[#allocation2 + $0x64] ss:$48 sps:$4 sm:$0xff]   ;;  %vm14386_vm15 = vmmov %vm14383_vm1  ;;  %vm3811_vm4 = vcmask 908292   ;;  %v3797_v48 = vpop.permute.xlu1 %3796 }
 0x70b   : > { %3597 = vst.msk [vmem:[#allocation2 + $0xf4] sm:$0xf] %vm14382_vm13, %v10403_v3  ;;  %vm12094_vm9 = vmor %vm3645_vm14, %vm3839_vm8  ;;  %vm14166_vm13 = vcmask 908288   ;;  %v3800_v13 = vrot.slane %v3797_v48, 4 }
 0x70c   : > { %3594 = vst.msk [vmem:[#allocation2 + $0x64] sm:$0xf] %vm14383_vm1, %v10403_v3  ;;  %9637 = vmatpush3.bf16.msra.mxu0 %v9845_v7  ;;  %vm12103_vm1 = vmor %vm3645_vm14, %vm3808_vm5  ;;  %vm14398_vm5 = vcmask 1039364  }
 0x70d   : > { %3595 = vst.msk [vmem:[#allocation2 + $0x94] sm:$0xf] %vm14384_vm6, %v10403_v3  ;;  %9638 = vmatprep.subr.bf16.mxu0 %v10412_v61  ;;  %vm12109_vm6 = vmor %vm3842_vm10, %vm14185_vm0  ;;  %v3803_v45 = vsel %vm14166_vm13, %v3800_v13, %v3797_v48 }
 0x70e   : > { %v9847_v43 = vld [vmem:[#allocation2 + $0x4] ss:$48 sps:$4 sm:$0xff]   ;;  %3614 = vst.msk [vmem:[#allocation2 + $0x9c] sm:$0xf] %vm14165_vm2, %v10403_v3  ;;  %3615 = vst.msk [vmem:[#allocation2 + $0xcc] sm:$0xf] %vm14165_vm2, %v10403_v3  ;;  %v3769_v18 = vpop.permute.xlu1 %3768 }
 0x70f   : > { %3592 = vst.msk [vmem:[#allocation2 + $0x4] sm:$0xf] %vm14385_vm7, %v10403_v3  ;;  %v3266_v49 = vpop.permute.xlu0 %3265  ;;  %vm12116_vm7 = vmor %vm3811_vm4, %vm14185_vm0  ;;  %v3772_v56 = vrot.slane %v3769_v18, 4  ;;  %vm14401_vm4 = vcmask 1039360  }
 0x710   : > { %3593 = vst.msk [vmem:[#allocation2 + $0x34] sm:$0xf] %vm14386_vm15, %v10403_v3  ;;  %9639 = vmatpush3.bf16.msra.mxu0 %v9846_v8  ;;  %vm14395_vm15 = vcmask 1044472   ;;  %vm12135_vm10 = vmor %vm14398_vm5, %vm14185_vm0  ;;  %vm14406_vm5 = vcmask 7168  }
 0x711   : > { %9640 = vmatprep.subr.bf16.mxu0 %v10412_v61  ;;  %3616 = vst.msk [vmem:[#allocation2 + $0xfc] sm:$0xf] %vm14165_vm2, %v10403_v3  ;;  %3617 = vst.msk [vmem:[#allocation2 + $0x12c] sm:$0xf] %vm14165_vm2, %v10403_v3  ;;  %v3774_v23 = vsel %vm14401_vm4, %v3772_v56, %v3769_v18 }
 0x712   : > { %3618 = vst.msk [vmem:[#allocation2 + $0x15c] sm:$0xf] %vm14165_vm2, %v10403_v3  ;;  %3620 = vst.msk [vmem:[#allocation2 + $0x1bc] sm:$0xf] %vm14165_vm2, %v10403_v3  ;;  %v3735_v27 = vpop.permute.xlu1 %3734 }
 0x713   : > { %3621 = vst.msk [vmem:[#allocation2 + $0x1ec] sm:$0xf] %vm14165_vm2, %v10403_v3  ;;  %3622 = vst.msk [vmem:[#allocation2 + $0x21c] sm:$0xf] %vm14165_vm2, %v10403_v3  ;;  %v3830_v2 = vpop.permute.xlu0 %3829  ;;  %v3738_v30 = vrot.slane %v3735_v27, 4 }
 0x714   : > { %9641 = vmatpush3.bf16.msra.mxu0 %v9847_v43  ;;  %3623 = vst.msk [vmem:[#allocation2 + $0x24c] sm:$0xf] %vm14165_vm2, %v10403_v3  ;;  %3624 = vst.msk [vmem:[#allocation2 + $0x27c] sm:$0xf] %vm14165_vm2, %v10403_v3  ;;  %v3832_v11 = vrot.slane %v3830_v2, 4 }
 0x715   : > { %9646 = vmatprep.subr.bf16.mxu0 %v10412_v61  ;;  %3625 = vst.msk [vmem:[#allocation2 + $0x2ac] sm:$0xf] %vm14165_vm2, %v10403_v3  ;;  %3626 = vst.msk [vmem:[#allocation2 + $0x2dc] sm:$0xf] %vm14165_vm2, %v10403_v3  ;;  %v3740_v52 = vsel %vm14406_vm5, %v3738_v30, %v3735_v27 }
 0x716   : > { %3627 = vst.msk [vmem:[#allocation2 + $0x30c] sm:$0xf] %vm14165_vm2, %v10403_v3  ;;  %3628 = vst.msk [vmem:[#allocation2 + $0x33c] sm:$0xf] %vm14165_vm2, %v10403_v3  ;;  %v3835_v0 = vsel %vm14185_vm0, %v3831_v5, %v3832_v11  ;;  %v3737_v15 = vpop.permute.xlu1 %3736 }
 0x717   : > { %9643 = vmatmul.mubr.msk.bf16.vlgmr.msra.gmra.mxu0 %vm14163_vm3, %v3252_v10  ;;  %3841 = vst.msk [vmem:[#allocation2 + $0x2a0] sm:$0xff] %vm12094_vm9, %v3834_v39  ;;  %v3836_v1 = vsel %vm14168_vm11, %v3835_v0, %v3830_v2  ;;  %v3799_v25 = vpop.permute.xlu0 %3798  ;;  %vm12127_vm8 = vmor %vm3645_vm14, %vm14395_vm15  ;;  %vm14403_vm3 = vcmask 1043464   ;;  %v3739_v4 = vrot.slane %v3737_v15, 4 }
 0x718   : > { %9647 = vmatpush3.bf16.msra.mxu0 %v9851_v47  ;;  %9662 = vmatprep.mubr.msk.bf16.mxu0 %vm14164_vm12, %v10412_v61  ;;  %v3801_v26 = vrot.slane %v3799_v25, 4  ;;  %3844 = vst.msk [vmem:[#allocation2 + $0x2a8] sm:$0xff] %vm12109_vm6, %v3836_v1  ;;  %vm14402_vm15 = vmmov %vm14401_vm4  ;;  %vm14407_vm4 = vcmask 7172  }
 0x719   : > { %9648 = vmatprep.subr.bf16.mxu0 %v10412_v61  ;;  %3810 = vst.msk [vmem:[#allocation2 + $0x240] sm:$0xff] %vm12103_vm1, %v3803_v45  ;;  %vm12146_vm12 = vmor %vm3645_vm14, %vm14403_vm3  ;;  %vm3715_vm3 = vcmask 1043592   ;;  %v3741_v62 = vsel %vm14185_vm0, %v3738_v30, %v3739_v4 }
 0x71a   : > { %v3804_v16 = vsel %vm14185_vm0, %v3800_v13, %v3801_v26  ;;  %3780 = vst.msk [vmem:[#allocation2 + $0x1e0] sm:$0xff] %vm12127_vm8, %v3774_v23  ;;  %vm14410_vm2 = vmmov %vm14406_vm5  ;;  %v3704_v17 = vpop.permute.xlu1 %3703 }
 0x71b   : > { %v3805_v19 = vsel %vm14166_vm13, %v3804_v16, %v3799_v25  ;;  %v3771_v55 = vpop.permute.xlu0 %3770  ;;  %3746 = vst.msk [vmem:[#allocation2 + $0x124] sm:$0xff] %vm12146_vm12, %v3740_v52  ;;  %v3742_v9 = vsel %vm14410_vm2, %v3741_v62, %v3737_v15  ;;  %vm14170_vm13 = vcmask 138240   ;;  %vm12166_vm5 = vmor %vm3645_vm14, %vm3715_vm3  ;;  %v3707_v7 = vrot.slane %v3704_v17, 4 }
 0x71c   : > { %9649 = vmatpush3.bf16.msra.mxu0 %v9855_v29  ;;  %3813 = vst.msk [vmem:[#allocation2 + $0x248] sm:$0xff] %vm12116_vm7, %v3805_v19  ;;  %v3773_v20 = vrot.slane %v3771_v55, 4  ;;  %vm14167_vm3 = vcmask 1042280  }
 0x71d   : > { %9650 = vmatprep.subr.bf16.mxu0 %v10412_v61  ;;  %v3710_v8 = vsel %vm14170_vm13, %v3707_v7, %v3704_v17 }
 0x71e   : > { %v3775_v12 = vsel %vm14185_vm0, %v3772_v56, %v3773_v20  ;;  %3717 = vst.msk [vmem:[#allocation2 + $0xc4] sm:$0xff] %vm12166_vm5, %v3710_v8  ;;  %v3706_v43 = vpop.permute.xlu1 %3705 }
 0x71f   : > { %v3776_v28 = vsel %vm14402_vm15, %v3775_v12, %v3771_v55  ;;  %vm12157_vm15 = vmor %vm14407_vm4, %vm14185_vm0  ;;  %vm3718_vm4 = vcmask 138244   ;;  %v3708_v10 = vrot.slane %v3706_v43, 4 }
 0x720   : > { %9651 = vmatpush3.bf16.msra.mxu0 %v9859_v34  ;;  %3782 = vst.msk [vmem:[#allocation2 + $0x1e8] sm:$0xff] %vm12135_vm10, %v3776_v28  ;;  %vm12174_vm2 = vmor %vm3718_vm4, %vm14185_vm0  ;;  %vm14417_vm4 = vcmask 130048  }
 0x721   : > { %9652 = vmatprep.subr.bf16.mxu0 %v10412_v61  ;;  %3748 = vst.msk [vmem:[#allocation2 + $0x12c] sm:$0xff] %vm12157_vm15, %v3742_v9  ;;  %v3711_v29 = vsel %vm14185_vm0, %v3707_v7, %v3708_v10 }
 0x722   : > { %v3712_v34 = vsel %vm14170_vm13, %v3711_v29, %v3706_v43 }
 0x723   : > { %3720 = vst.msk [vmem:[#allocation2 + $0xcc] sm:$0xff] %vm12174_vm2, %v3712_v34 }
 0x724   : > { %9653 = vmatpush3.bf16.msra.mxu0 %v9863_v37 }
 0x725   : > { %9654 = vmatprep.subr.bf16.mxu0 %v10412_v61 }
 0x728   : > { %9655 = vmatpush3.bf16.msra.mxu0 %v9867_v38 }
 0x729   : > { %9656 = vmatprep.subr.bf16.mxu0 %v10412_v61 }
 0x72a   : > { %v12182_v37 = vld [vmem:[#allocation2 + $0xcc] sm:$0xf] }
 0x72b   : > { %4206 = vst.msk [vmem:[#allocation2 + $0xcc] sm:$0x3] %vm14167_vm3, %v10403_v3  ;;  %vm14418_vm3 = vmmov %vm14417_vm4 }
 0x72c   : > { %9657 = vmatpush3.bf16.msra.mxu0 %v9871_v41 }
 0x72d   : > { %9658 = vmatprep.subr.bf16.mxu0 %v10412_v61 }
 0x730   : > { %9659 = vmatpush3.bf16.msra.mxu0 %v9875_v42 }
 0x731   : > { %9660 = vmatprep.subr.bf16.mxu0 %v10412_v61 }
 0x734   : > { %9661 = vmatpush3.bf16.msra.mxu0 %v9879_v24 }
 0x735   : > { %4129 = vmatprep.subr.bf16.mxu0 %v10403_v3 }
 0x7d7   : > { %v3337_v51 = vpop.f32.mrf.mxu0 }
 0x7d8   : > { %v3338_v54 = vadd.f32 %v3337_v51, %v3266_v49 }
 0x7d9   : > { %v9644_v6 = vpop.f32.mrf.mxu0 }
 0x7da   : > { %v3343_v57 = vmax.f32 %v3338_v54, 0.0 }
 0x7db   : > { %v3340_v46 = vpop.f32.mrf.mxu0 }
 0x7dc   : > { %v3344_v58 = vpack.c.bf16 %v3343_v57, %v3343_v57  ;;  %v3925_v57 = vld [vmem:[%s14415_s16] sm:$0xf]  ;;  %s14451_s16 = sld [smem:[#allocation4_spill]] }
 0x7dd   : > { %v9645_v60 = vpop.f32.mrf.mxu0 }
 0x7de   : > { %3538 = vmatmul.mubr.bf16.vlgmr.msra.gmra.mxu1 %v3344_v58  ;;  %9663 = vmatmul.mubr.bf16.vlgmr.msra.gmra.mxu0 %v3344_v58 }
 0x89e   : > { %v3539_v38 = vpop.f32.mrf.mxu1  ;;  %v3580_v41 = vpop.f32.mrf.mxu0 }
 0x89f   : > { %v9447_v42 = vpack.c.bf16 %v3580_v41, %v3580_v41 }
 0x8a0   : > { %v3541_v44 = vpop.f32.mrf.mxu1  ;;  %v9664_v36 = vpop.f32.mrf.mxu0 }
 0x8a1   : > { %3767 = vst [vmem:[#allocation2 + $0x1bc] sm:$0xf] %v9447_v42  ;;  %v12186_v24 = vpack.c.bf16 %v3541_v44, %v3539_v38  ;;  %3847 = vrot.lane.b32.xlu0 %v9447_v42, %s10420_s7 }
 0x8a2   : > { %v3543_v49 = vpop.f32.mrf.mxu1  ;;  %v3583_v51 = vpop.f32.mrf.mxu0 }
 0x8a3   : > { %3766 = vst [vmem:[#allocation2 + $0x1b4] sm:$0xff] %v12186_v24  ;;  %3845 = vrot.lane.b32.xlu1 %v12186_v24, %s10420_s7  ;;  %v9047_v44 = vcombine.high %v11974_v32, %v12186_v24 }
 0x8a4   : > { %v3544_v54 = vpop.f32.mrf.mxu1  ;;  %v9665_v6 = vpop.f32.mrf.mxu0 }
 0x8a5   : > { %3816 = vrot.lane.b32.xlu0 %v9447_v42, %s10421_s11  ;;  %v9046_v6 = vcombine.low %v11974_v32, %v12186_v24 }
 0x8a7   : > { %3814 = vrot.lane.b32.xlu1 %v12186_v24, %s10421_s11 }
 0x8a9   : > { %3785 = vrot.lane.b32.xlu0 %v9447_v42, %s10407_s10 }
 0x8ab   : > { %3783 = vrot.lane.b32.xlu1 %v12186_v24, %s10407_s10 }
 0x8ad   : > { %3751 = vrot.lane.b32.xlu0 %v9447_v42, %s14172_s1 }
 0x8af   : > { %3672 = vrot.lane.b32.xlu1 %v11974_v32, %s14174_s0 }
 0x8b1   : > { %3723 = vrot.lane.b32.xlu0 %v9447_v42, %s10422_s15 }
 0x8b3   : > { %3674 = vrot.lane.b32.xlu1 %v12034_v50, %s14174_s0 }
 0x8b5   : > { %3692 = vrot.lane.b32.xlu0 %v9447_v42, %s14174_s0 }
 0x8b7   : > { %3631 = vrot.lane.b32.xlu1 %v11974_v32, %s10424_s28 }
 0x8b9   : > { %3661 = vrot.lane.b32.xlu0 %v9447_v42, %s10424_s28 }
 0x8bb   : > { %3633 = vrot.lane.b32.xlu1 %v12034_v50, %s10424_s28 }
 0x8bd   : > { %3860 = vrot.lane.b32.xlu0 %v12034_v50, %s10425_s2  ;;  %v12227_v50 = vld.sshfl [vmem:[%s14416_s26] sm:$0x33 pattern:$0x76325410]  ;;  %s14452_s26 = sld [smem:[#allocation7_spill]] }
 0x8be   : > { %v3939_v46 = vcombine.high %v12227_v50, %v12227_v50 }
 0x8bf   : > { %3858 = vrot.lane.b32.xlu1 %v11974_v32, %s10425_s2 }
 0x8c0   : > { %9062 = vmatprep.mubr.msk.bf16.mxu0 %vm14417_vm4, %v3939_v46  ;;  %9061 = vmatprep.mubr.msk.bf16.mxu1 %vm14418_vm3, %v3939_v46  ;;  %vm14419_vm3 = vcmask 908288  }
 0x8c1   : > { %3749 = vrot.lane.b32.xlu0 %v12186_v24, %s14172_s1  ;;  %vm14420_vm4 = vmmov %vm14419_vm3  ;;  %s9677_s1 = smul.u32 20, %s14699_s23 }
 0x8c3   : > { %3875 = vrot.lane.b32.xlu1 %v12186_v24, %s10425_s2 }
 0x8c5   : > { %3721 = vrot.lane.b32.xlu0 %v12186_v24, %s10422_s15 }
 0x8c7   : > { %3928 = vperm.xlu1 %9752, %v3925_v57   ;;  %v9892_v57 = vld [vmem:[#allocation2 + $0x18c] ss:$48 sps:$4 sm:$0xff]  }
 0x8c9   : > { %3690 = vrot.lane.b32.xlu0 %v12186_v24, %s14174_s0  ;;  %s12410_s0 = scalar_lea.vmem %s14451_s16, %s9677_s1  ;;  %s14454_s1 = sld [smem:[#allocation13_spill]] }
 0x8ca   : > { %s14455_s16 = smov 18  }
 0x8cd   : > { %3659 = vrot.lane.b32.xlu0 %v12186_v24, %s10424_s28 }
 0x8d1   : > { %3877 = vrot.lane.b32.xlu0 %v9447_v42, %s10425_s2 }
 0x913   : > { %v3848_v58 = vpop.permute.xlu0 %3847 }
 0x914   : > { %v3850_v63 = vrot.slane %v3848_v58, 4 }
 0x915   : > { %v3846_v60 = vpop.permute.xlu1 %3845 }
 0x916   : > { %v3849_v2 = vrot.slane %v3846_v60, 4 }
 0x917   : > { %v3817_v5 = vpop.permute.xlu0 %3816 }
 0x918   : > { %v3851_v11 = vsel %vm14168_vm11, %v3849_v2, %v3846_v60  ;;  %v3852_v39 = vsel %vm14185_vm0, %v3849_v2, %v3850_v63  ;;  %v3819_v1 = vrot.slane %v3817_v5, 4 }
 0x919   : > { %v3853_v0 = vsel %vm14168_vm11, %v3852_v39, %v3848_v58  ;;  %3856 = vst.msk [vmem:[#allocation2 + $0x2d0] sm:$0xff] %vm12094_vm9, %v3851_v11  ;;  %v3815_v48 = vpop.permute.xlu1 %3814  ;;  %vm3684_vm9 = vcmask 1043600   ;;  %vm3864_vm11 = vcmask 891904  }
 0x91a   : > { %3857 = vst.msk [vmem:[#allocation2 + $0x2d8] sm:$0xff] %vm12109_vm6, %v3853_v0  ;;  %v3818_v25 = vrot.slane %v3815_v48, 4  ;;  %vm14421_vm6 = vcmask 1039360  }
 0x91b   : > { %v3786_v13 = vpop.permute.xlu0 %3785 }
 0x91c   : > { %v3820_v26 = vsel %vm14419_vm3, %v3818_v25, %v3815_v48  ;;  %v3821_v45 = vsel %vm14185_vm0, %v3818_v25, %v3819_v1  ;;  %v3788_v21 = vrot.slane %v3786_v13, 4  ;;  %vm14422_vm3 = vmmov %vm14421_vm6 }
 0x91d   : > { %v3822_v16 = vsel %vm14420_vm4, %v3821_v45, %v3817_v5  ;;  %3825 = vst.msk [vmem:[#allocation2 + $0x270] sm:$0xff] %vm12103_vm1, %v3820_v26  ;;  %v3784_v18 = vpop.permute.xlu1 %3783  ;;  %vm14169_vm4 = vcmask 146432   ;;  %vm12257_vm1 = vmor %vm3645_vm14, %vm3684_vm9  ;;  %vm14171_vm9 = vcmask 154624  }
 0x91e   : > { %3826 = vst.msk [vmem:[#allocation2 + $0x278] sm:$0xff] %vm12116_vm7, %v3822_v16  ;;  %v3787_v19 = vrot.slane %v3784_v18, 4  ;;  %vm3687_vm7 = vcmask 146436  }
 0x91f   : > { %v12247_v22 = vpop.permute.xlu0 %3751 }
 0x920   : > { %v3789_v55 = vsel %vm14421_vm6, %v3787_v19, %v3784_v18  ;;  %v3790_v56 = vsel %vm14185_vm0, %v3787_v19, %v3788_v21  ;;  %v9880_v23 = vld [vmem:[#allocation2 + $0x2a4] ss:$48 sps:$4 sm:$0xff]   ;;  %v3754_v48 = vrot.slane %v12247_v22, 4 }
 0x921   : > { %v3791_v20 = vsel %vm14422_vm3, %v3790_v56, %v3786_v13  ;;  %3794 = vst.msk [vmem:[#allocation2 + $0x210] sm:$0xff] %vm12127_vm8, %v3789_v55  ;;  %v3673_v40 = vpop.permute.xlu1 %3672  ;;  %v9882_v12 = vld [vmem:[#allocation2 + $0x2a8] ss:$48 sps:$4 sm:$0xff]   ;;  %v9883_v28 = vld [vmem:[#allocation2 + $0x2ac] ss:$48 sps:$4 sm:$0xff]   ;;  %vm12268_vm8 = vmor %vm3687_vm7, %vm14185_vm0  ;;  %vm3648_vm3 = vcmask 154628  }
 0x922   : > { %3795 = vst.msk [vmem:[#allocation2 + $0x218] sm:$0xff] %vm12135_vm10, %v3791_v20  ;;  %v3676_v27 = vrot.slane %v3673_v40, 4  ;;  %4088 = vmatprep.subr.bf16.mxu1 %v9882_v12  ;;  %4130 = vmatpush1.bf16.msra.mxu0 %v9883_v28  ;;  %vm3644_vm10 = vcmask 1043608   ;;  %vm14429_vm7 = vcmask 150528  }
 0x923   : > { %v12261_v30 = vpop.permute.xlu0 %3723  ;;  %4089 = vmatpush1.bf16.msra.mxu1 %v9880_v23  ;;  %4131 = vmatprep.subr.bf16.mxu0 %v10403_v3  ;;  %vm12280_vm6 = vmor %vm3645_vm14, %vm3644_vm10 }
 0x924   : > { %v3679_v53 = vsel %vm14169_vm4, %v3676_v27, %v3673_v40  ;;  %v9884_v52 = vld [vmem:[#allocation2 + $0x244] ss:$48 sps:$4 sm:$0xff]   ;;  %vm12299_vm10 = vmor %vm3648_vm3, %vm14185_vm0  ;;  %v3726_v20 = vrot.slane %v12261_v30, 4 }
 0x925   : > { %3686 = vst.msk [vmem:[#allocation2 + $0x64] sm:$0xff] %vm12257_vm1, %v3679_v53  ;;  %v3675_v31 = vpop.permute.xlu1 %3674  ;;  %v9886_v15 = vld [vmem:[#allocation2 + $0x248] ss:$48 sps:$4 sm:$0xff]   ;;  %v9887_v62 = vld [vmem:[#allocation2 + $0x24c] ss:$48 sps:$4 sm:$0xff]  }
 0x926   : > { %v3677_v4 = vrot.slane %v3675_v31, 4  ;;  %4090 = vmatprep.subr.bf16.mxu1 %v9886_v15  ;;  %4132 = vmatpush1.bf16.msra.mxu0 %v9887_v62 }
 0x927   : > { %v12272_v17 = vpop.permute.xlu0 %3692  ;;  %4091 = vmatpush1.bf16.msra.mxu1 %v9884_v52  ;;  %4133 = vmatprep.subr.bf16.mxu0 %v10403_v3 }
 0x928   : > { %v3680_v7 = vsel %vm14185_vm0, %v3676_v27, %v3677_v4  ;;  %v9888_v10 = vld [vmem:[#allocation2 + $0x1e4] ss:$48 sps:$4 sm:$0xff]   ;;  %v3695_v28 = vrot.slane %v12272_v17, 4 }
 0x929   : > { %v3681_v8 = vsel %vm14169_vm4, %v3680_v7, %v3675_v31  ;;  %v3632_v43 = vpop.permute.xlu1 %3631  ;;  %v9890_v29 = vld [vmem:[#allocation2 + $0x1e8] ss:$48 sps:$4 sm:$0xff]   ;;  %v9891_v41 = vld [vmem:[#allocation2 + $0x1ec] ss:$48 sps:$4 sm:$0xff]   ;;  %vm14432_vm4 = vcmask 1044328  }
 0x92a   : > { %3689 = vst.msk [vmem:[#allocation2 + $0x6c] sm:$0xff] %vm12268_vm8, %v3681_v8  ;;  %v3635_v38 = vrot.slane %v3632_v43, 4  ;;  %4092 = vmatprep.subr.bf16.mxu1 %v9890_v29  ;;  %4134 = vmatpush1.bf16.msra.mxu0 %v9891_v41  ;;  %vm14433_vm3 = vmmov %vm14432_vm4 }
 0x92b   : > { %v12284_v42 = vpop.permute.xlu0 %3661  ;;  %4093 = vmatpush1.bf16.msra.mxu1 %v9888_v10  ;;  %4135 = vmatprep.subr.bf16.mxu0 %v10403_v3  ;;  %vm12314_vm13 = vmor %vm3645_vm14, %vm14433_vm3  ;;  %vm14438_vm14 = vcmask 150528  }
 0x92c   : > { %v12288_v36 = vld [vmem:[#allocation2 + $0x64] sm:$0xff]  ;;  %v3638_v49 = vsel %vm14171_vm9, %v3635_v38, %v3632_v43  ;;  %4094 = vmatprep.subr.bf16.mxu1 %v9047_v44  ;;  %v3664_v7 = vrot.slane %v12284_v42, 4 }
 0x92d   : > { %4197 = vst.msk [vmem:[#allocation2 + $0x64] sm:$0xf] %vm14429_vm7, %v10403_v3  ;;  %v3634_v51 = vpop.permute.xlu1 %3633  ;;  %vm3872_vm7 = vcmask 891908  }
 0x92e   : > { %3647 = vst.msk [vmem:[#allocation2 + $0x4] sm:$0xff] %vm12280_vm6, %v3638_v49  ;;  %v3636_v54 = vrot.slane %v3634_v51, 4  ;;  %4136 = vmatpush1.bf16.msra.mxu0 %v9892_v57 }
 0x92f   : > { %v3861_v58 = vpop.permute.xlu0 %3860  ;;  %4095 = vmatpush1.bf16.msra.mxu1 %v9046_v6  ;;  %4137 = vmatprep.subr.bf16.mxu0 %v10403_v3 }
 0x930   : > { %v3640_v60 = vsel %vm14185_vm0, %v3635_v38, %v3636_v54  ;;  %v3863_v32 = vrot.slane %v3861_v58, 4 }
 0x931   : > { %v12304_v63 = vld [vmem:[#allocation2 + $0x6c] sm:$0xf]  ;;  %v3641_v2 = vsel %vm14171_vm9, %v3640_v60, %v3634_v51  ;;  %v3859_v5 = vpop.permute.xlu1 %3858  ;;  %vm12319_vm9 = vmor %vm3872_vm7, %vm14185_vm0 }
 0x932   : > { %4203 = vst.msk [vmem:[#allocation2 + $0x6c] sm:$0xf] %vm14432_vm4, %v10403_v3  ;;  %v3862_v11 = vrot.slane %v3859_v5, 4  ;;  %vm14439_vm4 = vcmask 7168  }
 0x933   : > { %3650 = vst.msk [vmem:[#allocation2 + $0xc] sm:$0xff] %vm12299_vm10, %v3641_v2  ;;  %v3750_v39 = vpop.permute.xlu0 %3749  ;;  %vm14440_vm7 = vmmov %vm14439_vm4 }
 0x934   : > { %v3865_v25 = vsel %vm3864_vm11, %v3862_v11, %v3859_v5  ;;  %v3866_v13 = vsel %vm14185_vm0, %v3862_v11, %v3863_v32  ;;  %v3753_v26 = vrot.slane %v3750_v39, 4  ;;  %v4174_v5 = vlaneseq  ;;  %v12417_v11 = vld [vmem:[%s12410_s0 + $0x8] sm:$0xff] }
 0x935   : > { %v12324_v1 = vld [vmem:[#allocation2 + $0x4] sm:$0xff]  ;;  %v3867_v45 = vsel %vm3864_vm11, %v3866_v13, %v3861_v58  ;;  %3871 = vst.msk [vmem:[#allocation2 + $0x300] sm:$0xff] %vm12314_vm13, %v3865_v25  ;;  %v3876_v16 = vpop.permute.xlu1 %3875  ;;  %9325 = vst.sshfl [vmem:[#allocation2 + $0xd4] sm:$0xf pattern:$0x76325410] %v12417_v11 }
 0x936   : > { %4195 = vst.msk [vmem:[#allocation2 + $0x4] sm:$0xf] %vm14438_vm14, %v10403_v3  ;;  %v3755_v18 = vsel %vm14439_vm4, %v3753_v26, %v3750_v39  ;;  %v3756_v21 = vsel %vm14185_vm0, %v3753_v26, %v3754_v48  ;;  %v3879_v19 = vrot.slane %v3876_v16, 4  ;;  %vm14441_vm14 = vcmask 138240  }
 0x937   : > { %3874 = vst.msk [vmem:[#allocation2 + $0x308] sm:$0xff] %vm12319_vm9, %v3867_v45  ;;  %v3757_v55 = vsel %vm14440_vm7, %v3756_v21, %v12247_v22  ;;  %v3722_v56 = vpop.permute.xlu0 %3721  ;;  %v12407_v32 = vshrl.u32 %v4174_v5, 7  ;;  %vm4199_vm4 = vcmask 148480   ;;  %vm14177_vm7 = vcmask 281600  }
 0x938   : > { %3760 = vst.msk [vmem:[#allocation2 + $0x154] sm:$0xff] %vm12146_vm12, %v3755_v18  ;;  %v3881_v40 = vsel %vm3864_vm11, %v3879_v19, %v3876_v16  ;;  %v3725_v23 = vrot.slane %v3722_v56, 4  ;;  %vm14442_vm12 = vmmov %vm14441_vm14 }
 0x939   : > { %3761 = vst.msk [vmem:[#allocation2 + $0x15c] sm:$0xff] %vm12157_vm15, %v3757_v55  ;;  %v12413_v24 = vsub.s32 2, %v12407_v32  ;;  %v12421_v39 = vsub.s32 0, %v12407_v32  ;;  %v12433_v48 = vsub.s32 1, %v12407_v32 }
 0x93a   : > { %v12345_v12 = vld [vmem:[#allocation2 + $0xc] sm:$0xf]  ;;  %3886 = vst.msk [vmem:[#allocation2 + $0x330] sm:$0xff] %vm12314_vm13, %v3881_v40  ;;  %v3727_v59 = vsel %vm14441_vm14, %v3725_v23, %v3722_v56  ;;  %v3728_v22 = vsel %vm14185_vm0, %v3725_v23, %v3726_v20  ;;  %vm14443_vm13 = vcmask 146432   ;;  %vm14179_vm14 = vcmask 1041408  }
 0x93b   : > { %4201 = vst.msk [vmem:[#allocation2 + $0xc] sm:$0xf] %vm14433_vm3, %v10403_v3  ;;  %v3729_v27 = vsel %vm14442_vm12, %v3728_v22, %v12261_v30  ;;  %v3691_v33 = vpop.permute.xlu0 %3690  ;;  %vm14444_vm15 = vmmov %vm14443_vm13  ;;  %vm4357_vm12 = vcmask 889860  }
 0x93c   : > { %3732 = vst.msk [vmem:[#allocation2 + $0xf4] sm:$0xff] %vm12166_vm5, %v3727_v59  ;;  %v3694_v53 = vrot.slane %v3691_v33, 4  ;;  %vm14445_vm5 = vcmask 154624  }
 0x93d   : > { %3733 = vst.msk [vmem:[#allocation2 + $0xfc] sm:$0xff] %vm12174_vm2, %v3729_v27  ;;  %vm14446_vm2 = vmmov %vm14445_vm5 }
 0x93e   : > { %v3696_v31 = vsel %vm14443_vm13, %v3694_v53, %v3691_v33  ;;  %v3697_v52 = vsel %vm14185_vm0, %v3694_v53, %v3695_v28  ;;  %6389 = vst.msk [vmem:[#allocation2 + $0x184] sm:$0xf] %vm14177_vm7, %v10403_v3  ;;  %vm14457_vm13 = vcmask 1042280  }
 0x93f   : > { %v9893_v15 = vld [vmem:[#allocation2 + $0x128] ss:$48 sps:$4 sm:$0xff]   ;;  %v9895_v4 = vld [vmem:[#allocation2 + $0x124] ss:$48 sps:$4 sm:$0xff]   ;;  %v3698_v62 = vsel %vm14444_vm15, %v3697_v52, %v12272_v17  ;;  %3701 = vst.msk [vmem:[#allocation2 + $0x94] sm:$0xff] %vm12257_vm1, %v3696_v31  ;;  %v3660_v35 = vpop.permute.xlu0 %3659  ;;  %vm14447_vm1 = vcmask 150528  }
 0x940   : > { %v9896_v30 = vld [vmem:[#allocation2 + $0x12c] ss:$48 sps:$4 sm:$0xff]   ;;  %3702 = vst.msk [vmem:[#allocation2 + $0x9c] sm:$0xff] %vm12268_vm8, %v3698_v62  ;;  %v3663_v47 = vrot.slane %v3660_v35, 4  ;;  %4096 = vmatprep.subr.bf16.mxu1 %v9893_v15  ;;  %vm14448_vm8 = vmmov %vm14433_vm3 }
 0x941   : > { %4097 = vmatpush1.bf16.msra.mxu1 %v9895_v4  ;;  %4138 = vmatpush1.bf16.msra.mxu0 %v9896_v30  ;;  %v9900_v60 = vld [vmem:[#allocation2 + $0x304] ss:$48 sps:$4 sm:$0xff]   ;;  %6387 = vst.msk [vmem:[#allocation2 + $0x124] sm:$0xf] %vm14177_vm7, %v10403_v3  ;;  %6388 = vst.msk [vmem:[#allocation2 + $0x154] sm:$0xf] %vm14177_vm7, %v10403_v3 }
 0x942   : > { %v3665_v8 = vsel %vm14445_vm5, %v3663_v47, %v3660_v35  ;;  %v3666_v43 = vsel %vm14185_vm0, %v3663_v47, %v3664_v7  ;;  %4139 = vmatprep.subr.bf16.mxu0 %v10403_v3  ;;  %v3929_v0 = vpop.permute.xlu1 %3928  ;;  %v4371_v4 = vld [vmem:[%s14454_s1] sm:$0xf]  ;;  %vm4358_vm5 = vmor %vm4357_vm12, %vm14179_vm14  ;;  %vm4266_vm12 = vcmask 1041544   ;;  %s10430_s1 = smov 33  }
 0x943   : > { %v9897_v10 = vld [vmem:[#allocation2 + $0xc8] ss:$48 sps:$4 sm:$0xff]   ;;  %v9899_v14 = vld [vmem:[#allocation2 + $0xc4] ss:$48 sps:$4 sm:$0xff]   ;;  %v3667_v17 = vsel %vm14446_vm2, %v3666_v43, %v12284_v42  ;;  %3670 = vst.msk [vmem:[#allocation2 + $0x34] sm:$0xff] %vm12280_vm6, %v3665_v8  ;;  %v3878_v9 = vpop.permute.xlu0 %3877  ;;  %vm14449_vm6 = vmmov %vm14447_vm1  ;;  %vm4321_vm2 = vcmask 1042296  }
 0x944   : > { %v3900_v29 = vld [vmem:[#allocation2 + $0xfc] sm:$0xf]  ;;  %3671 = vst.msk [vmem:[#allocation2 + $0x3c] sm:$0xff] %vm12299_vm10, %v3667_v17  ;;  %v3880_v38 = vrot.slane %v3878_v9, 4  ;;  %4098 = vmatprep.subr.bf16.mxu1 %v9897_v10  ;;  %vm14453_vm10 = vmmov 0  }
 0x945   : > { %v9042_v41 = vcombine.low %v12182_v37, %v3900_v29  ;;  %4099 = vmatpush1.bf16.msra.mxu1 %v9899_v14  ;;  %4200 = vst.msk [vmem:[#allocation2 + $0xc4] sm:$0x3] %vm4199_vm4, %v10403_v3 }
 0x946   : > { %v3895_v44 = vld [vmem:[#allocation2 + $0x94] sm:$0xff]  ;;  %v3882_v49 = vsel %vm14185_vm0, %v3879_v19, %v3880_v38  ;;  %6386 = vst.msk [vmem:[#allocation2 + $0xf4] sm:$0xf] %vm14177_vm7, %v10403_v3 }
 0x947   : > { %4140 = vmatpush1.bf16.msra.mxu0 %v9042_v41  ;;  %v3896_v51 = vld [vmem:[#allocation2 + $0x9c] sm:$0xf]  ;;  %4198 = vst.msk [vmem:[#allocation2 + $0x94] sm:$0xf] %vm14447_vm1, %v10403_v3  ;;  %v3883_v34 = vsel %vm3864_vm11, %v3882_v49, %v3878_v9  ;;  %v9038_v42 = vcombine.high %v12288_v36, %v3895_v44  ;;  %v9037_v54 = vcombine.low %v12288_v36, %v3895_v44  ;;  %vm4324_vm1 = vcmask 906244  }
 0x948   : > { %4141 = vmatprep.subr.bf16.mxu0 %v10403_v3  ;;  %4204 = vst.msk [vmem:[#allocation2 + $0x9c] sm:$0xf] %vm14448_vm8, %v10403_v3  ;;  %v9039_v37 = vcombine.low %v12304_v63, %v3896_v51 }
 0x949   : > { %3887 = vst.msk [vmem:[#allocation2 + $0x338] sm:$0xff] %vm12319_vm9, %v3883_v34  ;;  %4100 = vmatprep.subr.bf16.mxu1 %v9038_v42  ;;  %vm14450_vm9 = vmmov %vm14433_vm3  ;;  %vm14176_vm3 = vcmask 1045508   ;;  %v12473_v42 = vld [vmem:[%s12410_s0] sm:$0xff] }
 0x94a   : > { %v3891_v6 = vld [vmem:[#allocation2 + $0x34] sm:$0xff]  ;;  %4101 = vmatpush1.bf16.msra.mxu1 %v9037_v54  ;;  %vm4355_vm15 = vmor %vm14176_vm3, %vm14457_vm13  ;;  %vm14460_vm13 = vcmask 154624  }
 0x94b   : > { %4142 = vmatpush1.bf16.msra.mxu0 %v9039_v37  ;;  %4196 = vst.msk [vmem:[#allocation2 + $0x34] sm:$0xf] %vm14449_vm6, %v10403_v3  ;;  %v9035_v57 = vcombine.high %v12324_v1, %v3891_v6  ;;  %v9034_v36 = vcombine.low %v12324_v1, %v3891_v6  ;;  %v3892_v46 = vld [vmem:[#allocation2 + $0x3c] sm:$0xf]  ;;  %vm4322_vm8 = vmor %vm14176_vm3, %vm4321_vm2  ;;  %vm4251_vm2 = vcmask 1043458  }
 0x94c   : > { %4143 = vmatprep.subr.bf16.mxu0 %v10403_v3  ;;  %v9036_v58 = vcombine.low %v12345_v12, %v3892_v46  ;;  %4202 = vst.msk [vmem:[#allocation2 + $0x3c] sm:$0xf] %vm14450_vm9, %v10403_v3  ;;  %vm4325_vm6 = vmor %vm4324_vm1, %vm14179_vm14  ;;  %vm4226_vm9 = vcmask 1041560   ;;  %vm4304_vm1 = vcmask 1044474  }
 0x94d   : > { %4102 = vmatprep.subr.bf16.mxu1 %v9035_v57  ;;  %v12483_v57 = vcombine.high %v12473_v42, %v12473_v42 }
 0x94e   : > { %4103 = vmatpush1.bf16.msra.mxu1 %v9034_v36 }
 0x94f   : > { %4144 = vmatpush1.bf16.msra.mxu0 %v9036_v58 }
 0x950   : > { %4159 = vmatprep.subr.bf16.mxu0 %v10403_v3  ;;  %v9902_v63 = vld [vmem:[#allocation2 + $0x308] ss:$48 sps:$4 sm:$0xff]   ;;  %v9903_v2 = vld [vmem:[#allocation2 + $0x30c] ss:$48 sps:$4 sm:$0xff]  }
 0x951   : > { %4118 = vmatprep.subr.bf16.mxu1 %v9902_v63 }
 0x952   : > { %4119 = vmatpush2.bf16.msra.mxu1 %v9900_v60 }
 0x953   : > { %4160 = vmatpush2.bf16.msra.mxu0 %v9903_v2 }
 0x954   : > { %9666 = vmatprep.subr.bf16.mxu0 %v10412_v61 }
 0x955   : > { %4121 = vmatmul.mubr.bf16.vlgmr.msra.gmra.mxu1 %v12227_v50 }
 0x956   : > { %4162 = vmatmul.mubr.bf16.vlgmr.msra.gmra.mxu0 %v12227_v50  ;;  %4462 = vmatprep.mubr.bf16.mxu1 %v10403_v3  ;;  %v4172_v50 = vld [vmem:[%s14452_s26] sm:$0x7]  ;;  %s10429_s26 = smov 94  }
 0x957   : > { %9672 = vmatprep.mubr.msk.bf16.mxu0 %vm14453_vm10, %v10412_v61  ;;  %v4185_v26 = vrot.slane %v4172_v50, %v12413_v24  ;;  %v4177_v16 = vrot.slane %v4172_v50, %v12421_v39  ;;  %v4181_v20 = vrot.slane %v4172_v50, %v12433_v48  ;;  %vm14458_vm10 = vcmask 908288  }
 0x958   : > { %vm14459_vm4 = vmmov %vm14458_vm10 }
 0xa15   : > { %v4122_v25 = vpop.f32.mrf.mxu1 }
 0xa16   : > { %v4163_v1 = vpop.f32.mrf.mxu0  ;;  %v4123_v45 = vadd.f32 %v4122_v25, %v3929_v0 }
 0xa17   : > { %v4164_v13 = vadd.f32 %v4163_v1, %v3929_v0  ;;  %v4124_v21 = vpop.f32.mrf.mxu1 }
 0xa18   : > { %v4165_v18 = vpop.f32.mrf.mxu0  ;;  %v4169_v55 = vmax.f32 %v4123_v45, 0.0  ;;  %v4125_v56 = vadd.f32 %v4124_v21, %v3929_v0 }
 0xa19   : > { %v4171_v19 = vmax.f32 %v4164_v13, 0.0  ;;  %v4126_v23 = vpop.f32.mrf.mxu1 }
 0xa1a   : > { %v4166_v40 = vpop.f32.mrf.mxu0  ;;  %v4170_v59 = vmax.f32 %v4125_v56, 0.0  ;;  %v4189_v28 = vmul.f32 %v4177_v16, %v4169_v55 }
 0xa1b   : > { %v4191_v12 = vmul.f32 %v4185_v26, %v4171_v19  ;;  %v4127_v27 = vpop.f32.mrf.mxu1 }
 0xa1c   : > { %v4167_v22 = vpop.f32.mrf.mxu0  ;;  %v4190_v53 = vmul.f32 %v4181_v20, %v4170_v59 }
 0xa1d   : > { %v9449_v33 = vpack.c.bf16 %v4191_v12, %v4191_v12 }
 0xa1e   : > { %v9448_v31 = vpack.c.bf16 %v4190_v53, %v4189_v28 }
 0xa1f   : > { %4292 = vst [vmem:[#allocation2 + $0x6c] sm:$0x3] %v9449_v33  ;;  %4346 = vrot.lane.b32.xlu1 %v9449_v33, %s10425_s2  ;;  %v4235_v52 = vrot.slane %v9449_v33, 6 }
 0xa20   : > { %4291 = vst [vmem:[#allocation2 + $0x64] sm:$0x33] %v9448_v31  ;;  %4344 = vrot.lane.b32.xlu0 %v9448_v31, %s10425_s2  ;;  %v4234_v15 = vrot.slane %v9448_v31, 6  ;;  %s14456_s2 = smov 1  }
 0xa23   : > { %4312 = vrot.lane.b32.xlu1 %v9449_v33, %s10421_s11 }
 0xa24   : > { %4310 = vrot.lane.b32.xlu0 %v9448_v31, %s10421_s11  ;;  %s14481_s11 = sld [smem:[#allocation12_spill]] }
 0xa27   : > { %4295 = vrot.lane.b32.xlu1 %v4235_v52, %s10407_s10 }
 0xa28   : > { %4215 = vrot.lane.b32.xlu0 %v9448_v31, %s10424_s28 }
 0xa2b   : > { %4329 = vrot.lane.b32.xlu1 %v4235_v52, %s10420_s7 }
 0xa2c   : > { %4255 = vrot.lane.b32.xlu0 %v9448_v31, %s10422_s15 }
 0xa2f   : > { %4238 = vrot.lane.b32.xlu1 %v4235_v52, %s14455_s16 }
 0xa30   : > { %4293 = vrot.lane.b32.xlu0 %v4234_v15, %s10407_s10 }
 0xa33   : > { %4236 = vrot.lane.b32.xlu1 %v4234_v15, %s14455_s16  ;;  %s10431_s16 = smov 35  }
 0xa34   : > { %4327 = vrot.lane.b32.xlu0 %v4234_v15, %s10420_s7  ;;  %s14479_s7 = sld [smem:[#allocation6_spill]] }
 0xa37   : > { %4272 = vrot.lane.b32.xlu1 %v4234_v15, %s14456_s2 }
 0xa38   : > { %4217 = vrot.lane.b32.xlu0 %v9449_v33, %s10424_s28  ;;  %s10428_s28 = smov 95  }
 0xa3a   : > { %v9936_v36 = vld [vmem:[%s14479_s7 + $0x734] ss:$40 sps:$4 sm:$0xff]  }
 0xa3b   : > { %4274 = vrot.lane.b32.xlu1 %v4235_v52, %s14456_s2 }
 0xa3c   : > { %4257 = vrot.lane.b32.xlu0 %v9449_v33, %s10422_s15  ;;  %s10427_s15 = smov 93  }
 0xa40   : > { %4374 = vperm.xlu0 %9751, %v4371_v4  }
 0xa91   : > { %v4347_v62 = vpop.permute.xlu1 %4346 }
 0xa92   : > { %v4345_v35 = vpop.permute.xlu0 %4344  ;;  %v4349_v30 = vrot.slane %v4347_v62, 4 }
 0xa93   : > { %v4348_v7 = vrot.slane %v4345_v35, 4 }
 0xa95   : > { %v4313_v47 = vpop.permute.xlu1 %4312  ;;  %v4350_v8 = vsel %vm3864_vm11, %v4348_v7, %v4345_v35  ;;  %v4351_v43 = vsel %vm14185_vm0, %v4348_v7, %v4349_v30 }
 0xa96   : > { %v4352_v10 = vsel %vm3864_vm11, %v4351_v43, %v4347_v62  ;;  %4356 = vst.msk [vmem:[#allocation2 + $0xc0] sm:$0x33] %vm4355_vm15, %v4350_v8  ;;  %v4311_v14 = vpop.permute.xlu0 %4310  ;;  %v4315_v17 = vrot.slane %v4313_v47, 4  ;;  %vm4228_vm11 = vmor %vm14176_vm3, %vm4226_vm9  ;;  %vm4247_vm9 = vcmask 1043602  }
 0xa97   : > { %4359 = vst.msk [vmem:[#allocation2 + $0xc8] sm:$0x33] %vm4358_vm5, %v4352_v10  ;;  %v4314_v9 = vrot.slane %v4311_v14, 4  ;;  %vm12488_vm15 = vmor %vm14176_vm3, %vm4266_vm12  ;;  %vm14182_vm5 = vcmask 1047558   ;;  %vm4338_vm12 = vcmask 1044338  }
 0xa99   : > { %v4296_v29 = vpop.permute.xlu1 %4295  ;;  %v4316_v38 = vsel %vm14458_vm10, %v4314_v9, %v4311_v14  ;;  %v4317_v41 = vsel %vm14185_vm0, %v4314_v9, %v4315_v17  ;;  %vm12505_vm10 = vmor %vm14182_vm5, %vm4304_vm1 }
 0xa9a   : > { %v4318_v44 = vsel %vm14459_vm4, %v4317_v41, %v4313_v47  ;;  %4323 = vst.msk [vmem:[#allocation2 + $0x90] sm:$0x33] %vm4322_vm8, %v4316_v38  ;;  %v12466_v49 = vpop.permute.xlu0 %4215  ;;  %vm14463_vm8 = vcmask 138240   ;;  %v4298_v25 = vrot.slane %v4296_v29, 4  ;;  %vm4252_vm4 = vcmask 146438  }
 0xa9b   : > { %4326 = vst.msk [vmem:[#allocation2 + $0x98] sm:$0x33] %vm4325_vm6, %v4318_v44  ;;  %v4219_v51 = vrot.slane %v12466_v49, 4  ;;  %vm4307_vm6 = vcmask 1039366   ;;  %vm4253_vm3 = vmor %vm4252_vm4, %vm4251_vm2  ;;  %vm14470_vm4 = vcmask 900096  }
 0xa9d   : > { %v12470_v34 = vpop.permute.xlu1 %4329  ;;  %v4221_v54 = vsel %vm14460_vm13, %v4219_v51, %v12466_v49  ;;  %vm4341_vm13 = vcmask 900102  }
 0xa9e   : > { %v4369_v37 = vld [vmem:[#allocation2 + $0xc4] sm:$0x33]  ;;  %4229 = vst.msk [vmem:[#allocation2 + $0x4] sm:$0x33] %vm4228_vm11, %v4221_v54  ;;  %v12479_v6 = vpop.permute.xlu0 %4255  ;;  %vm4308_vm11 = vmor %vm4307_vm6, %vm4251_vm2  ;;  %vm4283_vm6 = vcmask 1043466   ;;  %v4332_v20 = vrot.slane %v12470_v34, 4 }
 0xa9f   : > { %6385 = vst.msk [vmem:[#allocation2 + $0xc4] sm:$0xf] %vm14177_vm7, %v10403_v3  ;;  %v4259_v46 = vrot.slane %v12479_v6, 4  ;;  %v9072_v58 = vcombine.high %v4369_v37, %v4369_v37  ;;  %v9071_v60 = vcombine.low %v4369_v37, %v4369_v37  ;;  %v9904_v63 = vld [vmem:[#allocation2 + $0xcc] ss:$0 sps:$4 sm:$0x33]  }
 0xaa0   : > { %9323 = vst.sshfl [vmem:[#allocation2 + $0xc4] sm:$0xf pattern:$0x76325410] %v12473_v42  ;;  %v4428_v0 = vsel %vm14179_vm14, %v9904_v63, 0  ;;  %vm14468_vm7 = vcmask 146432  }
 0xaa1   : > { %v4239_v2 = vpop.permute.xlu1 %4238  ;;  %9324 = vst.sshfl [vmem:[#allocation2 + $0xcc] sm:$0xf pattern:$0x76325410] %v12483_v57  ;;  %v4261_v5 = vsel %vm14463_vm8, %v4259_v46, %v12479_v6  ;;  %9074 = vmatprep.subr.msk.bf16.mxu1 %vm14179_vm14, %v9072_v58  ;;  %v4422_v50 = vsel %vm14179_vm14, %v9071_v60, 0  ;;  %9667 = vmatpush3.bf16.msra.mxu0 %v4428_v0  ;;  %vm4249_vm8 = vmor %vm14182_vm5, %vm4247_vm9 }
 0xaa2   : > { %4268 = vst.msk [vmem:[#allocation2 + $0x34] sm:$0x33] %vm12488_vm15, %v4261_v5  ;;  %v4294_v1 = vpop.permute.xlu0 %4293  ;;  %4441 = vmatpush1.bf16.msra.mxu1 %v4422_v50  ;;  %9668 = vmatprep.subr.bf16.mxu0 %v10412_v61  ;;  %v4241_v16 = vrot.slane %v4239_v2, 4  ;;  %vm14466_vm15 = vcmask 1039360   ;;  %vm4339_vm9 = vmor %vm14182_vm5, %vm4338_vm12  ;;  %v9909_v54 = vld [vmem:[%s14479_s7 + $0x234] ss:$40 sps:$4 sm:$0xff]  }
 0xaa3   : > { %v4297_v26 = vrot.slane %v4294_v1, 4  ;;  %vm14467_vm1 = vmmov %vm14466_vm15  ;;  %v4360_v6 = vld [vmem:[%s14481_s11] sm:$0x3]  ;;  %v9907_v58 = vld [vmem:[%s14479_s7 + $0x230] ss:$40 sps:$4 sm:$0xff]   ;;  %s10432_s11 = smov 34  }
 0xaa4   : > { %vm14473_vm12 = vmmov %vm14470_vm4  ;;  %v9912_v60 = vld [vmem:[%s14479_s7 + $0x1e4] ss:$40 sps:$4 sm:$0xff]   ;;  %v9915_v5 = vld [vmem:[%s14479_s7 + $0x194] ss:$40 sps:$4 sm:$0xff]  }
 0xaa5   : > { %v4237_v45 = vpop.permute.xlu1 %4236  ;;  %v4299_v18 = vsel %vm14466_vm15, %v4297_v26, %v4294_v1  ;;  %v4300_v21 = vsel %vm14185_vm0, %v4297_v26, %v4298_v25  ;;  %vm14469_vm15 = vmmov %vm14468_vm7  ;;  %v9942_v63 = vld [vmem:[%s14479_s7 + $0x6e4] ss:$40 sps:$4 sm:$0xff]   ;;  %v9940_v50 = vld [vmem:[%s14479_s7 + $0x6e0] ss:$40 sps:$4 sm:$0xff]  }
 0xaa6   : > { %v4240_v19 = vrot.slane %v4237_v45, 4  ;;  %v4301_v55 = vsel %vm14467_vm1, %v4300_v21, %v4296_v29  ;;  %4306 = vst.msk [vmem:[#allocation2 + $0x60] sm:$0xcc] %vm12505_vm10, %v4299_v18  ;;  %v4328_v56 = vpop.permute.xlu0 %4327  ;;  %vm4342_vm1 = vmor %vm4341_vm13, %vm4251_vm2  ;;  %vm14474_vm13 = vcmask 7168   ;;  %v9948_v0 = vld [vmem:[%s14479_s7 + $0x694] ss:$40 sps:$4 sm:$0xff]  }
 0xaa7   : > { %4309 = vst.msk [vmem:[#allocation2 + $0x68] sm:$0xcc] %vm4308_vm11, %v4301_v55  ;;  %v4331_v12 = vrot.slane %v4328_v56, 4  ;;  %vm4231_vm11 = vcmask 152580   ;;  %v9913_v1 = vld [vmem:[%s14479_s7 + $0x190] ss:$40 sps:$4 sm:$0xff]  }
 0xaa8   : > { %v4242_v40 = vsel %vm14468_vm7, %v4240_v19, %v4237_v45  ;;  %v4243_v23 = vsel %vm14185_vm0, %v4240_v19, %v4241_v16  ;;  %vm12529_vm7 = vmor %vm14182_vm5, %vm4283_vm6  ;;  %vm4269_vm6 = vcmask 136196   ;;  %v9918_v25 = vld [vmem:[%s14479_s7 + $0x144] ss:$40 sps:$4 sm:$0xff]   ;;  %v9946_v26 = vld [vmem:[%s14479_s7 + $0x690] ss:$40 sps:$4 sm:$0xff]  }
 0xaa9   : > { %v4244_v59 = vsel %vm14469_vm15, %v4243_v23, %v4239_v2  ;;  %4250 = vst.msk [vmem:[#allocation2 + $0x4] sm:$0xcc] %vm4249_vm8, %v4242_v40  ;;  %v4273_v22 = vpop.permute.xlu1 %4272  ;;  %v4333_v27 = vsel %vm14470_vm4, %v4331_v12, %v4328_v56  ;;  %v4334_v33 = vsel %vm14185_vm0, %v4331_v12, %v4332_v20  ;;  %vm4232_vm8 = vmor %vm4231_vm11, %vm14179_vm14  ;;  %v9910_v2 = vld [vmem:[%s14479_s7 + $0x1e0] ss:$40 sps:$4 sm:$0xff]   ;;  %v9954_v45 = vld [vmem:[%s14479_s7 + $0x644] ss:$40 sps:$4 sm:$0xff]  }
 0xaaa   : > { %4254 = vst.msk [vmem:[#allocation2 + $0xc] sm:$0xcc] %vm4253_vm3, %v4244_v59  ;;  %v4276_v53 = vrot.slane %v4273_v22, 4  ;;  %v4335_v31 = vsel %vm14473_vm12, %v4334_v33, %v12470_v34  ;;  %v4218_v52 = vpop.permute.xlu0 %4217  ;;  %vm4286_vm3 = vcmask 7174   ;;  %vm14478_vm11 = vmmov %vm14474_vm13  ;;  %v9916_v16 = vld [vmem:[%s14479_s7 + $0x140] ss:$40 sps:$4 sm:$0xff]  }
 0xaab   : > { %4340 = vst.msk [vmem:[#allocation2 + $0x90] sm:$0xcc] %vm4339_vm9, %v4333_v27  ;;  %v4220_v4 = vrot.slane %v4218_v52, 4  ;;  %vm14475_vm9 = vcmask 154624   ;;  %vm4287_vm15 = vmor %vm4286_vm3, %vm4251_vm2  ;;  %vm14480_vm2 = vcmask 138240  }
 0xaac   : > { %4343 = vst.msk [vmem:[#allocation2 + $0x98] sm:$0xcc] %vm4342_vm1, %v4335_v31  ;;  %v4278_v15 = vsel %vm14474_vm13, %v4276_v53, %v4273_v22  ;;  %vm14476_vm1 = vcmask 281600   ;;  %vm4270_vm12 = vmor %vm4269_vm6, %vm14179_vm14  ;;  %v9921_v18 = vld [vmem:[%s14479_s7 + $0xf4] ss:$40 sps:$4 sm:$0xff]   ;;  %vm14180_vm6 = vcmask 1044200  }
 0xaad   : > { %4285 = vst.msk [vmem:[#allocation2 + $0x34] sm:$0xcc] %vm12529_vm7, %v4278_v15  ;;  %v4275_v62 = vpop.permute.xlu1 %4274  ;;  %v4222_v35 = vsel %vm14185_vm0, %v4219_v51, %v4220_v4  ;;  %vm14477_vm4 = vmmov %vm14476_vm1  ;;  %v9952_v21 = vld [vmem:[%s14479_s7 + $0x640] ss:$40 sps:$4 sm:$0xff]   ;;  %v9960_v19 = vld [vmem:[%s14479_s7 + $0x5f4] ss:$40 sps:$4 sm:$0xff]  }
 0xaae   : > { %v4277_v30 = vrot.slane %v4275_v62, 4  ;;  %v4365_v7 = vld [vmem:[#allocation2 + $0x64] sm:$0xff]  ;;  %v4223_v47 = vsel %vm14475_vm9, %v4222_v35, %v4218_v52  ;;  %v4258_v8 = vpop.permute.xlu0 %4257  ;;  %vm14482_vm13 = vmmov %vm14476_vm1  ;;  %v9919_v55 = vld [vmem:[%s14479_s7 + $0xf0] ss:$40 sps:$4 sm:$0xff]   ;;  %6395 = vst.msk [vmem:[#allocation2 + $0xe8] sm:$0xf] %vm14180_vm6, %v10403_v3 }
 0xaaf   : > { %6383 = vst.msk [vmem:[#allocation2 + $0x64] sm:$0xf] %vm14476_vm1, %v10403_v3  ;;  %v4260_v14 = vrot.slane %v4258_v8, 4  ;;  %vm14483_vm3 = vmmov %vm14476_vm1  ;;  %v9924_v56 = vld [vmem:[%s14479_s7 + $0xa4] ss:$40 sps:$4 sm:$0xff]   ;;  %vm14181_vm9 = vcmask 1042152  }
 0xab0   : > { %v4361_v43 = vld [vmem:[#allocation2 + $0x4] sm:$0xff]  ;;  %4233 = vst.msk [vmem:[#allocation2 + $0xc] sm:$0x33] %vm4232_vm8, %v4223_v47  ;;  %v4279_v10 = vsel %vm14185_vm0, %v4276_v53, %v4277_v30  ;;  %vm14178_vm8 = vcmask 293888   ;;  %v9958_v20 = vld [vmem:[%s14479_s7 + $0x5f0] ss:$40 sps:$4 sm:$0xff]  }
 0xab1   : > { %6381 = vst.msk [vmem:[#allocation2 + $0x4] sm:$0xf] %vm14477_vm4, %v10403_v3  ;;  %v4280_v17 = vsel %vm14478_vm11, %v4279_v10, %v4275_v62  ;;  %v4262_v9 = vsel %vm14185_vm0, %v4259_v46, %v4260_v14  ;;  %v9966_v40 = vld [vmem:[%s14479_s7 + $0x5a4] ss:$40 sps:$4 sm:$0xff]   ;;  %v9922_v23 = vld [vmem:[%s14479_s7 + $0xa0] ss:$40 sps:$4 sm:$0xff]  }
 0xab2   : > { %4288 = vst.msk [vmem:[#allocation2 + $0x3c] sm:$0xcc] %vm4287_vm15, %v4280_v17  ;;  %v4263_v38 = vsel %vm14480_vm2, %v4262_v9, %v4258_v8  ;;  %v9927_v12 = vld [vmem:[%s14479_s7 + $0x54] ss:$40 sps:$4 sm:$0xff]   ;;  %v9964_v59 = vld [vmem:[%s14479_s7 + $0x5a0] ss:$40 sps:$4 sm:$0xff]  }
 0xab3   : > { %v4367_v29 = vld [vmem:[#allocation2 + $0x94] sm:$0xff]  ;;  %v9905_v41 = vld [vmem:[#allocation2 + $0x6c] ss:$48 sps:$4 sm:$0xff]   ;;  %4271 = vst.msk [vmem:[#allocation2 + $0x3c] sm:$0x33] %vm4270_vm12, %v4263_v38  ;;  %vm14484_vm15 = vcmask 1045508  }
 0xab4   : > { %6384 = vst.msk [vmem:[#allocation2 + $0x94] sm:$0xf] %vm14482_vm13, %v10403_v3  ;;  %v4363_v44 = vld [vmem:[#allocation2 + $0x34] sm:$0xff]  ;;  %v9069_v49 = vcombine.high %v4365_v7, %v4367_v29  ;;  %v9068_v51 = vcombine.low %v4365_v7, %v4367_v29  ;;  %9669 = vmatpush3.bf16.msra.mxu0 %v9905_v41  ;;  %v9930_v27 = vld [vmem:[%s14479_s7 + $0x4] ss:$40 sps:$4 sm:$0xff]   ;;  %vm12840_vm1 = vmor %vm14484_vm15, %vm14181_vm9  ;;  %vm14188_vm4 = vcmask 760832  }
 0xab5   : > { %6382 = vst.msk [vmem:[#allocation2 + $0x34] sm:$0xf] %vm14483_vm3, %v10403_v3  ;;  %v9066_v34 = vcombine.high %v4361_v43, %v4363_v44  ;;  %9670 = vmatprep.subr.bf16.mxu0 %v10412_v61  ;;  %v9065_v37 = vcombine.low %v4361_v43, %v4363_v44  ;;  %v9934_v61 = vld [vmem:[%s14479_s7 + $0x730] ss:$40 sps:$4 sm:$0xff]   ;;  %v9928_v33 = vld [vmem:[%s14479_s7] ss:$40 sps:$4 sm:$0xff]   ;;  %vm14487_vm12 = vmmov %vm14484_vm15 }
 0xab6   : > { %4442 = vmatprep.subr.bf16.mxu1 %v9069_v49  ;;  %v9925_v22 = vld [vmem:[%s14479_s7 + $0x50] ss:$40 sps:$4 sm:$0xff]   ;;  %v9933_v53 = vld [vmem:[%s14479_s7 + $0x4b4] ss:$40 sps:$4 sm:$0xff]   ;;  %v9939_v52 = vld [vmem:[%s14479_s7 + $0x464] ss:$40 sps:$4 sm:$0xff]  }
 0xab7   : > { %4443 = vmatpush1.bf16.msra.mxu1 %v9068_v51  ;;  %v9931_v31 = vld [vmem:[%s14479_s7 + $0x4b0] ss:$40 sps:$4 sm:$0xff]   ;;  %v9937_v15 = vld [vmem:[%s14479_s7 + $0x460] ss:$40 sps:$4 sm:$0xff]   ;;  %v9945_v4 = vld [vmem:[%s14479_s7 + $0x414] ss:$40 sps:$4 sm:$0xff]  }
 0xab8   : > { %4444 = vmatprep.subr.bf16.mxu1 %v9066_v34  ;;  %v9943_v62 = vld [vmem:[%s14479_s7 + $0x410] ss:$40 sps:$4 sm:$0xff]   ;;  %v9951_v35 = vld [vmem:[%s14479_s7 + $0x3c4] ss:$40 sps:$4 sm:$0xff]   ;;  %v9949_v30 = vld [vmem:[%s14479_s7 + $0x3c0] ss:$40 sps:$4 sm:$0xff]  }
 0xab9   : > { %v9957_v7 = vld [vmem:[%s14479_s7 + $0x374] ss:$40 sps:$4 sm:$0xff]   ;;  %v9955_v47 = vld [vmem:[%s14479_s7 + $0x370] ss:$40 sps:$4 sm:$0xff]   ;;  %v9963_v8 = vld [vmem:[%s14479_s7 + $0x324] ss:$40 sps:$4 sm:$0xff]  }
 0xaba   : > { %v9906_v46 = vld [vmem:[#allocation2 + $0xc] ss:$48 sps:$4 sm:$0xff]   ;;  %v9961_v43 = vld [vmem:[%s14479_s7 + $0x320] ss:$40 sps:$4 sm:$0xff]   ;;  %v9970_v17 = vld [vmem:[%s14479_s7 + $0x550] ss:$40 sps:$4 sm:$0xff]  }
 0xabb   : > { %4445 = vmatpush1.bf16.msra.mxu1 %v9065_v37  ;;  %9671 = vmatpush3.bf16.msra.mxu0 %v9906_v46  ;;  %v9972_v10 = vld [vmem:[%s14479_s7 + $0x554] ss:$40 sps:$4 sm:$0xff]   ;;  %v9967_v9 = vld [vmem:[%s14479_s7 + $0x2d0] ss:$40 sps:$4 sm:$0xff]   ;;  %v9978_v29 = vld [vmem:[%s14479_s7 + $0x504] ss:$40 sps:$4 sm:$0xff]  }
 0xabc   : > { %5957 = vmatprep.subr.bf16.mxu1 %v9909_v54  ;;  %5998 = vmatprep.subr.bf16.mxu0 %v9936_v36  ;;  %v9969_v14 = vld [vmem:[%s14479_s7 + $0x2d4] ss:$40 sps:$4 sm:$0xff]   ;;  %v9975_v38 = vld [vmem:[%s14479_s7 + $0x284] ss:$40 sps:$4 sm:$0xff]   ;;  %v9976_v41 = vld [vmem:[%s14479_s7 + $0x500] ss:$40 sps:$4 sm:$0xff]  }
 0xabd   : > { %v9973_v44 = vld [vmem:[%s14479_s7 + $0x280] ss:$40 sps:$4 sm:$0xff]   ;;  %v9981_v49 = vld [vmem:[%s14479_s7 + $0x23c] ss:$40 sps:$4 sm:$0xff]   ;;  %v10426_v34 = vmov 1983009808   ;;  %vm14490_vm15 = vmmov %vm14487_vm12 }
 0xabe   : > { %9075 = vmatmul.mubr.msk.bf16.vlgmr.msra.gmra.mxu1 %vm14178_vm8, %v4360_v6  ;;  %9673 = vmatmul.mubr.msk.bf16.vlgmr.msra.gmra.mxu0 %vm14178_vm8, %v4360_v6  ;;  %v9984_v51 = vld [vmem:[%s14479_s7 + $0x73c] ss:$40 sps:$4 sm:$0xff]   ;;  %v6405_v54 = vunpack.c.l.s4 %v10426_v34  ;;  %6391 = vst.msk [vmem:[#allocation2 + $0x28] sm:$0xf] %vm14180_vm6, %v10403_v3  ;;  %6392 = vst.msk [vmem:[#allocation2 + $0x58] sm:$0xf] %vm14180_vm6, %v10403_v3 }
 0xabf   : > { %5958 = vmatpush1.bf16.msra.mxu1 %v9907_v58  ;;  %5999 = vmatpush1.bf16.msra.mxu0 %v9934_v61  ;;  %v4375_v58 = vpop.permute.xlu0 %4374  ;;  %v10032_v34 = vld [vmem:[%s14479_s7 + $0x244] ss:$40 sps:$4 sm:$0xff]   ;;  %6393 = vst.msk [vmem:[#allocation2 + $0x88] sm:$0xf] %vm14180_vm6, %v10403_v3  ;;  %6394 = vst.msk [vmem:[#allocation2 + $0xb8] sm:$0xf] %vm14180_vm6, %v10403_v3 }
 0xac0   : > { %5959 = vmatprep.subr.bf16.mxu1 %v9912_v60  ;;  %6030 = vmatprep.mubr.bf16.mxu0 %v10403_v3  ;;  %v6406_v37 = vunpack.c.0.s8 %v6405_v54  ;;  %v10027_v54 = vld [vmem:[%s14479_s7 + $0x4b8] ss:$40 sps:$4 sm:$0xff]   ;;  %6396 = vst.msk [vmem:[#allocation2 + $0x118] sm:$0xf] %vm14180_vm6, %v10403_v3  ;;  %6397 = vst.msk [vmem:[#allocation2 + $0x148] sm:$0xf] %vm14180_vm6, %v10403_v3 }
 0xac1   : > { %6000 = vmatprep.subr.bf16.mxu0 %v9942_v63  ;;  %6398 = vst.msk [vmem:[#allocation2 + $0x178] sm:$0xf] %vm14180_vm6, %v10403_v3  ;;  %6399 = vst.msk [vmem:[#allocation2 + $0x1a8] sm:$0xf] %vm14180_vm6, %v10403_v3  ;;  %vm6910_vm11 = vcmask 1042168   ;;  %vm14191_vm13 = vcmask 777216  }
 0xac2   : > { %v12615_v6 = vsub.s32 %v6406_v37, %v12407_v32  ;;  %v10030_v37 = vld [vmem:[%s14479_s7 + $0x240] ss:$40 sps:$4 sm:$0xff]   ;;  %vm12858_vm2 = vmor %vm14487_vm12, %vm6910_vm11  ;;  %vm6989_vm3 = vcmask 1042160   ;;  %vm14186_vm12 = vcmask 769024   ;;  %vm6833_vm8 = vcmask 1042424  }
 0xac3   : > { %5960 = vmatpush1.bf16.msra.mxu1 %v9910_v2  ;;  %6001 = vmatpush1.bf16.msra.mxu0 %v9940_v50  ;;  %vm6990_vm11 = vmor %vm14490_vm15, %vm6989_vm3  ;;  %vm6659_vm14 = vcmask 1041672   ;;  %vm6643_vm6 = vcmask 269312   ;;  %vm6471_vm9 = vcmask 1041688  }
 0xac4   : > { %5961 = vmatprep.subr.bf16.mxu1 %v9915_v5  ;;  %6002 = vmatprep.subr.bf16.mxu0 %v9948_v0  ;;  %v12619_v36 = vrot.slane %v12473_v42, %v12615_v6  ;;  %v12623_v46 = vrot.slane %v12483_v57, %v12615_v6  ;;  %vm14491_vm3 = vmmov %vm14490_vm15 }
 0xac5   : > { %vm6834_vm15 = vmor %vm14491_vm3, %vm6833_vm8 }
 0xac6   : > { %7037 = vrot.lane.b32.xlu1 %v12619_v36, %s10427_s15  ;;  %7039 = vrot.lane.b32.xlu0 %v12623_v46, %s10427_s15  ;;  %vm14493_vm8 = vmmov %vm14491_vm3 }
 0xac7   : > { %5962 = vmatpush1.bf16.msra.mxu1 %v9913_v1  ;;  %6003 = vmatpush1.bf16.msra.mxu0 %v9946_v26  ;;  %vm12901_vm3 = vmor %vm14493_vm8, %vm6659_vm14 }
 0xac8   : > { %5963 = vmatprep.subr.bf16.mxu1 %v9918_v25  ;;  %6004 = vmatprep.subr.bf16.mxu0 %v9954_v45  ;;  %vm14496_vm14 = vmmov %vm14493_vm8  ;;  %vm14497_vm8 = vcmask 7168  }
 0xac9   : > { %vm12933_vm5 = vmor %vm14496_vm14, %vm6471_vm9  ;;  %vm14183_vm9 = vcmask 277504  }
 0xaca   : > { %6879 = vrot.lane.b32.xlu1 %v12619_v36, %s10428_s28  ;;  %6881 = vrot.lane.b32.xlu0 %v12623_v46, %s10428_s28 }
 0xacb   : > { %5964 = vmatpush1.bf16.msra.mxu1 %v9916_v16  ;;  %6005 = vmatpush1.bf16.msra.mxu0 %v9952_v21  ;;  %v9979_v16 = vld [vmem:[%s14479_s7 + $0x238] ss:$40 sps:$4 sm:$0xff]  }
 0xacc   : > { %5965 = vmatprep.subr.bf16.mxu1 %v9921_v18  ;;  %6006 = vmatprep.subr.bf16.mxu0 %v9960_v19  ;;  %v9982_v19 = vld [vmem:[%s14479_s7 + $0x738] ss:$40 sps:$4 sm:$0xff]  }
 0xace   : > { %6958 = vrot.lane.b32.xlu1 %v12619_v36, %s10429_s26  ;;  %6960 = vrot.lane.b32.xlu0 %v12623_v46, %s10429_s26 }
 0xacf   : > { %5966 = vmatpush1.bf16.msra.mxu1 %v9919_v55  ;;  %6007 = vmatpush1.bf16.msra.mxu0 %v9958_v20  ;;  %v9987_v20 = vld [vmem:[%s14479_s7 + $0x1ec] ss:$40 sps:$4 sm:$0xff]  }
 0xad0   : > { %5967 = vmatprep.subr.bf16.mxu1 %v9924_v56  ;;  %6008 = vmatprep.subr.bf16.mxu0 %v9966_v40  ;;  %v9990_v40 = vld [vmem:[%s14479_s7 + $0x6ec] ss:$40 sps:$4 sm:$0xff]  }
 0xad2   : > { %6803 = vrot.lane.b32.xlu1 %v12619_v36, %s10407_s10  ;;  %6805 = vrot.lane.b32.xlu0 %v12623_v46, %s10407_s10 }
 0xad3   : > { %5968 = vmatpush1.bf16.msra.mxu1 %v9922_v23  ;;  %6009 = vmatpush1.bf16.msra.mxu0 %v9964_v59  ;;  %v9985_v23 = vld [vmem:[%s14479_s7 + $0x1e8] ss:$40 sps:$4 sm:$0xff]   ;;  %v9993_v59 = vld [vmem:[%s14479_s7 + $0x19c] ss:$40 sps:$4 sm:$0xff]  }
 0xad4   : > { %5969 = vmatprep.subr.bf16.mxu1 %v9927_v12  ;;  %6010 = vmatprep.subr.bf16.mxu0 %v9972_v10  ;;  %v9988_v12 = vld [vmem:[%s14479_s7 + $0x6e8] ss:$40 sps:$4 sm:$0xff]   ;;  %v10017_v10 = vld [vmem:[%s14479_s7 + $0x5c] ss:$40 sps:$4 sm:$0xff]  }
 0xad6   : > { %6628 = vrot.lane.b32.xlu1 %v12619_v36, %s10430_s1 }
 0xad7   : > { %5970 = vmatpush1.bf16.msra.mxu1 %v9925_v22  ;;  %6011 = vmatpush1.bf16.msra.mxu0 %v9970_v17  ;;  %v9996_v22 = vld [vmem:[%s14479_s7 + $0x69c] ss:$40 sps:$4 sm:$0xff]   ;;  %v10015_v17 = vld [vmem:[%s14479_s7 + $0x58] ss:$40 sps:$4 sm:$0xff]  }
 0xad8   : > { %5971 = vmatprep.subr.bf16.mxu1 %v9930_v27  ;;  %6012 = vmatprep.subr.bf16.mxu0 %v9978_v29  ;;  %v9991_v27 = vld [vmem:[%s14479_s7 + $0x198] ss:$40 sps:$4 sm:$0xff]   ;;  %v10023_v29 = vld [vmem:[%s14479_s7 + $0xc] ss:$40 sps:$4 sm:$0xff]  }
 0xada   : > { %6707 = vrot.lane.b32.xlu1 %v12619_v36, %s14456_s2 }
 0xadb   : > { %5972 = vmatpush1.bf16.msra.mxu1 %v9928_v33  ;;  %6013 = vmatpush1.bf16.msra.mxu0 %v9976_v41  ;;  %v9994_v33 = vld [vmem:[%s14479_s7 + $0x698] ss:$40 sps:$4 sm:$0xff]   ;;  %v10026_v41 = vld [vmem:[%s14479_s7 + $0x50c] ss:$40 sps:$4 sm:$0xff]  }
 0xadc   : > { %5973 = vmatprep.subr.bf16.mxu1 %v9933_v53  ;;  %6039 = vmatprep.subr.bf16.mxu0 %v9981_v49  ;;  %v9999_v53 = vld [vmem:[%s14479_s7 + $0x14c] ss:$40 sps:$4 sm:$0xff]   ;;  %v10024_v49 = vld [vmem:[%s14479_s7 + $0x508] ss:$40 sps:$4 sm:$0xff]  }
 0xade   : > { %6440 = vrot.lane.b32.xlu1 %v12619_v36, %s10431_s16 }
 0xadf   : > { %5974 = vmatpush2.bf16.msra.mxu1 %v9931_v31  ;;  %v10002_v31 = vld [vmem:[%s14479_s7 + $0x64c] ss:$40 sps:$4 sm:$0xff]  }
 0xae0   : > { %5975 = vmatprep.subr.bf16.mxu1 %v9939_v52  ;;  %v9997_v52 = vld [vmem:[%s14479_s7 + $0x148] ss:$40 sps:$4 sm:$0xff]  }
 0xae2   : > { %6549 = vrot.lane.b32.xlu1 %v12619_v36, %s10432_s11  ;;  %v10035_v36 = vld [vmem:[%s14479_s7 + $0x46c] ss:$40 sps:$4 sm:$0xff]  }
 0xae3   : > { %5976 = vmatpush2.bf16.msra.mxu1 %v9937_v15  ;;  %v10000_v15 = vld [vmem:[%s14479_s7 + $0x648] ss:$40 sps:$4 sm:$0xff]  }
 0xae4   : > { %5977 = vmatprep.subr.bf16.mxu1 %v9945_v4  ;;  %v10005_v4 = vld [vmem:[%s14479_s7 + $0xfc] ss:$40 sps:$4 sm:$0xff]  }
 0xae7   : > { %5978 = vmatpush2.bf16.msra.mxu1 %v9943_v62  ;;  %v10008_v62 = vld [vmem:[%s14479_s7 + $0x5fc] ss:$40 sps:$4 sm:$0xff]  }
 0xae8   : > { %5979 = vmatprep.subr.bf16.mxu1 %v9951_v35  ;;  %v10003_v35 = vld [vmem:[%s14479_s7 + $0xf8] ss:$40 sps:$4 sm:$0xff]  }
 0xaeb   : > { %5980 = vmatpush2.bf16.msra.mxu1 %v9949_v30  ;;  %v10006_v30 = vld [vmem:[%s14479_s7 + $0x5f8] ss:$40 sps:$4 sm:$0xff]  }
 0xaec   : > { %5981 = vmatprep.subr.bf16.mxu1 %v9957_v7  ;;  %v10011_v7 = vld [vmem:[%s14479_s7 + $0xac] ss:$40 sps:$4 sm:$0xff]  }
 0xaef   : > { %5982 = vmatpush2.bf16.msra.mxu1 %v9955_v47  ;;  %v10014_v47 = vld [vmem:[%s14479_s7 + $0x5ac] ss:$40 sps:$4 sm:$0xff]  }
 0xaf0   : > { %5983 = vmatprep.subr.bf16.mxu1 %v9963_v8  ;;  %v10009_v8 = vld [vmem:[%s14479_s7 + $0xa8] ss:$40 sps:$4 sm:$0xff]  }
 0xaf3   : > { %5984 = vmatpush2.bf16.msra.mxu1 %v9961_v43  ;;  %v10012_v43 = vld [vmem:[%s14479_s7 + $0x5a8] ss:$40 sps:$4 sm:$0xff]  }
 0xaf4   : > { %5985 = vmatprep.subr.bf16.mxu1 %v9969_v14  ;;  %v10020_v14 = vld [vmem:[%s14479_s7 + $0x55c] ss:$40 sps:$4 sm:$0xff]  }
 0xaf7   : > { %5986 = vmatpush2.bf16.msra.mxu1 %v9967_v9  ;;  %v10018_v9 = vld [vmem:[%s14479_s7 + $0x558] ss:$40 sps:$4 sm:$0xff]  }
 0xaf8   : > { %5987 = vmatprep.subr.bf16.mxu1 %v9975_v38  ;;  %v12689_v38 = vrot.slane %v12417_v11, %v12615_v6 }
 0xafa   : > { %7041 = vrot.lane.b32.xlu1 %v12689_v38, %s10427_s15 }
 0xafb   : > { %5988 = vmatpush2.bf16.msra.mxu1 %v9973_v44  ;;  %v10021_v44 = vld [vmem:[%s14479_s7 + $0x8] ss:$40 sps:$4 sm:$0xff]  }
 0xafc   : > { %6080 = vmatprep.subr.bf16.mxu1 %v9984_v51  ;;  %v10029_v51 = vld [vmem:[%s14479_s7 + $0x4bc] ss:$40 sps:$4 sm:$0xff]  }
 0xafe   : > { %6883 = vrot.lane.b32.xlu1 %v12689_v38, %s10428_s28 }
 0xb02   : > { %6962 = vrot.lane.b32.xlu1 %v12689_v38, %s10429_s26 }
 0xb06   : > { %6807 = vrot.lane.b32.xlu1 %v12689_v38, %s10407_s10 }
 0xb0a   : > { %6630 = vrot.lane.b32.xlu1 %v12623_v46, %s10430_s1 }
 0xb0e   : > { %6709 = vrot.lane.b32.xlu1 %v12623_v46, %s14456_s2 }
 0xb7e   : > { %v4464_v60 = vpop.f32.mrf.mxu1  ;;  %v4505_v2 = vpop.f32.mrf.mxu0 }
 0xb7f   : > { %v4465_v61 = vadd.f32 %v4464_v60, %v4375_v58  ;;  %v4506_v5 = vadd.f32 %v4505_v2, %v4375_v58  ;;  %v10033_v60 = vld [vmem:[%s14479_s7 + $0x468] ss:$40 sps:$4 sm:$0xff]   ;;  %v10044_v2 = vld [vmem:[%s14479_s7 + $0x1a4] ss:$40 sps:$4 sm:$0xff]  }
 0xb80   : > { %v4466_v63 = vpop.f32.mrf.mxu1  ;;  %v9674_v0 = vpop.f32.mrf.mxu0 }
 0xb81   : > { %v4467_v42 = vadd.f32 %v4466_v63, %v4375_v58  ;;  %v4511_v50 = vmax.f32 %v4465_v61, 0.0  ;;  %v4513_v25 = vmax.f32 %v4506_v5, 0.0  ;;  %v10038_v58 = vld [vmem:[%s14479_s7 + $0x1f4] ss:$40 sps:$4 sm:$0xff]   ;;  %v10036_v61 = vld [vmem:[%s14479_s7 + $0x1f0] ss:$40 sps:$4 sm:$0xff]  }
 0xb82   : > { %v4468_v57 = vpop.f32.mrf.mxu1  ;;  %v4508_v45 = vpop.f32.mrf.mxu0  ;;  %v10041_v63 = vld [vmem:[%s14479_s7 + $0x41c] ss:$40 sps:$4 sm:$0xff]   ;;  %v10042_v5 = vld [vmem:[%s14479_s7 + $0x1a0] ss:$40 sps:$4 sm:$0xff]  }
 0xb83   : > { %v4512_v1 = vmax.f32 %v4467_v42, 0.0  ;;  %v12636_v21 = vpack.c.bf16 %v4513_v25, %v4513_v25  ;;  %v12639_v55 = vpack.c.bf16 %v4511_v50, %v4511_v50  ;;  %v10039_v42 = vld [vmem:[%s14479_s7 + $0x418] ss:$40 sps:$4 sm:$0xff]   ;;  %v10047_v50 = vld [vmem:[%s14479_s7 + $0x3cc] ss:$40 sps:$4 sm:$0xff]   ;;  %v6418_v45 = vcombine.high %v12417_v11, %v12417_v11 }
 0xb84   : > { %v4469_v26 = vpop.f32.mrf.mxu1  ;;  %v9675_v56 = vpop.f32.mrf.mxu0  ;;  %v10050_v57 = vld [vmem:[%s14479_s7 + $0x154] ss:$40 sps:$4 sm:$0xff]   ;;  %v10045_v0 = vld [vmem:[%s14479_s7 + $0x3c8] ss:$40 sps:$4 sm:$0xff]  }
 0xb85   : > { %v12634_v18 = vpack.c.bf16 %v4512_v1, %v4512_v1  ;;  %6031 = vmatmul.mubr.bf16.vlgmr.msra.gmra.mxu0 %v12636_v21  ;;  %v10048_v1 = vld [vmem:[%s14479_s7 + $0x150] ss:$40 sps:$4 sm:$0xff]   ;;  %v10053_v25 = vld [vmem:[%s14479_s7 + $0x37c] ss:$40 sps:$4 sm:$0xff]   ;;  %v10059_v56 = vld [vmem:[%s14479_s7 + $0x32c] ss:$40 sps:$4 sm:$0xff]  }
 0xb86   : > { %6040 = vmatpush1.bf16.msra.mxu0 %v9979_v16  ;;  %v10056_v26 = vld [vmem:[%s14479_s7 + $0x104] ss:$40 sps:$4 sm:$0xff]   ;;  %v10051_v16 = vld [vmem:[%s14479_s7 + $0x378] ss:$40 sps:$4 sm:$0xff]   ;;  %v10057_v11 = vld [vmem:[%s14479_s7 + $0x328] ss:$40 sps:$4 sm:$0xff]  }
 0xb87   : > { %5989 = vmatprep.mubr.bf16.mxu1 %v12634_v18  ;;  %6071 = vmatprep.mubr.bf16.mxu0 %v12634_v18  ;;  %9326 = vst.sshfl [vmem:[#allocation2 + $0xdc] sm:$0xf pattern:$0x76325410] %v6418_v45 }
 0xb88   : > { %5990 = vmatmul.mubr.bf16.vlgmr.msra.gmra.mxu1 %v12639_v55  ;;  %6041 = vmatprep.subr.bf16.mxu0 %v9987_v20  ;;  %v12732_v20 = vrot.slane %v6418_v45, %v12615_v6  ;;  %v10068_v6 = vld [vmem:[%s14479_s7 + $0x64] ss:$40 sps:$4 sm:$0xff]  }
 0xb89   : > { %6081 = vmatpush1.bf16.msra.mxu1 %v9982_v19  ;;  %6112 = vmatprep.mubr.bf16.mxu1 %v10403_v3  ;;  %v10054_v19 = vld [vmem:[%s14479_s7 + $0x100] ss:$40 sps:$4 sm:$0xff]   ;;  %v10131_v45 = vld [vmem:[%s14479_s7 + $0x1fc] ss:$40 sps:$4 sm:$0xff]  }
 0xb8a   : > { %6082 = vmatprep.subr.bf16.mxu1 %v9990_v40  ;;  %6042 = vmatpush1.bf16.msra.mxu0 %v9985_v23  ;;  %v10062_v40 = vld [vmem:[%s14479_s7 + $0xb4] ss:$40 sps:$4 sm:$0xff]   ;;  %v10060_v23 = vld [vmem:[%s14479_s7 + $0xb0] ss:$40 sps:$4 sm:$0xff]  }
 0xb8b   : > { %6043 = vmatprep.subr.bf16.mxu0 %v9993_v59  ;;  %7043 = vrot.lane.b32.xlu1 %v12732_v20, %s10427_s15  ;;  %v10063_v59 = vld [vmem:[%s14479_s7 + $0x2d8] ss:$40 sps:$4 sm:$0xff]  }
 0xb8d   : > { %6083 = vmatpush1.bf16.msra.mxu1 %v9988_v12  ;;  %v10065_v12 = vld [vmem:[%s14479_s7 + $0x2dc] ss:$40 sps:$4 sm:$0xff]  }
 0xb8e   : > { %6084 = vmatprep.subr.bf16.mxu1 %v9996_v22  ;;  %6044 = vmatpush1.bf16.msra.mxu0 %v9991_v27  ;;  %v10066_v22 = vld [vmem:[%s14479_s7 + $0x60] ss:$40 sps:$4 sm:$0xff]   ;;  %v10071_v27 = vld [vmem:[%s14479_s7 + $0x28c] ss:$40 sps:$4 sm:$0xff]  }
 0xb8f   : > { %6045 = vmatprep.subr.bf16.mxu0 %v9999_v53  ;;  %6442 = vrot.lane.b32.xlu1 %v12623_v46, %s10431_s16  ;;  %v10069_v53 = vld [vmem:[%s14479_s7 + $0x288] ss:$40 sps:$4 sm:$0xff]  }
 0xb91   : > { %6085 = vmatpush1.bf16.msra.mxu1 %v9994_v33  ;;  %v10074_v33 = vld [vmem:[%s14479_s7 + $0x14] ss:$40 sps:$4 sm:$0xff]  }
 0xb92   : > { %6086 = vmatprep.subr.bf16.mxu1 %v10002_v31  ;;  %6046 = vmatpush1.bf16.msra.mxu0 %v9997_v52  ;;  %v10072_v31 = vld [vmem:[%s14479_s7 + $0x10] ss:$40 sps:$4 sm:$0xff]   ;;  %v10080_v52 = vld [vmem:[%s14479_s7 + $0x744] ss:$40 sps:$4 sm:$0xff]  }
 0xb93   : > { %6047 = vmatprep.subr.bf16.mxu0 %v10005_v4  ;;  %6551 = vrot.lane.b32.xlu1 %v12623_v46, %s10432_s11  ;;  %v10078_v4 = vld [vmem:[%s14479_s7 + $0x740] ss:$40 sps:$4 sm:$0xff]  }
 0xb94   : > { %v10075_v46 = vld [vmem:[%s14479_s7 + $0x4c0] ss:$40 sps:$4 sm:$0xff]  }
 0xb95   : > { %6087 = vmatpush1.bf16.msra.mxu1 %v10000_v15  ;;  %v10077_v15 = vld [vmem:[%s14479_s7 + $0x4c4] ss:$40 sps:$4 sm:$0xff]  }
 0xb96   : > { %6088 = vmatprep.subr.bf16.mxu1 %v10008_v62  ;;  %6048 = vmatpush1.bf16.msra.mxu0 %v10003_v35  ;;  %v10086_v62 = vld [vmem:[%s14479_s7 + $0x6f4] ss:$40 sps:$4 sm:$0xff]  }
 0xb97   : > { %6049 = vmatprep.subr.bf16.mxu0 %v10011_v7  ;;  %6885 = vrot.lane.b32.xlu1 %v12732_v20, %s10428_s28  ;;  %v10083_v35 = vld [vmem:[%s14479_s7 + $0x474] ss:$40 sps:$4 sm:$0xff]   ;;  %v10081_v7 = vld [vmem:[%s14479_s7 + $0x470] ss:$40 sps:$4 sm:$0xff]  }
 0xb99   : > { %6089 = vmatpush1.bf16.msra.mxu1 %v10006_v30  ;;  %v10084_v30 = vld [vmem:[%s14479_s7 + $0x6f0] ss:$40 sps:$4 sm:$0xff]  }
 0xb9a   : > { %6090 = vmatprep.subr.bf16.mxu1 %v10014_v47  ;;  %6050 = vmatpush1.bf16.msra.mxu0 %v10009_v8  ;;  %v10092_v47 = vld [vmem:[%s14479_s7 + $0x6a4] ss:$40 sps:$4 sm:$0xff]  }
 0xb9b   : > { %6051 = vmatprep.subr.bf16.mxu0 %v10017_v10  ;;  %6964 = vrot.lane.b32.xlu1 %v12732_v20, %s10429_s26  ;;  %v10089_v8 = vld [vmem:[%s14479_s7 + $0x424] ss:$40 sps:$4 sm:$0xff]   ;;  %v10087_v10 = vld [vmem:[%s14479_s7 + $0x420] ss:$40 sps:$4 sm:$0xff]  }
 0xb9d   : > { %6091 = vmatpush1.bf16.msra.mxu1 %v10012_v43  ;;  %v10090_v43 = vld [vmem:[%s14479_s7 + $0x6a0] ss:$40 sps:$4 sm:$0xff]  }
 0xb9e   : > { %6092 = vmatprep.subr.bf16.mxu1 %v10020_v14  ;;  %6052 = vmatpush1.bf16.msra.mxu0 %v10015_v17  ;;  %v10098_v14 = vld [vmem:[%s14479_s7 + $0x654] ss:$40 sps:$4 sm:$0xff]  }
 0xb9f   : > { %6053 = vmatprep.subr.bf16.mxu0 %v10023_v29  ;;  %6809 = vrot.lane.b32.xlu1 %v12732_v20, %s10407_s10  ;;  %v10095_v17 = vld [vmem:[%s14479_s7 + $0x3d4] ss:$40 sps:$4 sm:$0xff]   ;;  %v10096_v29 = vld [vmem:[%s14479_s7 + $0x650] ss:$40 sps:$4 sm:$0xff]  }
 0xba1   : > { %6093 = vmatpush1.bf16.msra.mxu1 %v10018_v9  ;;  %v12774_v9 = vld.sshfl [vmem:[%s12410_s0 + $0x10] sm:$0x33 pattern:$0x76325410]  ;;  %s14505_s0 = sld [smem:[#allocation15_spill]] }
 0xba2   : > { %6094 = vmatprep.subr.bf16.mxu1 %v10026_v41  ;;  %6054 = vmatpush1.bf16.msra.mxu0 %v10021_v44  ;;  %v10093_v41 = vld [vmem:[%s14479_s7 + $0x3d0] ss:$40 sps:$4 sm:$0xff]   ;;  %v10104_v44 = vld [vmem:[%s14479_s7 + $0x604] ss:$40 sps:$4 sm:$0xff]   ;;  %6792 = vst [vmem:[#allocation2 + $0xe4] sm:$0x33] %v12774_v9 }
 0xba3   : > { %6055 = vmatprep.subr.bf16.mxu0 %v10029_v51  ;;  %7045 = vrot.lane.b32.xlu1 %v12774_v9, %s10427_s15  ;;  %v10102_v51 = vld [vmem:[%s14479_s7 + $0x600] ss:$40 sps:$4 sm:$0xff]  }
 0xba5   : > { %6095 = vmatpush1.bf16.msra.mxu1 %v10024_v49  ;;  %v10101_v49 = vld [vmem:[%s14479_s7 + $0x384] ss:$40 sps:$4 sm:$0xff]  }
 0xba6   : > { %6121 = vmatprep.subr.bf16.mxu1 %v10032_v34  ;;  %6056 = vmatpush2.bf16.msra.mxu0 %v10027_v54  ;;  %v10099_v34 = vld [vmem:[%s14479_s7 + $0x380] ss:$40 sps:$4 sm:$0xff]   ;;  %v10110_v54 = vld [vmem:[%s14479_s7 + $0x5b4] ss:$40 sps:$4 sm:$0xff]  }
 0xba7   : > { %6057 = vmatprep.subr.bf16.mxu0 %v10035_v36  ;;  %v10108_v36 = vld [vmem:[%s14479_s7 + $0x5b0] ss:$40 sps:$4 sm:$0xff]  }
 0xba8   : > { %6113 = vmatmul.mubr.bf16.vlgmr.msra.gmra.mxu1 %v12636_v21 }
 0xba9   : > { %6122 = vmatpush1.bf16.msra.mxu1 %v10030_v37  ;;  %6153 = vmatprep.mubr.bf16.mxu1 %v12634_v18  ;;  %v10107_v37 = vld [vmem:[%s14479_s7 + $0x334] ss:$40 sps:$4 sm:$0xff]  }
 0xbaa   : > { %6123 = vmatprep.subr.bf16.mxu1 %v10038_v58  ;;  %6058 = vmatpush2.bf16.msra.mxu0 %v10033_v60  ;;  %v10105_v58 = vld [vmem:[%s14479_s7 + $0x330] ss:$40 sps:$4 sm:$0xff]   ;;  %v10116_v60 = vld [vmem:[%s14479_s7 + $0x564] ss:$40 sps:$4 sm:$0xff]  }
 0xbab   : > { %6059 = vmatprep.subr.bf16.mxu0 %v10041_v63  ;;  %v10114_v63 = vld [vmem:[%s14479_s7 + $0x560] ss:$40 sps:$4 sm:$0xff]  }
 0xbad   : > { %6124 = vmatpush1.bf16.msra.mxu1 %v10036_v61  ;;  %v10113_v61 = vld [vmem:[%s14479_s7 + $0x2e4] ss:$40 sps:$4 sm:$0xff]  }
 0xbae   : > { %6125 = vmatprep.subr.bf16.mxu1 %v10044_v2  ;;  %6060 = vmatpush2.bf16.msra.mxu0 %v10039_v42  ;;  %v10111_v2 = vld [vmem:[%s14479_s7 + $0x2e0] ss:$40 sps:$4 sm:$0xff]   ;;  %v10122_v42 = vld [vmem:[%s14479_s7 + $0x514] ss:$40 sps:$4 sm:$0xff]  }
 0xbaf   : > { %6061 = vmatprep.subr.bf16.mxu0 %v10047_v50  ;;  %v10120_v50 = vld [vmem:[%s14479_s7 + $0x510] ss:$40 sps:$4 sm:$0xff]  }
 0xbb1   : > { %6126 = vmatpush1.bf16.msra.mxu1 %v10042_v5  ;;  %v10119_v5 = vld [vmem:[%s14479_s7 + $0x294] ss:$40 sps:$4 sm:$0xff]  }
 0xbb2   : > { %6127 = vmatprep.subr.bf16.mxu1 %v10050_v57  ;;  %6062 = vmatpush2.bf16.msra.mxu0 %v10045_v0  ;;  %v10117_v57 = vld [vmem:[%s14479_s7 + $0x290] ss:$40 sps:$4 sm:$0xff]   ;;  %v10125_v0 = vld [vmem:[%s14479_s7 + $0x24c] ss:$40 sps:$4 sm:$0xff]  }
 0xbb3   : > { %6063 = vmatprep.subr.bf16.mxu0 %v10053_v25  ;;  %v10123_v25 = vld [vmem:[%s14479_s7 + $0x248] ss:$40 sps:$4 sm:$0xff]  }
 0xbb5   : > { %6128 = vmatpush1.bf16.msra.mxu1 %v10048_v1  ;;  %v10128_v1 = vld [vmem:[%s14479_s7 + $0x74c] ss:$40 sps:$4 sm:$0xff]  }
 0xbb6   : > { %6129 = vmatprep.subr.bf16.mxu1 %v10056_v26  ;;  %6064 = vmatpush2.bf16.msra.mxu0 %v10051_v16  ;;  %v10126_v26 = vld [vmem:[%s14479_s7 + $0x748] ss:$40 sps:$4 sm:$0xff]   ;;  %v10134_v16 = vld [vmem:[%s14479_s7 + $0x6fc] ss:$40 sps:$4 sm:$0xff]  }
 0xbb7   : > { %6065 = vmatprep.subr.bf16.mxu0 %v10059_v56  ;;  %v10132_v56 = vld [vmem:[%s14479_s7 + $0x6f8] ss:$40 sps:$4 sm:$0xff]  }
 0xbb9   : > { %6130 = vmatpush1.bf16.msra.mxu1 %v10054_v19  ;;  %v10129_v19 = vld [vmem:[%s14479_s7 + $0x1f8] ss:$40 sps:$4 sm:$0xff]  }
 0xbba   : > { %6131 = vmatprep.subr.bf16.mxu1 %v10062_v40  ;;  %6066 = vmatpush2.bf16.msra.mxu0 %v10057_v11  ;;  %v10137_v40 = vld [vmem:[%s14479_s7 + $0x1ac] ss:$40 sps:$4 sm:$0xff]  }
 0xbbb   : > { %6067 = vmatprep.subr.bf16.mxu0 %v10065_v12  ;;  %v10140_v11 = vld [vmem:[%s14479_s7 + $0x6ac] ss:$40 sps:$4 sm:$0xff]   ;;  %v10138_v12 = vld [vmem:[%s14479_s7 + $0x6a8] ss:$40 sps:$4 sm:$0xff]  }
 0xbbd   : > { %6132 = vmatpush1.bf16.msra.mxu1 %v10060_v23  ;;  %v10135_v23 = vld [vmem:[%s14479_s7 + $0x1a8] ss:$40 sps:$4 sm:$0xff]  }
 0xbbe   : > { %6133 = vmatprep.subr.bf16.mxu1 %v10068_v6  ;;  %6068 = vmatpush2.bf16.msra.mxu0 %v10063_v59  ;;  %v10143_v6 = vld [vmem:[%s14479_s7 + $0x15c] ss:$40 sps:$4 sm:$0xff]  }
 0xbbf   : > { %6069 = vmatprep.subr.bf16.mxu0 %v10071_v27  ;;  %v10146_v59 = vld [vmem:[%s14479_s7 + $0x65c] ss:$40 sps:$4 sm:$0xff]   ;;  %v12834_v27 = vpop.permute.xlu1 %7037 }
 0xbc1   : > { %6134 = vmatpush1.bf16.msra.mxu1 %v10066_v22  ;;  %v10141_v22 = vld [vmem:[%s14479_s7 + $0x158] ss:$40 sps:$4 sm:$0xff]  }
 0xbc2   : > { %6135 = vmatprep.subr.bf16.mxu1 %v10074_v33  ;;  %6070 = vmatpush2.bf16.msra.mxu0 %v10069_v53  ;;  %v10144_v33 = vld [vmem:[%s14479_s7 + $0x658] ss:$40 sps:$4 sm:$0xff]   ;;  %v10149_v53 = vld [vmem:[%s14479_s7 + $0x10c] ss:$40 sps:$4 sm:$0xff]  }
 0xbc3   : > { %6162 = vmatprep.subr.bf16.mxu0 %v10080_v52  ;;  %v7047_v52 = vrot.slane %v12834_v27, 4 }
 0xbc5   : > { %6136 = vmatpush1.bf16.msra.mxu1 %v10072_v31  ;;  %6072 = vmatmul.mubr.bf16.vlgmr.msra.gmra.mxu0 %v12639_v55 }
 0xbc6   : > { %6137 = vmatprep.subr.bf16.mxu1 %v10077_v15  ;;  %6163 = vmatpush1.bf16.msra.mxu0 %v10078_v4  ;;  %v10152_v15 = vld [vmem:[%s14479_s7 + $0x60c] ss:$40 sps:$4 sm:$0xff]   ;;  %v7053_v4 = vsel %vm14188_vm4, %v7047_v52, %v12834_v27 }
 0xbc7   : > { %6194 = vmatprep.mubr.bf16.mxu0 %v10403_v3  ;;  %6164 = vmatprep.subr.bf16.mxu0 %v10086_v62  ;;  %7070 = vst.msk [vmem:[#allocation2 + $0x180] sm:$0x33] %vm12840_vm1, %v7053_v4  ;;  %v12853_v62 = vpop.permute.xlu1 %6879 }
 0xbc9   : > { %6138 = vmatpush2.bf16.msra.mxu1 %v10075_v46  ;;  %v10147_v46 = vld [vmem:[%s14479_s7 + $0x108] ss:$40 sps:$4 sm:$0xff]  }
 0xbca   : > { %6139 = vmatprep.subr.bf16.mxu1 %v10083_v35  ;;  %6165 = vmatpush1.bf16.msra.mxu0 %v10084_v30  ;;  %v10150_v35 = vld [vmem:[%s14479_s7 + $0x608] ss:$40 sps:$4 sm:$0xff]   ;;  %v10155_v30 = vld [vmem:[%s14479_s7 + $0xbc] ss:$40 sps:$4 sm:$0xff]  }
 0xbcb   : > { %6166 = vmatprep.subr.bf16.mxu0 %v10092_v47  ;;  %v6889_v47 = vrot.slane %v12853_v62, 4 }
 0xbcd   : > { %6140 = vmatpush2.bf16.msra.mxu1 %v10081_v7 }
 0xbce   : > { %6141 = vmatprep.subr.bf16.mxu1 %v10089_v8  ;;  %6167 = vmatpush1.bf16.msra.mxu0 %v10090_v43  ;;  %v10158_v8 = vld [vmem:[%s14479_s7 + $0x5bc] ss:$40 sps:$4 sm:$0xff]   ;;  %v6895_v43 = vsel %vm14191_vm13, %v6889_v47, %v12853_v62 }
 0xbcf   : > { %6168 = vmatprep.subr.bf16.mxu0 %v10098_v14  ;;  %6912 = vst.msk [vmem:[#allocation2 + $0x120] sm:$0x33] %vm12858_vm2, %v6895_v43  ;;  %v12871_v14 = vpop.permute.xlu1 %6958  ;;  %v10197_v43 = vld [vmem:[%s14479_s7 + $0x38c] ss:$40 sps:$4 sm:$0xff]  }
 0xbd1   : > { %6142 = vmatpush2.bf16.msra.mxu1 %v10087_v10  ;;  %v10153_v10 = vld [vmem:[%s14479_s7 + $0xb8] ss:$40 sps:$4 sm:$0xff]  }
 0xbd2   : > { %6143 = vmatprep.subr.bf16.mxu1 %v10095_v17  ;;  %6169 = vmatpush1.bf16.msra.mxu0 %v10096_v29  ;;  %v10156_v17 = vld [vmem:[%s14479_s7 + $0x5b8] ss:$40 sps:$4 sm:$0xff]   ;;  %v10161_v29 = vld [vmem:[%s14479_s7 + $0x6c] ss:$40 sps:$4 sm:$0xff]  }
 0xbd3   : > { %6170 = vmatprep.subr.bf16.mxu0 %v10104_v44  ;;  %v10164_v44 = vld [vmem:[%s14479_s7 + $0x56c] ss:$40 sps:$4 sm:$0xff]  }
 0xbd5   : > { %6144 = vmatpush2.bf16.msra.mxu1 %v10093_v41  ;;  %v6968_v41 = vrot.slane %v12871_v14, 4 }
 0xbd6   : > { %6145 = vmatprep.subr.bf16.mxu1 %v10101_v49  ;;  %6171 = vmatpush1.bf16.msra.mxu0 %v10102_v51  ;;  %v10159_v51 = vld [vmem:[%s14479_s7 + $0x68] ss:$40 sps:$4 sm:$0xff]  }
 0xbd7   : > { %6172 = vmatprep.subr.bf16.mxu0 %v10110_v54  ;;  %v6974_v49 = vsel %vm14186_vm12, %v6968_v41, %v12871_v14  ;;  %v10167_v54 = vld [vmem:[%s14479_s7 + $0x1c] ss:$40 sps:$4 sm:$0xff]  }
 0xbd8   : > { %6991 = vst.msk [vmem:[#allocation2 + $0x150] sm:$0x33] %vm6990_vm11, %v6974_v49  ;;  %vm14492_vm11 = vcmask 1039360   ;;  %v10198_v49 = vld [vmem:[%s14479_s7 + $0x110] ss:$40 sps:$4 sm:$0xff]  }
 0xbd9   : > { %6146 = vmatpush2.bf16.msra.mxu1 %v10099_v34  ;;  %v10162_v34 = vld [vmem:[%s14479_s7 + $0x568] ss:$40 sps:$4 sm:$0xff]  }
 0xbda   : > { %6147 = vmatprep.subr.bf16.mxu1 %v10107_v37  ;;  %6173 = vmatpush1.bf16.msra.mxu0 %v10108_v36  ;;  %v12885_v37 = vpop.permute.xlu1 %6803  ;;  %v10170_v36 = vld [vmem:[%s14479_s7 + $0x51c] ss:$40 sps:$4 sm:$0xff]  }
 0xbdb   : > { %6174 = vmatprep.subr.bf16.mxu0 %v10116_v60  ;;  %v10165_v60 = vld [vmem:[%s14479_s7 + $0x18] ss:$40 sps:$4 sm:$0xff]  }
 0xbdd   : > { %6148 = vmatpush2.bf16.msra.mxu1 %v10105_v58  ;;  %v6813_v58 = vrot.slane %v12885_v37, 4 }
 0xbde   : > { %6149 = vmatprep.subr.bf16.mxu1 %v10113_v61  ;;  %6175 = vmatpush1.bf16.msra.mxu0 %v10114_v63  ;;  %v10168_v63 = vld [vmem:[%s14479_s7 + $0x518] ss:$40 sps:$4 sm:$0xff]  }
 0xbdf   : > { %6176 = vmatprep.subr.bf16.mxu0 %v10122_v42  ;;  %v6818_v61 = vsel %vm14492_vm11, %v6813_v58, %v12885_v37  ;;  %v12897_v42 = vpop.permute.xlu1 %6628  ;;  %vm6737_vm11 = vcmask 1041416  }
 0xbe0   : > { %6835 = vst.msk [vmem:[#allocation2 + $0xf0] sm:$0x33] %vm6834_vm15, %v6818_v61  ;;  %vm6738_vm15 = vmor %vm14496_vm14, %vm6737_vm11  ;;  %vm14187_vm11 = vcmask 285696   ;;  %v10209_v61 = vld [vmem:[%s14479_s7 + $0x2ec] ss:$40 sps:$4 sm:$0xff]  }
 0xbe1   : > { %6150 = vmatpush2.bf16.msra.mxu1 %v10111_v2  ;;  %v10173_v2 = vld [vmem:[%s14479_s7 + $0x4cc] ss:$40 sps:$4 sm:$0xff]  }
 0xbe2   : > { %6151 = vmatprep.subr.bf16.mxu1 %v10119_v5  ;;  %6177 = vmatpush1.bf16.msra.mxu0 %v10120_v50  ;;  %v10176_v5 = vld [vmem:[%s14479_s7 + $0x254] ss:$40 sps:$4 sm:$0xff]  }
 0xbe3   : > { %6203 = vmatprep.subr.bf16.mxu0 %v10125_v0  ;;  %v10171_v0 = vld [vmem:[%s14479_s7 + $0x4c8] ss:$40 sps:$4 sm:$0xff]  }
 0xbe5   : > { %6152 = vmatpush2.bf16.msra.mxu1 %v10117_v57  ;;  %6195 = vmatmul.mubr.bf16.vlgmr.msra.gmra.mxu0 %v12636_v21  ;;  %v6638_v57 = vrot.slane %v12897_v42, 4 }
 0xbe6   : > { %6244 = vmatprep.subr.bf16.mxu1 %v10128_v1  ;;  %6204 = vmatpush1.bf16.msra.mxu0 %v10123_v25  ;;  %v10174_v25 = vld [vmem:[%s14479_s7 + $0x250] ss:$40 sps:$4 sm:$0xff]  }
 0xbe7   : > { %6235 = vmatprep.mubr.bf16.mxu0 %v12634_v18  ;;  %6205 = vmatprep.subr.bf16.mxu0 %v10131_v45  ;;  %v6644_v1 = vsel %vm6643_vm6, %v6638_v57, %v12897_v42  ;;  %v10179_v45 = vld [vmem:[%s14479_s7 + $0x47c] ss:$40 sps:$4 sm:$0xff]   ;;  %v10228_v42 = vld [vmem:[%s14479_s7 + $0x700] ss:$40 sps:$4 sm:$0xff]  }
 0xbe8   : > { %6154 = vmatmul.mubr.bf16.vlgmr.msra.gmra.mxu1 %v12639_v55  ;;  %6661 = vst.msk [vmem:[#allocation2 + $0x64] sm:$0x33] %vm12901_vm3, %v6644_v1  ;;  %v10215_v1 = vld [vmem:[%s14479_s7 + $0x29c] ss:$40 sps:$4 sm:$0xff]  }
 0xbe9   : > { %6245 = vmatpush1.bf16.msra.mxu1 %v10126_v26  ;;  %6276 = vmatprep.mubr.bf16.mxu1 %v10403_v3  ;;  %v12914_v26 = vpop.permute.xlu1 %6707 }
 0xbea   : > { %6246 = vmatprep.subr.bf16.mxu1 %v10134_v16  ;;  %6206 = vmatpush1.bf16.msra.mxu0 %v10129_v19  ;;  %v10182_v16 = vld [vmem:[%s14479_s7 + $0x204] ss:$40 sps:$4 sm:$0xff]   ;;  %v6717_v19 = vrot.slane %v12914_v26, 4 }
 0xbeb   : > { %6207 = vmatprep.subr.bf16.mxu0 %v10137_v40 }
 0xbec   : > { %v6722_v40 = vsel %vm14497_vm8, %v6717_v19, %v12914_v26  ;;  %vm14500_vm8 = vmmov %vm14496_vm14 }
 0xbed   : > { %6247 = vmatpush1.bf16.msra.mxu1 %v10132_v56  ;;  %v10177_v56 = vld [vmem:[%s14479_s7 + $0x478] ss:$40 sps:$4 sm:$0xff]   ;;  %6739 = vst.msk [vmem:[#allocation2 + $0x94] sm:$0x33] %vm6738_vm15, %v6722_v40  ;;  %vm6580_vm15 = vcmask 1041680  }
 0xbee   : > { %6248 = vmatprep.subr.bf16.mxu1 %v10140_v11  ;;  %6208 = vmatpush1.bf16.msra.mxu0 %v10135_v23  ;;  %v10180_v11 = vld [vmem:[%s14479_s7 + $0x200] ss:$40 sps:$4 sm:$0xff]   ;;  %v10185_v23 = vld [vmem:[%s14479_s7 + $0x42c] ss:$40 sps:$4 sm:$0xff]   ;;  %vm6581_vm14 = vmor %vm14500_vm8, %vm6580_vm15  ;;  %vm14501_vm15 = vcmask 7168   ;;  %vm14502_vm8 = vcmask 1039360  }
 0xbef   : > { %6209 = vmatprep.subr.bf16.mxu0 %v10143_v6  ;;  %v10188_v6 = vld [vmem:[%s14479_s7 + $0x1b4] ss:$40 sps:$4 sm:$0xff]  }
 0xbf0   : > { %v10224_v40 = vld [vmem:[%s14479_s7 + $0x754] ss:$40 sps:$4 sm:$0xff]  }
 0xbf1   : > { %6249 = vmatpush1.bf16.msra.mxu1 %v10138_v12  ;;  %v12929_v12 = vpop.permute.xlu1 %6440 }
 0xbf2   : > { %6250 = vmatprep.subr.bf16.mxu1 %v10146_v59  ;;  %6210 = vmatpush1.bf16.msra.mxu0 %v10141_v22  ;;  %v10183_v22 = vld [vmem:[%s14479_s7 + $0x428] ss:$40 sps:$4 sm:$0xff]  }
 0xbf3   : > { %6211 = vmatprep.subr.bf16.mxu0 %v10149_v53  ;;  %v10186_v53 = vld [vmem:[%s14479_s7 + $0x1b0] ss:$40 sps:$4 sm:$0xff]  }
 0xbf5   : > { %6251 = vmatpush1.bf16.msra.mxu1 %v10144_v33  ;;  %v12947_v4 = vpop.permute.xlu1 %6549 }
 0xbf6   : > { %6252 = vmatprep.subr.bf16.mxu1 %v10152_v15  ;;  %6212 = vmatpush1.bf16.msra.mxu0 %v10147_v46  ;;  %v10191_v15 = vld [vmem:[%s14479_s7 + $0x3dc] ss:$40 sps:$4 sm:$0xff]  }
 0xbf7   : > { %6213 = vmatprep.subr.bf16.mxu0 %v10155_v30  ;;  %v10194_v46 = vld [vmem:[%s14479_s7 + $0x164] ss:$40 sps:$4 sm:$0xff]   ;;  %v6559_v30 = vrot.slane %v12947_v4, 4 }
 0xbf9   : > { %6253 = vmatpush1.bf16.msra.mxu1 %v10150_v35  ;;  %v10189_v35 = vld [vmem:[%s14479_s7 + $0x3d8] ss:$40 sps:$4 sm:$0xff]  }
 0xbfa   : > { %6254 = vmatprep.subr.bf16.mxu1 %v10158_v8  ;;  %6214 = vmatpush1.bf16.msra.mxu0 %v10153_v10  ;;  %v10192_v8 = vld [vmem:[%s14479_s7 + $0x160] ss:$40 sps:$4 sm:$0xff]   ;;  %v12955_v10 = vpop.permute.xlu1 %7041 }
 0xbfb   : > { %6215 = vmatprep.subr.bf16.mxu0 %v10161_v29  ;;  %v6565_v29 = vsel %vm14183_vm9, %v6559_v30, %v12947_v4 }
 0xbfc   : > { %6582 = vst.msk [vmem:[#allocation2 + $0x34] sm:$0x33] %vm6581_vm14, %v6565_v29  ;;  %v10236_v29 = vld [vmem:[%s14479_s7 + $0x6b4] ss:$40 sps:$4 sm:$0xff]   ;;  %vm14503_vm14 = vmmov %vm14502_vm8 }
 0xbfd   : > { %6255 = vmatpush1.bf16.msra.mxu1 %v10156_v17  ;;  %v10200_v17 = vld [vmem:[%s14479_s7 + $0x114] ss:$40 sps:$4 sm:$0xff]  }
 0xbfe   : > { %6256 = vmatprep.subr.bf16.mxu1 %v10164_v44  ;;  %6216 = vmatpush1.bf16.msra.mxu0 %v10159_v51  ;;  %v10195_v44 = vld [vmem:[%s14479_s7 + $0x388] ss:$40 sps:$4 sm:$0xff]   ;;  %v10203_v51 = vld [vmem:[%s14479_s7 + $0x33c] ss:$40 sps:$4 sm:$0xff]  }
 0xbff   : > { %6217 = vmatprep.subr.bf16.mxu0 %v10167_v54  ;;  %v10206_v54 = vld [vmem:[%s14479_s7 + $0xc4] ss:$40 sps:$4 sm:$0xff]  }
 0xc01   : > { %6257 = vmatpush1.bf16.msra.mxu1 %v10162_v34  ;;  %v12965_v34 = vpop.permute.xlu1 %6883 }
 0xc02   : > { %6258 = vmatprep.subr.bf16.mxu1 %v10170_v36  ;;  %6218 = vmatpush1.bf16.msra.mxu0 %v10165_v60  ;;  %v10201_v36 = vld [vmem:[%s14479_s7 + $0x338] ss:$40 sps:$4 sm:$0xff]  }
 0xc03   : > { %6219 = vmatprep.subr.bf16.mxu0 %v10173_v2  ;;  %v10204_v60 = vld [vmem:[%s14479_s7 + $0xc0] ss:$40 sps:$4 sm:$0xff]   ;;  %v10212_v2 = vld [vmem:[%s14479_s7 + $0x74] ss:$40 sps:$4 sm:$0xff]  }
 0xc05   : > { %6259 = vmatpush1.bf16.msra.mxu1 %v10168_v63  ;;  %v12971_v63 = vpop.permute.xlu1 %6962 }
 0xc06   : > { %6285 = vmatprep.subr.bf16.mxu1 %v10176_v5  ;;  %6220 = vmatpush2.bf16.msra.mxu0 %v10171_v0  ;;  %v10207_v5 = vld [vmem:[%s14479_s7 + $0x2e8] ss:$40 sps:$4 sm:$0xff]  }
 0xc07   : > { %6221 = vmatprep.subr.bf16.mxu0 %v10179_v45  ;;  %v10210_v0 = vld [vmem:[%s14479_s7 + $0x70] ss:$40 sps:$4 sm:$0xff]   ;;  %v10218_v45 = vld [vmem:[%s14479_s7 + $0x24] ss:$40 sps:$4 sm:$0xff]  }
 0xc08   : > { %6277 = vmatmul.mubr.bf16.vlgmr.msra.gmra.mxu1 %v12636_v21 }
 0xc09   : > { %6286 = vmatpush1.bf16.msra.mxu1 %v10174_v25  ;;  %6317 = vmatprep.mubr.bf16.mxu1 %v12634_v18  ;;  %v6450_v18 = vrot.slane %v12929_v12, 4  ;;  %v12977_v25 = vpop.permute.xlu1 %6807 }
 0xc0a   : > { %6287 = vmatprep.subr.bf16.mxu1 %v10182_v16  ;;  %6222 = vmatpush2.bf16.msra.mxu0 %v10177_v56  ;;  %v10213_v16 = vld [vmem:[%s14479_s7 + $0x298] ss:$40 sps:$4 sm:$0xff]  }
 0xc0b   : > { %v6456_v33 = vsel %vm14187_vm11, %v6450_v18, %v12929_v12  ;;  %6223 = vmatprep.subr.bf16.mxu0 %v10185_v23  ;;  %v10216_v56 = vld [vmem:[%s14479_s7 + $0x20] ss:$40 sps:$4 sm:$0xff]   ;;  %v10221_v23 = vld [vmem:[%s14479_s7 + $0x4d4] ss:$40 sps:$4 sm:$0xff]  }
 0xc0c   : > { %6473 = vst.msk [vmem:[#allocation2 + $0x4] sm:$0x33] %vm12933_vm5, %v6456_v33 }
 0xc0d   : > { %6288 = vmatpush1.bf16.msra.mxu1 %v10180_v11  ;;  %v12983_v11 = vpop.permute.xlu1 %6630 }
 0xc0e   : > { %6289 = vmatprep.subr.bf16.mxu1 %v10188_v6  ;;  %6224 = vmatpush2.bf16.msra.mxu0 %v10183_v22  ;;  %v6639_v6 = vrot.slane %v12983_v11, 4  ;;  %v10222_v22 = vld [vmem:[%s14479_s7 + $0x750] ss:$40 sps:$4 sm:$0xff]  }
 0xc0f   : > { %6225 = vmatprep.subr.bf16.mxu0 %v10191_v15  ;;  %v10230_v15 = vld [vmem:[%s14479_s7 + $0x704] ss:$40 sps:$4 sm:$0xff]  }
 0xc10   : > { %v6645_v33 = vsel %vm14185_vm0, %v6638_v57, %v6639_v6 }
 0xc11   : > { %6290 = vmatpush1.bf16.msra.mxu1 %v10186_v53  ;;  %v10219_v53 = vld [vmem:[%s14479_s7 + $0x4d0] ss:$40 sps:$4 sm:$0xff]  }
 0xc12   : > { %6291 = vmatprep.subr.bf16.mxu1 %v10194_v46  ;;  %6226 = vmatpush2.bf16.msra.mxu0 %v10189_v35  ;;  %v6646_v46 = vsel %vm6643_vm6, %v6645_v33, %v12983_v11  ;;  %v12997_v35 = vpop.permute.xlu1 %6709 }
 0xc13   : > { %6227 = vmatprep.subr.bf16.mxu0 %v10197_v43  ;;  %6662 = vst [vmem:[#allocation2 + $0x6c] sm:$0x33] %v6646_v46  ;;  %v6718_v43 = vrot.slane %v12997_v35, 4 }
 0xc15   : > { %6292 = vmatpush1.bf16.msra.mxu1 %v10192_v8  ;;  %v10227_v8 = vld [vmem:[%s14479_s7 + $0x484] ss:$40 sps:$4 sm:$0xff]   ;;  %v6723_v57 = vsel %vm14185_vm0, %v6717_v19, %v6718_v43  ;;  %v10234_v19 = vld [vmem:[%s14479_s7 + $0x6b0] ss:$40 sps:$4 sm:$0xff]  }
 0xc16   : > { %6293 = vmatprep.subr.bf16.mxu1 %v10200_v17  ;;  %6228 = vmatpush2.bf16.msra.mxu0 %v10195_v44  ;;  %v10225_v17 = vld [vmem:[%s14479_s7 + $0x480] ss:$40 sps:$4 sm:$0xff]   ;;  %v6724_v44 = vsel %vm14501_vm15, %v6723_v57, %v12997_v35  ;;  %vm14504_vm15 = vmmov %vm14502_vm8 }
 0xc17   : > { %6229 = vmatprep.subr.bf16.mxu0 %v10203_v51  ;;  %v10233_v51 = vld [vmem:[%s14479_s7 + $0x434] ss:$40 sps:$4 sm:$0xff]   ;;  %6740 = vst [vmem:[#allocation2 + $0x9c] sm:$0x33] %v6724_v44 }
 0xc19   : > { %6294 = vmatpush1.bf16.msra.mxu1 %v10198_v49  ;;  %v13013_v49 = vpop.permute.xlu1 %7043 }
 0xc1a   : > { %6295 = vmatprep.subr.bf16.mxu1 %v10206_v54  ;;  %6230 = vmatpush2.bf16.msra.mxu0 %v10201_v36  ;;  %v7049_v54 = vrot.slane %v12955_v10, 4  ;;  %v7050_v26 = vrot.slane %v13013_v49, 4 }
 0xc1b   : > { %6231 = vmatprep.subr.bf16.mxu0 %v10209_v61  ;;  %v10242_v61 = vld [vmem:[%s14479_s7 + $0x664] ss:$40 sps:$4 sm:$0xff]  }
 0xc1c   : > { %v7058_v36 = vsel %vm14185_vm0, %v7049_v54, %v7050_v26 }
 0xc1d   : > { %6296 = vmatpush1.bf16.msra.mxu1 %v10204_v60  ;;  %v10231_v60 = vld [vmem:[%s14479_s7 + $0x430] ss:$40 sps:$4 sm:$0xff]  }
 0xc1e   : > { %6297 = vmatprep.subr.bf16.mxu1 %v10212_v2  ;;  %6232 = vmatpush2.bf16.msra.mxu0 %v10207_v5  ;;  %v7059_v2 = vsel %vm14188_vm4, %v7058_v36, %v13013_v49  ;;  %v13026_v5 = vpop.permute.xlu1 %6442  ;;  %v10252_v36 = vld [vmem:[%s14479_s7 + $0x5c0] ss:$40 sps:$4 sm:$0xff]  }
 0xc1f   : > { %6233 = vmatprep.subr.bf16.mxu0 %v10215_v1  ;;  %7073 = vst [vmem:[#allocation2 + $0x198] sm:$0x33] %v7059_v2  ;;  %v10240_v1 = vld [vmem:[%s14479_s7 + $0x660] ss:$40 sps:$4 sm:$0xff]  }
 0xc21   : > { %6298 = vmatpush1.bf16.msra.mxu1 %v10210_v0  ;;  %v10239_v0 = vld [vmem:[%s14479_s7 + $0x3e4] ss:$40 sps:$4 sm:$0xff]  }
 0xc22   : > { %6299 = vmatprep.subr.bf16.mxu1 %v10218_v45  ;;  %6234 = vmatpush2.bf16.msra.mxu0 %v10213_v16  ;;  %v10237_v45 = vld [vmem:[%s14479_s7 + $0x3e0] ss:$40 sps:$4 sm:$0xff]   ;;  %v10248_v16 = vld [vmem:[%s14479_s7 + $0x614] ss:$40 sps:$4 sm:$0xff]  }
 0xc23   : > { %6326 = vmatprep.subr.bf16.mxu0 %v10224_v40  ;;  %v13033_v40 = vpop.permute.xlu1 %6551 }
 0xc24   : > { %v6560_v33 = vrot.slane %v13033_v40, 4 }
 0xc25   : > { %6300 = vmatpush1.bf16.msra.mxu1 %v10216_v56  ;;  %6236 = vmatmul.mubr.bf16.vlgmr.msra.gmra.mxu0 %v12639_v55  ;;  %v6451_v56 = vrot.slane %v13026_v5, 4 }
 0xc26   : > { %6301 = vmatprep.subr.bf16.mxu1 %v10221_v23  ;;  %6327 = vmatpush1.bf16.msra.mxu0 %v10222_v22  ;;  %v7040_v23 = vpop.permute.xlu0 %7039  ;;  %v10245_v22 = vld [vmem:[%s14479_s7 + $0x394] ss:$40 sps:$4 sm:$0xff]   ;;  %v6566_v57 = vsel %vm14185_vm0, %v6559_v30, %v6560_v33 }
 0xc27   : > { %6358 = vmatprep.mubr.bf16.mxu0 %v10403_v3  ;;  %6328 = vmatprep.subr.bf16.mxu0 %v10230_v15  ;;  %v6891_v15 = vrot.slane %v12965_v34, 4  ;;  %v6457_v46 = vsel %vm14185_vm0, %v6450_v18, %v6451_v56  ;;  %v10243_v18 = vld [vmem:[%s14479_s7 + $0x390] ss:$40 sps:$4 sm:$0xff]   ;;  %v6567_v44 = vsel %vm14183_vm9, %v6566_v57, %v13033_v40  ;;  %v13062_v30 = vpop.permute.xlu1 %6885  ;;  %vm14184_vm9 = vcmask 754688  }
 0xc28   : > { %6583 = vst [vmem:[#allocation2 + $0x3c] sm:$0x33] %v6567_v44 }
 0xc29   : > { %6302 = vmatpush2.bf16.msra.mxu1 %v10219_v53  ;;  %v7048_v53 = vrot.slane %v7040_v23, 4 }
 0xc2a   : > { %6303 = vmatprep.subr.bf16.mxu1 %v10227_v8  ;;  %6329 = vmatpush1.bf16.msra.mxu0 %v10228_v42  ;;  %v10246_v8 = vld [vmem:[%s14479_s7 + $0x610] ss:$40 sps:$4 sm:$0xff]   ;;  %v6458_v42 = vsel %vm14187_vm11, %v6457_v46, %v13026_v5  ;;  %v6882_v27 = vpop.permute.xlu0 %6881  ;;  %vm6949_vm11 = vcmask 1044218  }
 0xc2b   : > { %6330 = vmatprep.subr.bf16.mxu0 %v10236_v29  ;;  %v7056_v12 = vsel %vm14185_vm0, %v7048_v53, %v7049_v54  ;;  %v10254_v29 = vld [vmem:[%s14479_s7 + $0x5c4] ss:$40 sps:$4 sm:$0xff]   ;;  %6474 = vst [vmem:[#allocation2 + $0xc] sm:$0x33] %v6458_v42  ;;  %v6892_v54 = vrot.slane %v13062_v30, 4 }
 0xc2c   : > { %v7057_v4 = vsel %vm14188_vm4, %v7056_v12, %v12955_v10  ;;  %v10258_v46 = vld [vmem:[%s14479_s7 + $0x570] ss:$40 sps:$4 sm:$0xff]   ;;  %v10266_v12 = vld [vmem:[%s14479_s7 + $0x524] ss:$40 sps:$4 sm:$0xff]  }
 0xc2d   : > { %6304 = vmatpush2.bf16.msra.mxu1 %v10225_v17  ;;  %v7054_v17 = vsel %vm14185_vm0, %v7047_v52, %v7048_v53  ;;  %v10251_v52 = vld [vmem:[%s14479_s7 + $0x344] ss:$40 sps:$4 sm:$0xff]   ;;  %7072 = vst [vmem:[#allocation2 + $0x190] sm:$0x33] %v7057_v4  ;;  %v6900_v10 = vsel %vm14185_vm0, %v6891_v15, %v6892_v54 }
 0xc2e   : > { %6305 = vmatprep.subr.bf16.mxu1 %v10233_v51  ;;  %6331 = vmatpush1.bf16.msra.mxu0 %v10234_v19  ;;  %v7055_v51 = vsel %vm14188_vm4, %v7054_v17, %v7040_v23  ;;  %v6890_v19 = vrot.slane %v6882_v27, 4  ;;  %v6961_v62 = vpop.permute.xlu0 %6960  ;;  %v10255_v17 = vld [vmem:[%s14479_s7 + $0x2f0] ss:$40 sps:$4 sm:$0xff]  }
 0xc2f   : > { %6332 = vmatprep.subr.bf16.mxu0 %v10242_v61  ;;  %7071 = vst [vmem:[#allocation2 + $0x188] sm:$0x33] %v7055_v51 }
 0xc30   : > { %v6896_v61 = vsel %vm14185_vm0, %v6889_v47, %v6890_v19  ;;  %v6898_v2 = vsel %vm14185_vm0, %v6890_v19, %v6891_v15  ;;  %v10257_v47 = vld [vmem:[%s14479_s7 + $0x2f4] ss:$40 sps:$4 sm:$0xff]   ;;  %v6969_v15 = vrot.slane %v6961_v62, 4 }
 0xc31   : > { %6306 = vmatpush2.bf16.msra.mxu1 %v10231_v60  ;;  %v6970_v60 = vrot.slane %v12971_v63, 4  ;;  %v6899_v23 = vsel %vm14191_vm13, %v6898_v2, %v12965_v34 }
 0xc32   : > { %6307 = vmatprep.subr.bf16.mxu1 %v10239_v0  ;;  %6333 = vmatpush1.bf16.msra.mxu0 %v10240_v1  ;;  %v10249_v0 = vld [vmem:[%s14479_s7 + $0x340] ss:$40 sps:$4 sm:$0xff]   ;;  %v10260_v1 = vld [vmem:[%s14479_s7 + $0x574] ss:$40 sps:$4 sm:$0xff]   ;;  %6914 = vst [vmem:[#allocation2 + $0x130] sm:$0x33] %v6899_v23  ;;  %v6975_v42 = vsel %vm14185_vm0, %v6968_v41, %v6969_v15  ;;  %v6806_v14 = vpop.permute.xlu0 %6805 }
 0xc33   : > { %6334 = vmatprep.subr.bf16.mxu0 %v10248_v16  ;;  %v6897_v16 = vsel %vm14191_vm13, %v6896_v61, %v6882_v27  ;;  %v6977_v57 = vsel %vm14185_vm0, %v6969_v15, %v6970_v60  ;;  %v10263_v41 = vld [vmem:[%s14479_s7 + $0x2a4] ss:$40 sps:$4 sm:$0xff]   ;;  %v6814_v27 = vrot.slane %v6806_v14, 4 }
 0xc34   : > { %6913 = vst [vmem:[#allocation2 + $0x128] sm:$0x33] %v6897_v16  ;;  %v6978_v44 = vsel %vm14186_vm12, %v6977_v57, %v12971_v63 }
 0xc35   : > { %6308 = vmatpush2.bf16.msra.mxu1 %v10237_v45  ;;  %v6901_v45 = vsel %vm14191_vm13, %v6900_v10, %v13062_v30  ;;  %6993 = vst [vmem:[#allocation2 + $0x160] sm:$0x33] %v6978_v44  ;;  %v6819_v63 = vsel %vm14185_vm0, %v6813_v58, %v6814_v27 }
 0xc36   : > { %6309 = vmatprep.subr.bf16.mxu1 %v10245_v22  ;;  %6335 = vmatpush1.bf16.msra.mxu0 %v10246_v8  ;;  %v13082_v22 = vpop.permute.xlu1 %6964  ;;  %6915 = vst [vmem:[#allocation2 + $0x138] sm:$0x33] %v6901_v45  ;;  %v6815_v8 = vrot.slane %v12977_v25, 4  ;;  %v6820_v61 = vsel %vm14503_vm14, %v6819_v63, %v6806_v14  ;;  %vm7107_vm14 = vcmask 1044202  }
 0xc37   : > { %6336 = vmatprep.subr.bf16.mxu0 %v10254_v29  ;;  %v6971_v53 = vrot.slane %v13082_v22, 4  ;;  %v6976_v29 = vsel %vm14186_vm12, %v6975_v42, %v6961_v62  ;;  %6836 = vst [vmem:[#allocation2 + $0xf8] sm:$0x33] %v6820_v61 }
 0xc38   : > { %6992 = vst [vmem:[#allocation2 + $0x158] sm:$0x33] %v6976_v29 }
 0xc39   : > { %6310 = vmatpush2.bf16.msra.mxu1 %v10243_v18  ;;  %v6979_v34 = vsel %vm14185_vm0, %v6970_v60, %v6971_v53  ;;  %v10261_v60 = vld [vmem:[%s14479_s7 + $0x2a0] ss:$40 sps:$4 sm:$0xff]  }
 0xc3a   : > { %6311 = vmatprep.subr.bf16.mxu1 %v10251_v52  ;;  %6337 = vmatpush1.bf16.msra.mxu0 %v10252_v36  ;;  %v6980_v18 = vsel %vm14186_vm12, %v6979_v34, %v13082_v22  ;;  %v13102_v51 = vpop.permute.xlu1 %6809  ;;  %v10264_v52 = vld [vmem:[%s14479_s7 + $0x520] ss:$40 sps:$4 sm:$0xff]   ;;  %v6821_v36 = vsel %vm14185_vm0, %v6814_v27, %v6815_v8 }
 0xc3b   : > { %6338 = vmatprep.subr.bf16.mxu0 %v10260_v1  ;;  %6994 = vst [vmem:[#allocation2 + $0x168] sm:$0x33] %v6980_v18  ;;  %v6816_v4 = vrot.slane %v13102_v51, 4  ;;  %v6822_v2 = vsel %vm14504_vm15, %v6821_v36, %v12977_v25  ;;  %vm14506_vm15 = vcmask 1047558  }
 0xc3c   : > { %6837 = vst [vmem:[#allocation2 + $0x100] sm:$0x33] %v6822_v2 }
 0xc3d   : > { %6312 = vmatpush2.bf16.msra.mxu1 %v10249_v0  ;;  %v6823_v19 = vsel %vm14185_vm0, %v6815_v8, %v6816_v4 }
 0xc3e   : > { %6313 = vmatprep.subr.bf16.mxu1 %v10257_v47  ;;  %6339 = vmatpush1.bf16.msra.mxu0 %v10258_v46  ;;  %v6824_v10 = vsel %vm14502_vm8, %v6823_v19, %v13102_v51  ;;  %v7046_v0 = vpop.permute.xlu1 %7045  ;;  %vm6698_vm8 = vcmask 1043722  }
 0xc3f   : > { %6340 = vmatprep.subr.bf16.mxu0 %v10266_v12  ;;  %6838 = vst [vmem:[#allocation2 + $0x108] sm:$0x33] %v6824_v10  ;;  %v7051_v37 = vrot.slane %v7046_v0, 4 }
 0xc41   : > { %6314 = vmatpush2.bf16.msra.mxu1 %v10255_v17  ;;  %v7060_v58 = vsel %vm14185_vm0, %v7050_v26, %v7051_v37  ;;  %7076 = vst.msk [vmem:[#allocation2 + $0x1a8] sm:$0x3] %vm14184_vm9, %v7051_v37  ;;  %vm6699_vm9 = vmor %vm14506_vm15, %vm6698_vm8 }
 0xc42   : > { %6315 = vmatprep.subr.bf16.mxu1 %v10263_v41  ;;  %6341 = vmatpush1.bf16.msra.mxu0 %v10264_v52  ;;  %v7061_v1 = vsel %vm14188_vm4, %v7060_v58, %v7046_v0  ;;  %vm14507_vm0 = vmmov %vm14506_vm15  ;;  %vm7028_vm15 = vcmask 1044210  }
 0xc43   : > { %7074 = vst [vmem:[#allocation2 + $0x1a0] sm:$0x33] %v7061_v1  ;;  %vm7108_vm12 = vmor %vm14507_vm0, %vm7107_vm14  ;;  %vm6540_vm14 = vcmask 1043738  }
 0xc44   : > { %vm6950_vm8 = vmor %vm14507_vm0, %vm6949_vm11 }
 0xc45   : > { %6316 = vmatpush2.bf16.msra.mxu1 %v10261_v60  ;;  %6359 = vmatmul.mubr.bf16.vlgmr.msra.gmra.mxu0 %v12636_v21  ;;  %v6032_v25 = vpop.f32.mrf.mxu0  ;;  %vm14509_vm11 = vmmov %vm14507_vm0 }
 0xc46   : > { %7458 = vmatprep.mubr.bf16.mxu0 %v10403_v3 }
 0xc47   : > { %v6034_v16 = vpop.f32.mrf.mxu0 }
 0xc48   : > { %6318 = vmatmul.mubr.bf16.vlgmr.msra.gmra.mxu1 %v12639_v55  ;;  %v5991_v45 = vpop.f32.mrf.mxu1 }
 0xc49   : > { %7540 = vmatprep.mubr.bf16.mxu1 %v10403_v3  ;;  %v6033_v23 = vadd.f32 %v6032_v25, %v5991_v45  ;;  %v6036_v62 = vpop.f32.mrf.mxu0 }
 0xc4a   : > { %v5993_v49 = vpop.f32.mrf.mxu1 }
 0xc4b   : > { %v6035_v26 = vadd.f32 %v6034_v16, %v5993_v49  ;;  %v6037_v46 = vpop.f32.mrf.mxu0 }
 0xc4c   : > { %v5995_v47 = vpop.f32.mrf.mxu1 }
 0xc4d   : > { %v9450_v15 = vpack.c.bf16 %v6035_v26, %v6033_v23 }
 0xc4e   : > { %v5996_v8 = vpop.f32.mrf.mxu1 }
 0xc4f   : > { %v6505_v34 = vrot.slane %v9450_v15, 6 }
 0xc51   : > { %6798 = vst [vmem:[#allocation2 + $0xc4] sm:$0xcc] %v6505_v34  ;;  %6668 = vrot.lane.b32.xlu0 %v6505_v34, %s10430_s1  ;;  %7077 = vrot.lane.b32.xlu1 %v6505_v34, %s10427_s15 }
 0xc55   : > { %6746 = vrot.lane.b32.xlu0 %v6505_v34, %s14456_s2  ;;  %6919 = vrot.lane.b32.xlu1 %v6505_v34, %s10428_s28 }
 0xc59   : > { %6510 = vrot.lane.b32.xlu0 %v6505_v34, %s10431_s16  ;;  %6998 = vrot.lane.b32.xlu1 %v6505_v34, %s10429_s26 }
 0xc5d   : > { %6589 = vrot.lane.b32.xlu0 %v6505_v34, %s10432_s11  ;;  %6842 = vrot.lane.b32.xlu1 %v6505_v34, %s10407_s10 }
 0xc61   : > { %6632 = vrot.lane.b32.xlu1 %v12689_v38, %s10430_s1 }
 0xc65   : > { %6711 = vrot.lane.b32.xlu1 %v12689_v38, %s14456_s2 }
 0xc68   : > { %v6114_v21 = vpop.f32.mrf.mxu1 }
 0xc69   : > { %6887 = vrot.lane.b32.xlu1 %v12774_v9, %s10428_s28 }
 0xc6a   : > { %v6116_v55 = vpop.f32.mrf.mxu1 }
 0xc6c   : > { %v6118_v42 = vpop.f32.mrf.mxu1 }
 0xc6d   : > { %6966 = vrot.lane.b32.xlu1 %v12774_v9, %s10429_s26 }
 0xc6e   : > { %v6119_v57 = vpop.f32.mrf.mxu1 }
 0xc71   : > { %6444 = vrot.lane.b32.xlu1 %v12689_v38, %s10431_s16 }
 0xc75   : > { %6553 = vrot.lane.b32.xlu1 %v12689_v38, %s10432_s11 }
 0xc79   : > { %6811 = vrot.lane.b32.xlu1 %v12774_v9, %s10407_s10 }
 0xc7d   : > { %6634 = vrot.lane.b32.xlu1 %v12732_v20, %s10430_s1 }
 0xc81   : > { %6713 = vrot.lane.b32.xlu1 %v12732_v20, %s14456_s2 }
 0xc85   : > { %6446 = vrot.lane.b32.xlu1 %v12732_v20, %s10431_s16  ;;  %v6073_v17 = vpop.f32.mrf.mxu0 }
 0xc86   : > { %v6115_v18 = vadd.f32 %v6114_v21, %v6073_v17 }
 0xc87   : > { %v6075_v12 = vpop.f32.mrf.mxu0 }
 0xc88   : > { %v6117_v38 = vadd.f32 %v6116_v55, %v6075_v12 }
 0xc89   : > { %6555 = vrot.lane.b32.xlu1 %v12732_v20, %s10432_s11  ;;  %v6077_v29 = vpop.f32.mrf.mxu0  ;;  %v7162_v20 = vld [vmem:[%s14505_s0] sm:$0xf]  ;;  %s14557_s0 = sld [smem:[#allocation14_spill]] }
 0xc8a   : > { %v9451_v44 = vpack.c.bf16 %v6117_v38, %v6115_v18 }
 0xc8b   : > { %v6078_v14 = vpop.f32.mrf.mxu0 }
 0xc8c   : > { %v6506_v41 = vrot.slane %v9451_v44, 6 }
 0xc8d   : > { %6636 = vrot.lane.b32.xlu1 %v12774_v9, %s10430_s1 }
 0xc8e   : > { %6799 = vst [vmem:[#allocation2 + $0xcc] sm:$0xcc] %v6506_v41  ;;  %7079 = vrot.lane.b32.xlu0 %v6506_v41, %s10427_s15 }
 0xc91   : > { %6715 = vrot.lane.b32.xlu1 %v12774_v9, %s14456_s2 }
 0xc92   : > { %6921 = vrot.lane.b32.xlu0 %v6506_v41, %s10428_s28 }
 0xc95   : > { %6448 = vrot.lane.b32.xlu1 %v12774_v9, %s10431_s16 }
 0xc96   : > { %7000 = vrot.lane.b32.xlu0 %v6506_v41, %s10429_s26 }
 0xc99   : > { %6557 = vrot.lane.b32.xlu1 %v12774_v9, %s10432_s11 }
 0xc9a   : > { %6844 = vrot.lane.b32.xlu0 %v6506_v41, %s10407_s10 }
 0xc9d   : > { %7165 = vperm.xlu1 %9752, %v7162_v20  }
 0xc9e   : > { %6670 = vrot.lane.b32.xlu0 %v6506_v41, %s10430_s1 }
 0xca2   : > { %6748 = vrot.lane.b32.xlu0 %v6506_v41, %s14456_s2 }
 0xca5   : > { %v6196_v27 = vpop.f32.mrf.mxu0 }
 0xca6   : > { %6512 = vrot.lane.b32.xlu0 %v6506_v41, %s10431_s16 }
 0xca7   : > { %v6198_v19 = vpop.f32.mrf.mxu0 }
 0xca8   : > { %v6155_v52 = vpop.f32.mrf.mxu1 }
 0xca9   : > { %v6197_v36 = vadd.f32 %v6196_v27, %v6155_v52  ;;  %v6200_v10 = vpop.f32.mrf.mxu0 }
 0xcaa   : > { %v6157_v63 = vpop.f32.mrf.mxu1  ;;  %6591 = vrot.lane.b32.xlu0 %v6506_v41, %s10432_s11 }
 0xcab   : > { %v6199_v60 = vadd.f32 %v6198_v19, %v6157_v63  ;;  %v6201_v2 = vpop.f32.mrf.mxu0 }
 0xcac   : > { %v6159_v61 = vpop.f32.mrf.mxu1 }
 0xcad   : > { %v9452_v9 = vpack.c.bf16 %v6199_v60, %v6197_v36 }
 0xcae   : > { %v6160_v0 = vpop.f32.mrf.mxu1 }
 0xcaf   : > { %v6507_v37 = vrot.slane %v9452_v9, 6 }
 0xcb1   : > { %6800 = vst [vmem:[#allocation2 + $0xd4] sm:$0xcc] %v6507_v37  ;;  %7081 = vrot.lane.b32.xlu0 %v6507_v37, %s10427_s15 }
 0xcb5   : > { %6923 = vrot.lane.b32.xlu0 %v6507_v37, %s10428_s28 }
 0xcb9   : > { %7002 = vrot.lane.b32.xlu0 %v6507_v37, %s10429_s26 }
 0xcbd   : > { %6846 = vrot.lane.b32.xlu0 %v6507_v37, %s10407_s10 }
 0xcc1   : > { %6672 = vrot.lane.b32.xlu0 %v6507_v37, %s10430_s1 }
 0xcc3   : > { %v13182_v58 = vpop.permute.xlu0 %6668  ;;  %v13184_v1 = vpop.permute.xlu1 %7077 }
 0xcc4   : > { %v6678_v25 = vrot.slane %v13182_v58, 4  ;;  %v7087_v45 = vrot.slane %v13184_v1, 4 }
 0xcc5   : > { %6750 = vrot.lane.b32.xlu0 %v6507_v37, %s14456_s2 }
 0xcc6   : > { %v6683_v16 = vsel %vm6643_vm6, %v6678_v25, %v13182_v58  ;;  %v7092_v49 = vsel %vm14188_vm4, %v7087_v45, %v13184_v1  ;;  %vm6619_vm4 = vcmask 1043730  }
 0xcc7   : > { %6700 = vst.msk [vmem:[#allocation2 + $0x64] sm:$0xcc] %vm6699_vm9, %v6683_v16  ;;  %v13198_v23 = vpop.permute.xlu0 %6746  ;;  %v13200_v26 = vpop.permute.xlu1 %6919  ;;  %vm6541_vm9 = vmor %vm14509_vm11, %vm6540_vm14  ;;  %vm14513_vm14 = vcmask 769024  }
 0xcc8   : > { %7109 = vst.msk [vmem:[#allocation2 + $0x180] sm:$0xcc] %vm7108_vm12, %v7092_v49  ;;  %v13202_v62 = vpop.f32.mrf.mxu1  ;;  %v6756_v47 = vrot.slane %v13198_v23, 4  ;;  %v6929_v15 = vrot.slane %v13200_v26, 4  ;;  %vm14508_vm12 = vcmask 7168  }
 0xcc9   : > { %6514 = vrot.lane.b32.xlu0 %v6507_v37, %s10431_s16 }
 0xcca   : > { %v6761_v46 = vsel %vm14508_vm12, %v6756_v47, %v13198_v23  ;;  %v6934_v8 = vsel %vm14191_vm13, %v6929_v15, %v13200_v26  ;;  %v13216_v34 = vpop.f32.mrf.mxu1  ;;  %vm13227_vm12 = vmor %vm14507_vm0, %vm7028_vm15 }
 0xccb   : > { %6776 = vst.msk [vmem:[#allocation2 + $0x94] sm:$0xcc] %vm12529_vm7, %v6761_v46  ;;  %v13221_v21 = vpop.permute.xlu0 %6510  ;;  %v13223_v55 = vpop.permute.xlu1 %6998  ;;  %vm14514_vm15 = vmmov %vm14507_vm0  ;;  %vm14518_vm0 = vcmask 1039360  }
 0xccc   : > { %6951 = vst.msk [vmem:[#allocation2 + $0x120] sm:$0xcc] %vm6950_vm8, %v6934_v8  ;;  %v6282_v42 = vpop.f32.mrf.mxu1  ;;  %v6520_v57 = vrot.slane %v13221_v21, 4  ;;  %v7008_v12 = vrot.slane %v13223_v55, 4  ;;  %vm14512_vm8 = vcmask 285696   ;;  %vm13248_vm11 = vmor %vm14514_vm15, %vm6619_vm4  ;;  %vm14519_vm4 = vcmask 281600  }
 0xccd   : > { %6593 = vrot.lane.b32.xlu0 %v6507_v37, %s10432_s11  ;;  %7717 = vst.msk [vmem:[#allocation2 + $0x64] sm:$0xf] %vm14519_vm4, %v10403_v3 }
 0xcce   : > { %v6525_v18 = vsel %vm14512_vm8, %v6520_v57, %v13221_v21  ;;  %v7013_v38 = vsel %vm14513_vm14, %v7008_v12, %v13223_v55  ;;  %v6283_v29 = vpop.f32.mrf.mxu1  ;;  %vm14520_vm8 = vmmov %vm14519_vm4  ;;  %vm14521_vm14 = vcmask 1043456  }
 0xccf   : > { %6542 = vst.msk [vmem:[#allocation2 + $0x4] sm:$0xcc] %vm6541_vm9, %v6525_v18  ;;  %v13243_v44 = vpop.permute.xlu0 %6589  ;;  %v13245_v14 = vpop.permute.xlu1 %6842  ;;  %vm14517_vm9 = vcmask 277504   ;;  %vm14522_vm15 = vmmov %vm14521_vm14 }
 0xcd0   : > { %7030 = vst.msk [vmem:[#allocation2 + $0x150] sm:$0xcc] %vm13227_vm12, %v7013_v38  ;;  %v6599_v20 = vrot.slane %v13243_v44, 4  ;;  %v6852_v27 = vrot.slane %v13245_v14, 4 }
 0xcd1   : > { %7718 = vst.msk [vmem:[#allocation2 + $0x94] sm:$0xf] %vm14520_vm8, %v10403_v3  ;;  %vm14524_vm8 = vmmov %vm14519_vm4 }
 0xcd2   : > { %v6604_v52 = vsel %vm14517_vm9, %v6599_v20, %v13243_v44  ;;  %v6857_v19 = vsel %vm14518_vm0, %v6852_v27, %v13245_v14  ;;  %v13262_v63 = vld [vmem:[#allocation2 + $0x68] ss:$48 sps:$4 sm:$0xff]   ;;  %vm14523_vm9 = vcmask 7168   ;;  %vm14189_vm0 = vcmask 771072   ;;  %7715 = vst.msk [vmem:[#allocation2 + $0x4] sm:$0xf] %vm14519_vm4, %v10403_v3 }
 0xcd3   : > { %6621 = vst.msk [vmem:[#allocation2 + $0x34] sm:$0xcc] %vm13248_vm11, %v6604_v52  ;;  %v6633_v36 = vpop.permute.xlu1 %6632  ;;  %vm14526_vm4 = vcmask 769024   ;;  %v13447_v44 = vld [vmem:[%s14557_s0] sm:$0x3]  ;;  %s14612_s0 = sld [smem:[#allocation8_spill]] }
 0xcd4   : > { %6872 = vst.msk [vmem:[#allocation2 + $0xf0] sm:$0xcc] %vm12505_vm10, %v6857_v19  ;;  %v6640_v60 = vrot.slane %v6633_v36, 4 }
 0xcd5   : > { %7716 = vst.msk [vmem:[#allocation2 + $0x34] sm:$0xf] %vm14524_vm8, %v10403_v3 }
 0xcd6   : > { %v6647_v10 = vsel %vm14521_vm14, %v6639_v6, %v6640_v60 }
 0xcd7   : > { %v6648_v61 = vsel %vm6643_vm6, %v6647_v10, %v6633_v36  ;;  %v6712_v9 = vpop.permute.xlu1 %6711 }
 0xcd8   : > { %6663 = vst [vmem:[#allocation2 + $0x74] sm:$0x33] %v6648_v61  ;;  %v6719_v2 = vrot.slane %v6712_v9, 4  ;;  %v7132_v23 = vld [vmem:[#allocation2 + $0x94] sm:$0xff] }
 0xcda   : > { %v6725_v0 = vsel %vm14522_vm15, %v6718_v43, %v6719_v2  ;;  %v13279_v37 = vld [vmem:[#allocation2 + $0x8] ss:$48 sps:$4 sm:$0xff]   ;;  %vm6996_vm15 = vcmask 762880  }
 0xcdb   : > { %v6726_v16 = vsel %vm14523_vm9, %v6725_v0, %v6712_v9  ;;  %v6888_v49 = vpop.permute.xlu1 %6887  ;;  %vm14525_vm9 = vmmov %vm14521_vm14 }
 0xcdc   : > { %6741 = vst [vmem:[#allocation2 + $0xa4] sm:$0x33] %v6726_v16  ;;  %v6893_v11 = vrot.slane %v6888_v49, 4  ;;  %vm14527_vm8 = vmmov %vm14525_vm9  ;;  %v7122_v21 = vld [vmem:[#allocation2 + $0x34] sm:$0xff] }
 0xcde   : > { %v6902_v6 = vsel %vm14521_vm14, %v6892_v54, %v6893_v11  ;;  %6918 = vst.msk [vmem:[#allocation2 + $0x148] sm:$0x3] %vm14189_vm0, %v6893_v11  ;;  %vm14528_vm14 = vcmask 285696   ;;  %vm14551_vm0 = vcmask 1039360  }
 0xcdf   : > { %v6903_v35 = vsel %vm14191_vm13, %v6902_v6, %v6888_v49  ;;  %v6967_v43 = vpop.permute.xlu1 %6966 }
 0xce0   : > { %6916 = vst [vmem:[#allocation2 + $0x140] sm:$0x33] %v6903_v35  ;;  %v6972_v46 = vrot.slane %v6967_v43, 4 }
 0xce2   : > { %v6981_v8 = vsel %vm14525_vm9, %v6971_v53, %v6972_v46  ;;  %6997 = vst.msk [vmem:[#allocation2 + $0x178] sm:$0x3] %vm6996_vm15, %v6972_v46  ;;  %vm14529_vm15 = vmmov %vm14527_vm8  ;;  %vm14530_vm9 = vcmask 277504  }
 0xce3   : > { %v6982_v42 = vsel %vm14526_vm4, %v6981_v8, %v6967_v43  ;;  %v6445_v18 = vpop.permute.xlu1 %6444  ;;  %vm6840_vm4 = vcmask 1033216  }
 0xce4   : > { %6995 = vst [vmem:[#allocation2 + $0x170] sm:$0x33] %v6982_v42  ;;  %v6452_v30 = vrot.slane %v6445_v18, 4 }
 0xce5   : > { %v6237_v38 = vpop.f32.mrf.mxu0 }
 0xce6   : > { %v6459_v54 = vsel %vm14527_vm8, %v6451_v56, %v6452_v30  ;;  %v6279_v22 = vadd.f32 %v13202_v62, %v6237_v38 }
 0xce7   : > { %v6460_v29 = vsel %vm14528_vm14, %v6459_v54, %v6445_v18  ;;  %v6554_v52 = vpop.permute.xlu1 %6553  ;;  %v6239_v36 = vpop.f32.mrf.mxu0  ;;  %vm14531_vm14 = vcmask 1039360  }
 0xce8   : > { %6475 = vst [vmem:[#allocation2 + $0x14] sm:$0x33] %v6460_v29  ;;  %v6561_v19 = vrot.slane %v6554_v52, 4  ;;  %v6281_v53 = vadd.f32 %v13216_v34, %v6239_v36 }
 0xce9   : > { %v6241_v61 = vpop.f32.mrf.mxu0 }
 0xcea   : > { %v6568_v10 = vsel %vm14529_vm15, %v6560_v33, %v6561_v19  ;;  %v9453_v9 = vpack.c.bf16 %v6281_v53, %v6279_v22  ;;  %vm14532_vm15 = vmmov %vm14527_vm8 }
 0xceb   : > { %v6569_v5 = vsel %vm14530_vm9, %v6568_v10, %v6554_v52  ;;  %v6812_v56 = vpop.permute.xlu1 %6811  ;;  %v6242_v16 = vpop.f32.mrf.mxu0  ;;  %vm14533_vm9 = vmmov %vm14527_vm8 }
 0xcec   : > { %6584 = vst [vmem:[#allocation2 + $0x44] sm:$0x33] %v6569_v5  ;;  %v6817_v0 = vrot.slane %v6812_v56, 4  ;;  %v13305_v49 = vrot.slane %v9453_v9, 6 }
 0xcee   : > { %v6825_v62 = vsel %vm14527_vm8, %v6816_v4, %v6817_v0  ;;  %6841 = vst.msk [vmem:[#allocation2 + $0x118] sm:$0x3] %vm6840_vm4, %v6817_v0  ;;  %6801 = vst [vmem:[#allocation2 + $0xdc] sm:$0xcc] %v13305_v49  ;;  %7083 = vrot.lane.b32.xlu0 %v13305_v49, %s10427_s15  ;;  %vm14534_vm4 = vcmask 7168  }
 0xcef   : > { %v6826_v40 = vsel %vm14531_vm14, %v6825_v62, %v6812_v56  ;;  %v6635_v34 = vpop.permute.xlu1 %6634  ;;  %vm14535_vm14 = vcmask 285696  }
 0xcf0   : > { %6839 = vst [vmem:[#allocation2 + $0x110] sm:$0x33] %v6826_v40  ;;  %v6641_v33 = vrot.slane %v6635_v34, 4 }
 0xcf2   : > { %v6649_v11 = vsel %vm14532_vm15, %v6640_v60, %v6641_v33  ;;  %6925 = vrot.lane.b32.xlu0 %v13305_v49, %s10428_s28  ;;  %vm14536_vm15 = vmmov %vm14527_vm8 }
 0xcf3   : > { %v6650_v6 = vsel %vm6643_vm6, %v6649_v11, %v6635_v34  ;;  %v6714_v35 = vpop.permute.xlu1 %6713 }
 0xcf4   : > { %6664 = vst [vmem:[#allocation2 + $0x7c] sm:$0x33] %v6650_v6  ;;  %v6720_v51 = vrot.slane %v6714_v35, 4 }
 0xcf6   : > { %v6727_v4 = vsel %vm14533_vm9, %v6719_v2, %v6720_v51  ;;  %7004 = vrot.lane.b32.xlu0 %v13305_v49, %s10429_s26  ;;  %vm14537_vm9 = vcmask 277504  }
 0xcf7   : > { %v6728_v43 = vsel %vm14534_vm4, %v6727_v4, %v6714_v35  ;;  %v6447_v46 = vpop.permute.xlu1 %6446  ;;  %vm14538_vm4 = vmmov %vm14527_vm8 }
 0xcf8   : > { %6742 = vst [vmem:[#allocation2 + $0xac] sm:$0x33] %v6728_v43  ;;  %v6453_v8 = vrot.slane %v6447_v46, 4 }
 0xcfa   : > { %v6461_v60 = vsel %vm14527_vm8, %v6452_v30, %v6453_v8  ;;  %6848 = vrot.lane.b32.xlu0 %v13305_v49, %s10407_s10  ;;  %vm14539_vm8 = vmmov %vm14538_vm4 }
 0xcfb   : > { %v6462_v42 = vsel %vm14535_vm14, %v6461_v60, %v6447_v46  ;;  %v6556_v18 = vpop.permute.xlu1 %6555  ;;  %vm14540_vm14 = vcmask 760832  }
 0xcfc   : > { %6476 = vst [vmem:[#allocation2 + $0x1c] sm:$0x33] %v6462_v42  ;;  %v6562_v54 = vrot.slane %v6556_v18, 4 }
 0xcfe   : > { %v6570_v2 = vsel %vm14536_vm15, %v6561_v19, %v6562_v54  ;;  %6674 = vrot.lane.b32.xlu0 %v13305_v49, %s10430_s1  ;;  %vm14541_vm15 = vmmov %vm14538_vm4 }
 0xcff   : > { %v6571_v38 = vsel %vm14537_vm9, %v6570_v2, %v6556_v18  ;;  %v6637_v29 = vpop.permute.xlu1 %6636  ;;  %vm14542_vm9 = vcmask 7168  }
 0xd00   : > { %6585 = vst [vmem:[#allocation2 + $0x4c] sm:$0x33] %v6571_v38  ;;  %v6642_v52 = vrot.slane %v6637_v29, 4  ;;  %v13330_v36 = vpop.permute.xlu0 %7079 }
 0xd01   : > { %v7088_v22 = vrot.slane %v13330_v36, 4 }
 0xd02   : > { %v6651_v30 = vsel %vm14538_vm4, %v6641_v33, %v6642_v52  ;;  %6752 = vrot.lane.b32.xlu0 %v13305_v49, %s14456_s2  ;;  %vm6478_vm4 = vcmask 279552  }
 0xd03   : > { %v6652_v53 = vsel %vm6643_vm6, %v6651_v30, %v6637_v29  ;;  %v6716_v10 = vpop.permute.xlu1 %6715  ;;  %v7093_v61 = vsel %vm14539_vm8, %v7087_v45, %v7088_v22 }
 0xd04   : > { %6665 = vst [vmem:[#allocation2 + $0x84] sm:$0x33] %v6652_v53  ;;  %v6721_v19 = vrot.slane %v6716_v10, 4  ;;  %v7094_v5 = vsel %vm14540_vm14, %v7093_v61, %v13330_v36  ;;  %v13344_v56 = vpop.permute.xlu0 %6921  ;;  %vm14543_vm14 = vmmov %vm14539_vm8 }
 0xd05   : > { %7110 = vst [vmem:[#allocation2 + $0x188] sm:$0xcc] %v7094_v5  ;;  %v6930_v0 = vrot.slane %v13344_v56, 4  ;;  %v6360_v16 = vpop.f32.mrf.mxu0 }
 0xd06   : > { %v6729_v9 = vsel %vm14541_vm15, %v6720_v51, %v6721_v19  ;;  %6516 = vrot.lane.b32.xlu0 %v13305_v49, %s10431_s16  ;;  %vm14544_vm15 = vcmask 285696  }
 0xd07   : > { %v6730_v62 = vsel %vm14542_vm9, %v6729_v9, %v6716_v10  ;;  %v6449_v40 = vpop.permute.xlu1 %6448  ;;  %v6935_v45 = vsel %vm14539_vm8, %v6929_v15, %v6930_v0  ;;  %v6362_v33 = vpop.f32.mrf.mxu0  ;;  %vm14545_vm9 = vmmov %vm14539_vm8  ;;  %vm14546_vm8 = vcmask 769024  }
 0xd08   : > { %v6319_v34 = vpop.f32.mrf.mxu1  ;;  %6743 = vst [vmem:[#allocation2 + $0xb4] sm:$0x33] %v6730_v62  ;;  %v6454_v1 = vrot.slane %v6449_v40, 4  ;;  %v6936_v11 = vsel %vm14191_vm13, %v6935_v45, %v13344_v56  ;;  %v13358_v35 = vpop.permute.xlu0 %7000 }
 0xd09   : > { %6952 = vst [vmem:[#allocation2 + $0x128] sm:$0xcc] %v6936_v11  ;;  %v6361_v4 = vadd.f32 %v6360_v16, %v6319_v34  ;;  %v7009_v46 = vrot.slane %v13358_v35, 4  ;;  %v6364_v60 = vpop.f32.mrf.mxu0 }
 0xd0a   : > { %v6321_v6 = vpop.f32.mrf.mxu1  ;;  %v6463_v51 = vsel %vm14543_vm14, %v6453_v8, %v6454_v1  ;;  %vm14547_vm14 = vmmov %vm14545_vm9  ;;  %v10269_v1 = vld [vmem:[#allocation2 + $0x124] ss:$48 sps:$4 sm:$0xff]  }
 0xd0b   : > { %v6363_v43 = vadd.f32 %v6362_v33, %v6321_v6  ;;  %v6464_v42 = vsel %vm14544_vm15, %v6463_v51, %v6449_v40  ;;  %v6558_v26 = vpop.permute.xlu1 %6557  ;;  %v7014_v38 = vsel %vm14545_vm9, %v7008_v12, %v7009_v46  ;;  %v6365_v8 = vpop.f32.mrf.mxu0  ;;  %vm14548_vm15 = vcmask 277504   ;;  %v10272_v6 = vld [vmem:[#allocation2 + $0xc4] ss:$48 sps:$4 sm:$0xff]  }
 0xd0c   : > { %v6323_v18 = vpop.f32.mrf.mxu1  ;;  %6477 = vst [vmem:[#allocation2 + $0x24] sm:$0x33] %v6464_v42  ;;  %v6563_v15 = vrot.slane %v6558_v26, 4  ;;  %v7015_v29 = vsel %vm14546_vm8, %v7014_v38, %v13358_v35  ;;  %v13370_v30 = vpop.permute.xlu0 %6844  ;;  %v7157_v53 = vld [vmem:[#allocation2 + $0x184] sm:$0xff]  ;;  %vm14549_vm8 = vmmov %vm14545_vm9 }
 0xd0d   : > { %v9454_v2 = vpack.c.bf16 %v6363_v43, %v6361_v4  ;;  %7031 = vst [vmem:[#allocation2 + $0x158] sm:$0xcc] %v7015_v29  ;;  %v6853_v61 = vrot.slane %v13370_v30, 4  ;;  %v9368_v5 = vcombine.high %v7157_v53, %v7157_v53  ;;  %v9367_v9 = vcombine.low %v7157_v53, %v7157_v53  ;;  %7719 = vst.msk [vmem:[#allocation2 + $0xc4] sm:$0x3] %vm6478_vm4, %v10403_v3  ;;  %v7127_v42 = vld [vmem:[#allocation2 + $0x64] sm:$0xff] }
 0xd0e   : > { %v6324_v52 = vpop.f32.mrf.mxu1  ;;  %v6572_v10 = vsel %vm14547_vm14, %v6562_v54, %v6563_v15  ;;  %vm14550_vm14 = vmmov %vm14549_vm8  ;;  %v9337_v18 = vcombine.low %v7127_v42, %v7132_v23 }
 0xd0f   : > { %v13373_v19 = vrot.slane %v9454_v2, 6  ;;  %v6573_v55 = vsel %vm14548_vm15, %v6572_v10, %v6558_v26  ;;  %v6858_v12 = vsel %vm14545_vm9, %v6852_v27, %v6853_v61  ;;  %9377 = vmatprep.subr.msk.bf16.mxu0 %vm14549_vm8, %v9368_v5  ;;  %v7397_v54 = vsel %vm14550_vm14, %v9367_v9, 0  ;;  %vm14552_vm15 = vmmov %vm14549_vm8 }
 0xd10   : > { %6586 = vst [vmem:[#allocation2 + $0x54] sm:$0x33] %v6573_v55  ;;  %v6859_v16 = vsel %vm14551_vm0, %v6858_v12, %v13370_v30  ;;  %v13389_v62 = vpop.permute.xlu0 %6670  ;;  %7433 = vmatpush1.bf16.msra.mxu0 %v7397_v54  ;;  %vm14553_vm0 = vmmov %vm14549_vm8  ;;  %vm14554_vm9 = vcmask 7168   ;;  %vm14556_vm14 = vcmask 285696  }
 0xd11   : > { %6802 = vst [vmem:[#allocation2 + $0xe4] sm:$0xcc] %v13373_v19  ;;  %7085 = vrot.lane.b32.xlu0 %v13373_v19, %s10427_s15  ;;  %6873 = vst [vmem:[#allocation2 + $0xf8] sm:$0xcc] %v6859_v16  ;;  %v6679_v40 = vrot.slane %v13389_v62, 4 }
 0xd12   : > { %vm14555_vm8 = vmmov %vm14553_vm0 }
 0xd13   : > { %v6684_v14 = vsel %vm14552_vm15, %v6678_v25, %v6679_v40  ;;  %vm14558_vm4 = vmmov %vm14553_vm0  ;;  %vm14559_vm15 = vcmask 277504  }
 0xd14   : > { %v6685_v27 = vsel %vm6643_vm6, %v6684_v14, %v13389_v62  ;;  %v13401_v34 = vpop.permute.xlu0 %6748  ;;  %v10271_v45 = vld [vmem:[#allocation2 + $0x128] ss:$48 sps:$4 sm:$0xff]  }
 0xd15   : > { %6927 = vrot.lane.b32.xlu0 %v13373_v19, %s10428_s28  ;;  %6701 = vst [vmem:[#allocation2 + $0x6c] sm:$0xcc] %v6685_v27  ;;  %v6757_v33 = vrot.slane %v13401_v34, 4  ;;  %7434 = vmatprep.subr.bf16.mxu0 %v10271_v45  ;;  %v10281_v27 = vld [vmem:[#allocation2 + $0x12c] ss:$48 sps:$4 sm:$0xff]  }
 0xd16   : > { %7435 = vmatpush1.bf16.msra.mxu0 %v10269_v1 }
 0xd17   : > { %v6762_v58 = vsel %vm14553_vm0, %v6756_v47, %v6757_v33 }
 0xd18   : > { %v6763_v25 = vsel %vm14554_vm9, %v6762_v58, %v13401_v34  ;;  %v13413_v11 = vpop.permute.xlu0 %6512  ;;  %v10274_v51 = vld [vmem:[#allocation2 + $0xc8] ss:$48 sps:$4 sm:$0xff]   ;;  %vm14560_vm9 = vcmask 760832  }
 0xd19   : > { %7006 = vrot.lane.b32.xlu0 %v13373_v19, %s10429_s26  ;;  %6777 = vst [vmem:[#allocation2 + $0x9c] sm:$0xcc] %v6763_v25  ;;  %v6521_v4 = vrot.slane %v13413_v11, 4  ;;  %7436 = vmatprep.subr.bf16.mxu0 %v10274_v51  ;;  %v10284_v25 = vld [vmem:[#allocation2 + $0xcc] ss:$48 sps:$4 sm:$0xff]  }
 0xd1a   : > { %7437 = vmatpush1.bf16.msra.mxu0 %v10272_v6 }
 0xd1b   : > { %v6526_v47 = vsel %vm14555_vm8, %v6520_v57, %v6521_v4  ;;  %7438 = vmatprep.subr.bf16.mxu0 %v13262_v63  ;;  %v7117_v63 = vld [vmem:[#allocation2 + $0x4] sm:$0xff]  ;;  %vm14561_vm8 = vcmask 588800  }
 0xd1c   : > { %v6527_v43 = vsel %vm14556_vm14, %v6526_v47, %v13413_v11  ;;  %v13427_v60 = vpop.permute.xlu0 %6591  ;;  %v9327_v38 = vcombine.low %v7117_v63, %v7122_v21  ;;  %vm14562_vm14 = vmmov %vm14553_vm0 }
 0xd1d   : > { %6850 = vrot.lane.b32.xlu0 %v13373_v19, %s10407_s10  ;;  %6543 = vst [vmem:[#allocation2 + $0xc] sm:$0xcc] %v6527_v43  ;;  %v6600_v26 = vrot.slane %v13427_v60, 4 }
 0xd1e   : > { %7439 = vmatpush1.bf16.msra.mxu0 %v9337_v18 }
 0xd1f   : > { %v6605_v57 = vsel %vm14558_vm4, %v6599_v20, %v6600_v26  ;;  %7440 = vmatprep.subr.bf16.mxu0 %v13279_v37  ;;  %vm14563_vm4 = vmmov %vm14553_vm0 }
 0xd20   : > { %v6606_v15 = vsel %vm14559_vm15, %v6605_v57, %v13427_v60  ;;  %vm14564_vm15 = vcmask 769024   ;;  %v10287_v23 = vld [vmem:[#allocation2 + $0x70] ss:$48 sps:$4 sm:$0xff]   ;;  %v10289_v42 = vld [vmem:[#allocation2 + $0x6c] ss:$48 sps:$4 sm:$0xff]  }
 0xd21   : > { %6595 = vrot.lane.b32.xlu0 %v13305_v49, %s10432_s11  ;;  %6622 = vst [vmem:[#allocation2 + $0x3c] sm:$0xcc] %v6606_v15 }
 0xd22   : > { %7441 = vmatpush1.bf16.msra.mxu0 %v9327_v38 }
 0xd23   : > { %v13441_v2 = vpop.permute.xlu0 %7081 }
 0xd24   : > { %v7089_v8 = vrot.slane %v13441_v2, 4 }
 0xd25   : > { %6676 = vrot.lane.b32.xlu0 %v13373_v19, %s10430_s1  ;;  %9378 = vmatmul.mubr.msk.bf16.vlgmr.msra.gmra.mxu0 %vm14561_vm8, %v13447_v44  ;;  %vm14566_vm8 = vmmov %vm14553_vm0 }
 0xd26   : > { %v7095_v20 = vsel %vm14553_vm0, %v7088_v22, %v7089_v8  ;;  %7499 = vmatprep.mubr.bf16.mxu0 %v10403_v3 }
 0xd27   : > { %v7096_v37 = vsel %vm14560_vm9, %v7095_v20, %v13441_v2  ;;  %v13456_v49 = vpop.permute.xlu0 %6923  ;;  %vm14565_vm9 = vmmov %vm14553_vm0 }
 0xd28   : > { %7111 = vst [vmem:[#allocation2 + $0x190] sm:$0xcc] %v7096_v37  ;;  %v6931_v29 = vrot.slane %v13456_v49, 4  ;;  %v10290_v18 = vld [vmem:[#allocation2 + $0x10] ss:$48 sps:$4 sm:$0xff]  }
 0xd29   : > { %6754 = vrot.lane.b32.xlu0 %v13373_v19, %s14456_s2  ;;  %v10292_v21 = vld [vmem:[#allocation2 + $0xc] ss:$48 sps:$4 sm:$0xff]  }
 0xd2a   : > { %v6937_v36 = vsel %vm14562_vm14, %v6930_v0, %v6931_v29  ;;  %vm14567_vm14 = vcmask 1039360  }
 0xd2b   : > { %v6938_v22 = vsel %vm14191_vm13, %v6937_v36, %v13456_v49  ;;  %v13471_v52 = vpop.permute.xlu0 %7002 }
 0xd2c   : > { %6953 = vst [vmem:[#allocation2 + $0x130] sm:$0xcc] %v6938_v22  ;;  %v7010_v53 = vrot.slane %v13471_v52, 4 }
 0xd2d   : > { %6518 = vrot.lane.b32.xlu0 %v13373_v19, %s10431_s16 }
 0xd2e   : > { %v7016_v10 = vsel %vm14563_vm4, %v7009_v46, %v7010_v53  ;;  %vm14568_vm4 = vmmov %vm14553_vm0 }
 0xd2f   : > { %v7017_v56 = vsel %vm14564_vm15, %v7016_v10, %v13471_v52  ;;  %v13483_v0 = vpop.permute.xlu0 %6846  ;;  %v7158_v5 = vld [vmem:[#allocation2 + $0x18c] sm:$0xff]  ;;  %vm14569_vm15 = vmmov %vm14553_vm0 }
 0xd30   : > { %7032 = vst [vmem:[#allocation2 + $0x160] sm:$0xcc] %v7017_v56  ;;  %v6854_v9 = vrot.slane %v13483_v0, 4  ;;  %v9370_v55 = vcombine.high %v7158_v5, %v7158_v5  ;;  %v9369_v12 = vcombine.low %v7158_v5, %v7158_v5 }
 0xd31   : > { %6597 = vrot.lane.b32.xlu0 %v13373_v19, %s10432_s11 }
 0xd32   : > { %v6860_v35 = vsel %vm14553_vm0, %v6853_v61, %v6854_v9  ;;  %9379 = vmatprep.subr.msk.bf16.mxu0 %vm14565_vm9, %v9370_v55  ;;  %v7403_v46 = vsel %vm14566_vm8, %v9369_v12, 0  ;;  %vm14570_vm0 = vcmask 7168   ;;  %vm14571_vm9 = vmmov %vm14568_vm4  ;;  %vm14572_vm8 = vcmask 285696  }
 0xd33   : > { %v6861_v54 = vsel %vm14567_vm14, %v6860_v35, %v13483_v0  ;;  %v13497_v16 = vpop.permute.xlu0 %6672  ;;  %7474 = vmatpush1.bf16.msra.mxu0 %v7403_v46  ;;  %vm14573_vm14 = vmmov %vm14568_vm4 }
 0xd34   : > { %6874 = vst [vmem:[#allocation2 + $0x100] sm:$0xcc] %v6861_v54  ;;  %v6680_v14 = vrot.slane %v13497_v16, 4 }
 0xd36   : > { %v6686_v30 = vsel %vm14568_vm4, %v6679_v40, %v6680_v14  ;;  %vm14574_vm4 = vcmask 277504  }
 0xd37   : > { %v6687_v19 = vsel %vm6643_vm6, %v6686_v30, %v13497_v16  ;;  %v13507_v61 = vpop.permute.xlu0 %6750  ;;  %v10283_v1 = vld [vmem:[#allocation2 + $0x130] ss:$48 sps:$4 sm:$0xff]   ;;  %v10295_v54 = vld [vmem:[#allocation2 + $0x134] ss:$48 sps:$4 sm:$0xff]  }
 0xd38   : > { %6702 = vst [vmem:[#allocation2 + $0x74] sm:$0xcc] %v6687_v19  ;;  %v6758_v45 = vrot.slane %v13507_v61, 4  ;;  %7475 = vmatprep.subr.bf16.mxu0 %v10283_v1 }
 0xd39   : > { %7476 = vmatpush1.bf16.msra.mxu0 %v10281_v27 }
 0xd3a   : > { %v6764_v58 = vsel %vm14569_vm15, %v6757_v33, %v6758_v45  ;;  %vm14575_vm15 = vcmask 588800  }
 0xd3b   : > { %v6765_v62 = vsel %vm14570_vm0, %v6764_v58, %v13507_v61  ;;  %v13517_v40 = vpop.permute.xlu0 %6514  ;;  %v10286_v6 = vld [vmem:[#allocation2 + $0xd0] ss:$48 sps:$4 sm:$0xff]   ;;  %vm14576_vm0 = vmmov %vm14571_vm9  ;;  %v10298_v1 = vld [vmem:[#allocation2 + $0xd4] ss:$48 sps:$4 sm:$0xff]  }
 0xd3c   : > { %6778 = vst [vmem:[#allocation2 + $0xa4] sm:$0xcc] %v6765_v62  ;;  %v6522_v51 = vrot.slane %v13517_v40, 4  ;;  %7477 = vmatprep.subr.bf16.mxu0 %v10286_v6 }
 0xd3d   : > { %7478 = vmatpush1.bf16.msra.mxu0 %v10284_v25 }
 0xd3e   : > { %v6528_v34 = vsel %vm14571_vm9, %v6521_v4, %v6522_v51  ;;  %7479 = vmatprep.subr.bf16.mxu0 %v10287_v23  ;;  %vm14577_vm9 = vcmask 760832  }
 0xd3f   : > { %v6529_v33 = vsel %vm14572_vm8, %v6528_v34, %v13517_v40  ;;  %v13527_v47 = vpop.permute.xlu0 %6593  ;;  %vm14578_vm8 = vmmov %vm14576_vm0  ;;  %v7129_v23 = vld [vmem:[#allocation2 + $0x74] sm:$0xff] }
 0xd40   : > { %6544 = vst [vmem:[#allocation2 + $0x14] sm:$0xcc] %v6529_v33  ;;  %v6601_v43 = vrot.slane %v13527_v47, 4 }
 0xd41   : > { %7480 = vmatpush1.bf16.msra.mxu0 %v10289_v42 }
 0xd42   : > { %v6607_v11 = vsel %vm14573_vm14, %v6600_v26, %v6601_v43  ;;  %7481 = vmatprep.subr.bf16.mxu0 %v10290_v18  ;;  %vm14579_vm14 = vmmov %vm14576_vm0 }
 0xd43   : > { %v6608_v4 = vsel %vm14574_vm4, %v6607_v11, %v13527_v47  ;;  %vm14580_vm4 = vcmask 769024   ;;  %v7134_v25 = vld [vmem:[#allocation2 + $0xa4] sm:$0xff] }
 0xd44   : > { %6623 = vst [vmem:[#allocation2 + $0x44] sm:$0xcc] %v6608_v4  ;;  %v10301_v6 = vld [vmem:[#allocation2 + $0x78] ss:$48 sps:$4 sm:$0xff]   ;;  %v9341_v34 = vcombine.low %v7129_v23, %v7134_v25 }
 0xd45   : > { %7482 = vmatpush1.bf16.msra.mxu0 %v10292_v21 }
 0xd47   : > { %v7119_v18 = vld [vmem:[#allocation2 + $0x14] sm:$0xff] }
 0xd48   : > { %9380 = vmatmul.mubr.msk.bf16.vlgmr.msra.gmra.mxu0 %vm14575_vm15, %v13447_v44  ;;  %vm14581_vm15 = vmmov %vm14576_vm0 }
 0xd49   : > { %7581 = vmatprep.mubr.bf16.mxu0 %v10403_v3 }
 0xd4b   : > { %v7124_v33 = vld [vmem:[#allocation2 + $0x44] sm:$0xff] }
 0xd4c   : > { %v10303_v42 = vld [vmem:[#allocation2 + $0x18] ss:$48 sps:$4 sm:$0xff]   ;;  %v9331_v4 = vcombine.low %v7119_v18, %v7124_v33 }
 0xd60   : > { %v13540_v57 = vpop.permute.xlu0 %7083 }
 0xd61   : > { %v7090_v15 = vrot.slane %v13540_v57, 4 }
 0xd63   : > { %v7097_v60 = vsel %vm14576_vm0, %v7089_v8, %v7090_v15 }
 0xd64   : > { %v7098_v26 = vsel %vm14577_vm9, %v7097_v60, %v13540_v57  ;;  %v13550_v63 = vpop.permute.xlu0 %6925  ;;  %vm14582_vm9 = vmmov %vm14576_vm0 }
 0xd65   : > { %7112 = vst [vmem:[#allocation2 + $0x198] sm:$0xcc] %v7098_v26  ;;  %v6932_v38 = vrot.slane %v13550_v63, 4 }
 0xd67   : > { %v6939_v20 = vsel %vm14578_vm8, %v6931_v29, %v6932_v38  ;;  %vm14583_vm8 = vcmask 1039360  }
 0xd68   : > { %v6940_v37 = vsel %vm14191_vm13, %v6939_v20, %v13550_v63  ;;  %v13560_v2 = vpop.permute.xlu0 %7004 }
 0xd69   : > { %6954 = vst [vmem:[#allocation2 + $0x138] sm:$0xcc] %v6940_v37  ;;  %v7011_v8 = vrot.slane %v13560_v2, 4 }
 0xd6b   : > { %v7018_v36 = vsel %vm14579_vm14, %v7010_v53, %v7011_v8  ;;  %vm14584_vm14 = vmmov %vm14576_vm0 }
 0xd6c   : > { %v7019_v22 = vsel %vm14580_vm4, %v7018_v36, %v13560_v2  ;;  %v13570_v49 = vpop.permute.xlu0 %6848  ;;  %v7159_v29 = vld [vmem:[#allocation2 + $0x194] sm:$0xff]  ;;  %vm14585_vm4 = vmmov %vm14576_vm0 }
 0xd6d   : > { %7033 = vst [vmem:[#allocation2 + $0x168] sm:$0xcc] %v7019_v22  ;;  %v6855_v10 = vrot.slane %v13570_v49, 4  ;;  %v9372_v56 = vcombine.high %v7159_v29, %v7159_v29  ;;  %v9371_v5 = vcombine.low %v7159_v29, %v7159_v29 }
 0xd6f   : > { %v6862_v55 = vsel %vm14581_vm15, %v6854_v9, %v6855_v10  ;;  %9381 = vmatprep.subr.msk.bf16.mxu1 %vm14576_vm0, %v9372_v56  ;;  %v7409_v52 = vsel %vm14582_vm9, %v9371_v5, 0  ;;  %vm14586_vm15 = vcmask 7168   ;;  %vm14587_vm9 = vcmask 285696  }
 0xd70   : > { %v6863_v53 = vsel %vm14583_vm8, %v6862_v55, %v13570_v49  ;;  %v13582_v12 = vpop.permute.xlu0 %6674  ;;  %7515 = vmatpush1.bf16.msra.mxu1 %v7409_v52  ;;  %vm7114_vm8 = vcmask 756738  }
 0xd71   : > { %6875 = vst [vmem:[#allocation2 + $0x108] sm:$0xcc] %v6863_v53  ;;  %v6681_v35 = vrot.slane %v13582_v12, 4 }
 0xd73   : > { %v6688_v0 = vsel %vm14584_vm14, %v6680_v14, %v6681_v35  ;;  %vm14588_vm14 = vmmov %vm14576_vm0 }
 0xd74   : > { %v6689_v9 = vsel %vm6643_vm6, %v6688_v0, %v13582_v12  ;;  %v13592_v46 = vpop.permute.xlu0 %6752  ;;  %v10297_v30 = vld [vmem:[#allocation2 + $0x138] ss:$48 sps:$4 sm:$0xff]  }
 0xd75   : > { %6703 = vst [vmem:[#allocation2 + $0x7c] sm:$0xcc] %v6689_v9  ;;  %v6759_v19 = vrot.slane %v13592_v46, 4  ;;  %7516 = vmatprep.subr.bf16.mxu1 %v10297_v30 }
 0xd76   : > { %7517 = vmatpush1.bf16.msra.mxu1 %v10295_v54 }
 0xd77   : > { %v6766_v27 = vsel %vm14585_vm4, %v6758_v45, %v6759_v19  ;;  %vm14589_vm4 = vcmask 760832  }
 0xd78   : > { %v6767_v16 = vsel %vm14586_vm15, %v6766_v27, %v13592_v46  ;;  %v13602_v14 = vpop.permute.xlu0 %6516  ;;  %v10300_v58 = vld [vmem:[#allocation2 + $0xd8] ss:$48 sps:$4 sm:$0xff]   ;;  %vm6956_vm15 = vcmask 773122  }
 0xd79   : > { %6779 = vst [vmem:[#allocation2 + $0xac] sm:$0xcc] %v6767_v16  ;;  %v6523_v62 = vrot.slane %v13602_v14, 4  ;;  %7518 = vmatprep.subr.bf16.mxu1 %v10300_v58  ;;  %v10309_v16 = vld [vmem:[#allocation2 + $0x13c] ss:$48 sps:$4 sm:$0xff]  }
 0xd7a   : > { %7519 = vmatpush1.bf16.msra.mxu1 %v10298_v1 }
 0xd7b   : > { %v6530_v61 = vsel %vm14576_vm0, %v6522_v51, %v6523_v62  ;;  %7520 = vmatprep.subr.bf16.mxu1 %v10301_v6  ;;  %vm14590_vm0 = vcmask 588800  }
 0xd7c   : > { %v6531_v45 = vsel %vm14587_vm9, %v6530_v61, %v13602_v14  ;;  %vm14591_vm9 = vmmov %vm14588_vm14 }
 0xd7d   : > { %6545 = vst [vmem:[#allocation2 + $0x1c] sm:$0xcc] %v6531_v45 }
 0xd7e   : > { %7521 = vmatpush1.bf16.msra.mxu1 %v9341_v34 }
 0xd7f   : > { %7522 = vmatprep.subr.bf16.mxu1 %v10303_v42 }
 0xd80   : > { %v7135_v18 = vld [vmem:[#allocation2 + $0xac] sm:$0xff] }
 0xd81   : > { %v10321_v12 = vld [vmem:[#allocation2 + $0x80] ss:$48 sps:$4 sm:$0xff]  }
 0xd82   : > { %7523 = vmatpush1.bf16.msra.mxu1 %v9331_v4 }
 0xd83   : > { %v7086_v11 = vpop.permute.xlu0 %7085 }
 0xd84   : > { %v7091_v21 = vrot.slane %v7086_v11, 4 }
 0xd85   : > { %9382 = vmatmul.mubr.msk.bf16.vlgmr.msra.gmra.mxu1 %vm14590_vm0, %v13447_v44  ;;  %vm14192_vm0 = vcmask 1035266  }
 0xd86   : > { %v7099_v40 = vsel %vm14588_vm14, %v7090_v15, %v7091_v21  ;;  %7115 = vst.msk [vmem:[#allocation2 + $0x1a8] sm:$0xc] %vm7114_vm8, %v7091_v21  ;;  %7622 = vmatprep.mubr.bf16.mxu1 %v10403_v3  ;;  %vm14190_vm14 = vcmask 764930   ;;  %vm14592_vm8 = vmmov %vm14591_vm9  ;;  %v7130_v21 = vld [vmem:[#allocation2 + $0x7c] sm:$0xff] }
 0xd87   : > { %v7100_v51 = vsel %vm14589_vm4, %v7099_v40, %v7086_v11  ;;  %v6928_v60 = vpop.permute.xlu0 %6927  ;;  %vm14593_vm4 = vcmask 769024  }
 0xd88   : > { %7113 = vst [vmem:[#allocation2 + $0x1a0] sm:$0xcc] %v7100_v51  ;;  %v6933_v26 = vrot.slane %v6928_v60, 4  ;;  %v9343_v51 = vcombine.low %v7130_v21, %v7135_v18  ;;  %v7667_v21 = vsub.s32 5, %v12407_v32 }
 0xd8a   : > { %v6941_v20 = vsel %vm14591_vm9, %v6932_v38, %v6933_v26  ;;  %6957 = vst.msk [vmem:[#allocation2 + $0x148] sm:$0xc] %vm6956_vm15, %v6933_v26  ;;  %vm14594_vm15 = vmmov %vm14592_vm8 }
 0xd8b   : > { %v6942_v57 = vsel %vm14191_vm13, %v6941_v20, %v6928_v60  ;;  %v7007_v15 = vpop.permute.xlu0 %7006  ;;  %vm14595_vm9 = vmmov %vm14592_vm8 }
 0xd8c   : > { %6955 = vst [vmem:[#allocation2 + $0x140] sm:$0xcc] %v6942_v57  ;;  %v7012_v37 = vrot.slane %v7007_v15, 4 }
 0xd8e   : > { %v7020_v36 = vsel %vm14592_vm8, %v7011_v8, %v7012_v37  ;;  %7036 = vst.msk [vmem:[#allocation2 + $0x178] sm:$0xc] %vm14190_vm14, %v7012_v37  ;;  %vm14597_vm14 = vcmask 1039360  }
 0xd8f   : > { %v7021_v22 = vsel %vm14593_vm4, %v7020_v36, %v7007_v15  ;;  %v6851_v29 = vpop.permute.xlu0 %6850  ;;  %v7160_v63 = vld [vmem:[#allocation2 + $0x19c] sm:$0xff]  ;;  %v7161_v56 = vld [vmem:[#allocation2 + $0x1a4] sm:$0xff]  ;;  %vm14596_vm4 = vmmov %vm14592_vm8 }
 0xd90   : > { %7034 = vst [vmem:[#allocation2 + $0x170] sm:$0xcc] %v7021_v22  ;;  %v6856_v38 = vrot.slane %v6851_v29, 4  ;;  %v9374_v5 = vcombine.high %v7160_v63, %v7160_v63  ;;  %v9376_v55 = vcombine.high %v7161_v56, %v7161_v56  ;;  %v9373_v52 = vcombine.low %v7160_v63, %v7160_v63  ;;  %vm14598_vm13 = vmmov %vm14596_vm4 }
 0xd91   : > { %v9375_v53 = vcombine.low %v7161_v56, %v7161_v56 }
 0xd92   : > { %v6864_v2 = vsel %vm14594_vm15, %v6855_v10, %v6856_v38  ;;  %6878 = vst.msk [vmem:[#allocation2 + $0x118] sm:$0xc] %vm14192_vm0, %v6856_v38  ;;  %9383 = vmatprep.subr.msk.bf16.mxu0 %vm14595_vm9, %v9374_v5  ;;  %9385 = vmatprep.subr.msk.bf16.mxu1 %vm14592_vm8, %v9376_v55  ;;  %v7415_v8 = vsel %vm14596_vm4, %v9373_v52, 0  ;;  %vm14599_vm15 = vmmov %vm14596_vm4  ;;  %vm14600_vm0 = vcmask 277504   ;;  %vm14604_vm9 = vcmask 7168   ;;  %v13671_v5 = vpop.permute.xlu1 %7165  ;;  %v13674_v52 = vld [vmem:[%s14612_s0] sm:$0xff] }
 0xd93   : > { %v6865_v0 = vsel %vm14597_vm14, %v6864_v2, %v6851_v29  ;;  %v6596_v9 = vpop.permute.xlu0 %6595  ;;  %7556 = vmatpush1.bf16.msra.mxu0 %v7415_v8  ;;  %v7421_v54 = vsel %vm14598_vm13, %v9375_v53, 0  ;;  %vm14601_vm13 = vmmov %vm14596_vm4  ;;  %vm14602_vm14 = vcmask 1042152  }
 0xd94   : > { %6876 = vst [vmem:[#allocation2 + $0x110] sm:$0xcc] %v6865_v0  ;;  %v6602_v30 = vrot.slane %v6596_v9, 4  ;;  %7597 = vmatpush1.bf16.msra.mxu1 %v7421_v54  ;;  %v7648_v0 = vrot.slane %v13674_v52, %v12421_v39  ;;  %v7652_v54 = vrot.slane %v13674_v52, %v12433_v48 }
 0xd95   : > { %v10314_v6 = vld [vmem:[#allocation2 + $0x148] ss:$48 sps:$4 sm:$0xff]  }
 0xd96   : > { %v6609_v49 = vsel %vm14599_vm15, %v6601_v43, %v6602_v30  ;;  %7598 = vmatprep.subr.bf16.mxu1 %v10314_v6  ;;  %v10315_v43 = vld [vmem:[#allocation2 + $0xdc] ss:$48 sps:$4 sm:$0xff]   ;;  %vm14607_vm15 = vcmask 1044200  }
 0xd97   : > { %v6610_v10 = vsel %vm14600_vm0, %v6609_v49, %v6596_v9  ;;  %v6677_v27 = vpop.permute.xlu0 %6676  ;;  %v10311_v1 = vld [vmem:[#allocation2 + $0x140] ss:$48 sps:$4 sm:$0xff]   ;;  %v10312_v25 = vld [vmem:[#allocation2 + $0x144] ss:$48 sps:$4 sm:$0xff]   ;;  %vm14603_vm0 = vmmov %vm14596_vm4  ;;  %vm14606_vm4 = vcmask 285696  }
 0xd98   : > { %6624 = vst [vmem:[#allocation2 + $0x4c] sm:$0xcc] %v6610_v10  ;;  %v6682_v58 = vrot.slane %v6677_v27, 4  ;;  %7557 = vmatprep.subr.bf16.mxu0 %v10311_v1  ;;  %7599 = vmatpush1.bf16.msra.mxu1 %v10312_v25  ;;  %vm14605_vm8 = vmmov %vm14603_vm0 }
 0xd99   : > { %7558 = vmatpush1.bf16.msra.mxu0 %v10309_v16  ;;  %v10320_v42 = vld [vmem:[#allocation2 + $0xe8] ss:$48 sps:$4 sm:$0xff]  }
 0xd9a   : > { %v6690_v61 = vsel %vm14601_vm13, %v6681_v35, %v6682_v58  ;;  %7724 = vst.msk [vmem:[#allocation2 + $0xe8] sm:$0x3] %vm14602_vm14, %v10403_v3  ;;  %7600 = vmatprep.subr.bf16.mxu1 %v10320_v42  ;;  %vm14608_vm13 = vmmov %vm14603_vm0  ;;  %vm14609_vm14 = vcmask 277504   ;;  %v13691_v58 = vsub.s32 3, %v12407_v32 }
 0xd9b   : > { %v6691_v47 = vsel %vm6643_vm6, %v6690_v61, %v6677_v27  ;;  %v6755_v45 = vpop.permute.xlu0 %6754  ;;  %v10317_v23 = vld [vmem:[#allocation2 + $0xe0] ss:$48 sps:$4 sm:$0xff]   ;;  %v10318_v33 = vld [vmem:[#allocation2 + $0xe4] ss:$48 sps:$4 sm:$0xff]  }
 0xd9c   : > { %6704 = vst [vmem:[#allocation2 + $0x84] sm:$0xcc] %v6691_v47  ;;  %v6760_v34 = vrot.slane %v6755_v45, 4  ;;  %7559 = vmatprep.subr.bf16.mxu0 %v10317_v23  ;;  %7601 = vmatpush1.bf16.msra.mxu1 %v10318_v33  ;;  %v7660_v23 = vrot.slane %v13674_v52, %v13691_v58 }
 0xd9d   : > { %7560 = vmatpush1.bf16.msra.mxu0 %v10315_v43 }
 0xd9e   : > { %v6768_v35 = vsel %vm14603_vm0, %v6759_v19, %v6760_v34  ;;  %7561 = vmatprep.subr.bf16.mxu0 %v10321_v12  ;;  %vm14610_vm0 = vmmov %vm14607_vm15 }
 0xd9f   : > { %v6769_v11 = vsel %vm14604_vm9, %v6768_v35, %v6755_v45  ;;  %v6519_v4 = vpop.permute.xlu0 %6518  ;;  %v10323_v60 = vld [vmem:[#allocation2 + $0x20] ss:$48 sps:$4 sm:$0xff]   ;;  %v10325_v15 = vld [vmem:[#allocation2 + $0x1c] ss:$48 sps:$4 sm:$0xff]   ;;  %vm14611_vm9 = vcmask 588800   ;;  %v7656_v45 = vrot.slane %v13674_v52, %v12413_v24 }
 0xda0   : > { %6780 = vst [vmem:[#allocation2 + $0xb4] sm:$0xcc] %v6769_v11  ;;  %v6524_v40 = vrot.slane %v6519_v4, 4 }
 0xda1   : > { %7562 = vmatpush1.bf16.msra.mxu0 %v9343_v51 }
 0xda2   : > { %v6532_v26 = vsel %vm14605_vm8, %v6523_v62, %v6524_v40  ;;  %7563 = vmatprep.subr.bf16.mxu0 %v10323_v60  ;;  %vm14613_vm8 = vmmov %vm14610_vm0 }
 0xda3   : > { %v7131_v46 = vld [vmem:[#allocation2 + $0x84] sm:$0xff]  ;;  %v6533_v19 = vsel %vm14606_vm4, %v6532_v26, %v6519_v4  ;;  %v6598_v20 = vpop.permute.xlu0 %6597  ;;  %vm14614_vm4 = vmmov %vm14610_vm0  ;;  %v7663_v4 = vsub.s32 4, %v12407_v32 }
 0xda4   : > { %7722 = vst.msk [vmem:[#allocation2 + $0x88] sm:$0xf] %vm14607_vm15, %v10403_v3  ;;  %6546 = vst [vmem:[#allocation2 + $0x24] sm:$0xcc] %v6533_v19  ;;  %v6603_v57 = vrot.slane %v6598_v20, 4 }
 0xda5   : > { %7564 = vmatpush1.bf16.msra.mxu0 %v10325_v15  ;;  %vm14615_vm15 = vmmov %vm14611_vm9 }
 0xda6   : > { %v6611_v37 = vsel %vm14608_vm13, %v6602_v30, %v6603_v57  ;;  %vm14616_vm13 = vcmask 760832  }
 0xda7   : > { %v7136_v36 = vld [vmem:[#allocation2 + $0xb4] sm:$0xff]  ;;  %v6612_v14 = vsel %vm14609_vm14, %v6611_v37, %v6598_v20  ;;  %v7668_v20 = vrot.slane %v13674_v52, %v7667_v21 }
 0xda8   : > { %7723 = vst.msk [vmem:[#allocation2 + $0xb8] sm:$0xf] %vm14610_vm0, %v10403_v3  ;;  %6625 = vst [vmem:[#allocation2 + $0x54] sm:$0xcc] %v6612_v14  ;;  %v9346_v62 = vcombine.high %v7131_v46, %v7136_v36  ;;  %v9345_v22 = vcombine.low %v7131_v46, %v7136_v36  ;;  %9384 = vmatmul.mubr.msk.bf16.vlgmr.msra.gmra.mxu0 %vm14611_vm9, %v13447_v44  ;;  %v7664_v46 = vrot.slane %v13674_v52, %v7663_v4  ;;  %vm14619_vm0 = vcmask 285696  }
 0xda9   : > { %8275 = vmatprep.mubr.bf16.mxu0 %v10403_v3 }
 0xdaa   : > { %7602 = vmatprep.subr.bf16.mxu1 %v9346_v62 }
 0xdab   : > { %v7121_v29 = vld [vmem:[#allocation2 + $0x24] sm:$0xff]  ;;  %7603 = vmatpush1.bf16.msra.mxu1 %v9345_v22 }
 0xdac   : > { %7720 = vst.msk [vmem:[#allocation2 + $0x28] sm:$0xf] %vm14613_vm8, %v10403_v3 }
 0xdaf   : > { %v7126_v63 = vld [vmem:[#allocation2 + $0x54] sm:$0xff] }
 0xdb0   : > { %7721 = vst.msk [vmem:[#allocation2 + $0x58] sm:$0xf] %vm14614_vm4, %v10403_v3  ;;  %v9336_v56 = vcombine.high %v7121_v29, %v7126_v63  ;;  %v9335_v38 = vcombine.low %v7121_v29, %v7126_v63 }
 0xdb2   : > { %7604 = vmatprep.subr.bf16.mxu1 %v9336_v56 }
 0xdb3   : > { %7605 = vmatpush1.bf16.msra.mxu1 %v9335_v38  ;;  %v7671_v38 = vsub.s32 6, %v12407_v32 }
 0xdb6   : > { %9386 = vmatmul.mubr.msk.bf16.vlgmr.msra.gmra.mxu1 %vm14615_vm15, %v13447_v44 }
 0xdb7   : > { %8316 = vmatprep.mubr.bf16.mxu1 %v10403_v3 }
 0xde5   : > { %v7460_v55 = vpop.f32.mrf.mxu0 }
 0xde6   : > { %v7461_v53 = vadd.f32 %v7460_v55, %v13671_v5  ;;  %v7675_v55 = vsub.s32 7, %v12407_v32 }
 0xde7   : > { %v7462_v2 = vpop.f32.mrf.mxu0 }
 0xde8   : > { %v7631_v8 = vmax.f32 %v7461_v53, 0.0  ;;  %v7463_v9 = vadd.f32 %v7462_v2, %v13671_v5  ;;  %v7676_v31 = vrot.slane %v13674_v52, %v7675_v55 }
 0xde9   : > { %v7464_v44 = vpop.f32.mrf.mxu0 }
 0xdea   : > { %v7632_v30 = vmax.f32 %v7463_v9, 0.0  ;;  %v7695_v10 = vmul.f32 %v7648_v0, %v7631_v8  ;;  %v7672_v44 = vrot.slane %v13674_v52, %v7671_v38 }
 0xdeb   : > { %v7465_v49 = vpop.f32.mrf.mxu0 }
 0xdec   : > { %v7696_v27 = vmul.f32 %v7652_v54, %v7632_v30 }
 0xdee   : > { %v9455_v16 = vpack.c.bf16 %v7696_v27, %v7695_v10 }
 0xdf0   : > { %7904 = vst [vmem:[#allocation2 + $0x64] sm:$0x33] %v9455_v16  ;;  %8017 = vrot.lane.b32.xlu0 %v9455_v16, %s10427_s15  ;;  %v7786_v1 = vrot.slane %v9455_v16, 6 }
 0xdf2   : > { %7791 = vrot.lane.b32.xlu1 %v7786_v1, %s10432_s11 }
 0xdf4   : > { %7945 = vrot.lane.b32.xlu0 %v9455_v16, %s10428_s28 }
 0xdf6   : > { %7863 = vrot.lane.b32.xlu1 %v7786_v1, %s14456_s2 }
 0xdf8   : > { %7750 = vrot.lane.b32.xlu0 %v9455_v16, %s10431_s16 }
 0xdfc   : > { %7827 = vrot.lane.b32.xlu0 %v9455_v16, %s10430_s1 }
 0xe00   : > { %7909 = vrot.lane.b32.xlu0 %v7786_v1, %s10407_s10 }
 0xe04   : > { %7981 = vrot.lane.b32.xlu0 %v7786_v1, %s10429_s26 }
 0xe08   : > { %v7501_v25 = vpop.f32.mrf.mxu0 }
 0xe09   : > { %v7502_v6 = vadd.f32 %v7501_v25, %v13671_v5 }
 0xe0a   : > { %v7503_v61 = vpop.f32.mrf.mxu0 }
 0xe0b   : > { %v7633_v47 = vmax.f32 %v7502_v6, 0.0  ;;  %v7504_v43 = vadd.f32 %v7503_v61, %v13671_v5 }
 0xe0c   : > { %v7505_v34 = vpop.f32.mrf.mxu0 }
 0xe0d   : > { %v7634_v33 = vmax.f32 %v7504_v43, 0.0  ;;  %v7697_v18 = vmul.f32 %v7656_v45, %v7633_v47 }
 0xe0e   : > { %v7506_v42 = vpop.f32.mrf.mxu0 }
 0xe0f   : > { %v7698_v12 = vmul.f32 %v7660_v23, %v7634_v33 }
 0xe11   : > { %v9456_v35 = vpack.c.bf16 %v7698_v12, %v7697_v18  ;;  %v7642_v12 = vld [vmem:[%s14612_s0 + $0x8] sm:$0x3] }
 0xe13   : > { %7905 = vst [vmem:[#allocation2 + $0x6c] sm:$0x33] %v9456_v35  ;;  %8019 = vrot.lane.b32.xlu1 %v9456_v35, %s10427_s15  ;;  %7752 = vrot.lane.b32.xlu0 %v9456_v35, %s10431_s16  ;;  %v7787_v11 = vrot.slane %v9456_v35, 6 }
 0xe17   : > { %7947 = vrot.lane.b32.xlu1 %v9456_v35, %s10428_s28  ;;  %7829 = vrot.lane.b32.xlu0 %v9456_v35, %s10430_s1 }
 0xe1b   : > { %7911 = vrot.lane.b32.xlu1 %v7787_v11, %s10407_s10  ;;  %7793 = vrot.lane.b32.xlu0 %v7787_v11, %s10432_s11 }
 0xe1f   : > { %7983 = vrot.lane.b32.xlu1 %v7787_v11, %s10429_s26  ;;  %7865 = vrot.lane.b32.xlu0 %v7787_v11, %s14456_s2 }
 0xe45   : > { %v7542_v40 = vpop.f32.mrf.mxu1 }
 0xe46   : > { %v7543_v51 = vadd.f32 %v7542_v40, %v13671_v5  ;;  %v7680_v40 = vrot.slane %v7642_v12, %v12421_v39 }
 0xe47   : > { %v7544_v60 = vpop.f32.mrf.mxu1 }
 0xe48   : > { %v7635_v26 = vmax.f32 %v7543_v51, 0.0  ;;  %v7545_v19 = vadd.f32 %v7544_v60, %v13671_v5  ;;  %v7684_v51 = vrot.slane %v7642_v12, %v12433_v48 }
 0xe49   : > { %v7546_v57 = vpop.f32.mrf.mxu1 }
 0xe4a   : > { %v7636_v15 = vmax.f32 %v7545_v19, 0.0  ;;  %v7699_v36 = vmul.f32 %v7664_v46, %v7635_v26 }
 0xe4b   : > { %v7547_v37 = vpop.f32.mrf.mxu1 }
 0xe4c   : > { %v7700_v14 = vmul.f32 %v7668_v20, %v7636_v15 }
 0xe4e   : > { %v9457_v62 = vpack.c.bf16 %v7700_v14, %v7699_v36 }
 0xe50   : > { %7906 = vst [vmem:[#allocation2 + $0x74] sm:$0x33] %v9457_v62  ;;  %7754 = vrot.lane.b32.xlu1 %v9457_v62, %s10431_s16  ;;  %8021 = vrot.lane.b32.xlu0 %v9457_v62, %s10427_s15  ;;  %v7788_v22 = vrot.slane %v9457_v62, 6 }
 0xe54   : > { %7831 = vrot.lane.b32.xlu1 %v9457_v62, %s10430_s1  ;;  %7949 = vrot.lane.b32.xlu0 %v9457_v62, %s10428_s28 }
 0xe58   : > { %7795 = vrot.lane.b32.xlu1 %v7788_v22, %s10432_s11  ;;  %7913 = vrot.lane.b32.xlu0 %v7788_v22, %s10407_s10 }
 0xe5c   : > { %7867 = vrot.lane.b32.xlu1 %v7788_v22, %s14456_s2  ;;  %7985 = vrot.lane.b32.xlu0 %v7788_v22, %s10429_s26 }
 0xe62   : > { %v13721_v29 = vpop.permute.xlu0 %8017 }
 0xe63   : > { %v8027_v63 = vrot.slane %v13721_v29, 4 }
 0xe64   : > { %v13724_v56 = vpop.permute.xlu1 %7791 }
 0xe65   : > { %v8032_v53 = vsel %vm14616_vm13, %v8027_v63, %v13721_v29  ;;  %v7801_v2 = vrot.slane %v13724_v56, 4 }
 0xe66   : > { %8047 = vst.msk [vmem:[#allocation2 + $0xc0] sm:$0x33] %vm12840_vm1, %v8032_v53  ;;  %v13735_v0 = vpop.permute.xlu0 %7945  ;;  %vm14617_vm1 = vcmask 777216  }
 0xe67   : > { %v7806_v9 = vsel %vm14609_vm14, %v7801_v2, %v13724_v56  ;;  %v7955_v54 = vrot.slane %v13735_v0, 4  ;;  %vm14628_vm4 = vmmov %vm14617_vm1 }
 0xe68   : > { %v7583_v8 = vpop.f32.mrf.mxu0  ;;  %7821 = vst.msk [vmem:[#allocation2 + $0x4] sm:$0xcc] %vm13248_vm11, %v7806_v9  ;;  %v13747_v49 = vpop.permute.xlu1 %7863  ;;  %vm14618_vm11 = vcmask 7168  }
 0xe69   : > { %v7584_v32 = vadd.f32 %v7583_v8, %v13671_v5  ;;  %v7960_v27 = vsel %vm14617_vm1, %v7955_v54, %v13735_v0  ;;  %v7873_v1 = vrot.slane %v13747_v49, 4  ;;  %vm14632_vm1 = vcmask 277504  }
 0xe6a   : > { %v7585_v30 = vpop.f32.mrf.mxu0  ;;  %7975 = vst.msk [vmem:[#allocation2 + $0x90] sm:$0x33] %vm12858_vm2, %v7960_v27  ;;  %v7751_v25 = vpop.permute.xlu0 %7750 }
 0xe6b   : > { %v7637_v10 = vmax.f32 %v7584_v32, 0.0  ;;  %v7586_v16 = vadd.f32 %v7585_v30, %v13671_v5  ;;  %v7878_v52 = vsel %vm14618_vm11, %v7873_v1, %v13747_v49  ;;  %v7760_v61 = vrot.slane %v7751_v25, 4  ;;  %v8458_v49 = vld [vmem:[%s10594_s17] sm:$0x7] }
 0xe6c   : > { %v7587_v41 = vpop.f32.mrf.mxu0  ;;  %7893 = vst.msk [vmem:[#allocation2 + $0x34] sm:$0xcc] %vm12529_vm7, %v7878_v52  ;;  %vm14620_vm7 = vcmask 1039360  }
 0xe6d   : > { %v7638_v6 = vmax.f32 %v7586_v16, 0.0  ;;  %v7701_v45 = vmul.f32 %v7672_v44, %v7637_v10  ;;  %v7765_v23 = vsel %vm14619_vm0, %v7760_v61, %v7751_v25  ;;  %vm14631_vm14 = vmmov %vm14620_vm7 }
 0xe6e   : > { %v7588_v47 = vpop.f32.mrf.mxu0  ;;  %7780 = vst.msk [vmem:[#allocation2 + $0x4] sm:$0x33] %vm12933_vm5, %v7765_v23  ;;  %v7828_v7 = vpop.permute.xlu0 %7827  ;;  %vm14621_vm5 = vcmask 769024  }
 0xe6f   : > { %v7702_v43 = vmul.f32 %v7676_v31, %v7638_v6  ;;  %v7837_v33 = vrot.slane %v7828_v7, 4 }
 0xe71   : > { %v9458_v34 = vpack.c.bf16 %v7702_v43, %v7701_v45  ;;  %v7842_v42 = vsel %vm6643_vm6, %v7837_v33, %v7828_v7 }
 0xe72   : > { %7857 = vst.msk [vmem:[#allocation2 + $0x34] sm:$0x33] %vm12901_vm3, %v7842_v42  ;;  %v7910_v28 = vpop.permute.xlu0 %7909  ;;  %vm14624_vm3 = vmmov %vm14616_vm13 }
 0xe73   : > { %7907 = vst [vmem:[#allocation2 + $0x7c] sm:$0x33] %v9458_v34  ;;  %8023 = vrot.lane.b32.xlu1 %v9458_v34, %s10427_s15  ;;  %v7919_v35 = vrot.slane %v7910_v28, 4  ;;  %v7789_v17 = vrot.slane %v9458_v34, 6 }
 0xe75   : > { %v7924_v59 = vsel %vm14620_vm7, %v7919_v35, %v7910_v28  ;;  %vm14635_vm7 = vcmask 1041408  }
 0xe76   : > { %v7624_v18 = vpop.f32.mrf.mxu1  ;;  %7939 = vst.msk [vmem:[#allocation2 + $0x60] sm:$0xcc] %vm12505_vm10, %v7924_v59  ;;  %v7982_v60 = vpop.permute.xlu0 %7981  ;;  %vm14622_vm10 = vcmask 1043456   ;;  %v10433_v59 = vmov 2  }
 0xe77   : > { %v7625_v11 = vadd.f32 %v7624_v18, %v13671_v5  ;;  %7951 = vrot.lane.b32.xlu1 %v9458_v34, %s10428_s28  ;;  %v7991_v46 = vrot.slane %v7982_v60, 4  ;;  %vm14623_vm2 = vmmov %vm14622_vm10  ;;  %v8079_v18 = vld [vmem:[%s10584_s3] sm:$0xf] }
 0xe78   : > { %v7626_v4 = vpop.f32.mrf.mxu1  ;;  %vm14626_vm9 = vmmov %vm14623_vm2 }
 0xe79   : > { %v7639_v21 = vmax.f32 %v7625_v11, 0.0  ;;  %v7627_v50 = vadd.f32 %v7626_v4, %v13671_v5  ;;  %v7996_v20 = vsel %vm14621_vm5, %v7991_v46, %v7982_v60  ;;  %vm14627_vm8 = vmmov %vm14623_vm2  ;;  %v10333_v11 = vld [vmem:[#allocation2 + $0x8] ss:$48 sps:$4 sm:$0xff]   ;;  %v10331_v4 = vld [vmem:[#allocation2 + $0x4] ss:$48 sps:$4 sm:$0xff]  }
 0xe7a   : > { %v7628_v26 = vpop.f32.mrf.mxu1  ;;  %8011 = vst.msk [vmem:[#allocation2 + $0x90] sm:$0xcc] %vm13227_vm12, %v7996_v20  ;;  %vm14625_vm12 = vmmov %vm14619_vm0 }
 0xe7b   : > { %v7640_v19 = vmax.f32 %v7627_v50, 0.0  ;;  %v7703_v15 = vmul.f32 %v7680_v40, %v7639_v21  ;;  %vm14629_vm15 = vmmov %vm14623_vm2  ;;  %v10434_v40 = vmov 1   ;;  %v10435_v50 = vmov 3  }
 0xe7c   : > { %v7629_v57 = vpop.f32.mrf.mxu1  ;;  %vm14630_vm13 = vmmov %vm14623_vm2 }
 0xe7d   : > { %v7704_v37 = vmul.f32 %v7684_v51, %v7640_v19  ;;  %vm14633_vm11 = vmmov %vm14623_vm2 }
 0xe7e   : > { %vm14634_vm0 = vmmov %vm14623_vm2 }
 0xe7f   : > { %v9459_v36 = vpack.c.bf16 %v7704_v37, %v7703_v15 }
 0xe81   : > { %7908 = vst [vmem:[#allocation2 + $0x84] sm:$0x33] %v9459_v36  ;;  %7758 = vrot.lane.b32.xlu1 %v9459_v36, %s10431_s16  ;;  %8025 = vrot.lane.b32.xlu0 %v9459_v36, %s10427_s15  ;;  %v7790_v16 = vrot.slane %v9459_v36, 6  ;;  %v10328_v12 = vld [vmem:[#allocation2 + $0x64] ss:$48 sps:$4 sm:$0xff]  }
 0xe85   : > { %7835 = vrot.lane.b32.xlu1 %v9459_v36, %s10430_s1  ;;  %7953 = vrot.lane.b32.xlu0 %v9459_v36, %s10428_s28  ;;  %v13786_v13 = vpop.permute.xlu1 %8019  ;;  %v13788_v5 = vpop.permute.xlu0 %7752 }
 0xe86   : > { %v8028_v14 = vrot.slane %v13786_v13, 4  ;;  %v7761_v62 = vrot.slane %v13788_v5, 4 }
 0xe88   : > { %v8033_v22 = vsel %vm14622_vm10, %v8027_v63, %v8028_v14  ;;  %v7766_v38 = vsel %vm14623_vm2, %v7760_v61, %v7761_v62  ;;  %vm14636_vm10 = vcmask 7168   ;;  %vm14637_vm2 = vmmov %vm14635_vm7 }
 0xe89   : > { %7915 = vrot.lane.b32.xlu1 %v7789_v17, %s10407_s10  ;;  %7756 = vrot.lane.b32.xlu0 %v9458_v34, %s10431_s16  ;;  %v8034_v55 = vsel %vm14624_vm3, %v8033_v22, %v13786_v13  ;;  %v7767_v53 = vsel %vm14625_vm12, %v7766_v38, %v13788_v5  ;;  %v13806_v8 = vpop.permute.xlu1 %7947  ;;  %v13808_v9 = vpop.permute.xlu0 %7829  ;;  %vm14639_vm3 = vcmask 293888   ;;  %vm14640_vm12 = vmmov %vm14634_vm0 }
 0xe8a   : > { %8048 = vst [vmem:[#allocation2 + $0xc8] sm:$0x33] %v8034_v55  ;;  %7781 = vst [vmem:[#allocation2 + $0xc] sm:$0x33] %v7767_v53  ;;  %v7956_v29 = vrot.slane %v13806_v8, 4  ;;  %v7838_v63 = vrot.slane %v13808_v9, 4 }
 0xe8c   : > { %v7961_v32 = vsel %vm14626_vm9, %v7955_v54, %v7956_v29  ;;  %v7843_v44 = vsel %vm14627_vm8, %v7837_v33, %v7838_v63  ;;  %vm14641_vm9 = vmmov %vm14634_vm0  ;;  %vm14642_vm8 = vcmask 285696  }
 0xe8d   : > { %7987 = vrot.lane.b32.xlu1 %v7789_v17, %s10429_s26  ;;  %7833 = vrot.lane.b32.xlu0 %v9458_v34, %s10430_s1  ;;  %v7962_v30 = vsel %vm14628_vm4, %v7961_v32, %v13806_v8  ;;  %v7844_v31 = vsel %vm6643_vm6, %v7843_v44, %v13808_v9  ;;  %v13826_v10 = vpop.permute.xlu1 %7911  ;;  %v13828_v27 = vpop.permute.xlu0 %7793  ;;  %vm14643_vm4 = vcmask 760832  }
 0xe8e   : > { %7976 = vst [vmem:[#allocation2 + $0x98] sm:$0x33] %v7962_v30  ;;  %7858 = vst [vmem:[#allocation2 + $0x3c] sm:$0x33] %v7844_v31  ;;  %v7920_v0 = vrot.slane %v13826_v10, 4  ;;  %v7802_v54 = vrot.slane %v13828_v27, 4 }
 0xe90   : > { %v7925_v41 = vsel %vm14629_vm15, %v7919_v35, %v7920_v0  ;;  %v7807_v25 = vsel %vm14630_vm13, %v7801_v2, %v7802_v54  ;;  %vm14644_vm15 = vmmov %vm14634_vm0 }
 0xe91   : > { %7917 = vrot.lane.b32.xlu1 %v7790_v16, %s10407_s10  ;;  %7797 = vrot.lane.b32.xlu0 %v7789_v17, %s10432_s11  ;;  %v7926_v6 = vsel %vm14631_vm14, %v7925_v41, %v13826_v10  ;;  %v7808_v52 = vsel %vm14632_vm1, %v7807_v25, %v13828_v27  ;;  %v13846_v61 = vpop.permute.xlu1 %7983  ;;  %v13848_v47 = vpop.permute.xlu0 %7865  ;;  %v8074_v45 = vld [vmem:[#allocation2 + $0xc4] sm:$0x33]  ;;  %s14638_s10 = sld [smem:[#allocation16_spill]]  ;;  %vm14645_vm13 = vmmov %vm14634_vm0  ;;  %vm14646_vm14 = vcmask 777216  }
 0xe92   : > { %7940 = vst [vmem:[#allocation2 + $0x68] sm:$0xcc] %v7926_v6  ;;  %7822 = vst [vmem:[#allocation2 + $0xc] sm:$0xcc] %v7808_v52  ;;  %v7992_v56 = vrot.slane %v13846_v61, 4  ;;  %v7874_v2 = vrot.slane %v13848_v47, 4  ;;  %v9413_v43 = vcombine.high %v8074_v45, %v8074_v45  ;;  %v9412_v23 = vcombine.low %v8074_v45, %v8074_v45 }
 0xe93   : > { %vm14647_vm1 = vmmov %vm14634_vm0 }
 0xe94   : > { %v7997_v7 = vsel %vm14633_vm11, %v7991_v46, %v7992_v56  ;;  %v7879_v34 = vsel %vm14634_vm0, %v7873_v1, %v7874_v2  ;;  %v8214_v33 = vsel %vm14635_vm7, %v9412_v23, 0  ;;  %9422 = vmatprep.subr.msk.bf16.mxu0 %vm14637_vm2, %v9413_v43  ;;  %v8465_v1 = vld [vmem:[%s10589_s21] sm:$0x7]  ;;  %vm14648_vm11 = vmmov %vm14634_vm0  ;;  %vm14649_vm0 = vcmask 277504  }
 0xe95   : > { %7989 = vrot.lane.b32.xlu1 %v7790_v16, %s10429_s26  ;;  %7869 = vrot.lane.b32.xlu0 %v7789_v17, %s14456_s2  ;;  %v7998_v42 = vsel %vm14621_vm5, %v7997_v7, %v13846_v61  ;;  %v7880_v28 = vsel %vm14636_vm10, %v7879_v34, %v13848_v47  ;;  %vm14650_vm7 = vcmask 1039360   ;;  %vm14651_vm5 = vmmov %vm14647_vm1 }
 0xe96   : > { %8012 = vst [vmem:[#allocation2 + $0x98] sm:$0xcc] %v7998_v42  ;;  %7894 = vst [vmem:[#allocation2 + $0x3c] sm:$0xcc] %v7880_v28  ;;  %8254 = vmatpush1.bf16.msra.mxu0 %v8214_v33 }
 0xe97   : > { %v13874_v21 = vld [vmem:[%s14638_s10] sm:$0x3]  ;;  %vm14652_vm10 = vmmov %vm14647_vm1 }
 0xe99   : > { %7799 = vrot.lane.b32.xlu1 %v7790_v16, %s10432_s11  ;;  %8082 = vperm.xlu0 %9751, %v8079_v18  }
 0xe9d   : > { %7871 = vrot.lane.b32.xlu1 %v7790_v16, %s14456_s2  ;;  %8461 = vperm.xlu0 %9751, %v8458_v49   ;;  %v10330_v35 = vld [vmem:[#allocation2 + $0x68] ss:$48 sps:$4 sm:$0xff]   ;;  %v10336_v47 = vld [vmem:[#allocation2 + $0x6c] ss:$48 sps:$4 sm:$0xff]   ;;  %s9678_s2 = smul.u32 40, %s14699_s23 }
 0xe9e   : > { %8255 = vmatprep.subr.bf16.mxu0 %v10330_v35  ;;  %v10339_v61 = vld [vmem:[#allocation2 + $0xc] ss:$48 sps:$4 sm:$0xff]  }
 0xe9f   : > { %8256 = vmatpush1.bf16.msra.mxu0 %v10328_v12  ;;  %s14047_s15 = scalar_lea.vmem %s10599_s8, %s9678_s2 }
 0xea0   : > { %8257 = vmatprep.subr.bf16.mxu0 %v10333_v11 }
 0xea1   : > { %8468 = vperm.xlu1 %9752, %v8465_v1   ;;  %9754 = vset.pattern.permute.xlu0 %v10433_v59 }
 0xea2   : > { %8596 = vperm.xlu0 %9754, %v8465_v1  }
 0xea3   : > { %8258 = vmatpush1.bf16.msra.mxu0 %v10331_v4 }
 0xea5   : > { %9753 = vset.pattern.permute.xlu1 %v10434_v40 }
 0xea6   : > { %8532 = vperm.xlu1 %9753, %v8465_v1   ;;  %9756 = vset.pattern.permute.xlu0 %v10435_v50 }
 0xea7   : > { %9423 = vmatmul.mubr.msk.bf16.vlgmr.msra.gmra.mxu0 %vm14639_vm3, %v13874_v21  ;;  %vm14653_vm3 = vmmov %vm14637_vm2 }
 0xea8   : > { %8357 = vmatprep.mubr.bf16.mxu0 %v10403_v3 }
 0xeaa   : > { %9755 = vset.pattern.permute.xlu1 %v10435_v50 }
 0xeab   : > { %8660 = vperm.xlu1 %9755, %v8465_v1  }
 0xec2   : > { %v13879_v51 = vpop.permute.xlu1 %7754  ;;  %v8022_v60 = vpop.permute.xlu0 %8021 }
 0xec3   : > { %v7762_v26 = vrot.slane %v13879_v51, 4  ;;  %v8029_v46 = vrot.slane %v8022_v60, 4 }
 0xec5   : > { %v7768_v19 = vsel %vm14640_vm12, %v7761_v62, %v7762_v26  ;;  %v8035_v20 = vsel %vm14641_vm9, %v8028_v14, %v8029_v46  ;;  %vm14654_vm12 = vcmask 7168   ;;  %vm14655_vm9 = vcmask 769024  }
 0xec6   : > { %v7769_v57 = vsel %vm14642_vm8, %v7768_v19, %v13879_v51  ;;  %v8036_v15 = vsel %vm14643_vm4, %v8035_v20, %v8022_v60  ;;  %v13893_v37 = vpop.permute.xlu1 %7831  ;;  %v7950_v36 = vpop.permute.xlu0 %7949  ;;  %vm14656_vm8 = vcmask 293888   ;;  %vm14657_vm4 = vmmov %vm14647_vm1 }
 0xec7   : > { %7782 = vst [vmem:[#allocation2 + $0x14] sm:$0x33] %v7769_v57  ;;  %8049 = vst [vmem:[#allocation2 + $0xd0] sm:$0x33] %v8036_v15  ;;  %v7839_v17 = vrot.slane %v13893_v37, 4  ;;  %v7957_v22 = vrot.slane %v7950_v36, 4 }
 0xec9   : > { %v7845_v13 = vsel %vm14644_vm15, %v7838_v63, %v7839_v17  ;;  %v7963_v5 = vsel %vm14645_vm13, %v7956_v29, %v7957_v22  ;;  %vm14658_vm15 = vcmask 760832   ;;  %vm14659_vm13 = vmmov %vm14647_vm1 }
 0xeca   : > { %v7846_v14 = vsel %vm6643_vm6, %v7845_v13, %v13893_v37  ;;  %v7964_v62 = vsel %vm14646_vm14, %v7963_v5, %v7950_v36  ;;  %v13907_v38 = vpop.permute.xlu1 %7795  ;;  %v13909_v55 = vpop.permute.xlu0 %7913 }
 0xecb   : > { %7859 = vst [vmem:[#allocation2 + $0x44] sm:$0x33] %v7846_v14  ;;  %7977 = vst [vmem:[#allocation2 + $0xa0] sm:$0x33] %v7964_v62  ;;  %v7803_v53 = vrot.slane %v13907_v38, 4  ;;  %v7921_v9 = vrot.slane %v13909_v55, 4 }
 0xecd   : > { %v7809_v8 = vsel %vm14647_vm1, %v7802_v54, %v7803_v53  ;;  %v7927_v29 = vsel %vm14648_vm11, %v7920_v0, %v7921_v9  ;;  %vm14660_vm1 = vmmov %vm14637_vm2 }
 0xece   : > { %v7810_v63 = vsel %vm14649_vm0, %v7809_v8, %v13907_v38  ;;  %v7928_v32 = vsel %vm14650_vm7, %v7927_v29, %v13909_v55  ;;  %v13927_v44 = vpop.permute.xlu1 %7867  ;;  %v13929_v30 = vpop.permute.xlu0 %7985  ;;  %v8075_v31 = vld [vmem:[#allocation2 + $0xcc] sm:$0x33]  ;;  %vm14661_vm11 = vmmov %vm14660_vm1  ;;  %vm14663_vm7 = vcmask 754688  }
 0xecf   : > { %7823 = vst [vmem:[#allocation2 + $0x14] sm:$0xcc] %v7810_v63  ;;  %7941 = vst [vmem:[#allocation2 + $0x70] sm:$0xcc] %v7928_v32  ;;  %v7875_v27 = vrot.slane %v13927_v44, 4  ;;  %v7993_v54 = vrot.slane %v13929_v30, 4  ;;  %v9415_v10 = vcombine.high %v8075_v31, %v8075_v31  ;;  %v9414_v16 = vcombine.low %v8075_v31, %v8075_v31 }
 0xed0   : > { %vm14662_vm0 = vmmov %vm14657_vm4 }
 0xed1   : > { %v7881_v0 = vsel %vm14651_vm5, %v7874_v2, %v7875_v27  ;;  %v7999_v41 = vsel %vm14652_vm10, %v7992_v56, %v7993_v54  ;;  %9424 = vmatprep.subr.msk.bf16.mxu1 %vm14637_vm2, %v9415_v10  ;;  %v8220_v25 = vsel %vm14653_vm3, %v9414_v16, 0  ;;  %v10341_v2 = vld [vmem:[#allocation2 + $0x10] ss:$48 sps:$4 sm:$0xff]   ;;  %vm14664_vm5 = vmmov %vm14658_vm15  ;;  %vm14666_vm2 = vcmask 771072  }
 0xed2   : > { %v7882_v6 = vsel %vm14654_vm12, %v7881_v0, %v13927_v44  ;;  %v8000_v52 = vsel %vm14655_vm9, %v7999_v41, %v13929_v30  ;;  %8295 = vmatpush1.bf16.msra.mxu1 %v8220_v25  ;;  %vm14665_vm10 = vmmov %vm14662_vm0 }
 0xed3   : > { %7895 = vst [vmem:[#allocation2 + $0x44] sm:$0xcc] %v7882_v6  ;;  %8013 = vst [vmem:[#allocation2 + $0xa0] sm:$0xcc] %v8000_v52 }
 0xed4   : > { %vm14667_vm3 = vmmov %vm14646_vm14 }
 0xed5   : > { %vm14668_vm12 = vmmov %vm14662_vm0 }
 0xed6   : > { %vm14669_vm9 = vmmov %vm14662_vm0 }
 0xeda   : > { %v10338_v45 = vld [vmem:[#allocation2 + $0x70] ss:$48 sps:$4 sm:$0xff]  }
 0xedb   : > { %8296 = vmatprep.subr.bf16.mxu1 %v10338_v45 }
 0xedc   : > { %8297 = vmatpush1.bf16.msra.mxu1 %v10336_v47 }
 0xedd   : > { %8298 = vmatprep.subr.bf16.mxu1 %v10341_v2 }
 0xee0   : > { %8299 = vmatpush1.bf16.msra.mxu1 %v10339_v61 }
 0xee3   : > { %9425 = vmatmul.mubr.msk.bf16.vlgmr.msra.gmra.mxu1 %vm14656_vm8, %v13874_v21  ;;  %vm14670_vm8 = vmmov %vm14662_vm0 }
 0xee4   : > { %8398 = vmatprep.mubr.bf16.mxu1 %v10403_v3 }
 0xee5   : > { %v8024_v56 = vpop.permute.xlu1 %8023 }
 0xee6   : > { %v8030_v43 = vrot.slane %v8024_v56, 4 }
 0xee8   : > { %v8037_v23 = vsel %vm14657_vm4, %v8029_v46, %v8030_v43  ;;  %vm14671_vm4 = vcmask 1039360  }
 0xee9   : > { %v8038_v7 = vsel %vm14658_vm15, %v8037_v23, %v8024_v56  ;;  %v7952_v34 = vpop.permute.xlu1 %7951  ;;  %vm14672_vm15 = vcmask 285696  }
 0xeea   : > { %8050 = vst [vmem:[#allocation2 + $0xd8] sm:$0x33] %v8038_v7  ;;  %v7958_v33 = vrot.slane %v7952_v34, 4 }
 0xeec   : > { %v7965_v42 = vsel %vm14659_vm13, %v7957_v22, %v7958_v33  ;;  %vm14673_vm13 = vmmov %vm14672_vm15 }
 0xeed   : > { %v7966_v28 = vsel %vm14646_vm14, %v7965_v42, %v7952_v34  ;;  %vm14674_vm14 = vmmov %vm14662_vm0 }
 0xeee   : > { %7978 = vst [vmem:[#allocation2 + $0xa8] sm:$0x33] %v7966_v28 }
 0xef1   : > { %v8076_v18 = vld [vmem:[#allocation2 + $0xd4] sm:$0x33] }
 0xef2   : > { %v9417_v12 = vcombine.high %v8076_v18, %v8076_v18  ;;  %v9416_v35 = vcombine.low %v8076_v18, %v8076_v18 }
 0xef3   : > { %v7759_v49 = vpop.permute.xlu1 %7758  ;;  %v8026_v1 = vpop.permute.xlu0 %8025 }
 0xef4   : > { %v7764_v11 = vrot.slane %v7759_v49, 4  ;;  %v8031_v59 = vrot.slane %v8026_v1, 4  ;;  %9426 = vmatprep.subr.msk.bf16.mxu0 %vm14660_vm1, %v9417_v12  ;;  %v8226_v4 = vsel %vm14661_vm11, %v9416_v35, 0  ;;  %vm14675_vm1 = vmmov %vm14662_vm0  ;;  %v10349_v35 = vld [vmem:[#allocation2 + $0x18] ss:$48 sps:$4 sm:$0xff]  }
 0xef5   : > { %8336 = vmatpush1.bf16.msra.mxu0 %v8226_v4  ;;  %vm14676_vm11 = vmmov %vm14662_vm0 }
 0xef6   : > { %v8039_v40 = vsel %vm14662_vm0, %v8030_v43, %v8031_v59  ;;  %8052 = vst.msk [vmem:[#allocation2 + $0xe8] sm:$0x3] %vm14663_vm7, %v8031_v59  ;;  %vm14677_vm0 = vcmask 1041408  }
 0xef7   : > { %v8040_v50 = vsel %vm14664_vm5, %v8039_v40, %v8026_v1  ;;  %v7836_v60 = vpop.permute.xlu1 %7835  ;;  %v7954_v46 = vpop.permute.xlu0 %7953  ;;  %vm14678_vm7 = vmmov %vm14677_vm0  ;;  %vm14679_vm5 = vcmask 769024   ;;  %v10347_v40 = vld [vmem:[#allocation2 + $0x14] ss:$48 sps:$4 sm:$0xff]  }
 0xef8   : > { %8051 = vst [vmem:[#allocation2 + $0xe0] sm:$0x33] %v8040_v50  ;;  %v7841_v19 = vrot.slane %v7836_v60, 4  ;;  %v7959_v20 = vrot.slane %v7954_v46, 4 }
 0xefa   : > { %v7967_v57 = vsel %vm14665_vm10, %v7958_v33, %v7959_v20  ;;  %7980 = vst.msk [vmem:[#allocation2 + $0xb8] sm:$0x3] %vm14666_vm2, %v7959_v20  ;;  %vm14680_vm10 = vmmov %vm14675_vm1  ;;  %vm14681_vm2 = vcmask 1035266  }
 0xefb   : > { %v7968_v15 = vsel %vm14667_vm3, %v7967_v57, %v7954_v46  ;;  %v7916_v36 = vpop.permute.xlu1 %7915  ;;  %v7757_v22 = vpop.permute.xlu0 %7756  ;;  %vm14682_vm3 = vmmov %vm14675_vm1 }
 0xefc   : > { %7979 = vst [vmem:[#allocation2 + $0xb0] sm:$0x33] %v7968_v15  ;;  %v7922_v13 = vrot.slane %v7916_v36, 4  ;;  %v7763_v5 = vrot.slane %v7757_v22, 4 }
 0xefe   : > { %v7929_v14 = vsel %vm14668_vm12, %v7921_v9, %v7922_v13  ;;  %v7770_v62 = vsel %vm14669_vm9, %v7762_v26, %v7763_v5  ;;  %v7772_v8 = vsel %vm14670_vm8, %v7763_v5, %v7764_v11  ;;  %vm14683_vm12 = vmmov %vm14671_vm4  ;;  %vm14684_vm9 = vcmask 277504  }
 0xeff   : > { %v7930_v29 = vsel %vm14671_vm4, %v7929_v14, %v7916_v36  ;;  %v7771_v63 = vsel %vm14672_vm15, %v7770_v62, %v7757_v22  ;;  %v7773_v32 = vsel %vm14673_vm13, %v7772_v8, %v7759_v49  ;;  %v7988_v31 = vpop.permute.xlu1 %7987  ;;  %v7834_v10 = vpop.permute.xlu0 %7833  ;;  %v8077_v16 = vld [vmem:[#allocation2 + $0xdc] sm:$0x33]  ;;  %vm14686_vm8 = vcmask 764930   ;;  %vm14687_vm4 = vmmov %vm14675_vm1  ;;  %v10344_v49 = vld [vmem:[#allocation2 + $0x74] ss:$48 sps:$4 sm:$0xff]  }
 0xf00   : > { %7942 = vst [vmem:[#allocation2 + $0x78] sm:$0xcc] %v7930_v29  ;;  %7783 = vst [vmem:[#allocation2 + $0x1c] sm:$0x33] %v7771_v63  ;;  %v7994_v55 = vrot.slane %v7988_v31, 4  ;;  %v7840_v9 = vrot.slane %v7834_v10, 4  ;;  %v9419_v0 = vcombine.high %v8077_v16, %v8077_v16  ;;  %v9418_v51 = vcombine.low %v8077_v16, %v8077_v16 }
 0xf01   : > { %7784 = vst [vmem:[#allocation2 + $0x24] sm:$0x33] %v7773_v32  ;;  %vm14688_vm15 = vmmov %vm14679_vm5  ;;  %vm14689_vm13 = vcmask 7168   ;;  %v8078_v59 = vld [vmem:[#allocation2 + $0xe4] sm:$0x33] }
 0xf02   : > { %v8001_v26 = vsel %vm14674_vm14, %v7993_v54, %v7994_v55  ;;  %v7847_v41 = vsel %vm14675_vm1, %v7839_v17, %v7840_v9  ;;  %v7849_v25 = vsel %vm14676_vm11, %v7840_v9, %v7841_v19  ;;  %9428 = vmatprep.subr.msk.bf16.mxu1 %vm14677_vm0, %v9419_v0  ;;  %v8232_v6 = vsel %vm14678_vm7, %v9418_v51, 0  ;;  %vm14690_vm14 = vmmov %vm14675_vm1 }
 0xf03   : > { %v8002_v52 = vsel %vm14679_vm5, %v8001_v26, %v7988_v31  ;;  %v7848_v47 = vsel %vm6643_vm6, %v7847_v41, %v7834_v10  ;;  %v7850_v45 = vsel %vm6643_vm6, %v7849_v25, %v7836_v60  ;;  %v7918_v2 = vpop.permute.xlu1 %7917  ;;  %8377 = vmatpush1.bf16.msra.mxu1 %v8232_v6  ;;  %v7798_v30 = vpop.permute.xlu0 %7797  ;;  %vm14685_vm6 = vmmov %vm14675_vm1  ;;  %v9421_v50 = vcombine.high %v8078_v59, %v8078_v59 }
 0xf04   : > { %8014 = vst [vmem:[#allocation2 + $0xa8] sm:$0xcc] %v8002_v52  ;;  %7860 = vst [vmem:[#allocation2 + $0x4c] sm:$0x33] %v7848_v47  ;;  %v7923_v37 = vrot.slane %v7918_v2, 4  ;;  %v7804_v17 = vrot.slane %v7798_v30, 4  ;;  %v9420_v60 = vcombine.low %v8078_v59, %v8078_v59 }
 0xf05   : > { %7861 = vst [vmem:[#allocation2 + $0x54] sm:$0x33] %v7850_v45  ;;  %vm14691_vm1 = vmmov %vm14684_vm9  ;;  %vm14694_vm5 = vcmask 293888  }
 0xf06   : > { %v7931_v54 = vsel %vm14680_vm10, %v7922_v13, %v7923_v37  ;;  %7944 = vst.msk [vmem:[#allocation2 + $0x88] sm:$0xc] %vm14681_vm2, %v7923_v37  ;;  %v7811_v61 = vsel %vm14682_vm3, %v7803_v53, %v7804_v17  ;;  %vm14692_vm11 = vmmov %vm14682_vm3 }
 0xf07   : > { %v7932_v56 = vsel %vm14683_vm12, %v7931_v54, %v7918_v2  ;;  %v7812_v43 = vsel %vm14684_vm9, %v7811_v61, %v7798_v30  ;;  %v7990_v23 = vpop.permute.xlu1 %7989  ;;  %v7870_v7 = vpop.permute.xlu0 %7869  ;;  %vm14693_vm0 = vmmov %vm14689_vm13 }
 0xf08   : > { %7943 = vst [vmem:[#allocation2 + $0x80] sm:$0xcc] %v7932_v56  ;;  %7824 = vst [vmem:[#allocation2 + $0x1c] sm:$0xcc] %v7812_v43  ;;  %v7995_v34 = vrot.slane %v7990_v23, 4  ;;  %v7876_v33 = vrot.slane %v7870_v7, 4 }
 0xf09   : > { %vm14695_vm10 = vmmov %vm14678_vm7 }
 0xf0a   : > { %v8003_v42 = vsel %vm14685_vm6, %v7994_v55, %v7995_v34  ;;  %8016 = vst.msk [vmem:[#allocation2 + $0xb8] sm:$0xc] %vm14686_vm8, %v7995_v34  ;;  %v7883_v38 = vsel %vm14687_vm4, %v7875_v27, %v7876_v33  ;;  %v8238_v15 = vsel %vm14695_vm10, %v9420_v60, 0  ;;  %vm14696_vm2 = vmmov %vm14694_vm5 }
 0xf0b   : > { %v8004_v53 = vsel %vm14688_vm15, %v8003_v42, %v7990_v23  ;;  %v7884_v28 = vsel %vm14689_vm13, %v7883_v38, %v7870_v7  ;;  %v7800_v18 = vpop.permute.xlu1 %7799  ;;  %v10346_v1 = vld [vmem:[#allocation2 + $0x78] ss:$48 sps:$4 sm:$0xff]   ;;  %v10351_v20 = vld [vmem:[#allocation2 + $0x7c] ss:$48 sps:$4 sm:$0xff]   ;;  %vm14697_vm3 = vmmov %vm14696_vm2 }
 0xf0c   : > { %8015 = vst [vmem:[#allocation2 + $0xb0] sm:$0xcc] %v8004_v53  ;;  %7896 = vst [vmem:[#allocation2 + $0x4c] sm:$0xcc] %v7884_v28  ;;  %v7805_v12 = vrot.slane %v7800_v18, 4  ;;  %8337 = vmatprep.subr.bf16.mxu0 %v10346_v1 }
 0xf0d   : > { %8338 = vmatpush1.bf16.msra.mxu0 %v10344_v49 }
 0xf0e   : > { %v7813_v11 = vsel %vm14690_vm14, %v7804_v17, %v7805_v12  ;;  %8339 = vmatprep.subr.bf16.mxu0 %v10349_v35 }
 0xf0f   : > { %v7814_v44 = vsel %vm14691_vm1, %v7813_v11, %v7800_v18  ;;  %v7872_v4 = vpop.permute.xlu1 %7871 }
 0xf10   : > { %7825 = vst [vmem:[#allocation2 + $0x24] sm:$0xcc] %v7814_v44  ;;  %v7877_v27 = vrot.slane %v7872_v4, 4 }
 0xf11   : > { %8340 = vmatpush1.bf16.msra.mxu0 %v10347_v40  ;;  %v10360_v22 = vld [vmem:[#allocation2 + $0x88] ss:$48 sps:$4 sm:$0xff]  }
 0xf12   : > { %v7885_v46 = vsel %vm14692_vm11, %v7876_v33, %v7877_v27  ;;  %9430 = vmatprep.subr.msk.bf16.mxu0 %vm14678_vm7, %v9421_v50 }
 0xf13   : > { %v7886_v19 = vsel %vm14693_vm0, %v7885_v46, %v7872_v4  ;;  %v10353_v57 = vld [vmem:[#allocation2 + $0x80] ss:$48 sps:$4 sm:$0xff]   ;;  %v10355_v13 = vld [vmem:[#allocation2 + $0x1c] ss:$48 sps:$4 sm:$0xff]   ;;  %v10358_v5 = vld [vmem:[#allocation2 + $0x84] ss:$48 sps:$4 sm:$0xff]  }
 0xf14   : > { %7897 = vst [vmem:[#allocation2 + $0x54] sm:$0xcc] %v7886_v19  ;;  %9427 = vmatmul.mubr.msk.bf16.vlgmr.msra.gmra.mxu0 %vm14694_vm5, %v13874_v21  ;;  %8378 = vmatprep.subr.bf16.mxu1 %v10353_v57  ;;  %v10357_v36 = vld [vmem:[#allocation2 + $0x20] ss:$48 sps:$4 sm:$0xff]   ;;  %v14013_v8 = vpop.permute.xlu0 %8082 }
 0xf15   : > { %8379 = vmatpush1.bf16.msra.mxu1 %v10351_v20  ;;  %8418 = vmatpush1.bf16.msra.mxu0 %v8238_v15 }
 0xf16   : > { %8380 = vmatprep.subr.bf16.mxu1 %v10357_v36  ;;  %8419 = vmatprep.subr.bf16.mxu0 %v10360_v22 }
 0xf17   : > { %8439 = vmatprep.mubr.bf16.mxu0 %v10403_v3 }
 0xf18   : > { %v14019_v55 = vpop.permute.xlu0 %8461 }
 0xf19   : > { %8381 = vmatpush1.bf16.msra.mxu1 %v10355_v13  ;;  %8420 = vmatpush1.bf16.msra.mxu0 %v10358_v5 }
 0xf1b   : > { %v10361_v14 = vld [vmem:[#allocation2 + $0x24] ss:$48 sps:$4 sm:$0xff]   ;;  %v10363_v62 = vld [vmem:[#allocation2 + $0x28] ss:$48 sps:$4 sm:$0xff]  }
 0xf1c   : > { %9429 = vmatmul.mubr.msk.bf16.vlgmr.msra.gmra.mxu1 %vm14696_vm2, %v13874_v21  ;;  %8421 = vmatprep.subr.bf16.mxu0 %v10363_v62  ;;  %v14016_v31 = vpop.permute.xlu1 %8468 }
 0xf1d   : > { %8422 = vmatpush1.bf16.msra.mxu0 %v10361_v14  ;;  %v14031_v2 = vpop.permute.xlu0 %8596 }
 0xf20   : > { %9431 = vmatmul.mubr.msk.bf16.vlgmr.msra.gmra.mxu0 %vm14697_vm3, %v13874_v21 }
 0xf21   : > { %v14024_v41 = vpop.permute.xlu1 %8532 }
 0xf26   : > { %v14040_v7 = vpop.permute.xlu1 %8660 }
 0xf67   : > { %v8277_v29 = vpop.f32.mrf.mxu0 }
 0xf68   : > { %v8278_v63 = vadd.f32 %v8277_v29, %v14013_v8 }
 0xf69   : > { %v8279_v32 = vpop.f32.mrf.mxu0 }
 0xf6a   : > { %v8448_v3 = vmax.f32 %v8278_v63, 0.0  ;;  %v8280_v10 = vadd.f32 %v8279_v32, %v14013_v8 }
 0xf6b   : > { %v8281_v16 = vpop.f32.mrf.mxu0 }
 0xf6c   : > { %v8474_v9 = vrot.slane %v8448_v3, %v12421_v39  ;;  %v8538_v0 = vrot.slane %v8448_v3, %v12433_v48  ;;  %v8449_v51 = vmax.f32 %v8280_v10, 0.0  ;;  %v8602_v25 = vrot.slane %v8448_v3, %v12413_v24 }
 0xf6d   : > { %v8282_v21 = vpop.f32.mrf.mxu0  ;;  %v8666_v17 = vrot.slane %v8448_v3, %v13691_v58 }
 0xf6e   : > { %v8511_v26 = vmul.f32 %v8474_v9, %v14016_v31  ;;  %v8478_v6 = vrot.slane %v8449_v51, %v12421_v39  ;;  %v8542_v52 = vrot.slane %v8449_v51, %v12433_v48  ;;  %v8575_v45 = vmul.f32 %v8538_v0, %v14024_v41 }
 0xf6f   : > { %v8606_v37 = vrot.slane %v8449_v51, %v12413_v24  ;;  %v8670_v43 = vrot.slane %v8449_v51, %v13691_v58  ;;  %v8639_v23 = vmul.f32 %v8602_v25, %v14031_v2  ;;  %v8703_v38 = vmul.f32 %v8666_v17, %v14040_v7 }
 0xf70   : > { %v8521_v47 = vadd.f32 %v8511_v26, %v14019_v55  ;;  %v8512_v30 = vmul.f32 %v8478_v6, %v14016_v31  ;;  %v8576_v56 = vmul.f32 %v8542_v52, %v14024_v41 }
 0xf71   : > { %v8640_v33 = vmul.f32 %v8606_v37, %v14031_v2  ;;  %v8704_v53 = vmul.f32 %v8670_v43, %v14040_v7 }
 0xf72   : > { %v8585_v54 = vadd.f32 %v8575_v45, %v8521_v47  ;;  %v8522_v61 = vadd.f32 %v8512_v30, %v14019_v55 }
 0xf74   : > { %v8586_v34 = vadd.f32 %v8576_v56, %v8522_v61  ;;  %v8649_v42 = vadd.f32 %v8639_v23, %v8585_v54 }
 0xf76   : > { %v8650_v28 = vadd.f32 %v8640_v33, %v8586_v34  ;;  %v8713_v18 = vadd.f32 %v8703_v38, %v8649_v42 }
 0xf78   : > { %v8714_v49 = vadd.f32 %v8704_v53, %v8650_v28 }
 0xf7a   : > { %v8733_v1 = vcombine.low %v8713_v18, %v8714_v49 }
 0xf7c   : > { %8743 = vst [vmem:[%s14047_s15] sm:$0x77] %v8733_v1 }
 0xfa3   : > { %v8318_v12 = vpop.f32.mrf.mxu1 }
 0xfa4   : > { %v8319_v35 = vadd.f32 %v8318_v12, %v14013_v8 }
 0xfa5   : > { %v8320_v11 = vpop.f32.mrf.mxu1 }
 0xfa6   : > { %v8450_v59 = vmax.f32 %v8319_v35, 0.0  ;;  %v8321_v44 = vadd.f32 %v8320_v11, %v14013_v8 }
 0xfa7   : > { %v8322_v4 = vpop.f32.mrf.mxu1 }
 0xfa8   : > { %v8482_v27 = vrot.slane %v8450_v59, %v12421_v39  ;;  %v8546_v40 = vrot.slane %v8450_v59, %v12433_v48  ;;  %v8451_v50 = vmax.f32 %v8321_v44, 0.0  ;;  %v8610_v19 = vrot.slane %v8450_v59, %v12413_v24 }
 0xfa9   : > { %v8323_v60 = vpop.f32.mrf.mxu1  ;;  %v8674_v14 = vrot.slane %v8450_v59, %v13691_v58 }
 0xfaa   : > { %v8513_v46 = vmul.f32 %v8482_v27, %v14016_v31  ;;  %v8486_v20 = vrot.slane %v8451_v50, %v12421_v39  ;;  %v8550_v57 = vrot.slane %v8451_v50, %v12433_v48  ;;  %v8577_v36 = vmul.f32 %v8546_v40, %v14024_v41 }
 0xfab   : > { %v8614_v13 = vrot.slane %v8451_v50, %v12413_v24  ;;  %v8641_v62 = vmul.f32 %v8610_v19, %v14031_v2  ;;  %v8678_v32 = vrot.slane %v8451_v50, %v13691_v58  ;;  %v8705_v9 = vmul.f32 %v8674_v14, %v14040_v7 }
 0xfac   : > { %v8523_v15 = vadd.f32 %v8513_v46, %v14019_v55  ;;  %v8514_v22 = vmul.f32 %v8486_v20, %v14016_v31  ;;  %v8578_v63 = vmul.f32 %v8550_v57, %v14024_v41 }
 0xfad   : > { %v8642_v16 = vmul.f32 %v8614_v13, %v14031_v2  ;;  %v8706_v51 = vmul.f32 %v8678_v32, %v14040_v7 }
 0xfae   : > { %v8587_v5 = vadd.f32 %v8577_v36, %v8523_v15  ;;  %v8524_v29 = vadd.f32 %v8514_v22, %v14019_v55 }
 0xfb0   : > { %v8651_v3 = vadd.f32 %v8641_v62, %v8587_v5  ;;  %v8588_v10 = vadd.f32 %v8578_v63, %v8524_v29 }
 0xfb2   : > { %v8652_v0 = vadd.f32 %v8642_v16, %v8588_v10  ;;  %v8715_v21 = vadd.f32 %v8705_v9, %v8651_v3 }
 0xfb4   : > { %v8716_v26 = vadd.f32 %v8706_v51, %v8652_v0 }
 0xfb6   : > { %v8734_v25 = vcombine.low %v8715_v21, %v8716_v26 }
 0xfb8   : > { %8744 = vst [vmem:[%s14047_s15 + $0x8] sm:$0x77] %v8734_v25 }
 0xfd4   : > { %v8359_v6 = vpop.f32.mrf.mxu0 }
 0xfd5   : > { %v8360_v52 = vadd.f32 %v8359_v6, %v14013_v8 }
 0xfd6   : > { %v8361_v47 = vpop.f32.mrf.mxu0 }
 0xfd7   : > { %v8452_v45 = vmax.f32 %v8360_v52, 0.0  ;;  %v8362_v30 = vadd.f32 %v8361_v47, %v14013_v8 }
 0xfd8   : > { %v8363_v37 = vpop.f32.mrf.mxu0 }
 0xfd9   : > { %v8490_v17 = vrot.slane %v8452_v45, %v12421_v39  ;;  %v8554_v54 = vrot.slane %v8452_v45, %v12433_v48  ;;  %v8618_v61 = vrot.slane %v8452_v45, %v12413_v24  ;;  %v8453_v56 = vmax.f32 %v8362_v30, 0.0 }
 0xfda   : > { %v8364_v43 = vpop.f32.mrf.mxu0  ;;  %v8682_v49 = vrot.slane %v8452_v45, %v13691_v58 }
 0xfdb   : > { %v8515_v23 = vmul.f32 %v8490_v17, %v14016_v31  ;;  %v8494_v34 = vrot.slane %v8453_v56, %v12421_v39  ;;  %v8558_v33 = vrot.slane %v8453_v56, %v12433_v48  ;;  %v8579_v53 = vmul.f32 %v8554_v54, %v14024_v41 }
 0xfdc   : > { %v8400_v42 = vpop.f32.mrf.mxu1  ;;  %v8643_v18 = vmul.f32 %v8618_v61, %v14031_v2  ;;  %v8622_v12 = vrot.slane %v8453_v56, %v12413_v24  ;;  %v8686_v59 = vrot.slane %v8453_v56, %v13691_v58  ;;  %v8707_v14 = vmul.f32 %v8682_v49, %v14040_v7 }
 0xfdd   : > { %v8525_v38 = vadd.f32 %v8515_v23, %v14019_v55  ;;  %v8401_v28 = vadd.f32 %v8400_v42, %v14013_v8  ;;  %v8516_v1 = vmul.f32 %v8494_v34, %v14016_v31  ;;  %v8580_v40 = vmul.f32 %v8558_v33, %v14024_v41 }
 0xfde   : > { %v8402_v35 = vpop.f32.mrf.mxu1  ;;  %v8644_v15 = vmul.f32 %v8622_v12, %v14031_v2  ;;  %v8708_v62 = vmul.f32 %v8686_v59, %v14040_v7 }
 0xfdf   : > { %v8589_v11 = vadd.f32 %v8579_v53, %v8525_v38  ;;  %v8454_v44 = vmax.f32 %v8401_v28, 0.0  ;;  %v8403_v4 = vadd.f32 %v8402_v35, %v14013_v8  ;;  %v8526_v27 = vadd.f32 %v8516_v1, %v14019_v55 }
 0xfe0   : > { %v8404_v50 = vpop.f32.mrf.mxu1  ;;  %v8441_v60 = vpop.f32.mrf.mxu0 }
 0xfe1   : > { %v8653_v46 = vadd.f32 %v8643_v18, %v8589_v11  ;;  %v8498_v19 = vrot.slane %v8454_v44, %v12421_v39  ;;  %v8562_v20 = vrot.slane %v8454_v44, %v12433_v48  ;;  %v8590_v57 = vadd.f32 %v8580_v40, %v8526_v27 }
 0xfe2   : > { %v8455_v36 = vmax.f32 %v8403_v4, 0.0  ;;  %v8442_v22 = vadd.f32 %v8441_v60, %v14013_v8  ;;  %v8405_v13 = vpop.f32.mrf.mxu1  ;;  %v8443_v5 = vpop.f32.mrf.mxu0  ;;  %v8626_v63 = vrot.slane %v8454_v44, %v12413_v24  ;;  %v8690_v3 = vrot.slane %v8454_v44, %v13691_v58 }
 0xfe3   : > { %v8517_v29 = vmul.f32 %v8498_v19, %v14016_v31  ;;  %v8654_v32 = vadd.f32 %v8644_v15, %v8590_v57  ;;  %v8717_v0 = vadd.f32 %v8707_v14, %v8653_v46  ;;  %v8581_v21 = vmul.f32 %v8562_v20, %v14024_v41 }
 0xfe4   : > { %v8502_v10 = vrot.slane %v8455_v36, %v12421_v39  ;;  %v8566_v16 = vrot.slane %v8455_v36, %v12433_v48  ;;  %v8445_v9 = vpop.f32.mrf.mxu0  ;;  %v8456_v26 = vmax.f32 %v8442_v22, 0.0  ;;  %v8630_v52 = vrot.slane %v8455_v36, %v12413_v24 }
 0xfe5   : > { %v8527_v51 = vadd.f32 %v8517_v29, %v14019_v55  ;;  %v8718_v25 = vadd.f32 %v8708_v62, %v8654_v32  ;;  %v8444_v47 = vadd.f32 %v8443_v5, %v14013_v8  ;;  %v8645_v37 = vmul.f32 %v8626_v63, %v14031_v2 }
 0xfe6   : > { %v8518_v6 = vmul.f32 %v8502_v10, %v14016_v31  ;;  %v8446_v45 = vpop.f32.mrf.mxu0  ;;  %v8694_v17 = vrot.slane %v8455_v36, %v13691_v58  ;;  %v8506_v54 = vrot.slane %v8456_v26, %v12421_v39  ;;  %v8582_v43 = vmul.f32 %v8566_v16, %v14024_v41 }
 0xfe7   : > { %v8591_v30 = vadd.f32 %v8581_v21, %v8527_v51  ;;  %v8735_v61 = vcombine.low %v8717_v0, %v8718_v25  ;;  %v8570_v23 = vrot.slane %v8456_v26, %v12433_v48  ;;  %v8457_v33 = vmax.f32 %v8444_v47, 0.0 }
 0xfe8   : > { %v8528_v56 = vadd.f32 %v8518_v6, %v14019_v55  ;;  %v8519_v34 = vmul.f32 %v8506_v54, %v14016_v31  ;;  %v8646_v38 = vmul.f32 %v8630_v52, %v14031_v2  ;;  %v8634_v18 = vrot.slane %v8456_v26, %v12413_v24 }
 0xfe9   : > { %8745 = vst [vmem:[%s14047_s15 + $0x10] sm:$0x77] %v8735_v61  ;;  %v8655_v8 = vadd.f32 %v8645_v37, %v8591_v30  ;;  %v8583_v28 = vmul.f32 %v8570_v23, %v14024_v41  ;;  %v8510_v49 = vrot.slane %v8457_v33, %v12421_v39  ;;  %v8709_v1 = vmul.f32 %v8690_v3, %v14040_v7 }
 0xfea   : > { %v8592_v42 = vadd.f32 %v8582_v43, %v8528_v56  ;;  %v8529_v53 = vadd.f32 %v8519_v34, %v14019_v55  ;;  %v8710_v35 = vmul.f32 %v8694_v17, %v14040_v7  ;;  %v8574_v11 = vrot.slane %v8457_v33, %v12433_v48 }
 0xfeb   : > { %v8520_v44 = vmul.f32 %v8510_v49, %v14016_v31  ;;  %v8638_v4 = vrot.slane %v8457_v33, %v12413_v24  ;;  %v8719_v27 = vadd.f32 %v8709_v1, %v8655_v8  ;;  %v8698_v50 = vrot.slane %v8456_v26, %v13691_v58 }
 0xfec   : > { %v8656_v12 = vadd.f32 %v8646_v38, %v8592_v42  ;;  %v8593_v59 = vadd.f32 %v8583_v28, %v8529_v53  ;;  %v8647_v39 = vmul.f32 %v8634_v18, %v14031_v2  ;;  %v8584_v46 = vmul.f32 %v8574_v11, %v14024_v41 }
 0xfed   : > { %v8530_v60 = vadd.f32 %v8520_v44, %v14019_v55  ;;  %v8702_v19 = vrot.slane %v8457_v33, %v13691_v58  ;;  %v8648_v31 = vmul.f32 %v8638_v4, %v14031_v2  ;;  %v8711_v24 = vmul.f32 %v8698_v50, %v14040_v7 }
 0xfee   : > { %v8720_v40 = vadd.f32 %v8710_v35, %v8656_v12  ;;  %v8657_v48 = vadd.f32 %v8647_v39, %v8593_v59 }
 0xfef   : > { %v8594_v57 = vadd.f32 %v8584_v46, %v8530_v60  ;;  %v8712_v36 = vmul.f32 %v8702_v19, %v14040_v7 }
 0xff0   : > { %v8736_v20 = vcombine.low %v8719_v27, %v8720_v40  ;;  %v8721_v22 = vadd.f32 %v8711_v24, %v8657_v48 }
 0xff1   : > { %v8658_v15 = vadd.f32 %v8648_v31, %v8594_v57 }
 0xff2   : > { %8746 = vst [vmem:[%s14047_s15 + $0x18] sm:$0x77] %v8736_v20 }
 0xff3   : > { %v8722_v13 = vadd.f32 %v8712_v36, %v8658_v15 }
 0xff5   : > { %v8737_v5 = vcombine.low %v8721_v22, %v8722_v13 }
 0xff7   : > { %8747 = vst [vmem:[%s14047_s15 + $0x20] sm:$0x77] %v8737_v5 }
 0xff8 PF: > { %s73_s22 = sadd.s32 1, %s10370_s22  }
 0xff9   : > { %p70_p4 = scmp.ge.s32.totalorder %s73_s22, 4  }
 0xffb   :  { %72 = sbr.rel (!%p70_p4) target bundleno = 49 (0x31), region = 217 }

</bundles_post_ra>
